<compile_context>
chip_gen: v6e
topology: v6e:2x2x1
jax: 0.10.0
libtpu: 0.0.40
codegen_flags: <defaults>
</compile_context>

<pallas_src>
import functools

import jax
import jax.numpy as jnp
from jax.experimental import pallas as pl
from jax.experimental.pallas import tpu as pltpu

IN_DIM = 3
HIDDEN = 20
OUT_DIM = 2
N_HIDDEN_LAYERS = 8          # (20,20) Linear+Tanh layers after the first one
LANES = 128                  # TPU vreg lane width
SAT = 30.0                   # tanh(SAT) == 1.0 exactly in f32 and bf16


def pinn_mlp_kernel(xyz1_ref, w0a_ref, wha_ref, wla_ref, out_ref, *, precision):
    """One row-tile of the bias-folded MLP.

    xyz1_ref: (IN_DIM+1, TM)                       rows = [x, y, t, 1]
    w0a_ref : (HIDDEN+1, IN_DIM+1)                 [W0 | b0] + SAT row
    wha_ref : (N_HIDDEN_LAYERS, HIDDEN+1, HIDDEN+1)[Wi | bi] + SAT row
    wla_ref : (OUT_DIM, HIDDEN+1)                  [WL | bL]
    out_ref : (OUT_DIM, TM)
    """
    cdt = xyz1_ref.dtype                       # compute dtype (f32 or bf16)

    # First layer: (21,4) @ (4,TM).  Row 20 of the pre-activation equals SAT,
    # so after tanh it is exactly 1.0 and carries the next layer's bias column.
    g = jnp.tanh(
        jnp.dot(w0a_ref[...], xyz1_ref[...],
                preferred_element_type=jnp.float32,
                precision=precision).astype(cdt))                  # (21, TM)

    # 8 hidden layers, static unroll (small fixed trip count -> LLO visibility).
    for i in range(N_HIDDEN_LAYERS):
        g = jnp.tanh(
            jnp.dot(wha_ref[i], g,
                    preferred_element_type=jnp.float32,
                    precision=precision).astype(cdt))              # (21, TM)

    out_ref[...] = jnp.dot(
        wla_ref[...], g,
        preferred_element_type=jnp.float32,
        precision=precision).astype(out_ref.dtype)                 # (2, TM)


def init_params(key):
    """nn.Linear default init: U[-1/sqrt(fan_in), +].  w: (out, in), b: (out,)."""
    ks = jax.random.split(key, 2 * (2 + N_HIDDEN_LAYERS))

    def lin(kw, kb, fan_in, fan_out):
        bound = 1.0 / float(fan_in) ** 0.5
        w = jax.random.uniform(kw, (fan_out, fan_in), jnp.float32, -bound, bound)
        b = jax.random.uniform(kb, (fan_out,), jnp.float32, -bound, bound)
        return w, b

    w0, b0 = lin(ks[0], ks[1], IN_DIM, HIDDEN)
    wh, bh = [], []
    for i in range(N_HIDDEN_LAYERS):
        w, b = lin(ks[2 + 2 * i], ks[3 + 2 * i], HIDDEN, HIDDEN)
        wh.append(w)
        bh.append(b)
    wl, bl = lin(ks[-2], ks[-1], HIDDEN, OUT_DIM)
    return (w0, b0, jnp.stack(wh), jnp.stack(bh), wl, bl)


def pack_params(params, dtype=jnp.float32):
    """Fold biases into augmented weights (call ONCE, outside the step loop).

      w0a[0:20] = [w0 | b0],       w0a[20]    = [0, 0, 0, SAT]
      wha[i,0:20] = [wh_i | bh_i], wha[i,20]  = [0, ..., 0, SAT]
      wla = [wl | bl]

    Row 20's pre-activation is SAT * 1 = SAT and tanh(SAT) == 1.0 exactly, so
    the constant-1 row survives every layer without any explicit bias add.
    """
    w0, b0, wh, bh, wl, bl = params
    sat_row0 = jnp.zeros((1, IN_DIM + 1), jnp.float32).at[0, IN_DIM].set(SAT)
    w0a = jnp.concatenate(
        [jnp.concatenate([w0, b0[:, None]], axis=1), sat_row0], axis=0)
    sat_rowh = jnp.zeros((N_HIDDEN_LAYERS, 1, HIDDEN + 1),
                         jnp.float32).at[:, 0, HIDDEN].set(SAT)
    wha = jnp.concatenate(
        [jnp.concatenate([wh, bh[:, :, None]], axis=2), sat_rowh], axis=1)
    wla = jnp.concatenate([wl, bl[:, None]], axis=1)
    return (w0a.astype(dtype), wha.astype(dtype), wla.astype(dtype))


def _pick_tile(n, tm):
    """Row tile: multiple of 128 lanes, clamped to the batch, and >= 2 grid
    steps whenever there is more than one lane tile of work (v7x has 2 TCs)."""
    n_lane = pl.cdiv(n, LANES) * LANES
    tm = max(LANES, min(pl.cdiv(tm, LANES) * LANES, n_lane))
    if n_lane > LANES and pl.cdiv(n_lane, tm) < 2:
        tm = pl.cdiv(n_lane // 2, LANES) * LANES
    n_pad = pl.cdiv(n_lane, tm) * tm
    return tm, n_pad


def pinn_forward(x, y, t, packed_params, *, tm=4096, return_transposed=False):
    """x, y, t: (N, 1) arrays.  packed_params from pack_params(); its dtype
    selects the compute dtype (f32 default; bf16 recommended on v6e/v7x)."""
    w0a, wha, wla = packed_params
    cdt = w0a.dtype
    N = x.shape[0]
    tm, n_pad = _pick_tile(N, tm)

    # Single lane-dense relayout pass: rows = [x, y, t, 1], shape (4, n_pad).
    xyz1 = jnp.stack(
        [x[:, 0], y[:, 0], t[:, 0], jnp.ones((N,), x.dtype)], axis=0).astype(cdt)
    if n_pad != N:
        xyz1 = jnp.pad(xyz1, ((0, 0), (0, n_pad - N)))

    precision = (jax.lax.Precision.HIGHEST if cdt == jnp.float32
                 else jax.lax.Precision.DEFAULT)

    out_t = pl.pallas_call(
        functools.partial(pinn_mlp_kernel, precision=precision),
        out_shape=jax.ShapeDtypeStruct((OUT_DIM, n_pad), jnp.float32),
        grid_spec=pltpu.PrefetchScalarGridSpec(
            num_scalar_prefetch=0,
            grid=(n_pad // tm,),
            in_specs=[
                pl.BlockSpec((IN_DIM + 1, tm), lambda i: (0, i)),     # [x;y;t;1]
                # Weights: constant index maps -> resident across the grid.
                pl.BlockSpec((HIDDEN + 1, IN_DIM + 1), lambda i: (0, 0)),
                pl.BlockSpec((N_HIDDEN_LAYERS, HIDDEN + 1, HIDDEN + 1),
                             lambda i: (0, 0, 0)),
                pl.BlockSpec((OUT_DIM, HIDDEN + 1), lambda i: (0, 0)),
            ],
            out_specs=pl.BlockSpec((OUT_DIM, tm), lambda i: (0, i)),
        ),
        compiler_params=pltpu.CompilerParams(
            dimension_semantics=("parallel",)),
    )(xyz1, w0a, wha, wla)

    out_t = out_t[:, :N]
    # PINN training loops can consume the lane-dense (2, N) layout directly and
    # skip the extra HBM transpose pass by passing return_transposed=True.
    return out_t if return_transposed else out_t.T


def pinn_reference(x, y, t, params):
    """Pure-JAX f32 reference of the PyTorch module (true-f32 matmuls)."""
    hi = jax.lax.Precision.HIGHEST
    w0, b0, wh, bh, wl, bl = params
    h = jnp.concatenate([x, y, t], axis=1).astype(jnp.float32)      # (N, 3)
    h = jnp.tanh(jnp.dot(h, w0.T, precision=hi) + b0)
    for i in range(N_HIDDEN_LAYERS):
        h = jnp.tanh(jnp.dot(h, wh[i].T, precision=hi) + bh[i])
    return jnp.dot(h, wl.T, precision=hi) + bl


if __name__ == "__main__":
    key = jax.random.PRNGKey(0)
    k_x, k_y, k_t, k_p = jax.random.split(key, 4)

    N = 2048  # collocation points; tile picker -> tm=1024, grid=2 (both v7x TCs)
    x = jax.random.normal(k_x, (N, 1), jnp.float32)
    y = jax.random.normal(k_y, (N, 1), jnp.float32)
    t = jax.random.normal(k_t, (N, 1), jnp.float32)

    params = init_params(k_p)
    ref = pinn_reference(x, y, t, params)

    # f32 path (safe on v5e/v6e/v7x; HIGHEST-precision MXU = true-f32 fidelity).
    out = jax.block_until_ready(
        pinn_forward(x, y, t, pack_params(params, jnp.float32)))
    assert out.shape == (N, OUT_DIM)
    assert jnp.allclose(out, ref, atol=1e-5, rtol=1e-5), "f32 mismatch vs reference"

    # bf16 activations/weights: ~2x tanh (EUP) throughput on v6e/v7x and half
    # the VMEM footprint of h.  (Runs on all generations; keep f32 on v5e.)
    out_bf16 = jax.block_until_ready(
        pinn_forward(x, y, t, pack_params(params, jnp.bfloat16)))
    assert out_bf16.shape == (N, OUT_DIM)
    assert jnp.allclose(out_bf16, ref, atol=1e-1, rtol=1e-1), "bf16 mismatch vs reference"

    print("KERNEL_OK")
</pallas_src>

<mosaic_0001>
module attributes {stable_mosaic.version = 11 : i64} {
  func.func @pinn_mlp_kernel(%arg0: i32, %arg1: memref<4x1024xf32, #tpu.memory_space<vmem>>, %arg2: memref<21x4xf32, #tpu.memory_space<vmem>>, %arg3: memref<8x21x21xf32, #tpu.memory_space<vmem>>, %arg4: memref<2x21xf32, #tpu.memory_space<vmem>>, %arg5: memref<2x1024xf32, #tpu.memory_space<vmem>>) attributes {dimension_semantics = [#tpu.dimension_semantics<parallel>], iteration_bounds = array<i64: 2>, scalar_prefetch = 0 : i64, scratch_operands = 0 : i64, tpu.core_type = #tpu.core_type<tc>, window_params = [{transform_indices = @transform_0, window_bounds = array<i64: 4, 1024>}, {pipeline_mode = #tpu.pipeline_mode<synchronous>, transform_indices = @transform_1, window_bounds = array<i64: 21, 4>}, {pipeline_mode = #tpu.pipeline_mode<synchronous>, transform_indices = @transform_2, window_bounds = array<i64: 8, 21, 21>}, {pipeline_mode = #tpu.pipeline_mode<synchronous>, transform_indices = @transform_3, window_bounds = array<i64: 2, 21>}, {transform_indices = @transform_4, window_bounds = array<i64: 2, 1024>}]} {
    %c0 = arith.constant 0 : index
    %c0_0 = arith.constant 0 : index
    %0 = vector.load %arg2[%c0, %c0_0] : memref<21x4xf32, #tpu.memory_space<vmem>>, vector<21x4xf32>
    %c0_1 = arith.constant 0 : index
    %c0_2 = arith.constant 0 : index
    %1 = vector.load %arg1[%c0_1, %c0_2] : memref<4x1024xf32, #tpu.memory_space<vmem>>, vector<4x1024xf32>
    %cst = arith.constant dense<0.000000e+00> : vector<21x1024xf32>
    %2 = tpu.matmul %0, %1, %cst {dimension_numbers = #tpu.dot_dimension_numbers<[1], [0], [0], [1], [0, 0, 1, 1], [], []>, precision = #tpu.contract_precision<fp32>} : vector<21x4xf32>, vector<4x1024xf32>, vector<21x1024xf32> -> vector<21x1024xf32>
    %3 = math.tanh %2 : vector<21x1024xf32>
    %c0_3 = arith.constant 0 : index
    %c0_4 = arith.constant 0 : index
    %c0_5 = arith.constant 0 : index
    %4 = vector.load %arg3[%c0_3, %c0_4, %c0_5] : memref<8x21x21xf32, #tpu.memory_space<vmem>>, vector<1x21x21xf32>
    %5 = vector.shape_cast %4 : vector<1x21x21xf32> to vector<21x21xf32>
    %cst_6 = arith.constant dense<0.000000e+00> : vector<21x1024xf32>
    %6 = tpu.matmul %5, %3, %cst_6 {dimension_numbers = #tpu.dot_dimension_numbers<[1], [0], [0], [1], [0, 0, 1, 1], [], []>, precision = #tpu.contract_precision<fp32>} : vector<21x21xf32>, vector<21x1024xf32>, vector<21x1024xf32> -> vector<21x1024xf32>
    %7 = math.tanh %6 : vector<21x1024xf32>
    %c1 = arith.constant 1 : index
    %c0_7 = arith.constant 0 : index
    %c0_8 = arith.constant 0 : index
    %8 = vector.load %arg3[%c1, %c0_7, %c0_8] : memref<8x21x21xf32, #tpu.memory_space<vmem>>, vector<1x21x21xf32>
    %9 = vector.shape_cast %8 : vector<1x21x21xf32> to vector<21x21xf32>
    %cst_9 = arith.constant dense<0.000000e+00> : vector<21x1024xf32>
    %10 = tpu.matmul %9, %7, %cst_9 {dimension_numbers = #tpu.dot_dimension_numbers<[1], [0], [0], [1], [0, 0, 1, 1], [], []>, precision = #tpu.contract_precision<fp32>} : vector<21x21xf32>, vector<21x1024xf32>, vector<21x1024xf32> -> vector<21x1024xf32>
    %11 = math.tanh %10 : vector<21x1024xf32>
    %c2 = arith.constant 2 : index
    %c0_10 = arith.constant 0 : index
    %c0_11 = arith.constant 0 : index
    %12 = vector.load %arg3[%c2, %c0_10, %c0_11] : memref<8x21x21xf32, #tpu.memory_space<vmem>>, vector<1x21x21xf32>
    %13 = vector.shape_cast %12 : vector<1x21x21xf32> to vector<21x21xf32>
    %cst_12 = arith.constant dense<0.000000e+00> : vector<21x1024xf32>
    %14 = tpu.matmul %13, %11, %cst_12 {dimension_numbers = #tpu.dot_dimension_numbers<[1], [0], [0], [1], [0, 0, 1, 1], [], []>, precision = #tpu.contract_precision<fp32>} : vector<21x21xf32>, vector<21x1024xf32>, vector<21x1024xf32> -> vector<21x1024xf32>
    %15 = math.tanh %14 : vector<21x1024xf32>
    %c3 = arith.constant 3 : index
    %c0_13 = arith.constant 0 : index
    %c0_14 = arith.constant 0 : index
    %16 = vector.load %arg3[%c3, %c0_13, %c0_14] : memref<8x21x21xf32, #tpu.memory_space<vmem>>, vector<1x21x21xf32>
    %17 = vector.shape_cast %16 : vector<1x21x21xf32> to vector<21x21xf32>
    %cst_15 = arith.constant dense<0.000000e+00> : vector<21x1024xf32>
    %18 = tpu.matmul %17, %15, %cst_15 {dimension_numbers = #tpu.dot_dimension_numbers<[1], [0], [0], [1], [0, 0, 1, 1], [], []>, precision = #tpu.contract_precision<fp32>} : vector<21x21xf32>, vector<21x1024xf32>, vector<21x1024xf32> -> vector<21x1024xf32>
    %19 = math.tanh %18 : vector<21x1024xf32>
    %c4 = arith.constant 4 : index
    %c0_16 = arith.constant 0 : index
    %c0_17 = arith.constant 0 : index
    %20 = vector.load %arg3[%c4, %c0_16, %c0_17] : memref<8x21x21xf32, #tpu.memory_space<vmem>>, vector<1x21x21xf32>
    %21 = vector.shape_cast %20 : vector<1x21x21xf32> to vector<21x21xf32>
    %cst_18 = arith.constant dense<0.000000e+00> : vector<21x1024xf32>
    %22 = tpu.matmul %21, %19, %cst_18 {dimension_numbers = #tpu.dot_dimension_numbers<[1], [0], [0], [1], [0, 0, 1, 1], [], []>, precision = #tpu.contract_precision<fp32>} : vector<21x21xf32>, vector<21x1024xf32>, vector<21x1024xf32> -> vector<21x1024xf32>
    %23 = math.tanh %22 : vector<21x1024xf32>
    %c5 = arith.constant 5 : index
    %c0_19 = arith.constant 0 : index
    %c0_20 = arith.constant 0 : index
    %24 = vector.load %arg3[%c5, %c0_19, %c0_20] : memref<8x21x21xf32, #tpu.memory_space<vmem>>, vector<1x21x21xf32>
    %25 = vector.shape_cast %24 : vector<1x21x21xf32> to vector<21x21xf32>
    %cst_21 = arith.constant dense<0.000000e+00> : vector<21x1024xf32>
    %26 = tpu.matmul %25, %23, %cst_21 {dimension_numbers = #tpu.dot_dimension_numbers<[1], [0], [0], [1], [0, 0, 1, 1], [], []>, precision = #tpu.contract_precision<fp32>} : vector<21x21xf32>, vector<21x1024xf32>, vector<21x1024xf32> -> vector<21x1024xf32>
    %27 = math.tanh %26 : vector<21x1024xf32>
    %c6 = arith.constant 6 : index
    %c0_22 = arith.constant 0 : index
    %c0_23 = arith.constant 0 : index
    %28 = vector.load %arg3[%c6, %c0_22, %c0_23] : memref<8x21x21xf32, #tpu.memory_space<vmem>>, vector<1x21x21xf32>
    %29 = vector.shape_cast %28 : vector<1x21x21xf32> to vector<21x21xf32>
    %cst_24 = arith.constant dense<0.000000e+00> : vector<21x1024xf32>
    %30 = tpu.matmul %29, %27, %cst_24 {dimension_numbers = #tpu.dot_dimension_numbers<[1], [0], [0], [1], [0, 0, 1, 1], [], []>, precision = #tpu.contract_precision<fp32>} : vector<21x21xf32>, vector<21x1024xf32>, vector<21x1024xf32> -> vector<21x1024xf32>
    %31 = math.tanh %30 : vector<21x1024xf32>
    %c7 = arith.constant 7 : index
    %c0_25 = arith.constant 0 : index
    %c0_26 = arith.constant 0 : index
    %32 = vector.load %arg3[%c7, %c0_25, %c0_26] : memref<8x21x21xf32, #tpu.memory_space<vmem>>, vector<1x21x21xf32>
    %33 = vector.shape_cast %32 : vector<1x21x21xf32> to vector<21x21xf32>
    %cst_27 = arith.constant dense<0.000000e+00> : vector<21x1024xf32>
    %34 = tpu.matmul %33, %31, %cst_27 {dimension_numbers = #tpu.dot_dimension_numbers<[1], [0], [0], [1], [0, 0, 1, 1], [], []>, precision = #tpu.contract_precision<fp32>} : vector<21x21xf32>, vector<21x1024xf32>, vector<21x1024xf32> -> vector<21x1024xf32>
    %35 = math.tanh %34 : vector<21x1024xf32>
    %c0_28 = arith.constant 0 : index
    %c0_29 = arith.constant 0 : index
    %36 = vector.load %arg4[%c0_28, %c0_29] : memref<2x21xf32, #tpu.memory_space<vmem>>, vector<2x21xf32>
    %cst_30 = arith.constant dense<0.000000e+00> : vector<2x1024xf32>
    %37 = tpu.matmul %36, %35, %cst_30 {dimension_numbers = #tpu.dot_dimension_numbers<[1], [0], [0], [1], [0, 0, 1, 1], [], []>, precision = #tpu.contract_precision<fp32>} : vector<2x21xf32>, vector<21x1024xf32>, vector<2x1024xf32> -> vector<2x1024xf32>
    %c0_31 = arith.constant 0 : index
    %c0_32 = arith.constant 0 : index
    %38 = vector.load %arg5[%c0_31, %c0_32] : memref<2x1024xf32, #tpu.memory_space<vmem>>, vector<2x1024xf32>
    tpu.vector_store %arg5[%c0_31, %c0_32], %37 {strides = array<i32>} : memref<2x1024xf32, #tpu.memory_space<vmem>>, vector<2x1024xf32>,
    return
  }
  func.func @transform_0(%arg0: i32) -> (i32, i32) {
    %c0_i32 = arith.constant 0 : i32
    %c0_i32_0 = arith.constant 0 : i32
    return %c0_i32, %arg0 : i32, i32
  }
  func.func @transform_1(%arg0: i32) -> (i32, i32) {
    %c0_i32 = arith.constant 0 : i32
    %c0_i32_0 = arith.constant 0 : i32
    %c0_i32_1 = arith.constant 0 : i32
    return %c0_i32, %c0_i32_0 : i32, i32
  }
  func.func @transform_2(%arg0: i32) -> (i32, i32, i32) {
    %c0_i32 = arith.constant 0 : i32
    %c0_i32_0 = arith.constant 0 : i32
    %c0_i32_1 = arith.constant 0 : i32
    %c0_i32_2 = arith.constant 0 : i32
    return %c0_i32, %c0_i32_0, %c0_i32_1 : i32, i32, i32
  }
  func.func @transform_3(%arg0: i32) -> (i32, i32) {
    %c0_i32 = arith.constant 0 : i32
    %c0_i32_0 = arith.constant 0 : i32
    %c0_i32_1 = arith.constant 0 : i32
    return %c0_i32, %c0_i32_0 : i32, i32
  }
  func.func @transform_4(%arg0: i32) -> (i32, i32) {
    %c0_i32 = arith.constant 0 : i32
    %c0_i32_0 = arith.constant 0 : i32
    return %c0_i32, %arg0 : i32, i32
  }
}

</mosaic_0001>

<bundles_post_ra>
// kernel: tpu_custom_call.1
= control target key start
LH: loop header
LB: loop body
LE: loop exit
PB: predicated region body
PF: predicated region fallthrough
CT: control target
= control target key end

     0   :  { %9 = vsyncpa [#allocation3], 0  ;;  %s32058_s0 = inlined_call_operand.vmem [shape: f32[4,2048], index: 0, kind: input, shape index: {}]   ;;  %s32059_s1 = inlined_call_operand.vmem [shape: f32[21,4], index: 1, kind: input, shape index: {}]   ;;  %s32060_s2 = inlined_call_operand.vmem [shape: f32[8,21,21], index: 2, kind: input, shape index: {}]   ;;  %s32061_s3 = inlined_call_operand.vmem [shape: f32[2,21], index: 3, kind: input, shape index: {}]   ;;  %s32062_s4 = inlined_call_operand.hbm [shape: f32[2,2048], index: 4, kind: output, shape index: {}]  }
   0x1   :  { %11 = vsyncpa [#allocation3 + $0x1], 0  ;;  %s25503_s15 = smov 0   ;;  %s25505_s16 = smov 0  }
   0x2   :  { %s25507_s17 = smov 0   ;;  %s25509_s18 = smov 0  }
   0x3 LB: > { %s25524_s19 = sadd.s32 4294967295, %s25473_s18   ;;  %s24902_s20 = sadd.s32 4294967294, %s25473_s18   ;;  %s25473_s18 = sphi %s25509_s18, %s32267_s18   ;;  %s25469_s17 = sphi %s25507_s17, %s32266_s17   ;;  %s25465_s16 = sphi %s25505_s16, %s32265_s16   ;;  %s25461_s15 = sphi %s25503_s15, %s32264_s15  }
   0x4   : > { %s25528_s21 = sadd.s32 1, %s25473_s18   ;;  %s113_s22 = sadd.s32 1, %s25469_s17 }
   0x5   : > { %s110_s23 = ssub.s32 %s25473_s18, %s25528_s21  ;;  %p123_p0 = scmp.ne.s32.totalorder %s25469_s17, %s25465_s16 }
   0x6   : > { %p111_p1 = scmp.eq.s32.totalorder %s110_s23, 0  ;;  %p124_p2 = scmp.eq.s32.totalorder %s25524_s19, 1 }
   0x7   : > { %p129_p3 = scmp.ne.s32.totalorder %s25465_s16, %s25461_s15  ;;  %p130_p4 = scmp.eq.s32.totalorder %s24902_s20, 1 }
   0x8   : > { %s25539_s24 = scalar_select %p111_p1, %s25469_s17, %s113_s22  }
   0x9   : > { %p25541_p5 = por %p124_p2, %p123_p0  ;;  %p25545_p6 = por %p130_p4, %p129_p3 }
   0xa   : > { %p24905_p7 = scmp.ge.s32.totalorder %s25473_s18, 1  ;;  %p166_p8 = scmp.lt.s32.totalorder %s25473_s18, 3 }
   0xc   : > { %p167_p9 = pnand %p24905_p7, %p166_p8 }
   0xe   : > { %170 = sbr.rel (%p167_p9) target bundleno = 2764 (0xacc), region = 36 }
  0x13   : > { %s24907_s27 = sshll.u32 %s25524_s19, 3  ;;  %v199_v0 = vld [vmem:[%s32059_s1] sm:$0xff]  ;;  %vm214_vm0 = vcmask 31744   ;;  %v200_v1 = vld [vmem:[%s32059_s1 + $0x8] sm:$0xff]  ;;  %v32099_v2 = vmov 0.0   ;;  %vm224_vm1 = vcmask 1043456  }
  0x14   : > { %p193_p10 = scmp.lt.s32.totalorder %s24907_s27, 15  ;;  %307 = vmatprep.mubr.f32.mxu0 %v32099_v2  ;;  %v216_v3 = vsel %vm214_vm0, %v199_v0, 0  ;;  %v219_v4 = vsel %vm214_vm0, %v200_v1, 0  ;;  %415 = vmatprep.mubr.f32.mxu1 %v32099_v2  ;;  %v201_v5 = vld [vmem:[%s32059_s1 + $0x10] sm:$0x1f]  ;;  %vm2520_vm2 = vcmask 171008  }
  0x15   : > { %v25563_v6 = vand.u32 4294901760, %v216_v3  ;;  %v25565_v7 = vand.u32 4294901760, %v219_v4  ;;  %v222_v8 = vsel %vm214_vm0, %v201_v5, 0  ;;  %vm2530_vm3 = vcmask 1044480   ;;  %s24935_s14 = sshll.u32 %s25524_s19, 8  ;;  %s25477_s30 = smov [#allocation2]  }
  0x16   : > { %s32269_s27 = smov (!%p193_p10, %s24907_s27), 15  ;;  %v25567_v9 = vand.u32 4294901760, %v222_v8  ;;  %s25417_s5 = sshll.u32 %s25477_s30, 4  ;;  %s25418_s5 = int_to_ptr.vmem [resolvable:$false] %s25417_s5 }
  0x17   : > { %v25570_v10 = vsub.f32 %v216_v3, %v25563_v6  ;;  %v25573_v11 = vsub.f32 %v219_v4, %v25565_v7  ;;  %s24908_s8 = sshll.u32 %s32269_s27, 2  ;;  %s24841_s27 = scalar_lea.hbm %s32062_s4, %s24935_s14 }
  0x18   : > { %s25578_s11 = scalar_lea.vmem %s32058_s0, %s24908_s8  ;;  %v25587_v14 = vsub.f32 %v222_v8, %v25567_v9  ;;  %s25419_s19 = scalar_lea.vmem %s25418_s5, 512 }
  0x19   : > { %v25581_v12 = vand.u32 4294901760, %v25570_v10  ;;  %v25584_v13 = vand.u32 4294901760, %v25573_v11  ;;  %v202_v15 = vld [vmem:[%s25578_s11] sm:$0xff]  ;;  %v203_v19 = vld [vmem:[%s25578_s11 + $0x8] sm:$0xff]  ;;  %v205_v24 = vld [vmem:[%s25578_s11 + $0x18] sm:$0xff] }
  0x1a   : > { %v210_v16 = vcombine.high %v202_v15, %v202_v15  ;;  %v225_v17 = vsel %vm224_vm1, %v202_v15, 0  ;;  %v25598_v23 = vand.u32 4294901760, %v25587_v14  ;;  %v211_v28 = vcombine.high %v203_v19, %v203_v19  ;;  %v204_v53 = vld [vmem:[%s25578_s11 + $0x10] sm:$0xff]  ;;  %s189_s11 = sand.u32 1, %s25465_s16  }
  0x1b   : > { %v311_v18 = vsub.f32 %v25570_v10, %v25581_v12  ;;  %v273_v20 = vand.u32 4294901760, %v225_v17  ;;  %v322_v22 = vsub.f32 %v25573_v11, %v25584_v13  ;;  %v213_v31 = vcombine.high %v205_v24, %v205_v24  ;;  %s24906_s12 = sshll.u32 %s189_s11, 4  ;;  %s24829_s28 = scalar_lea.sflag [#allocation3], %s189_s11 }
  0x1c   : > { %v227_v21 = vsel %vm224_vm1, %v210_v16, 0  ;;  %v333_v32 = vsub.f32 %v25587_v14, %v25598_v23  ;;  %v25606_v33 = vsel %vm224_vm1, %v205_v24, 0  ;;  %v231_v37 = vsel %vm224_vm1, %v211_v28, 0  ;;  %s32018_s13 = scalar_lea.vmem [#allocation2], %s24906_s12 }
  0x1d   : > { %v271_v25 = vand.u32 4294901760, %v227_v21  ;;  %v25601_v26 = vand.u32 4294901760, %v311_v18  ;;  %v378_v27 = vsub.f32 %v225_v17, %v273_v20  ;;  %v25609_v34 = vand.u32 4294901760, %v322_v22  ;;  %s24843_s20 = sshll.u32 %s32018_s13, 4  ;;  %s24844_s20 = int_to_ptr.vmem [resolvable:$true] %s24843_s20 }
  0x1e   : > { %v25614_v38 = vsel %vm224_vm1, %v213_v31, 0  ;;  %v25616_v41 = vand.u32 4294901760, %v231_v37  ;;  %v25619_v43 = vand.u32 4294901760, %v333_v32  ;;  %v229_v45 = vsel %vm224_vm1, %v203_v19, 0  ;;  %s25413_s29 = scalar_lea.vmem %s24844_s20, 256  ;;  %p25420_p0 = scmp.lt.s32.totalorder %s24844_s20, %s25418_s5 }
  0x1f   : > { %272 = vmatprep.subr.mxu0 %v271_v25  ;;  %v372_v29 = vsub.f32 %v227_v21, %v271_v25  ;;  %v379_v30 = vand.u32 4294901760, %v378_v27  ;;  %v25632_v47 = vand.u32 4294901760, %v229_v45  ;;  %v212_v55 = vcombine.high %v204_v53, %v204_v53  ;;  %p25414_p11 = scmp.ne.s32.totalorder %s24844_s20, %s25413_s29  ;;  %p25421_p1 = scmp.lt.s32.totalorder %s25419_s19, %s25413_s29 }
  0x20   : > { %274 = vmatpush1.msra.mxu0 %v273_v20  ;;  %v935_v44 = vsub.f32 %v231_v37, %v25616_v41  ;;  %v233_v59 = vsel %vm224_vm1, %v204_v53, 0  ;;  %v25714_v5 = vand.u32 4294901760, %v25614_v38  ;;  %v1962_v16 = vand.u32 4294901760, %v25606_v33 }
  0x21   : > { %313 = vmatmul.mubr.f32.vlgmr.msra.gmra.mxu0 %v25601_v26  ;;  %v373_v35 = vand.u32 4294901760, %v372_v29  ;;  %v380_v36 = vsub.f32 %v378_v27, %v379_v30  ;;  %469 = vmatprep.subr.mxu0 %v372_v29  ;;  %v941_v49 = vsub.f32 %v229_v45, %v25632_v47  ;;  %v235_v56 = vsel %vm224_vm1, %v212_v55, 0  ;;  %p25415_p12 = pnand %p25414_p11, %p25541_p5  ;;  %p25422_p2 = por %p25421_p1, %p25420_p0 }
  0x22   : > { %318 = vmatprep.mubr.f32.mxu0 %v32099_v2  ;;  %472 = vmatpush1.msra.mxu0 %v378_v27  ;;  %v936_v46 = vand.u32 4294901760, %v935_v44  ;;  %v25664_v57 = vand.u32 4294901760, %v235_v56  ;;  %v25682_v61 = vand.u32 4294901760, %v233_v59  ;;  %v2061_v8 = vsub.f32 %v25614_v38, %v25714_v5 }
  0x23   : > { %v374_v39 = vsub.f32 %v372_v29, %v373_v35  ;;  %657 = vmatprep.subr.mxu0 %v373_v35  ;;  %v381_v40 = vand.u32 4294901760, %v380_v36  ;;  %v942_v51 = vand.u32 4294901760, %v941_v49  ;;  %v2067_v18 = vsub.f32 %v25606_v33, %v1962_v16  ;;  %p25416_p13 = pneg %p25415_p12 }
  0x24   : > { %v937_v48 = vsub.f32 %v935_v44, %v936_v46  ;;  %v1498_v58 = vsub.f32 %v235_v56, %v25664_v57  ;;  %v1504_v63 = vsub.f32 %v233_v59, %v25682_v61  ;;  %v2062_v15 = vand.u32 4294901760, %v2061_v8 }
  0x25   : > { %324 = vmatmul.mubr.f32.gmra.mxu0 %v25609_v34  ;;  %v375_v42 = vand.u32 4294901760, %v374_v39  ;;  %v943_v52 = vsub.f32 %v941_v49, %v942_v51  ;;  %p25423_p3 = pnand %p25422_p2, %p25416_p13 }
  0x26   : > { %329 = vmatprep.mubr.f32.mxu0 %v32099_v2  ;;  %v938_v50 = vand.u32 4294901760, %v937_v48  ;;  %v1499_v60 = vand.u32 4294901760, %v1498_v58  ;;  %v1505_v1 = vand.u32 4294901760, %v1504_v63  ;;  %v2063_v17 = vsub.f32 %v2061_v8, %v2062_v15 }
  0x27   : > { %376 = vmatprep.subr.mxu1 %v375_v42  ;;  %v944_v54 = vand.u32 4294901760, %v943_v52 }
  0x28   : > { %382 = vmatpush1.msra.mxu1 %v381_v40  ;;  %v1500_v62 = vsub.f32 %v1498_v58, %v1499_v60  ;;  %v1506_v3 = vsub.f32 %v1504_v63, %v1505_v1  ;;  %v2064_v19 = vand.u32 4294901760, %v2063_v17 }
  0x29   : > { %335 = vmatmul.mubr.f32.gmra.mxu0 %v25619_v43  ;;  %417 = vmatmul.mubr.f32.vlgmr.msra.gmra.mxu1 %v25563_v6 }
  0x2a   : > { %422 = vmatprep.mubr.f32.mxu1 %v32099_v2  ;;  %505 = vmatprep.mubr.f32.mxu0 %v32099_v2  ;;  %v1501_v0 = vand.u32 4294901760, %v1500_v62  ;;  %v1507_v4 = vand.u32 4294901760, %v1506_v3 }
  0x2b   : > { %561 = vmatprep.subr.mxu1 %v271_v25 }
  0x2c   : > { %563 = vmatpush1.msra.mxu1 %v273_v20 }
  0x2d   : > { %424 = vmatmul.mubr.f32.gmra.mxu1 %v25565_v7  ;;  %508 = vmatmul.mubr.f32.vlgmr.msra.gmra.mxu0 %v25570_v10 }
  0x2e   : > { %429 = vmatprep.mubr.f32.mxu1 %v32099_v2  ;;  %513 = vmatprep.mubr.f32.mxu0 %v32099_v2 }
  0x2f   : > { %661 = vmatpush1.msra.mxu0 %v379_v30  ;;  %747 = vmatprep.subr.mxu1 %v271_v25 }
  0x30   : > { %835 = vmatprep.subr.mxu0 %v25616_v41 }
  0x31   : > { %431 = vmatmul.mubr.f32.gmra.mxu1 %v25567_v9  ;;  %516 = vmatmul.mubr.f32.gmra.mxu0 %v25573_v11 }
  0x32   : > { %521 = vmatprep.mubr.f32.mxu0 %v32099_v2  ;;  %596 = vmatprep.mubr.f32.mxu1 %v32099_v2 }
  0x35   : > { %524 = vmatmul.mubr.f32.gmra.mxu0 %v25587_v14  ;;  %600 = vmatmul.mubr.f32.vlgmr.msra.gmra.mxu1 %v25581_v12 }
  0x36   : > { %605 = vmatprep.mubr.f32.mxu1 %v32099_v2  ;;  %694 = vmatprep.mubr.f32.mxu0 %v32099_v2 }
  0x37   : > { %749 = vmatpush1.msra.mxu1 %v273_v20  ;;  %v2068_v20 = vand.u32 4294901760, %v2067_v18 }
  0x38   : > { %939 = vmatprep.subr.mxu1 %v938_v50 }
  0x39   : > { %609 = vmatmul.mubr.f32.gmra.mxu1 %v25584_v13  ;;  %696 = vmatmul.mubr.f32.vlgmr.msra.gmra.mxu0 %v25563_v6  ;;  %v2069_v21 = vsub.f32 %v2067_v18, %v2068_v20 }
  0x3a   : > { %614 = vmatprep.mubr.f32.mxu1 %v32099_v2  ;;  %701 = vmatprep.mubr.f32.mxu0 %v32099_v2 }
  0x3b   : > { %837 = vmatpush1.msra.mxu0 %v25632_v47  ;;  %v2070_v22 = vand.u32 4294901760, %v2069_v21 }
  0x3c   : > { %1032 = vmatprep.subr.mxu0 %v935_v44 }
  0x3d   : > { %618 = vmatmul.mubr.f32.gmra.mxu1 %v25598_v23  ;;  %703 = vmatmul.mubr.f32.gmra.mxu0 %v25565_v7 }
  0x3e   : > { %708 = vmatprep.mubr.f32.mxu0 %v32099_v2  ;;  %782 = vmatprep.mubr.f32.mxu1 %v32099_v2 }
  0x41   : > { %710 = vmatmul.mubr.f32.gmra.mxu0 %v25567_v9  ;;  %784 = vmatmul.mubr.f32.vlgmr.msra.gmra.mxu1 %v25563_v6 }
  0x42   : > { %789 = vmatprep.mubr.f32.mxu1 %v32099_v2  ;;  %870 = vmatprep.mubr.f32.mxu0 %v32099_v2 }
  0x43   : > { %945 = vmatpush1.msra.mxu1 %v944_v54 }
  0x44   : > { %1124 = vmatprep.subr.mxu1 %v25616_v41 }
  0x45   : > { %791 = vmatmul.mubr.f32.gmra.mxu1 %v25565_v7  ;;  %876 = vmatmul.mubr.f32.vlgmr.msra.gmra.mxu0 %v25601_v26 }
  0x46   : > { %796 = vmatprep.mubr.f32.mxu1 %v32099_v2  ;;  %881 = vmatprep.mubr.f32.mxu0 %v32099_v2 }
  0x47   : > { %1035 = vmatpush1.msra.mxu0 %v941_v49 }
  0x48   : > { %1220 = vmatprep.subr.mxu0 %v936_v46 }
  0x49   : > { %798 = vmatmul.mubr.f32.gmra.mxu1 %v25567_v9  ;;  %887 = vmatmul.mubr.f32.gmra.mxu0 %v25609_v34 }
  0x4a   : > { %892 = vmatprep.mubr.f32.mxu0 %v32099_v2  ;;  %978 = vmatprep.mubr.f32.mxu1 %v32099_v2 }
  0x4d   : > { %898 = vmatmul.mubr.f32.gmra.mxu0 %v25619_v43  ;;  %980 = vmatmul.mubr.f32.vlgmr.msra.gmra.mxu1 %v25563_v6 }
  0x4e   : > { %985 = vmatprep.mubr.f32.mxu1 %v32099_v2  ;;  %1068 = vmatprep.mubr.f32.mxu0 %v32099_v2 }
  0x4f   : > { %1126 = vmatpush1.msra.mxu1 %v25632_v47 }
  0x50   : > { %1310 = vmatprep.subr.mxu1 %v25616_v41 }
  0x51   : > { %987 = vmatmul.mubr.f32.gmra.mxu1 %v25565_v7  ;;  %1071 = vmatmul.mubr.f32.vlgmr.msra.gmra.mxu0 %v25570_v10 }
  0x52   : > { %992 = vmatprep.mubr.f32.mxu1 %v32099_v2  ;;  %1076 = vmatprep.mubr.f32.mxu0 %v32099_v2 }
  0x53   : > { %1224 = vmatpush1.msra.mxu0 %v942_v51 }
  0x54   : > { %1398 = vmatprep.subr.mxu0 %v25664_v57 }
  0x55   : > { %994 = vmatmul.mubr.f32.gmra.mxu1 %v25567_v9  ;;  %1079 = vmatmul.mubr.f32.gmra.mxu0 %v25573_v11 }
  0x56   : > { %1084 = vmatprep.mubr.f32.mxu0 %v32099_v2  ;;  %1159 = vmatprep.mubr.f32.mxu1 %v32099_v2 }
  0x59   : > { %1087 = vmatmul.mubr.f32.gmra.mxu0 %v25587_v14  ;;  %1163 = vmatmul.mubr.f32.vlgmr.msra.gmra.mxu1 %v25581_v12 }
  0x5a   : > { %1168 = vmatprep.mubr.f32.mxu1 %v32099_v2  ;;  %1257 = vmatprep.mubr.f32.mxu0 %v32099_v2 }
  0x5b   : > { %1312 = vmatpush1.msra.mxu1 %v25632_v47 }
  0x5c   : > { %1502 = vmatprep.subr.mxu1 %v1501_v0 }
  0x5d   : > { %1172 = vmatmul.mubr.f32.gmra.mxu1 %v25584_v13  ;;  %1259 = vmatmul.mubr.f32.vlgmr.msra.gmra.mxu0 %v25563_v6 }
  0x5e   : > { %1177 = vmatprep.mubr.f32.mxu1 %v32099_v2  ;;  %1264 = vmatprep.mubr.f32.mxu0 %v32099_v2 }
  0x5f   : > { %1400 = vmatpush1.msra.mxu0 %v25682_v61 }
  0x60   : > { %1595 = vmatprep.subr.mxu0 %v1498_v58 }
  0x61   : > { %1181 = vmatmul.mubr.f32.gmra.mxu1 %v25598_v23  ;;  %1266 = vmatmul.mubr.f32.gmra.mxu0 %v25565_v7 }
  0x62   : > { %1271 = vmatprep.mubr.f32.mxu0 %v32099_v2  ;;  %1345 = vmatprep.mubr.f32.mxu1 %v32099_v2 }
  0x65   : > { %1273 = vmatmul.mubr.f32.gmra.mxu0 %v25567_v9  ;;  %1347 = vmatmul.mubr.f32.vlgmr.msra.gmra.mxu1 %v25563_v6 }
  0x66   : > { %1352 = vmatprep.mubr.f32.mxu1 %v32099_v2  ;;  %1433 = vmatprep.mubr.f32.mxu0 %v32099_v2 }
  0x67   : > { %1508 = vmatpush1.msra.mxu1 %v1507_v4 }
  0x68   : > { %1687 = vmatprep.subr.mxu1 %v25664_v57 }
  0x69   : > { %1354 = vmatmul.mubr.f32.gmra.mxu1 %v25565_v7  ;;  %1439 = vmatmul.mubr.f32.vlgmr.msra.gmra.mxu0 %v25601_v26 }
  0x6a   : > { %1359 = vmatprep.mubr.f32.mxu1 %v32099_v2  ;;  %1444 = vmatprep.mubr.f32.mxu0 %v32099_v2 }
  0x6b   : > { %1598 = vmatpush1.msra.mxu0 %v1504_v63 }
  0x6c   : > { %1783 = vmatprep.subr.mxu0 %v1499_v60 }
  0x6d   : > { %1361 = vmatmul.mubr.f32.gmra.mxu1 %v25567_v9  ;;  %1450 = vmatmul.mubr.f32.gmra.mxu0 %v25609_v34 }
  0x6e   : > { %1455 = vmatprep.mubr.f32.mxu0 %v32099_v2  ;;  %1541 = vmatprep.mubr.f32.mxu1 %v32099_v2 }
  0x71   : > { %1461 = vmatmul.mubr.f32.gmra.mxu0 %v25619_v43  ;;  %1543 = vmatmul.mubr.f32.vlgmr.msra.gmra.mxu1 %v25563_v6 }
  0x72   : > { %1548 = vmatprep.mubr.f32.mxu1 %v32099_v2  ;;  %1631 = vmatprep.mubr.f32.mxu0 %v32099_v2 }
  0x73   : > { %1689 = vmatpush1.msra.mxu1 %v25682_v61 }
  0x74   : > { %1873 = vmatprep.subr.mxu1 %v25664_v57 }
  0x75   : > { %1550 = vmatmul.mubr.f32.gmra.mxu1 %v25565_v7  ;;  %1634 = vmatmul.mubr.f32.vlgmr.msra.gmra.mxu0 %v25570_v10 }
  0x76   : > { %1555 = vmatprep.mubr.f32.mxu1 %v32099_v2  ;;  %1639 = vmatprep.mubr.f32.mxu0 %v32099_v2 }
  0x77   : > { %1787 = vmatpush1.msra.mxu0 %v1505_v1 }
  0x78   : > { %1961 = vmatprep.subr.mxu0 %v25714_v5 }
  0x79   : > { %1557 = vmatmul.mubr.f32.gmra.mxu1 %v25567_v9  ;;  %1642 = vmatmul.mubr.f32.gmra.mxu0 %v25573_v11 }
  0x7a   : > { %1647 = vmatprep.mubr.f32.mxu0 %v32099_v2  ;;  %1722 = vmatprep.mubr.f32.mxu1 %v32099_v2 }
  0x7d   : > { %1650 = vmatmul.mubr.f32.gmra.mxu0 %v25587_v14  ;;  %1726 = vmatmul.mubr.f32.vlgmr.msra.gmra.mxu1 %v25581_v12 }
  0x7e   : > { %1731 = vmatprep.mubr.f32.mxu1 %v32099_v2  ;;  %1820 = vmatprep.mubr.f32.mxu0 %v32099_v2 }
  0x7f   : > { %1875 = vmatpush1.msra.mxu1 %v25682_v61 }
  0x80   : > { %2065 = vmatprep.subr.mxu1 %v2064_v19 }
  0x81   : > { %1735 = vmatmul.mubr.f32.gmra.mxu1 %v25584_v13  ;;  %1822 = vmatmul.mubr.f32.vlgmr.msra.gmra.mxu0 %v25563_v6 }
  0x82   : > { %1740 = vmatprep.mubr.f32.mxu1 %v32099_v2  ;;  %1827 = vmatprep.mubr.f32.mxu0 %v32099_v2 }
  0x83   : > { %1963 = vmatpush1.msra.mxu0 %v1962_v16 }
  0x84   : > { %2158 = vmatprep.subr.mxu0 %v2061_v8 }
  0x85   : > { %1744 = vmatmul.mubr.f32.gmra.mxu1 %v25598_v23  ;;  %1829 = vmatmul.mubr.f32.gmra.mxu0 %v25565_v7 }
  0x86   : > { %1834 = vmatprep.mubr.f32.mxu0 %v32099_v2  ;;  %1908 = vmatprep.mubr.f32.mxu1 %v32099_v2 }
  0x89   : > { %1836 = vmatmul.mubr.f32.gmra.mxu0 %v25567_v9  ;;  %1910 = vmatmul.mubr.f32.vlgmr.msra.gmra.mxu1 %v25563_v6 }
  0x8a   : > { %1915 = vmatprep.mubr.f32.mxu1 %v32099_v2  ;;  %1996 = vmatprep.mubr.f32.mxu0 %v32099_v2 }
  0x8b   : > { %2071 = vmatpush1.msra.mxu1 %v2070_v22 }
  0x8c   : > { %2250 = vmatprep.subr.mxu1 %v25714_v5 }
  0x8d   : > { %1917 = vmatmul.mubr.f32.gmra.mxu1 %v25565_v7  ;;  %2002 = vmatmul.mubr.f32.vlgmr.msra.gmra.mxu0 %v25601_v26 }
  0x8e   : > { %1922 = vmatprep.mubr.f32.mxu1 %v32099_v2  ;;  %2007 = vmatprep.mubr.f32.mxu0 %v32099_v2 }
  0x8f   : > { %2161 = vmatpush1.msra.mxu0 %v2067_v18 }
  0x90   : > { %2346 = vmatprep.subr.mxu0 %v2062_v15 }
  0x91   : > { %1924 = vmatmul.mubr.f32.gmra.mxu1 %v25567_v9  ;;  %2013 = vmatmul.mubr.f32.gmra.mxu0 %v25609_v34 }
  0x92   : > { %2018 = vmatprep.mubr.f32.mxu0 %v32099_v2  ;;  %2104 = vmatprep.mubr.f32.mxu1 %v32099_v2 }
  0x95   : > { %2024 = vmatmul.mubr.f32.gmra.mxu0 %v25619_v43  ;;  %2106 = vmatmul.mubr.f32.vlgmr.msra.gmra.mxu1 %v25563_v6 }
  0x96   : > { %2111 = vmatprep.mubr.f32.mxu1 %v32099_v2  ;;  %2194 = vmatprep.mubr.f32.mxu0 %v32099_v2 }
  0x97   : > { %2252 = vmatpush1.msra.mxu1 %v1962_v16 }
  0x98   : > { %2436 = vmatprep.subr.mxu1 %v25714_v5 }
  0x99   : > { %2113 = vmatmul.mubr.f32.gmra.mxu1 %v25565_v7  ;;  %2197 = vmatmul.mubr.f32.vlgmr.msra.gmra.mxu0 %v25570_v10 }
  0x9a   : > { %2118 = vmatprep.mubr.f32.mxu1 %v32099_v2  ;;  %2202 = vmatprep.mubr.f32.mxu0 %v32099_v2 }
  0x9b   : > { %2350 = vmatpush1.msra.mxu0 %v2068_v20 }
  0x9d   : > { %2120 = vmatmul.mubr.f32.gmra.mxu1 %v25567_v9  ;;  %2205 = vmatmul.mubr.f32.gmra.mxu0 %v25573_v11 }
  0x9e   : > { %2210 = vmatprep.mubr.f32.mxu0 %v32099_v2  ;;  %2285 = vmatprep.mubr.f32.mxu1 %v32099_v2 }
  0xa1   : > { %2213 = vmatmul.mubr.f32.gmra.mxu0 %v25587_v14  ;;  %2289 = vmatmul.mubr.f32.vlgmr.msra.gmra.mxu1 %v25581_v12 }
  0xa2   : > { %2294 = vmatprep.mubr.f32.mxu1 %v32099_v2  ;;  %2383 = vmatprep.mubr.f32.mxu0 %v32099_v2 }
  0xa3   : > { %2438 = vmatpush1.msra.mxu1 %v1962_v16 }
  0xa5   : > { %2298 = vmatmul.mubr.f32.gmra.mxu1 %v25584_v13  ;;  %2385 = vmatmul.mubr.f32.vlgmr.msra.gmra.mxu0 %v25563_v6 }
  0xa6   : > { %2303 = vmatprep.mubr.f32.mxu1 %v32099_v2  ;;  %2390 = vmatprep.mubr.f32.mxu0 %v32099_v2 }
  0xa9   : > { %2307 = vmatmul.mubr.f32.gmra.mxu1 %v25598_v23  ;;  %2392 = vmatmul.mubr.f32.gmra.mxu0 %v25565_v7 }
  0xaa   : > { %2397 = vmatprep.mubr.f32.mxu0 %v32099_v2  ;;  %2471 = vmatprep.mubr.f32.mxu1 %v32099_v2 }
  0xad   : > { %2399 = vmatmul.mubr.f32.gmra.mxu0 %v25567_v9  ;;  %2473 = vmatmul.mubr.f32.vlgmr.msra.gmra.mxu1 %v25563_v6 }
  0xae   : > { %2478 = vmatprep.mubr.f32.mxu1 %v32099_v2  ;;  %2625 = vmatprep.mubr.f32.mxu0 %v32099_v2 }
  0xb1   : > { %2480 = vmatmul.mubr.f32.gmra.mxu1 %v25565_v7 }
  0xb2   : > { %2485 = vmatprep.mubr.f32.mxu1 %v32099_v2 }
  0xb5   : > { %2487 = vmatmul.mubr.f32.gmra.mxu1 %v25567_v9 }
  0xb6   : > { %2753 = vmatprep.mubr.f32.mxu1 %v32099_v2 }
  0xe1   : > { %v314_v10 = vpop.f32.mrf.mxu0 }
  0xe3   : > { %v316_v11 = vpop.f32.mrf.mxu0 }
  0xe5   : > { %v325_v12 = vpop.f32.mrf.mxu0 }
  0xe7   : > { %v327_v13 = vpop.f32.mrf.mxu0 }
  0xe9   : > { %v336_v14 = vpop.f32.mrf.mxu0  ;;  %v418_v23 = vpop.f32.mrf.mxu1 }
  0xea   : > { %v419_v43 = vadd.f32 %v418_v23, %v314_v10 }
  0xeb   : > { %v338_v24 = vpop.f32.mrf.mxu0  ;;  %v420_v6 = vpop.f32.mrf.mxu1 }
  0xec   : > { %v421_v39 = vadd.f32 %v420_v6, %v316_v11 }
  0xed   : > { %v425_v25 = vpop.f32.mrf.mxu1  ;;  %v509_v26 = vpop.f32.mrf.mxu0 }
  0xee   : > { %v426_v42 = vadd.f32 %v425_v25, %v325_v12  ;;  %v510_v49 = vadd.f32 %v509_v26, %v419_v43  ;;  %v2518_v25 = vld [vmem:[%s32060_s2 + $0x8] sm:$0xff] }
  0xef   : > { %v427_v27 = vpop.f32.mrf.mxu1  ;;  %v511_v28 = vpop.f32.mrf.mxu0 }
  0xf0   : > { %v512_v44 = vadd.f32 %v511_v28, %v421_v39  ;;  %v428_v47 = vadd.f32 %v427_v27, %v327_v13 }
  0xf1   : > { %v432_v29 = vpop.f32.mrf.mxu1  ;;  %v517_v7 = vpop.f32.mrf.mxu0 }
  0xf2   : > { %v518_v48 = vadd.f32 %v517_v7, %v426_v42  ;;  %v433_v53 = vadd.f32 %v432_v29, %v336_v14  ;;  %v2519_v29 = vld [vmem:[%s32060_s2 + $0x10] sm:$0x1f] }
  0xf3   : > { %v434_v30 = vpop.f32.mrf.mxu1  ;;  %v519_v31 = vpop.f32.mrf.mxu0 }
  0xf4   : > { %v520_v54 = vadd.f32 %v519_v31, %v428_v47  ;;  %v435_v60 = vadd.f32 %v434_v30, %v338_v24  ;;  %v2517_v24 = vld [vmem:[%s32060_s2] sm:$0xff]  ;;  %v2525_v31 = vsel %vm2520_vm2, %v2518_v25, 0 }
  0xf5   : > { %v525_v32 = vpop.f32.mrf.mxu0  ;;  %v601_v9 = vpop.f32.mrf.mxu1  ;;  %v2522_v28 = vsel %vm2520_vm2, %v2517_v24, 0 }
  0xf6   : > { %v602_v56 = vadd.f32 %v601_v9, %v510_v49  ;;  %v526_v61 = vadd.f32 %v525_v32, %v433_v53 }
  0xf7   : > { %v527_v33 = vpop.f32.mrf.mxu0  ;;  %v603_v34 = vpop.f32.mrf.mxu1 }
  0xf8   : > { %v604_v50 = vadd.f32 %v603_v34, %v512_v44  ;;  %v528_v5 = vadd.f32 %v527_v33, %v435_v60  ;;  %v25825_v33 = vand.u32 4294901760, %v2522_v28  ;;  %v2528_v34 = vsel %vm2520_vm2, %v2519_v29, 0 }
  0xf9   : > { %v610_v35 = vpop.f32.mrf.mxu1  ;;  %v697_v36 = vpop.f32.mrf.mxu0 }
  0xfa   : > { %v611_v55 = vadd.f32 %v610_v35, %v518_v48  ;;  %v698_v0 = vadd.f32 %v697_v36, %v602_v56  ;;  %v25828_v35 = vand.u32 4294901760, %v2525_v31  ;;  %v25839_v42 = vsub.f32 %v2522_v28, %v25825_v33 }
  0xfb   : > { %v612_v37 = vpop.f32.mrf.mxu1  ;;  %v699_v38 = vpop.f32.mrf.mxu0 }
  0xfc   : > { %v700_v57 = vadd.f32 %v699_v38, %v604_v50  ;;  %v613_v62 = vadd.f32 %v612_v37, %v520_v54  ;;  %v25832_v38 = vand.u32 4294901760, %v2528_v34  ;;  %v25842_v44 = vsub.f32 %v2525_v31, %v25828_v35 }
  0xfd   : > { %v619_v40 = vpop.f32.mrf.mxu1  ;;  %v704_v41 = vpop.f32.mrf.mxu0  ;;  %v25862_v56 = vand.u32 4294901760, %v25839_v42 }
  0xfe   : > { %v705_v63 = vadd.f32 %v704_v41, %v611_v55  ;;  %v620_v8 = vadd.f32 %v619_v40, %v526_v61 }
  0xff   : > { %v621_v45 = vpop.f32.mrf.mxu1  ;;  %v706_v46 = vpop.f32.mrf.mxu0 }
 0x100   : > { %v707_v15 = vadd.f32 %v706_v46, %v613_v62  ;;  %v622_v20 = vadd.f32 %v621_v45, %v528_v5 }
 0x101   : > { %v711_v51 = vpop.f32.mrf.mxu0  ;;  %v785_v52 = vpop.f32.mrf.mxu1 }
 0x102   : > { %v786_v17 = vadd.f32 %v785_v52, %v698_v0  ;;  %v712_v21 = vadd.f32 %v711_v51, %v620_v8  ;;  %v25853_v51 = vsub.f32 %v2528_v34, %v25832_v38 }
 0x103   : > { %v713_v58 = vpop.f32.mrf.mxu0  ;;  %v787_v59 = vpop.f32.mrf.mxu1 }
 0x104   : > { %v788_v1 = vadd.f32 %v787_v59, %v700_v57  ;;  %v714_v12 = vadd.f32 %v713_v58, %v622_v20  ;;  %v25866_v58 = vand.u32 4294901760, %v25842_v44  ;;  %v25882_v5 = vand.u32 4294901760, %v25853_v51 }
 0x105   : > { %v792_v3 = vpop.f32.mrf.mxu1  ;;  %v25798_v4 = vpop.f32.mrf.mxu0 }
 0x106   : > { %v793_v16 = vadd.f32 %v792_v3, %v705_v63  ;;  %v2651_v25 = vsub.f32 %v25853_v51, %v25882_v5 }
 0x107   : > { %v794_v18 = vpop.f32.mrf.mxu1  ;;  %v25800_v19 = vpop.f32.mrf.mxu0 }
 0x108   : > { %24981 = vtanh.f32 %v793_v16  ;;  %v795_v22 = vadd.f32 %v794_v18, %v707_v15 }
 0x109   : > { %24983 = vtanh.f32 %v788_v1  ;;  %v799_v10 = vpop.f32.mrf.mxu1  ;;  %v25802_v11 = vpop.f32.mrf.mxu0 }
 0x10a   : > { %24985 = vtanh.f32 %v795_v22  ;;  %v800_v13 = vadd.f32 %v799_v10, %v712_v21  ;;  %v2640_v21 = vsub.f32 %v25842_v44, %v25866_v58 }
 0x10b   : > { %24987 = vtanh.f32 %v786_v17  ;;  %v801_v14 = vpop.f32.mrf.mxu1  ;;  %v25804_v23 = vpop.f32.mrf.mxu0  ;;  %v2629_v17 = vsub.f32 %v25839_v42, %v25862_v56 }
 0x10c   : > { %24989 = vtanh.f32 %v800_v13  ;;  %v802_v6 = vadd.f32 %v801_v14, %v714_v12 }
 0x10d   : > { %v25812_v26 = vpop.f32.mrf.mxu0  ;;  %v25814_v27 = vpop.f32.mrf.mxu1  ;;  %v25913_v34 = vand.u32 4294901760, %v2629_v17 }
 0x10e   : > { %24991 = vtanh.f32 %v802_v6 }
 0x10f   : > { %v25820_v7 = vpop.f32.mrf.mxu0  ;;  %v983_v30 = vpop.f32.mrf.mxu1 }
 0x110   : > { %v984_v28 = vadd.f32 %v983_v30, %v25800_v19 }
 0x111   : > { %v988_v32 = vpop.f32.mrf.mxu1  ;;  %v25823_v9 = vpop.f32.mrf.mxu0 }
 0x113   : > { %v25830_v36 = vpop.f32.mrf.mxu1  ;;  %v1074_v37 = vpop.f32.mrf.mxu0 }
 0x114   : > { %v1075_v19 = vadd.f32 %v1074_v37, %v984_v28  ;;  %v991_v37 = vadd.f32 %v25830_v36, %v25804_v23 }
 0x115   : > { %v24982_v39 = vpop.eup %24981  ;;  %v25834_v40 = vpop.f32.mrf.mxu1 }
 0x116   : > { %v25836_v41 = vpop.f32.mrf.mxu0  ;;  %v24984_v43 = vpop.eup %24983  ;;  %v25850_v50 = vand.u32 4294901760, %v24982_v39  ;;  %v996_v36 = vadd.f32 %v25834_v40, %v25812_v26 }
 0x117   : > { %v24986_v45 = vpop.eup %24985  ;;  %v25844_v46 = vpop.f32.mrf.mxu1  ;;  %v25859_v55 = vand.u32 4294901760, %v24984_v43 }
 0x118   : > { %v25846_v47 = vpop.f32.mrf.mxu0  ;;  %v24988_v48 = vpop.eup %24987  ;;  %v25848_v49 = vand.u32 4294901760, %v24986_v45  ;;  %v25879_v3 = vsub.f32 %v24982_v39, %v25850_v50  ;;  %v998_v26 = vadd.f32 %v25844_v46, %v25820_v7 }
 0x119   : > { %v24990_v52 = vpop.eup %24989  ;;  %v25857_v54 = vpop.f32.mrf.mxu1  ;;  %v25872_v63 = vand.u32 4294901760, %v24988_v48  ;;  %v25894_v20 = vsub.f32 %v24984_v43, %v25859_v55 }
 0x11a   : > { %v25855_v53 = vpop.f32.mrf.mxu0  ;;  %v2532_v57 = vsel %vm2530_vm3, %v24990_v52, 0  ;;  %v25875_v0 = vsub.f32 %v24986_v45, %v25848_v49  ;;  %v2705_v6 = vand.u32 4294901760, %v25879_v3  ;;  %v989_v45 = vadd.f32 %v988_v32, %v25802_v11 }
 0x11b   : > { %v24992_v59 = vpop.eup %24991  ;;  %v1166_v61 = vpop.f32.mrf.mxu1  ;;  %v25870_v62 = vand.u32 4294901760, %v2532_v57  ;;  %v25905_v24 = vsub.f32 %v24988_v48, %v25872_v63  ;;  %v32066_v43 = vand.u32 4294901760, %v25894_v20  ;;  %v25922_v52 = vand.u32 4294901760, %v2640_v21 }
 0x11c   : > { %v25868_v60 = vpop.f32.mrf.mxu0  ;;  %v2535_v1 = vsel %vm2530_vm3, %v24992_v59, 0  ;;  %v32064_v14 = vand.u32 4294901760, %v25875_v0  ;;  %v2706_v17 = vsub.f32 %v25879_v3, %v2705_v6  ;;  %v25940_v21 = vand.u32 4294901760, %v2651_v25 }
 0x11d   : > { %v1173_v8 = vpop.f32.mrf.mxu1  ;;  %v25886_v16 = vand.u32 4294901760, %v2535_v1  ;;  %v25891_v18 = vsub.f32 %v2532_v57, %v25870_v62  ;;  %v2717_v32 = vand.u32 4294901760, %v25905_v24  ;;  %v1081_v28 = vadd.f32 %v25836_v41, %v989_v45 }
 0x11e   : > { %v25884_v15 = vpop.f32.mrf.mxu0  ;;  %v2700_v11 = vsub.f32 %v25875_v0, %v32064_v14  ;;  %v2712_v23 = vsub.f32 %v25894_v20, %v32066_v43  ;;  %v1083_v25 = vadd.f32 %v25846_v47, %v991_v37  ;;  %v1089_v40 = vadd.f32 %v25855_v53, %v996_v36 }
 0x11f   : > { %v1175_v22 = vpop.f32.mrf.mxu1  ;;  %2582 = vmatprep.subr.mxu0 %v25886_v16  ;;  %v25900_v12 = vsub.f32 %v2535_v1, %v25886_v16  ;;  %v32063_v13 = vand.u32 4294901760, %v25891_v18  ;;  %v982_v1 = vadd.f32 %v25814_v27, %v25798_v4  ;;  %v1091_v7 = vadd.f32 %v25868_v60, %v998_v26 }
 0x120   : > { %v1262_v10 = vpop.f32.mrf.mxu0  ;;  %2584 = vmatpush1.msra.mxu0 %v25870_v62  ;;  %v2701_v43 = vand.u32 4294901760, %v2700_v11  ;;  %v1176_v47 = vadd.f32 %v1175_v22, %v1083_v25  ;;  %v2713_v37 = vand.u32 4294901760, %v2712_v23 }
 0x121   : > { %v1182_v29 = vpop.f32.mrf.mxu1  ;;  %2586 = vmatprep.subr.mxu0 %v25848_v49  ;;  %v32065_v39 = vand.u32 4294901760, %v25900_v12  ;;  %v2694_v48 = vsub.f32 %v25891_v18, %v32063_v13  ;;  %v1167_v13 = vadd.f32 %v1166_v61, %v1075_v19  ;;  %v1073_v27 = vadd.f32 %v25823_v9, %v982_v1 }
 0x122   : > { %v1267_v31 = vpop.f32.mrf.mxu0  ;;  %2588 = vmatpush1.msra.mxu0 %v25850_v50  ;;  %v1174_v61 = vadd.f32 %v1173_v8, %v1081_v28  ;;  %v2718_v9 = vsub.f32 %v25905_v24, %v2717_v32  ;;  %v2707_v8 = vand.u32 4294901760, %v2706_v17  ;;  %v1183_v46 = vadd.f32 %v1182_v29, %v1089_v40 }
 0x123   : > { %v1184_v30 = vpop.f32.mrf.mxu1  ;;  %2590 = vmatprep.subr.mxu0 %v25859_v55  ;;  %v2688_v59 = vsub.f32 %v25900_v12, %v32065_v39  ;;  %v2695_v41 = vand.u32 4294901760, %v2694_v48  ;;  %v1263_v45 = vadd.f32 %v1262_v10, %v1167_v13  ;;  %v1165_v10 = vadd.f32 %v25857_v54, %v1073_v27 }
 0x124   : > { %v1269_v57 = vpop.f32.mrf.mxu0  ;;  %2592 = vmatpush1.msra.mxu0 %v25872_v63  ;;  %v1268_v13 = vadd.f32 %v1267_v31, %v1174_v61  ;;  %v2719_v28 = vand.u32 4294901760, %v2718_v9  ;;  %v32165_v60 = vand.u32 4294901760, %v25900_v12  ;;  %v32168_v9 = vand.u32 4294901760, %v25894_v20 }
 0x125   : > { %v1348_v39 = vpop.f32.mrf.mxu1  ;;  %2631 = vmatmul.mubr.f32.vlgmr.msra.gmra.mxu0 %v25913_v34  ;;  %2803 = vmatprep.subr.mxu0 %v25900_v12  ;;  %v2689_v4 = vand.u32 4294901760, %v2688_v59  ;;  %v1270_v53 = vadd.f32 %v1269_v57, %v1176_v47  ;;  %v1261_v22 = vadd.f32 %v25884_v15, %v1165_v10 }
 0x126   : > { %v1274_v14 = vpop.f32.mrf.mxu0  ;;  %2806 = vmatpush1.msra.mxu0 %v25891_v18  ;;  %2636 = vmatprep.mubr.f32.mxu0 %v32099_v2 }
 0x127   : > { %v1350_v59 = vpop.f32.mrf.mxu1  ;;  %2690 = vmatprep.subr.mxu1 %v2689_v4  ;;  %2809 = vmatprep.subr.mxu0 %v25875_v0  ;;  %v1185_v4 = vadd.f32 %v1184_v30, %v1091_v7  ;;  %v1349_v29 = vadd.f32 %v1348_v39, %v1261_v22 }
 0x128   : > { %v1276_v19 = vpop.f32.mrf.mxu0  ;;  %2696 = vmatpush1.msra.mxu1 %v2695_v41  ;;  %2812 = vmatpush1.msra.mxu0 %v25879_v3  ;;  %v1351_v48 = vadd.f32 %v1350_v59, %v1263_v45  ;;  %v32166_v41 = vand.u32 4294901760, %v25891_v18 }
 0x129   : > { %v1355_v1 = vpop.f32.mrf.mxu1  ;;  %2642 = vmatmul.mubr.f32.gmra.mxu0 %v25922_v52  ;;  %2702 = vmatprep.subr.mxu1 %v2701_v43  ;;  %v1275_v43 = vadd.f32 %v1274_v14, %v1183_v46  ;;  %v1277_v27 = vadd.f32 %v1276_v19, %v1185_v4  ;;  %v32167_v19 = vand.u32 4294901760, %v25875_v0 }
 0x12a   : > { %v25963_v11 = vpop.f32.mrf.mxu0  ;;  %2815 = vmatprep.subr.mxu0 %v25894_v20  ;;  %2708 = vmatpush1.msra.mxu1 %v2707_v8  ;;  %v1356_v17 = vadd.f32 %v1355_v1, %v1268_v13  ;;  %24993 = vtanh.f32 %v1351_v48 }
 0x12b   : > { %2818 = vmatpush1.msra.mxu0 %v25905_v24  ;;  %v1357_v54 = vpop.f32.mrf.mxu1  ;;  %2714 = vmatprep.subr.mxu1 %v2713_v37 }
 0x12c   : > { %v25970_v31 = vpop.f32.mrf.mxu0  ;;  %v1358_v23 = vadd.f32 %v1357_v54, %v1270_v53  ;;  %3003 = vmatprep.subr.mxu0 %v32165_v60  ;;  %2647 = vmatprep.mubr.f32.mxu0 %v32099_v2 }
 0x12d   : > { %2720 = vmatpush1.msra.mxu1 %v2719_v28  ;;  %v1362_v15 = vpop.f32.mrf.mxu1  ;;  %2653 = vmatmul.mubr.f32.gmra.mxu0 %v25940_v21 }
 0x12e   : > { %v25975_v57 = vpop.f32.mrf.mxu0  ;;  %24995 = vtanh.f32 %v1358_v23  ;;  %v1363_v36 = vadd.f32 %v1362_v15, %v1275_v43  ;;  %2755 = vmatmul.mubr.f32.vlgmr.msra.gmra.mxu1 %v25825_v33  ;;  %2903 = vmatprep.subr.mxu1 %v25886_v16 }
 0x12f   : > { %24997 = vtanh.f32 %v1356_v17  ;;  %2905 = vmatpush1.msra.mxu1 %v25870_v62  ;;  %v1364_v12 = vpop.f32.mrf.mxu1  ;;  %2760 = vmatprep.mubr.f32.mxu1 %v32099_v2 }
 0x130   : > { %v25981_v14 = vpop.f32.mrf.mxu0  ;;  %24999 = vtanh.f32 %v1363_v36  ;;  %v1365_v39 = vadd.f32 %v1364_v12, %v1277_v27  ;;  %2907 = vmatprep.subr.mxu1 %v25848_v49  ;;  %2851 = vmatprep.mubr.f32.mxu0 %v32099_v2 }
 0x131   : > { %25001 = vtanh.f32 %v1349_v29  ;;  %2909 = vmatpush1.msra.mxu1 %v25850_v50  ;;  %v25989_v25 = vpop.f32.mrf.mxu1  ;;  %2854 = vmatmul.mubr.f32.vlgmr.msra.gmra.mxu0 %v25839_v42 }
 0x132   : > { %v25987_v30 = vpop.f32.mrf.mxu0  ;;  %25003 = vtanh.f32 %v1365_v39  ;;  %2762 = vmatmul.mubr.f32.gmra.mxu1 %v25828_v35  ;;  %2911 = vmatprep.subr.mxu1 %v25859_v55 }
 0x133   : > { %3007 = vmatpush1.msra.mxu0 %v32166_v41  ;;  %2913 = vmatpush1.msra.mxu1 %v25872_v63  ;;  %v25999_v45 = vpop.f32.mrf.mxu1 }
 0x134   : > { %v25997_v61 = vpop.f32.mrf.mxu0  ;;  %3011 = vmatprep.subr.mxu0 %v32167_v19  ;;  %3105 = vmatprep.subr.mxu1 %v25886_v16  ;;  %v1547_v19 = vadd.f32 %v25999_v45, %v25970_v31 }
 0x135   : > { %3015 = vmatpush1.msra.mxu0 %v2705_v6  ;;  %2767 = vmatprep.mubr.f32.mxu1 %v32099_v2  ;;  %v26007_v59 = vpop.f32.mrf.mxu1 }
 0x136   : > { %v26009_v18 = vpop.f32.mrf.mxu0  ;;  %2859 = vmatprep.mubr.f32.mxu0 %v32099_v2  ;;  %3019 = vmatprep.subr.mxu0 %v32168_v9 }
 0x137   : > { %2769 = vmatmul.mubr.f32.gmra.mxu1 %v25832_v38  ;;  %2862 = vmatmul.mubr.f32.gmra.mxu0 %v25842_v44  ;;  %v26016_v0 = vpop.f32.mrf.mxu1  ;;  %v24994_v20 = vpop.eup %24993 }
 0x138   : > { %v26018_v16 = vpop.f32.mrf.mxu0  ;;  %3023 = vmatpush1.msra.mxu0 %v2717_v32  ;;  %2867 = vmatprep.mubr.f32.mxu0 %v32099_v2  ;;  %v26057_v53 = vand.u32 4294901760, %v24994_v20 }
 0x139   : > { %2946 = vmatprep.mubr.f32.mxu1 %v32099_v2  ;;  %v26024_v3 = vpop.f32.mrf.mxu1 }
 0x13a   : > { %v26026_v6 = vpop.f32.mrf.mxu0  ;;  %v26087_v15 = vsub.f32 %v24994_v20, %v26057_v53 }
 0x13b   : > { %v24996_v26 = vpop.eup %24995  ;;  %2870 = vmatmul.mubr.f32.gmra.mxu0 %v25853_v51  ;;  %2950 = vmatmul.mubr.f32.vlgmr.msra.gmra.mxu1 %v25862_v56  ;;  %v26030_v40 = vpop.f32.mrf.mxu1 }
 0x13c   : > { %v26032_v47 = vpop.f32.mrf.mxu0  ;;  %v24998_v24 = vpop.eup %24997  ;;  %3107 = vmatpush1.msra.mxu1 %v25870_v62  ;;  %2955 = vmatprep.mubr.f32.mxu1 %v32099_v2  ;;  %v26044_v1 = vand.u32 4294901760, %v24996_v26  ;;  %v3326_v45 = vand.u32 4294901760, %v26087_v15 }
 0x13d   : > { %v25000_v32 = vpop.eup %24999  ;;  %3109 = vmatprep.subr.mxu1 %v25848_v49  ;;  %3056 = vmatprep.mubr.f32.mxu0 %v32099_v2  ;;  %v26040_v10 = vpop.f32.mrf.mxu1  ;;  %v26052_v46 = vand.u32 4294901760, %v24998_v24 }
 0x13e   : > { %v26038_v8 = vpop.f32.mrf.mxu0  ;;  %v25002_v13 = vpop.eup %25001  ;;  %3111 = vmatpush1.msra.mxu1 %v25850_v50  ;;  %v2538_v48 = vsel %vm2530_vm3, %v25000_v32, 0  ;;  %v1545_v32 = vadd.f32 %v25989_v25, %v25963_v11 }
 0x13f   : > { %v25004_v37 = vpop.eup %25003  ;;  %3113 = vmatprep.subr.mxu1 %v25859_v55  ;;  %2959 = vmatmul.mubr.f32.gmra.mxu1 %v25866_v58  ;;  %v1729_v49 = vpop.f32.mrf.mxu1  ;;  %v26050_v7 = vand.u32 4294901760, %v2538_v48  ;;  %v26070_v28 = vand.u32 4294901760, %v25002_v13  ;;  %v26081_v60 = vsub.f32 %v24998_v24, %v26052_v46 }
 0x140   : > { %v26048_v62 = vpop.f32.mrf.mxu0  ;;  %3058 = vmatmul.mubr.f32.vlgmr.msra.gmra.mxu0 %v25825_v33  ;;  %3115 = vmatpush1.msra.mxu1 %v25872_v63  ;;  %v2541_v50 = vsel %vm2530_vm3, %v25004_v37, 0  ;;  %v26073_v63 = vsub.f32 %v24996_v26, %v26044_v1  ;;  %v1638_v37 = vadd.f32 %v26018_v16, %v1547_v19 }
 0x141   : > { %2964 = vmatprep.mubr.f32.mxu1 %v32099_v2  ;;  %3063 = vmatprep.mubr.f32.mxu0 %v32099_v2  ;;  %v26061_v55 = vpop.f32.mrf.mxu1  ;;  %v26065_v17 = vand.u32 4294901760, %v2541_v50  ;;  %v26068_v54 = vsub.f32 %v2538_v48, %v26050_v7  ;;  %v26097_v41 = vsub.f32 %v25002_v13, %v26070_v28  ;;  %v3320_v24 = vand.u32 4294901760, %v26081_v60 }
 0x142   : > { %v26063_v22 = vpop.f32.mrf.mxu0  ;;  %v3314_v39 = vand.u32 4294901760, %v26073_v63  ;;  %v1552_v13 = vadd.f32 %v26007_v59, %v25975_v57  ;;  %v1554_v48 = vadd.f32 %v26016_v0, %v25981_v14  ;;  %v1730_v0 = vadd.f32 %v1729_v49, %v1638_v37 }
 0x143   : > { %2968 = vmatmul.mubr.f32.gmra.mxu1 %v25882_v5  ;;  %v1738_v4 = vpop.f32.mrf.mxu1  ;;  %3197 = vmatprep.subr.mxu0 %v26065_v17  ;;  %v26078_v23 = vsub.f32 %v2541_v50, %v26065_v17  ;;  %v32067_v29 = vand.u32 4294901760, %v26068_v54  ;;  %v3332_v14 = vand.u32 4294901760, %v26097_v41  ;;  %v3327_v49 = vsub.f32 %v26087_v15, %v3326_v45 }
 0x144   : > { %v1825_v43 = vpop.f32.mrf.mxu0  ;;  %3065 = vmatmul.mubr.f32.gmra.mxu0 %v25828_v35  ;;  %3148 = vmatprep.mubr.f32.mxu1 %v32099_v2  ;;  %v3315_v57 = vsub.f32 %v26073_v63, %v3314_v39  ;;  %v1646_v59 = vadd.f32 %v26032_v47, %v1554_v48 }
 0x145   : > { %3070 = vmatprep.mubr.f32.mxu0 %v32099_v2  ;;  %3199 = vmatpush1.msra.mxu0 %v26050_v7  ;;  %v1745_v27 = vpop.f32.mrf.mxu1  ;;  %v32068_v12 = vand.u32 4294901760, %v26078_v23  ;;  %v3309_v31 = vsub.f32 %v26068_v54, %v32067_v29  ;;  %v1636_v29 = vadd.f32 %v26009_v18, %v1545_v32  ;;  %v1826_v48 = vadd.f32 %v1825_v43, %v1730_v0 }
 0x146   : > { %v26091_v36 = vpop.f32.mrf.mxu0  ;;  %3201 = vmatprep.subr.mxu0 %v26044_v1  ;;  %v1739_v32 = vadd.f32 %v1738_v4, %v1646_v59 }
 0x147   : > { %3150 = vmatmul.mubr.f32.vlgmr.msra.gmra.mxu1 %v25825_v33  ;;  %3203 = vmatpush1.msra.mxu0 %v26052_v46  ;;  %v1747_v9 = vpop.f32.mrf.mxu1  ;;  %v3303_v26 = vsub.f32 %v26078_v23, %v32068_v12  ;;  %v1559_v12 = vadd.f32 %v26024_v3, %v25987_v30  ;;  %v3321_v30 = vsub.f32 %v26081_v60, %v3320_v24  ;;  %v3310_v47 = vand.u32 4294901760, %v3309_v31 }
 0x148   : > { %v1832_v20 = vpop.f32.mrf.mxu0  ;;  %3072 = vmatmul.mubr.f32.gmra.mxu0 %v25832_v38  ;;  %3205 = vmatprep.subr.mxu0 %v26057_v53  ;;  %v1561_v3 = vadd.f32 %v26030_v40, %v25997_v61  ;;  %v3316_v31 = vand.u32 4294901760, %v3315_v57  ;;  %v3328_v57 = vand.u32 4294901760, %v3327_v49  ;;  %v1728_v0 = vadd.f32 %v26040_v10, %v1636_v29 }
 0x149   : > { %3155 = vmatprep.mubr.f32.mxu1 %v32099_v2  ;;  %3207 = vmatpush1.msra.mxu0 %v26070_v28  ;;  %v26122_v25 = vpop.f32.mrf.mxu1  ;;  %v3304_v50 = vand.u32 4294901760, %v3303_v26  ;;  %v1652_v19 = vadd.f32 %v26038_v8, %v1559_v12  ;;  %v1644_v26 = vadd.f32 %v26026_v6, %v1552_v13  ;;  %v3333_v6 = vsub.f32 %v26097_v41, %v3332_v14 }
 0x14a   : > { %v1837_v11 = vpop.f32.mrf.mxu0  ;;  %3240 = vmatprep.mubr.f32.mxu0 %v32099_v2  ;;  %3418 = vmatprep.subr.mxu0 %v26078_v23  ;;  %v1654_v8 = vadd.f32 %v26048_v62, %v1561_v3  ;;  %v1833_v43 = vadd.f32 %v1832_v20, %v1739_v32  ;;  %v3322_v37 = vand.u32 4294901760, %v3321_v30  ;;  %v32169_v10 = vand.u32 4294901760, %v26078_v23 }
 0x14b   : > { %3157 = vmatmul.mubr.f32.gmra.mxu1 %v25828_v35  ;;  %v1913_v18 = vpop.f32.mrf.mxu1  ;;  %3305 = vmatprep.subr.mxu1 %v3304_v50  ;;  %v1746_v12 = vadd.f32 %v1745_v27, %v1652_v19  ;;  %v1737_v4 = vadd.f32 %v26061_v55, %v1644_v26  ;;  %v1824_v19 = vadd.f32 %v26063_v22, %v1728_v0 }
 0x14c   : > { %v1839_v16 = vpop.f32.mrf.mxu0  ;;  %3246 = vmatmul.mubr.f32.vlgmr.msra.gmra.mxu0 %v25913_v34  ;;  %3162 = vmatprep.mubr.f32.mxu1 %v32099_v2  ;;  %v1914_v13 = vadd.f32 %v1913_v18, %v1826_v48  ;;  %v1748_v27 = vadd.f32 %v1747_v9, %v1654_v8  ;;  %v3334_v9 = vand.u32 4294901760, %v3333_v6 }
 0x14d   : > { %3421 = vmatpush1.msra.mxu0 %v26068_v54  ;;  %3251 = vmatprep.mubr.f32.mxu0 %v32099_v2  ;;  %v1918_v61 = vpop.f32.mrf.mxu1  ;;  %v1838_v59 = vadd.f32 %v1837_v11, %v1746_v12  ;;  %v1831_v55 = vadd.f32 %v26091_v36, %v1737_v4  ;;  %v1912_v49 = vadd.f32 %v26122_v25, %v1824_v19 }
 0x14e   : > { %v26149_v40 = vpop.f32.mrf.mxu0  ;;  %3424 = vmatprep.subr.mxu0 %v26073_v63  ;;  %3311 = vmatpush1.msra.mxu1 %v3310_v47  ;;  %v1840_v30 = vadd.f32 %v1839_v16, %v1748_v27  ;;  %25005 = vtanh.f32 %v1914_v13 }
 0x14f   : > { %3427 = vmatpush1.msra.mxu0 %v26081_v60  ;;  %3164 = vmatmul.mubr.f32.gmra.mxu1 %v25832_v38  ;;  %v1920_v50 = vpop.f32.mrf.mxu1  ;;  %v1919_v47 = vadd.f32 %v1918_v61, %v1831_v55  ;;  %v32170_v61 = vand.u32 4294901760, %v26068_v54 }
 0x150   : > { %v26159_v62 = vpop.f32.mrf.mxu0  ;;  %3257 = vmatmul.mubr.f32.gmra.mxu0 %v25922_v52  ;;  %3317 = vmatprep.subr.mxu1 %v3316_v31  ;;  %v1921_v20 = vadd.f32 %v1920_v50, %v1833_v43 }
 0x151   : > { %3430 = vmatprep.subr.mxu0 %v26087_v15  ;;  %3323 = vmatpush1.msra.mxu1 %v3322_v37  ;;  %v1925_v18 = vpop.f32.mrf.mxu1 }
 0x152   : > { %v26165_v3 = vpop.f32.mrf.mxu0  ;;  %3433 = vmatpush1.msra.mxu0 %v26097_v41  ;;  %3329 = vmatprep.subr.mxu1 %v3328_v57  ;;  %v1926_v11 = vadd.f32 %v1925_v18, %v1838_v59 }
 0x153   : > { %3618 = vmatprep.subr.mxu0 %v32169_v10  ;;  %3262 = vmatprep.mubr.f32.mxu0 %v32099_v2  ;;  %v1927_v29 = vpop.f32.mrf.mxu1 }
 0x154   : > { %v26172_v36 = vpop.f32.mrf.mxu0  ;;  %3335 = vmatpush1.msra.mxu1 %v3334_v9  ;;  %3368 = vmatprep.mubr.f32.mxu1 %v32099_v2  ;;  %25007 = vtanh.f32 %v1926_v11  ;;  %v1928_v16 = vadd.f32 %v1927_v29, %v1840_v30 }
 0x155   : > { %25009 = vtanh.f32 %v1921_v20  ;;  %3268 = vmatmul.mubr.f32.gmra.mxu0 %v25940_v21  ;;  %3370 = vmatmul.mubr.f32.vlgmr.msra.gmra.mxu1 %v25825_v33  ;;  %v26180_v23 = vpop.f32.mrf.mxu1 }
 0x156   : > { %v26178_v22 = vpop.f32.mrf.mxu0  ;;  %3518 = vmatprep.subr.mxu1 %v26065_v17  ;;  %25011 = vtanh.f32 %v1928_v16  ;;  %3375 = vmatprep.mubr.f32.mxu1 %v32099_v2 }
 0x157   : > { %25013 = vtanh.f32 %v1919_v47  ;;  %3520 = vmatpush1.msra.mxu1 %v26050_v7  ;;  %3466 = vmatprep.mubr.f32.mxu0 %v32099_v2  ;;  %v26188_v26 = vpop.f32.mrf.mxu1 }
 0x158   : > { %v26186_v25 = vpop.f32.mrf.mxu0  ;;  %3522 = vmatprep.subr.mxu1 %v26044_v1  ;;  %25015 = vtanh.f32 %v1912_v49 }
 0x159   : > { %3524 = vmatpush1.msra.mxu1 %v26052_v46  ;;  %3469 = vmatmul.mubr.f32.vlgmr.msra.gmra.mxu0 %v25839_v42  ;;  %v26193_v32 = vpop.f32.mrf.mxu1 }
 0x15a   : > { %v26195_v48 = vpop.f32.mrf.mxu0  ;;  %3377 = vmatmul.mubr.f32.gmra.mxu1 %v25828_v35  ;;  %3526 = vmatprep.subr.mxu1 %v26057_v53 }
 0x15b   : > { %3622 = vmatpush1.msra.mxu0 %v32170_v61  ;;  %3528 = vmatpush1.msra.mxu1 %v26070_v28  ;;  %v26202_v8 = vpop.f32.mrf.mxu1  ;;  %v25006_v60 = vpop.eup %25005 }
 0x15c   : > { %v26204_v12 = vpop.f32.mrf.mxu0  ;;  %3626 = vmatprep.subr.mxu0 %v3314_v39  ;;  %3720 = vmatprep.subr.mxu1 %v26065_v17  ;;  %v26262_v20 = vand.u32 4294901760, %v25006_v60  ;;  %v2117_v61 = vadd.f32 %v26202_v8, %v26172_v36  ;;  %v2115_v36 = vadd.f32 %v26193_v32, %v26165_v3  ;;  %v2108_v32 = vadd.f32 %v26180_v23, %v26149_v40 }
 0x15d   : > { %3630 = vmatpush1.msra.mxu0 %v3320_v24  ;;  %3382 = vmatprep.mubr.f32.mxu1 %v32099_v2  ;;  %v26212_v31 = vpop.f32.mrf.mxu1  ;;  %v2110_v23 = vadd.f32 %v26188_v26, %v26159_v62 }
 0x15e   : > { %v26214_v54 = vpop.f32.mrf.mxu0  ;;  %3474 = vmatprep.mubr.f32.mxu0 %v32099_v2  ;;  %3634 = vmatprep.subr.mxu0 %v3326_v45  ;;  %v26292_v16 = vsub.f32 %v25006_v60, %v26262_v20  ;;  %v2122_v60 = vadd.f32 %v26212_v31, %v26178_v22 }
 0x15f   : > { %3384 = vmatmul.mubr.f32.gmra.mxu1 %v25832_v38  ;;  %3477 = vmatmul.mubr.f32.gmra.mxu0 %v25842_v44  ;;  %v26221_v63 = vpop.f32.mrf.mxu1  ;;  %v2201_v26 = vadd.f32 %v26204_v12, %v2110_v23  ;;  %v2199_v12 = vadd.f32 %v26195_v48, %v2108_v32 }
 0x160   : > { %v26223_v17 = vpop.f32.mrf.mxu0  ;;  %3638 = vmatpush1.msra.mxu0 %v3332_v14  ;;  %3482 = vmatprep.mubr.f32.mxu0 %v32099_v2  ;;  %v3941_v22 = vand.u32 4294901760, %v26292_v16  ;;  %v2124_v31 = vadd.f32 %v26221_v63, %v26186_v25 }
 0x161   : > { %v25008_v39 = vpop.eup %25007  ;;  %3561 = vmatprep.mubr.f32.mxu1 %v32099_v2  ;;  %v26231_v15 = vpop.f32.mrf.mxu1  ;;  %v2209_v8 = vadd.f32 %v26223_v17, %v2117_v61  ;;  %v2207_v17 = vadd.f32 %v26214_v54, %v2115_v36 }
 0x162   : > { %v26229_v24 = vpop.f32.mrf.mxu0  ;;  %v25010_v45 = vpop.eup %25009  ;;  %v2544_v6 = vsel %vm2530_vm3, %v25008_v39, 0 }
 0x163   : > { %v25012_v4 = vpop.eup %25011  ;;  %3485 = vmatmul.mubr.f32.gmra.mxu0 %v25853_v51  ;;  %3565 = vmatmul.mubr.f32.vlgmr.msra.gmra.mxu1 %v25862_v56  ;;  %v26238_v41 = vpop.f32.mrf.mxu1  ;;  %v26243_v37 = vand.u32 4294901760, %v2544_v6 }
 0x164   : > { %v26236_v43 = vpop.f32.mrf.mxu0  ;;  %v25014_v14 = vpop.eup %25013  ;;  %3722 = vmatpush1.msra.mxu1 %v26050_v7  ;;  %3570 = vmatprep.mubr.f32.mxu1 %v32099_v2  ;;  %v2547_v13 = vsel %vm2530_vm3, %v25012_v4, 0  ;;  %v26254_v7 = vand.u32 4294901760, %v25010_v45 }
 0x165   : > { %3724 = vmatprep.subr.mxu1 %v26044_v1  ;;  %3671 = vmatprep.mubr.f32.mxu0 %v32099_v2  ;;  %v26247_v50 = vpop.f32.mrf.mxu1  ;;  %v26251_v59 = vand.u32 4294901760, %v2547_v13  ;;  %v25016_v57 = vpop.eup %25015  ;;  %v26260_v1 = vand.u32 4294901760, %v25014_v14 }
 0x166   : > { %v26249_v27 = vpop.f32.mrf.mxu0  ;;  %3726 = vmatpush1.msra.mxu1 %v26052_v46  ;;  %v26270_v46 = vsub.f32 %v2544_v6, %v26243_v37  ;;  %v26276_v9 = vand.u32 4294901760, %v25016_v57  ;;  %v26281_v19 = vsub.f32 %v25010_v45, %v26254_v7 }
 0x167   : > { %3728 = vmatprep.subr.mxu1 %v26057_v53  ;;  %3574 = vmatmul.mubr.f32.gmra.mxu1 %v25866_v58  ;;  %v2301_v0 = vpop.f32.mrf.mxu1  ;;  %v26265_v18 = vsub.f32 %v2547_v13, %v26251_v59  ;;  %v26289_v29 = vsub.f32 %v25014_v14, %v26260_v1 }
 0x168   : > { %v26258_v55 = vpop.f32.mrf.mxu0  ;;  %3673 = vmatmul.mubr.f32.vlgmr.msra.gmra.mxu0 %v25825_v33  ;;  %3730 = vmatpush1.msra.mxu1 %v26070_v28  ;;  %v3923_v49 = vand.u32 4294901760, %v26270_v46  ;;  %v26304_v45 = vsub.f32 %v25016_v57, %v26276_v9  ;;  %v3929_v4 = vand.u32 4294901760, %v26281_v19  ;;  %v2302_v61 = vadd.f32 %v2301_v0, %v2209_v8 }
 0x169   : > { %3579 = vmatprep.mubr.f32.mxu1 %v32099_v2  ;;  %3678 = vmatprep.mubr.f32.mxu0 %v32099_v2  ;;  %v2308_v53 = vpop.f32.mrf.mxu1  ;;  %v3917_v11 = vand.u32 4294901760, %v26265_v18  ;;  %v3935_v57 = vand.u32 4294901760, %v26289_v29 }
 0x16a   : > { %v26274_v30 = vpop.f32.mrf.mxu0  ;;  %3812 = vmatprep.subr.mxu0 %v26251_v59  ;;  %v3924_v3 = vsub.f32 %v26270_v46, %v3923_v49  ;;  %v3947_v63 = vand.u32 4294901760, %v26304_v45  ;;  %v3930_v40 = vsub.f32 %v26281_v19, %v3929_v4 }
 0x16b   : > { %3583 = vmatmul.mubr.f32.gmra.mxu1 %v25882_v5  ;;  %3814 = vmatpush1.msra.mxu0 %v26243_v37  ;;  %v2310_v28 = vpop.f32.mrf.mxu1  ;;  %v3918_v10 = vsub.f32 %v26265_v18, %v3917_v11  ;;  %v3936_v36 = vsub.f32 %v26289_v29, %v3935_v57 }
 0x16c   : > { %v2395_v47 = vpop.f32.mrf.mxu0  ;;  %3680 = vmatmul.mubr.f32.gmra.mxu0 %v25828_v35  ;;  %3763 = vmatprep.mubr.f32.mxu1 %v32099_v2  ;;  %v3925_v62 = vand.u32 4294901760, %v3924_v3 }
 0x16d   : > { %3685 = vmatprep.mubr.f32.mxu0 %v32099_v2  ;;  %3816 = vmatprep.subr.mxu0 %v26254_v7  ;;  %v26301_v39 = vpop.f32.mrf.mxu1  ;;  %v3919_v6 = vand.u32 4294901760, %v3918_v10  ;;  %v2215_v10 = vadd.f32 %v26229_v24, %v2122_v60  ;;  %v2217_v24 = vadd.f32 %v26236_v43, %v2124_v31  ;;  %v2396_v54 = vadd.f32 %v2395_v47, %v2302_v61 }
 0x16e   : > { %3818 = vmatpush1.msra.mxu0 %v26260_v1  ;;  %v2400_v14 = vpop.f32.mrf.mxu0 }
 0x16f   : > { %3765 = vmatmul.mubr.f32.vlgmr.msra.gmra.mxu1 %v25825_v33  ;;  %3820 = vmatprep.subr.mxu0 %v26262_v20  ;;  %v26315_v13 = vpop.f32.mrf.mxu1  ;;  %v2309_v60 = vadd.f32 %v2308_v53, %v2215_v10  ;;  %v3942_v53 = vsub.f32 %v26292_v16, %v3941_v22  ;;  %v2311_v8 = vadd.f32 %v2310_v28, %v2217_v24  ;;  %v3937_v24 = vand.u32 4294901760, %v3936_v36 }
 0x170   : > { %3687 = vmatmul.mubr.f32.gmra.mxu0 %v25832_v38  ;;  %3770 = vmatprep.mubr.f32.mxu1 %v32099_v2  ;;  %v2402_v0 = vpop.f32.mrf.mxu0  ;;  %v3948_v10 = vsub.f32 %v26304_v45, %v3947_v63 }
 0x171   : > { %3822 = vmatpush1.msra.mxu0 %v26276_v9  ;;  %3855 = vmatprep.mubr.f32.mxu0 %v32099_v2  ;;  %v2481_v25 = vpop.f32.mrf.mxu1  ;;  %v2401_v31 = vadd.f32 %v2400_v14, %v2309_v60  ;;  %v2403_v28 = vadd.f32 %v2402_v0, %v2311_v8  ;;  %v3931_v14 = vand.u32 4294901760, %v3930_v40  ;;  %v2291_v40 = vadd.f32 %v26231_v15, %v2199_v12 }
 0x172   : > { %4033 = vmatprep.subr.mxu0 %v26265_v18  ;;  %3920 = vmatprep.subr.mxu1 %v3919_v6  ;;  %v2300_v6 = vadd.f32 %v26247_v50, %v2207_v17  ;;  %v2293_v17 = vadd.f32 %v26238_v41, %v2201_v26  ;;  %v3949_v48 = vand.u32 4294901760, %v3948_v10 }
 0x173   : > { %3772 = vmatmul.mubr.f32.gmra.mxu1 %v25828_v35  ;;  %v2483_v43 = vpop.f32.mrf.mxu1  ;;  %v2387_v41 = vadd.f32 %v26249_v27, %v2291_v40 }
 0x174   : > { %3861 = vmatmul.mubr.f32.vlgmr.msra.gmra.mxu0 %v25913_v34  ;;  %3777 = vmatprep.mubr.f32.mxu1 %v32099_v2  ;;  %v2484_v47 = vadd.f32 %v2483_v43, %v2396_v54  ;;  %v2394_v50 = vadd.f32 %v26274_v30, %v2300_v6  ;;  %v3943_v30 = vand.u32 4294901760, %v3942_v53  ;;  %v2389_v0 = vadd.f32 %v26258_v55, %v2293_v17 }
 0x175   : > { %4036 = vmatpush1.msra.mxu0 %v26270_v46  ;;  %3866 = vmatprep.mubr.f32.mxu0 %v32099_v2  ;;  %v2488_v61 = vpop.f32.mrf.mxu1  ;;  %v2475_v15 = vadd.f32 %v26301_v39, %v2387_v41 }
 0x176   : > { %4039 = vmatprep.subr.mxu0 %v26281_v19  ;;  %3926 = vmatpush1.msra.mxu1 %v3925_v62  ;;  %v2489_v3 = vadd.f32 %v2488_v61, %v2401_v31  ;;  %v2482_v23 = vadd.f32 %v2481_v25, %v2394_v50  ;;  %v2477_v32 = vadd.f32 %v26315_v13, %v2389_v0 }
 0x177   : > { %4042 = vmatpush1.msra.mxu0 %v26289_v29  ;;  %3779 = vmatmul.mubr.f32.gmra.mxu1 %v25832_v38  ;;  %v2490_v60 = vpop.f32.mrf.mxu1 }
 0x178   : > { %3872 = vmatmul.mubr.f32.gmra.mxu0 %v25922_v52  ;;  %3932 = vmatprep.subr.mxu1 %v3931_v14  ;;  %25017 = vtanh.f32 %v2489_v3  ;;  %v2491_v54 = vadd.f32 %v2490_v60, %v2403_v28 }
 0x179   : > { %4045 = vmatprep.subr.mxu0 %v26292_v16  ;;  %3938 = vmatpush1.msra.mxu1 %v3937_v24  ;;  %25019 = vtanh.f32 %v2484_v47 }
 0x17a   : > { %4048 = vmatpush1.msra.mxu0 %v26304_v45  ;;  %3944 = vmatprep.subr.mxu1 %v3943_v30  ;;  %25021 = vtanh.f32 %v2491_v54 }
 0x17b   : > { %4233 = vmatprep.subr.mxu0 %v3917_v11  ;;  %3877 = vmatprep.mubr.f32.mxu0 %v32099_v2  ;;  %25023 = vtanh.f32 %v2482_v23 }
 0x17c   : > { %3950 = vmatpush1.msra.mxu1 %v3949_v48  ;;  %3983 = vmatprep.mubr.f32.mxu1 %v32099_v2  ;;  %25025 = vtanh.f32 %v2477_v32 }
 0x17d   : > { %3883 = vmatmul.mubr.f32.gmra.mxu0 %v25940_v21  ;;  %3985 = vmatmul.mubr.f32.vlgmr.msra.gmra.mxu1 %v25825_v33  ;;  %25027 = vtanh.f32 %v2475_v15 }
 0x17e   : > { %4133 = vmatprep.subr.mxu1 %v26251_v59  ;;  %3990 = vmatprep.mubr.f32.mxu1 %v32099_v2 }
 0x17f   : > { %4135 = vmatpush1.msra.mxu1 %v26243_v37  ;;  %4081 = vmatprep.mubr.f32.mxu0 %v32099_v2 }
 0x180   : > { %4137 = vmatprep.subr.mxu1 %v26254_v7 }
 0x181   : > { %4139 = vmatpush1.msra.mxu1 %v26260_v1  ;;  %4084 = vmatmul.mubr.f32.vlgmr.msra.gmra.mxu0 %v25839_v42 }
 0x182   : > { %3992 = vmatmul.mubr.f32.gmra.mxu1 %v25828_v35  ;;  %4141 = vmatprep.subr.mxu1 %v26262_v20 }
 0x183   : > { %4237 = vmatpush1.msra.mxu0 %v3923_v49  ;;  %4143 = vmatpush1.msra.mxu1 %v26276_v9 }
 0x184   : > { %4241 = vmatprep.subr.mxu0 %v3929_v4  ;;  %4335 = vmatprep.subr.mxu1 %v26251_v59 }
 0x185   : > { %v25018_v27 = vpop.eup %25017  ;;  %4245 = vmatpush1.msra.mxu0 %v3935_v57  ;;  %3997 = vmatprep.mubr.f32.mxu1 %v32099_v2 }
 0x186   : > { %v25020_v55 = vpop.eup %25019  ;;  %4089 = vmatprep.mubr.f32.mxu0 %v32099_v2  ;;  %4249 = vmatprep.subr.mxu0 %v3941_v22  ;;  %v2550_v18 = vsel %vm2530_vm3, %v25018_v27, 0 }
 0x187   : > { %v25022_v46 = vpop.eup %25021  ;;  %3999 = vmatmul.mubr.f32.gmra.mxu1 %v25832_v38  ;;  %4092 = vmatmul.mubr.f32.gmra.mxu0 %v25842_v44  ;;  %v26404_v11 = vand.u32 4294901760, %v2550_v18  ;;  %v26409_v16 = vand.u32 4294901760, %v25020_v55 }
 0x188   : > { %4253 = vmatpush1.msra.mxu0 %v3947_v63  ;;  %4097 = vmatprep.mubr.f32.mxu0 %v32099_v2  ;;  %v2553_v59 = vsel %vm2530_vm3, %v25022_v46, 0  ;;  %v25024_v19 = vpop.eup %25023 }
 0x189   : > { %4176 = vmatprep.mubr.f32.mxu1 %v32099_v2  ;;  %v26407_v29 = vand.u32 4294901760, %v2553_v59  ;;  %v25026_v39 = vpop.eup %25025  ;;  %v26418_v45 = vand.u32 4294901760, %v25024_v19  ;;  %v26421_v4 = vsub.f32 %v2550_v18, %v26404_v11  ;;  %v26427_v57 = vsub.f32 %v25020_v55, %v26409_v16 }
 0x18a   : > { %v25028_v22 = vpop.eup %25027 }
 0x18b   : > { %4100 = vmatmul.mubr.f32.gmra.mxu0 %v25853_v51  ;;  %4180 = vmatmul.mubr.f32.vlgmr.msra.gmra.mxu1 %v25862_v56  ;;  %v26414_v49 = vsub.f32 %v2553_v59, %v26407_v29  ;;  %v4538_v25 = vand.u32 4294901760, %v26421_v4  ;;  %v26440_v63 = vsub.f32 %v25024_v19, %v26418_v45 }
 0x18c   : > { %4337 = vmatpush1.msra.mxu1 %v26243_v37  ;;  %4185 = vmatprep.mubr.f32.mxu1 %v32099_v2  ;;  %v26433_v37 = vand.u32 4294901760, %v25026_v39 }
 0x18d   : > { %4339 = vmatprep.subr.mxu1 %v26254_v7  ;;  %4286 = vmatprep.mubr.f32.mxu0 %v32099_v2  ;;  %v4532_v13 = vand.u32 4294901760, %v26414_v49  ;;  %v4539_v43 = vsub.f32 %v26421_v4, %v4538_v25  ;;  %v4550_v53 = vand.u32 4294901760, %v26440_v63 }
 0x18e   : > { %4341 = vmatpush1.msra.mxu1 %v26260_v1  ;;  %4427 = vmatprep.subr.mxu0 %v26407_v29  ;;  %v26444_v1 = vand.u32 4294901760, %v25028_v22 }
 0x18f   : > { %4343 = vmatprep.subr.mxu1 %v26262_v20  ;;  %4189 = vmatmul.mubr.f32.gmra.mxu1 %v25866_v58  ;;  %v4533_v7 = vsub.f32 %v26414_v49, %v4532_v13  ;;  %v4544_v20 = vand.u32 4294901760, %v26427_v57  ;;  %v4540_v62 = vand.u32 4294901760, %v4539_v43  ;;  %v4551_v26 = vsub.f32 %v26440_v63, %v4550_v53 }
 0x190   : > { %4288 = vmatmul.mubr.f32.vlgmr.msra.gmra.mxu0 %v25825_v33  ;;  %4345 = vmatpush1.msra.mxu1 %v26276_v9  ;;  %v26451_v9 = vsub.f32 %v25026_v39, %v26433_v37  ;;  %v4561_v8 = vsub.f32 %v25028_v22, %v26444_v1 }
 0x191   : > { %4194 = vmatprep.mubr.f32.mxu1 %v32099_v2  ;;  %4293 = vmatprep.mubr.f32.mxu0 %v32099_v2  ;;  %v4534_v36 = vand.u32 4294901760, %v4533_v7  ;;  %v4545_v6 = vsub.f32 %v26427_v57, %v4544_v20  ;;  %v4552_v50 = vand.u32 4294901760, %v4551_v26 }
 0x192   : > { %4429 = vmatpush1.msra.mxu0 %v26404_v11  ;;  %v4556_v31 = vand.u32 4294901760, %v26451_v9  ;;  %v4562_v10 = vand.u32 4294901760, %v4561_v8 }
 0x193   : > { %4198 = vmatmul.mubr.f32.gmra.mxu1 %v25882_v5  ;;  %4431 = vmatprep.subr.mxu0 %v26409_v16  ;;  %v4546_v47 = vand.u32 4294901760, %v4545_v6 }
 0x194   : > { %4295 = vmatmul.mubr.f32.gmra.mxu0 %v25828_v35  ;;  %4378 = vmatprep.mubr.f32.mxu1 %v32099_v2  ;;  %v4557_v61 = vsub.f32 %v26451_v9, %v4556_v31  ;;  %v4563_v28 = vsub.f32 %v4561_v8, %v4562_v10 }
 0x195   : > { %4300 = vmatprep.mubr.f32.mxu0 %v32099_v2  ;;  %4433 = vmatpush1.msra.mxu0 %v26418_v45 }
 0x196   : > { %4435 = vmatprep.subr.mxu0 %v26433_v37  ;;  %4535 = vmatprep.subr.mxu1 %v4534_v36  ;;  %v4558_v14 = vand.u32 4294901760, %v4557_v61 }
 0x197   : > { %4380 = vmatmul.mubr.f32.vlgmr.msra.gmra.mxu1 %v25825_v33  ;;  %4437 = vmatpush1.msra.mxu0 %v26444_v1 }
 0x198   : > { %4302 = vmatmul.mubr.f32.gmra.mxu0 %v25832_v38  ;;  %4385 = vmatprep.mubr.f32.mxu1 %v32099_v2 }
 0x199   : > { %4470 = vmatprep.mubr.f32.mxu0 %v32099_v2  ;;  %4648 = vmatprep.subr.mxu0 %v26414_v49 }
 0x19a   : > { %4541 = vmatpush1.msra.mxu1 %v4540_v62 }
 0x19b   : > { %4387 = vmatmul.mubr.f32.gmra.mxu1 %v25828_v35  ;;  %4547 = vmatprep.subr.mxu1 %v4546_v47 }
 0x19c   : > { %4476 = vmatmul.mubr.f32.vlgmr.msra.gmra.mxu0 %v25913_v34  ;;  %4392 = vmatprep.mubr.f32.mxu1 %v32099_v2  ;;  %v4564_v34 = vand.u32 4294901760, %v4563_v28 }
 0x19d   : > { %4651 = vmatpush1.msra.mxu0 %v26421_v4  ;;  %4481 = vmatprep.mubr.f32.mxu0 %v32099_v2 }
 0x19e   : > { %4654 = vmatprep.subr.mxu0 %v26427_v57  ;;  %4553 = vmatpush1.msra.mxu1 %v4552_v50 }
 0x19f   : > { %4657 = vmatpush1.msra.mxu0 %v26440_v63  ;;  %4394 = vmatmul.mubr.f32.gmra.mxu1 %v25832_v38 }
 0x1a0   : > { %4487 = vmatmul.mubr.f32.gmra.mxu0 %v25922_v52  ;;  %4660 = vmatprep.subr.mxu0 %v26451_v9 }
 0x1a1   : > { %4663 = vmatpush1.msra.mxu0 %v4561_v8  ;;  %4559 = vmatprep.subr.mxu1 %v4558_v14 }
 0x1a2   : > { %4848 = vmatprep.subr.mxu0 %v4532_v13  ;;  %4492 = vmatprep.mubr.f32.mxu0 %v32099_v2 }
 0x1a3   : > { %4565 = vmatpush1.msra.mxu1 %v4564_v34  ;;  %4598 = vmatprep.mubr.f32.mxu1 %v32099_v2 }
 0x1a4   : > { %4498 = vmatmul.mubr.f32.gmra.mxu0 %v25940_v21  ;;  %4600 = vmatmul.mubr.f32.vlgmr.msra.gmra.mxu1 %v25825_v33 }
 0x1a5   : > { %4748 = vmatprep.subr.mxu1 %v26407_v29  ;;  %4605 = vmatprep.mubr.f32.mxu1 %v32099_v2 }
 0x1a6   : > { %4750 = vmatpush1.msra.mxu1 %v26404_v11  ;;  %4696 = vmatprep.mubr.f32.mxu0 %v32099_v2 }
 0x1a7   : > { %4752 = vmatprep.subr.mxu1 %v26409_v16 }
 0x1a8   : > { %4754 = vmatpush1.msra.mxu1 %v26418_v45  ;;  %4699 = vmatmul.mubr.f32.vlgmr.msra.gmra.mxu0 %v25839_v42 }
 0x1a9   : > { %4607 = vmatmul.mubr.f32.gmra.mxu1 %v25828_v35  ;;  %4756 = vmatprep.subr.mxu1 %v26433_v37 }
 0x1aa   : > { %4852 = vmatpush1.msra.mxu0 %v4538_v25  ;;  %4758 = vmatpush1.msra.mxu1 %v26444_v1 }
 0x1ab   : > { %4856 = vmatprep.subr.mxu0 %v4544_v20  ;;  %4950 = vmatprep.subr.mxu1 %v26407_v29 }
 0x1ac   : > { %4860 = vmatpush1.msra.mxu0 %v4550_v53  ;;  %4612 = vmatprep.mubr.f32.mxu1 %v32099_v2 }
 0x1ad   : > { %4704 = vmatprep.mubr.f32.mxu0 %v32099_v2  ;;  %4864 = vmatprep.subr.mxu0 %v4556_v31 }
 0x1ae   : > { %4614 = vmatmul.mubr.f32.gmra.mxu1 %v25832_v38  ;;  %4707 = vmatmul.mubr.f32.gmra.mxu0 %v25842_v44 }
 0x1af   : > { %4868 = vmatpush1.msra.mxu0 %v4562_v10  ;;  %4712 = vmatprep.mubr.f32.mxu0 %v32099_v2 }
 0x1b0   : > { %4791 = vmatprep.mubr.f32.mxu1 %v32099_v2 }
 0x1b2   : > { %4715 = vmatmul.mubr.f32.gmra.mxu0 %v25853_v51  ;;  %4795 = vmatmul.mubr.f32.vlgmr.msra.gmra.mxu1 %v25862_v56 }
 0x1b3   : > { %4952 = vmatpush1.msra.mxu1 %v26404_v11  ;;  %4800 = vmatprep.mubr.f32.mxu1 %v32099_v2 }
 0x1b4   : > { %4954 = vmatprep.subr.mxu1 %v26409_v16  ;;  %4901 = vmatprep.mubr.f32.mxu0 %v32099_v2 }
 0x1b5   : > { %4956 = vmatpush1.msra.mxu1 %v26418_v45 }
 0x1b6   : > { %4958 = vmatprep.subr.mxu1 %v26433_v37  ;;  %4804 = vmatmul.mubr.f32.gmra.mxu1 %v25866_v58 }
 0x1b7   : > { %4903 = vmatmul.mubr.f32.vlgmr.msra.gmra.mxu0 %v25825_v33  ;;  %4960 = vmatpush1.msra.mxu1 %v26444_v1 }
 0x1b8   : > { %4809 = vmatprep.mubr.f32.mxu1 %v32099_v2  ;;  %4908 = vmatprep.mubr.f32.mxu0 %v32099_v2 }
 0x1ba   : > { %4813 = vmatmul.mubr.f32.gmra.mxu1 %v25882_v5 }
 0x1bb   : > { %4910 = vmatmul.mubr.f32.gmra.mxu0 %v25828_v35  ;;  %4993 = vmatprep.mubr.f32.mxu1 %v32099_v2 }
 0x1bc   : > { %4915 = vmatprep.mubr.f32.mxu0 %v32099_v2 }
 0x1be   : > { %4995 = vmatmul.mubr.f32.vlgmr.msra.gmra.mxu1 %v25825_v33 }
 0x1bf   : > { %4917 = vmatmul.mubr.f32.gmra.mxu0 %v25832_v38  ;;  %5000 = vmatprep.mubr.f32.mxu1 %v32099_v2 }
 0x1c0   : > { %5146 = vmatprep.mubr.f32.mxu0 %v32099_v2 }
 0x1c2   : > { %5002 = vmatmul.mubr.f32.gmra.mxu1 %v25828_v35 }
 0x1c3   : > { %5007 = vmatprep.mubr.f32.mxu1 %v32099_v2 }
 0x1c6   : > { %5009 = vmatmul.mubr.f32.gmra.mxu1 %v25832_v38 }
 0x1c7   : > { %5274 = vmatprep.mubr.f32.mxu1 %v32099_v2 }
 0x1e5   : > { %v2632_v42 = vpop.f32.mrf.mxu0 }
 0x1e7   : > { %v2634_v44 = vpop.f32.mrf.mxu0 }
 0x1e9   : > { %v2643_v51 = vpop.f32.mrf.mxu0 }
 0x1eb   : > { %v2645_v56 = vpop.f32.mrf.mxu0 }
 0x1ed   : > { %v2654_v58 = vpop.f32.mrf.mxu0 }
 0x1ee   : > { %v2756_v33 = vpop.f32.mrf.mxu1 }
 0x1ef   : > { %v2656_v5 = vpop.f32.mrf.mxu0  ;;  %v2757_v46 = vadd.f32 %v2756_v33, %v2632_v42 }
 0x1f0   : > { %v2758_v52 = vpop.f32.mrf.mxu1 }
 0x1f1   : > { %v2855_v21 = vpop.f32.mrf.mxu0  ;;  %v2759_v15 = vadd.f32 %v2758_v52, %v2634_v44 }
 0x1f2   : > { %v2763_v3 = vpop.f32.mrf.mxu1  ;;  %v2856_v49 = vadd.f32 %v2855_v21, %v2757_v46 }
 0x1f3   : > { %v2857_v12 = vpop.f32.mrf.mxu0  ;;  %v2764_v55 = vadd.f32 %v2763_v3, %v2643_v51  ;;  %v24910_v3 = vld [vmem:[%s32060_s2 + $0x20] sm:$0xff] }
 0x1f4   : > { %v2765_v17 = vpop.f32.mrf.mxu1  ;;  %v2858_v59 = vadd.f32 %v2857_v12, %v2759_v15 }
 0x1f5   : > { %v2766_v19 = vadd.f32 %v2765_v17, %v2645_v56 }
 0x1f7   : > { %v2770_v24 = vpop.f32.mrf.mxu1  ;;  %v2863_v35 = vpop.f32.mrf.mxu0 }
 0x1f8   : > { %v2864_v29 = vadd.f32 %v2863_v35, %v2764_v55  ;;  %v2771_v4 = vadd.f32 %v2770_v24, %v2654_v58  ;;  %v24909_v58 = vld [vmem:[%s32060_s2 + $0x18] sm:$0xff] }
 0x1f9   : > { %v2772_v60 = vpop.f32.mrf.mxu1  ;;  %v2865_v23 = vpop.f32.mrf.mxu0  ;;  %v5044_v21 = vsel %vm2520_vm2, %v24909_v58, 0 }
 0x1fa   : > { %v2866_v13 = vadd.f32 %v2865_v23, %v2766_v19  ;;  %v2773_v63 = vadd.f32 %v2772_v60, %v2656_v5  ;;  %v26554_v24 = vand.u32 4294901760, %v5044_v21  ;;  %v5047_v23 = vsel %vm2520_vm2, %v24910_v3, 0 }
 0x1fb   : > { %v2871_v30 = vpop.f32.mrf.mxu0  ;;  %v2951_v38 = vpop.f32.mrf.mxu1 }
 0x1fc   : > { %v2952_v37 = vadd.f32 %v2951_v38, %v2856_v49  ;;  %v2872_v1 = vadd.f32 %v2871_v30, %v2771_v4  ;;  %v24911_v38 = vld [vmem:[%s32060_s2 + $0x28] sm:$0x1f] }
 0x1fd   : > { %v2873_v54 = vpop.f32.mrf.mxu0  ;;  %v2953_v40 = vpop.f32.mrf.mxu1 }
 0x1fe   : > { %v2954_v39 = vadd.f32 %v2953_v40, %v2858_v59  ;;  %v2874_v8 = vadd.f32 %v2873_v54, %v2773_v63  ;;  %v26569_v40 = vsub.f32 %v5044_v21, %v26554_v24 }
 0x1ff   : > { %v2960_v0 = vpop.f32.mrf.mxu1 }
 0x200   : > { %v3059_v48 = vpop.f32.mrf.mxu0  ;;  %v2961_v57 = vadd.f32 %v2960_v0, %v2864_v29  ;;  %v26571_v0 = vand.u32 4294901760, %v5047_v23 }
 0x201   : > { %v2962_v41 = vpop.f32.mrf.mxu1  ;;  %v3060_v43 = vadd.f32 %v3059_v48, %v2952_v37 }
 0x202   : > { %v3061_v32 = vpop.f32.mrf.mxu0  ;;  %v2963_v20 = vadd.f32 %v2962_v41, %v2866_v13  ;;  %v26586_v19 = vsub.f32 %v5047_v23, %v26571_v0 }
 0x203   : > { %v2969_v27 = vpop.f32.mrf.mxu1  ;;  %v3062_v7 = vadd.f32 %v3061_v32, %v2954_v39 }
 0x204   : > { %v3066_v18 = vpop.f32.mrf.mxu0  ;;  %v2970_v31 = vadd.f32 %v2969_v27, %v2872_v1  ;;  %v5050_v27 = vsel %vm2520_vm2, %v24911_v38, 0 }
 0x205   : > { %v2971_v11 = vpop.f32.mrf.mxu1  ;;  %v3067_v36 = vadd.f32 %v3066_v18, %v2961_v57 }
 0x206   : > { %v3068_v16 = vpop.f32.mrf.mxu0  ;;  %v2972_v50 = vadd.f32 %v2971_v11, %v2874_v8  ;;  %v26583_v11 = vand.u32 4294901760, %v26569_v40 }
 0x207   : > { %v3151_v45 = vpop.f32.mrf.mxu1  ;;  %v3069_v62 = vadd.f32 %v3068_v16, %v2963_v20 }
 0x208   : > { %v3073_v22 = vpop.f32.mrf.mxu0  ;;  %v3152_v10 = vadd.f32 %v3151_v45, %v3060_v43  ;;  %v26594_v45 = vand.u32 4294901760, %v5050_v27  ;;  %v5150_v1 = vsub.f32 %v26569_v40, %v26583_v11 }
 0x209   : > { %v3153_v25 = vpop.f32.mrf.mxu1  ;;  %v3074_v28 = vadd.f32 %v3073_v22, %v2970_v31 }
 0x20a   : > { %v3075_v9 = vpop.f32.mrf.mxu0  ;;  %v3154_v53 = vadd.f32 %v3153_v25, %v3062_v7  ;;  %v26630_v31 = vsub.f32 %v5050_v27, %v26594_v45 }
 0x20b   : > { %v3158_v6 = vpop.f32.mrf.mxu1  ;;  %v3076_v44 = vadd.f32 %v3075_v9, %v2972_v50 }
 0x20c   : > { %v3159_v26 = vadd.f32 %v3158_v6, %v3067_v36  ;;  %v26535_v47 = vpop.f32.mrf.mxu0  ;;  %v26615_v36 = vand.u32 4294901760, %v26586_v19 }
 0x20d   : > { %v3160_v61 = vpop.f32.mrf.mxu1 }
 0x20e   : > { %25029 = vtanh.f32 %v3159_v26  ;;  %v3161_v14 = vadd.f32 %v3160_v61, %v3069_v62  ;;  %v26537_v34 = vpop.f32.mrf.mxu0  ;;  %v5161_v58 = vsub.f32 %v26586_v19, %v26615_v36 }
 0x20f   : > { %25031 = vtanh.f32 %v3154_v53  ;;  %v3165_v42 = vpop.f32.mrf.mxu1 }
 0x210   : > { %25033 = vtanh.f32 %v3161_v14  ;;  %v3166_v51 = vadd.f32 %v3165_v42, %v3074_v28  ;;  %v26539_v56 = vpop.f32.mrf.mxu0  ;;  %v26644_v14 = vand.u32 4294901760, %v5150_v1 }
 0x211   : > { %25035 = vtanh.f32 %v3152_v10  ;;  %v3167_v33 = vpop.f32.mrf.mxu1 }
 0x212   : > { %25037 = vtanh.f32 %v3166_v51  ;;  %v3168_v5 = vadd.f32 %v3167_v33, %v3076_v44  ;;  %v26544_v52 = vpop.f32.mrf.mxu0 }
 0x214   : > { %25039 = vtanh.f32 %v3168_v5  ;;  %v26653_v5 = vand.u32 4294901760, %v26630_v31 }
 0x215   : > { %v26550_v12 = vpop.f32.mrf.mxu0  ;;  %v26552_v17 = vpop.f32.mrf.mxu1 }
 0x217   : > { %v26556_v35 = vpop.f32.mrf.mxu0  ;;  %v26558_v60 = vpop.f32.mrf.mxu1 }
 0x218   : > { %v3374_v27 = vadd.f32 %v26558_v60, %v26537_v34  ;;  %v5172_v34 = vsub.f32 %v26630_v31, %v26653_v5 }
 0x219   : > { %v26561_v30 = vpop.f32.mrf.mxu0 }
 0x21a   : > { %v26566_v54 = vpop.f32.mrf.mxu1 }
 0x21b   : > { %v25030_v48 = vpop.eup %25029  ;;  %v26573_v41 = vpop.f32.mrf.mxu0  ;;  %v3379_v60 = vadd.f32 %v26566_v54, %v26539_v56 }
 0x21c   : > { %v25032_v32 = vpop.eup %25031  ;;  %v26575_v15 = vpop.f32.mrf.mxu1  ;;  %v26580_v59 = vand.u32 4294901760, %v25030_v48  ;;  %v3473_v1 = vadd.f32 %v26573_v41, %v3374_v27 }
 0x21d   : > { %v25034_v55 = vpop.eup %25033  ;;  %v26592_v39 = vand.u32 4294901760, %v25032_v32  ;;  %v3381_v54 = vadd.f32 %v26575_v15, %v26544_v52 }
 0x21e   : > { %v25036_v18 = vpop.eup %25035  ;;  %v26578_v46 = vand.u32 4294901760, %v25034_v55  ;;  %v26612_v20 = vsub.f32 %v25030_v48, %v26580_v59 }
 0x21f   : > { %v25038_v29 = vpop.eup %25037  ;;  %v26588_v16 = vpop.f32.mrf.mxu1  ;;  %v26603_v7 = vand.u32 4294901760, %v25036_v18  ;;  %v26627_v8 = vsub.f32 %v25032_v32, %v26592_v39 }
 0x220   : > { %v26590_v49 = vpop.f32.mrf.mxu0  ;;  %v5053_v4 = vsel %vm2530_vm3, %v25038_v29, 0  ;;  %v26606_v25 = vsub.f32 %v25034_v55, %v26578_v46  ;;  %v32069_v42 = vand.u32 4294901760, %v26612_v20 }
 0x221   : > { %v25040_v13 = vpop.eup %25039  ;;  %v26597_v57 = vpop.f32.mrf.mxu1  ;;  %v26601_v37 = vand.u32 4294901760, %v5053_v4  ;;  %v26641_v28 = vsub.f32 %v25036_v18, %v26603_v7  ;;  %v32071_v33 = vand.u32 4294901760, %v26627_v8  ;;  %v3479_v41 = vadd.f32 %v26590_v49, %v3379_v60 }
 0x222   : > { %v26599_v22 = vpop.f32.mrf.mxu0  ;;  %v5056_v63 = vsel %vm2530_vm3, %v25040_v13, 0  ;;  %v32070_v50 = vand.u32 4294901760, %v26606_v25  ;;  %v5227_v18 = vsub.f32 %v26612_v20, %v32069_v42  ;;  %v26677_v13 = vand.u32 4294901760, %v5161_v58 }
 0x223   : > { %v26619_v43 = vpop.f32.mrf.mxu1  ;;  %v26621_v53 = vand.u32 4294901760, %v5056_v63  ;;  %v26624_v6 = vsub.f32 %v5053_v4, %v26601_v37  ;;  %v32073_v32 = vand.u32 4294901760, %v26641_v28  ;;  %v3372_v58 = vadd.f32 %v26552_v17, %v26535_v47 }
 0x224   : > { %v26617_v9 = vpop.f32.mrf.mxu0  ;;  %v5221_v48 = vsub.f32 %v26606_v25, %v32070_v50  ;;  %v5228_v47 = vand.u32 4294901760, %v5227_v18  ;;  %v3481_v52 = vadd.f32 %v26599_v22, %v3381_v54 }
 0x225   : > { %v3568_v26 = vpop.f32.mrf.mxu1  ;;  %5103 = vmatprep.subr.mxu0 %v26621_v53  ;;  %v26636_v10 = vsub.f32 %v5056_v63, %v26621_v53  ;;  %v32072_v61 = vand.u32 4294901760, %v26624_v6  ;;  %v5233_v63 = vsub.f32 %v26627_v8, %v32071_v33  ;;  %v5239_v56 = vsub.f32 %v26641_v28, %v32073_v32 }
 0x226   : > { %v26632_v62 = vpop.f32.mrf.mxu0  ;;  %5105 = vmatpush1.msra.mxu0 %v26601_v37  ;;  %v5222_v33 = vand.u32 4294901760, %v5221_v48  ;;  %v3569_v27 = vadd.f32 %v3568_v26, %v3473_v1  ;;  %v3471_v17 = vadd.f32 %v26561_v30, %v3372_v58  ;;  %v26703_v32 = vand.u32 4294901760, %v5172_v34 }
 0x227   : > { %v3575_v44 = vpop.f32.mrf.mxu1  ;;  %5107 = vmatprep.subr.mxu0 %v26578_v46  ;;  %v5208_v51 = vand.u32 4294901760, %v26636_v10  ;;  %v5215_v3 = vsub.f32 %v26624_v6, %v32072_v61  ;;  %v3388_v30 = vadd.f32 %v26597_v57, %v26556_v35 }
 0x228   : > { %v26655_v21 = vpop.f32.mrf.mxu0  ;;  %5109 = vmatpush1.msra.mxu0 %v26580_v59  ;;  %v3576_v15 = vadd.f32 %v3575_v44, %v3479_v41 }
 0x229   : > { %v3577_v23 = vpop.f32.mrf.mxu1  ;;  %5111 = vmatprep.subr.mxu0 %v26592_v39  ;;  %v5209_v38 = vsub.f32 %v26636_v10, %v5208_v51  ;;  %v3489_v35 = vadd.f32 %v26632_v62, %v3388_v30 }
 0x22a   : > { %v3676_v55 = vpop.f32.mrf.mxu0  ;;  %5113 = vmatpush1.msra.mxu0 %v26603_v7 }
 0x22b   : > { %v3584_v29 = vpop.f32.mrf.mxu1  ;;  %5152 = vmatmul.mubr.f32.vlgmr.msra.gmra.mxu0 %v26644_v14  ;;  %5324 = vmatprep.subr.mxu0 %v26636_v10  ;;  %v5210_v4 = vand.u32 4294901760, %v5209_v38  ;;  %v5216_v38 = vand.u32 4294901760, %v5215_v3  ;;  %v3386_v3 = vadd.f32 %v26588_v16, %v26550_v12  ;;  %v3677_v49 = vadd.f32 %v3676_v55, %v3569_v27 }
 0x22c   : > { %v3681_v42 = vpop.f32.mrf.mxu0  ;;  %5327 = vmatpush1.msra.mxu0 %v26624_v6  ;;  %5157 = vmatprep.mubr.f32.mxu0 %v32099_v2  ;;  %v3567_v16 = vadd.f32 %v26619_v43, %v3471_v17  ;;  %v32172_v27 = vand.u32 4294901760, %v26606_v25 }
 0x22d   : > { %v3586_v50 = vpop.f32.mrf.mxu1  ;;  %5211 = vmatprep.subr.mxu1 %v5210_v4  ;;  %5330 = vmatprep.subr.mxu0 %v26606_v25  ;;  %v5234_v4 = vand.u32 4294901760, %v5233_v63  ;;  %v3487_v12 = vadd.f32 %v26617_v9, %v3386_v3  ;;  %v3578_v63 = vadd.f32 %v3577_v23, %v3481_v52  ;;  %v3682_v22 = vadd.f32 %v3681_v42, %v3576_v15 }
 0x22e   : > { %v3683_v61 = vpop.f32.mrf.mxu0  ;;  %5217 = vmatpush1.msra.mxu1 %v5216_v38  ;;  %5333 = vmatpush1.msra.mxu0 %v26612_v20  ;;  %v3675_v57 = vadd.f32 %v26655_v21, %v3567_v16  ;;  %v3587_v62 = vadd.f32 %v3586_v50, %v3489_v35  ;;  %v32175_v25 = vand.u32 4294901760, %v26641_v28 }
 0x22f   : > { %v3766_v48 = vpop.f32.mrf.mxu1  ;;  %5163 = vmatmul.mubr.f32.gmra.mxu0 %v26677_v13  ;;  %5223 = vmatprep.subr.mxu1 %v5222_v33  ;;  %v5240_v33 = vand.u32 4294901760, %v5239_v56  ;;  %v3585_v43 = vadd.f32 %v3584_v29, %v3487_v12  ;;  %v3684_v34 = vadd.f32 %v3683_v61, %v3578_v63  ;;  %v32171_v56 = vand.u32 4294901760, %v26624_v6 }
 0x230   : > { %v3688_v26 = vpop.f32.mrf.mxu0  ;;  %5336 = vmatprep.subr.mxu0 %v26627_v8  ;;  %5229 = vmatpush1.msra.mxu1 %v5228_v47  ;;  %v3767_v10 = vadd.f32 %v3766_v48, %v3675_v57  ;;  %v32173_v47 = vand.u32 4294901760, %v26612_v20  ;;  %v32174_v6 = vand.u32 4294901760, %v26627_v8 }
 0x231   : > { %v3768_v18 = vpop.f32.mrf.mxu1  ;;  %5339 = vmatpush1.msra.mxu0 %v26641_v28  ;;  %5235 = vmatprep.subr.mxu1 %v5234_v4 }
 0x232   : > { %v3690_v44 = vpop.f32.mrf.mxu0  ;;  %v3769_v55 = vadd.f32 %v3768_v18, %v3677_v49  ;;  %5524 = vmatprep.subr.mxu0 %v5208_v51  ;;  %5168 = vmatprep.mubr.f32.mxu0 %v32099_v2  ;;  %v3689_v51 = vadd.f32 %v3688_v26, %v3585_v43 }
 0x233   : > { %v3773_v9 = vpop.f32.mrf.mxu1  ;;  %5241 = vmatpush1.msra.mxu1 %v5240_v33  ;;  %5174 = vmatmul.mubr.f32.gmra.mxu0 %v26703_v32  ;;  %v3691_v29 = vadd.f32 %v3690_v44, %v3587_v62 }
 0x234   : > { %v3774_v60 = vadd.f32 %v3773_v9, %v3682_v22  ;;  %v26718_v23 = vpop.f32.mrf.mxu0  ;;  %5276 = vmatmul.mubr.f32.vlgmr.msra.gmra.mxu1 %v26554_v24  ;;  %5424 = vmatprep.subr.mxu1 %v26621_v53  ;;  %25041 = vtanh.f32 %v3769_v55 }
 0x235   : > { %v3775_v42 = vpop.f32.mrf.mxu1  ;;  %5426 = vmatpush1.msra.mxu1 %v26601_v37  ;;  %5281 = vmatprep.mubr.f32.mxu1 %v32099_v2 }
 0x236   : > { %v3776_v21 = vadd.f32 %v3775_v42, %v3684_v34  ;;  %v26724_v1 = vpop.f32.mrf.mxu0  ;;  %5428 = vmatprep.subr.mxu1 %v26578_v46  ;;  %5372 = vmatprep.mubr.f32.mxu0 %v32099_v2  ;;  %25043 = vtanh.f32 %v3774_v60 }
 0x237   : > { %v3780_v61 = vpop.f32.mrf.mxu1  ;;  %5430 = vmatpush1.msra.mxu1 %v26580_v59  ;;  %5375 = vmatmul.mubr.f32.vlgmr.msra.gmra.mxu0 %v26569_v40 }
 0x238   : > { %25045 = vtanh.f32 %v3776_v21  ;;  %v3781_v38 = vadd.f32 %v3780_v61, %v3689_v51  ;;  %v26730_v58 = vpop.f32.mrf.mxu0  ;;  %5283 = vmatmul.mubr.f32.gmra.mxu1 %v26571_v0  ;;  %5432 = vmatprep.subr.mxu1 %v26592_v39 }
 0x239   : > { %25047 = vtanh.f32 %v3767_v10  ;;  %v3782_v50 = vpop.f32.mrf.mxu1  ;;  %5528 = vmatpush1.msra.mxu0 %v32171_v56  ;;  %5434 = vmatpush1.msra.mxu1 %v26603_v7 }
 0x23a   : > { %25049 = vtanh.f32 %v3781_v38  ;;  %v3783_v54 = vadd.f32 %v3782_v50, %v3691_v29  ;;  %v26737_v41 = vpop.f32.mrf.mxu0  ;;  %5532 = vmatprep.subr.mxu0 %v32172_v27  ;;  %5626 = vmatprep.subr.mxu1 %v26621_v53 }
 0x23b   : > { %5536 = vmatpush1.msra.mxu0 %v32173_v47  ;;  %5288 = vmatprep.mubr.f32.mxu1 %v32099_v2 }
 0x23c   : > { %25051 = vtanh.f32 %v3783_v54  ;;  %5380 = vmatprep.mubr.f32.mxu0 %v32099_v2  ;;  %5540 = vmatprep.subr.mxu0 %v32174_v6 }
 0x23d   : > { %v26748_v17 = vpop.f32.mrf.mxu0  ;;  %v26750_v3 = vpop.f32.mrf.mxu1  ;;  %5290 = vmatmul.mubr.f32.gmra.mxu1 %v26594_v45  ;;  %5383 = vmatmul.mubr.f32.gmra.mxu0 %v26586_v19 }
 0x23e   : > { %5544 = vmatpush1.msra.mxu0 %v32175_v25  ;;  %5388 = vmatprep.mubr.f32.mxu0 %v32099_v2 }
 0x23f   : > { %v26757_v20 = vpop.f32.mrf.mxu0  ;;  %v26759_v53 = vpop.f32.mrf.mxu1  ;;  %5467 = vmatprep.mubr.f32.mxu1 %v32099_v2 }
 0x241   : > { %v26762_v8 = vpop.f32.mrf.mxu0  ;;  %5391 = vmatmul.mubr.f32.gmra.mxu0 %v26630_v31  ;;  %5471 = vmatmul.mubr.f32.vlgmr.msra.gmra.mxu1 %v26583_v11  ;;  %v25042_v28 = vpop.eup %25041 }
 0x242   : > { %v26766_v48 = vpop.f32.mrf.mxu1  ;;  %5628 = vmatpush1.msra.mxu1 %v26601_v37  ;;  %5476 = vmatprep.mubr.f32.mxu1 %v32099_v2  ;;  %v26792_v16 = vand.u32 4294901760, %v25042_v28 }
 0x243   : > { %v26770_v4 = vpop.f32.mrf.mxu0  ;;  %5630 = vmatprep.subr.mxu1 %v26578_v46  ;;  %5577 = vmatprep.mubr.f32.mxu0 %v32099_v2  ;;  %v25044_v52 = vpop.eup %25043 }
 0x244   : > { %v26774_v15 = vpop.f32.mrf.mxu1  ;;  %5632 = vmatpush1.msra.mxu1 %v26580_v59  ;;  %v26789_v59 = vand.u32 4294901760, %v25044_v52  ;;  %v26823_v60 = vsub.f32 %v25042_v28, %v26792_v16  ;;  %v3989_v28 = vadd.f32 %v26759_v53, %v26724_v1  ;;  %v3994_v1 = vadd.f32 %v26766_v48, %v26730_v58 }
 0x245   : > { %v25046_v49 = vpop.eup %25045  ;;  %5634 = vmatprep.subr.mxu1 %v26592_v39  ;;  %5480 = vmatmul.mubr.f32.gmra.mxu1 %v26615_v36  ;;  %v3996_v48 = vadd.f32 %v26774_v15, %v26737_v41 }
 0x246   : > { %v25048_v37 = vpop.eup %25047  ;;  %5579 = vmatmul.mubr.f32.vlgmr.msra.gmra.mxu0 %v26554_v24  ;;  %5636 = vmatpush1.msra.mxu1 %v26603_v7  ;;  %v26781_v26 = vand.u32 4294901760, %v25046_v49  ;;  %v26820_v34 = vsub.f32 %v25044_v52, %v26789_v59  ;;  %v32076_v27 = vand.u32 4294901760, %v26823_v60  ;;  %v4088_v53 = vadd.f32 %v26770_v4, %v3989_v28 }
 0x247   : > { %v25050_v46 = vpop.eup %25049  ;;  %v26783_v30 = vpop.f32.mrf.mxu1  ;;  %5485 = vmatprep.mubr.f32.mxu1 %v32099_v2  ;;  %5584 = vmatprep.mubr.f32.mxu0 %v32099_v2  ;;  %v26801_v22 = vand.u32 4294901760, %v25048_v37 }
 0x248   : > { %v26785_v12 = vpop.f32.mrf.mxu0  ;;  %v5059_v39 = vsel %vm2530_vm3, %v25050_v46, 0  ;;  %v26807_v55 = vsub.f32 %v25046_v49, %v26781_v26  ;;  %v5841_v50 = vand.u32 4294901760, %v26820_v34 }
 0x249   : > { %v25052_v18 = vpop.eup %25051  ;;  %v26794_v33 = vpop.f32.mrf.mxu1  ;;  %5489 = vmatmul.mubr.f32.gmra.mxu1 %v26653_v5  ;;  %v26799_v63 = vand.u32 4294901760, %v5059_v39  ;;  %v26834_v21 = vsub.f32 %v25048_v37, %v26801_v22  ;;  %v4094_v4 = vadd.f32 %v26785_v12, %v3994_v1 }
 0x24a   : > { %v26796_v7 = vpop.f32.mrf.mxu0  ;;  %5586 = vmatmul.mubr.f32.gmra.mxu0 %v26571_v0  ;;  %v5062_v44 = vsel %vm2530_vm3, %v25052_v18, 0  ;;  %5669 = vmatprep.mubr.f32.mxu1 %v32099_v2  ;;  %v32074_v61 = vand.u32 4294901760, %v26807_v55 }
 0x24b   : > { %v26811_v57 = vpop.f32.mrf.mxu1  ;;  %v26813_v9 = vand.u32 4294901760, %v5062_v44  ;;  %5591 = vmatprep.mubr.f32.mxu0 %v32099_v2  ;;  %v26817_v43 = vsub.f32 %v5059_v39, %v26799_v63  ;;  %v32077_v25 = vand.u32 4294901760, %v26834_v21  ;;  %v5842_v39 = vsub.f32 %v26820_v34, %v5841_v50 }
 0x24c   : > { %v26809_v35 = vpop.f32.mrf.mxu0  ;;  %v5836_v49 = vsub.f32 %v26807_v55, %v32074_v61  ;;  %v5848_v61 = vsub.f32 %v26823_v60, %v32076_v27  ;;  %v4096_v41 = vadd.f32 %v26796_v7, %v3996_v48 }
 0x24d   : > { %v4183_v42 = vpop.f32.mrf.mxu1  ;;  %5718 = vmatprep.subr.mxu0 %v26813_v9  ;;  %5671 = vmatmul.mubr.f32.vlgmr.msra.gmra.mxu1 %v26554_v24  ;;  %v26830_v62 = vsub.f32 %v5062_v44, %v26813_v9  ;;  %v32075_v51 = vand.u32 4294901760, %v26817_v43  ;;  %v5854_v58 = vsub.f32 %v26834_v21, %v32077_v25  ;;  %v5843_v25 = vand.u32 4294901760, %v5842_v39 }
 0x24e   : > { %v26825_v10 = vpop.f32.mrf.mxu0  ;;  %5720 = vmatpush1.msra.mxu0 %v26799_v63  ;;  %5676 = vmatprep.mubr.f32.mxu1 %v32099_v2  ;;  %v5837_v27 = vand.u32 4294901760, %v5836_v49  ;;  %v5849_v49 = vand.u32 4294901760, %v5848_v61 }
 0x24f   : > { %v4190_v29 = vpop.f32.mrf.mxu1  ;;  %5593 = vmatmul.mubr.f32.gmra.mxu0 %v26594_v45  ;;  %5722 = vmatprep.subr.mxu0 %v26781_v26  ;;  %v5823_v38 = vand.u32 4294901760, %v26830_v62  ;;  %v5830_v54 = vsub.f32 %v26817_v43, %v32075_v51  ;;  %v5855_v39 = vand.u32 4294901760, %v5854_v58 }
 0x250   : > { %v26843_v56 = vpop.f32.mrf.mxu0  ;;  %5724 = vmatpush1.msra.mxu0 %v26789_v59  ;;  %5761 = vmatprep.mubr.f32.mxu0 %v32099_v2  ;;  %v4191_v15 = vadd.f32 %v4190_v29, %v4094_v4 }
 0x251   : > { %v4192_v47 = vpop.f32.mrf.mxu1  ;;  %5726 = vmatprep.subr.mxu0 %v26792_v16  ;;  %5678 = vmatmul.mubr.f32.gmra.mxu1 %v26571_v0  ;;  %v5824_v6 = vsub.f32 %v26830_v62, %v5823_v38  ;;  %v5831_v44 = vand.u32 4294901760, %v5830_v54  ;;  %v4184_v54 = vadd.f32 %v4183_v42, %v4088_v53 }
 0x252   : > { %v4291_v52 = vpop.f32.mrf.mxu0  ;;  %5728 = vmatpush1.msra.mxu0 %v26801_v22  ;;  %5683 = vmatprep.mubr.f32.mxu1 %v32099_v2  ;;  %v4193_v7 = vadd.f32 %v4192_v47, %v4096_v41 }
 0x253   : > { %v4199_v37 = vpop.f32.mrf.mxu1  ;;  %5767 = vmatmul.mubr.f32.vlgmr.msra.gmra.mxu0 %v26644_v14  ;;  %5939 = vmatprep.subr.mxu0 %v26830_v62  ;;  %v5825_v46 = vand.u32 4294901760, %v5824_v6  ;;  %v3987_v6 = vadd.f32 %v26750_v3, %v26718_v23  ;;  %v4001_v3 = vadd.f32 %v26783_v30, %v26748_v17  ;;  %v4292_v12 = vadd.f32 %v4291_v52, %v4184_v54 }
 0x254   : > { %v4296_v18 = vpop.f32.mrf.mxu0  ;;  %5942 = vmatpush1.msra.mxu0 %v26817_v43  ;;  %5772 = vmatprep.mubr.f32.mxu0 %v32099_v2  ;;  %v32176_v54 = vand.u32 4294901760, %v26817_v43  ;;  %v32178_v43 = vand.u32 4294901760, %v26823_v60 }
 0x255   : > { %v4201_v51 = vpop.f32.mrf.mxu1  ;;  %5826 = vmatprep.subr.mxu1 %v5825_v46  ;;  %5945 = vmatprep.subr.mxu0 %v26807_v55  ;;  %v4086_v23 = vadd.f32 %v26762_v8, %v3987_v6  ;;  %v4003_v8 = vadd.f32 %v26794_v33, %v26757_v20  ;;  %v4102_v17 = vadd.f32 %v26809_v35, %v4001_v3 }
 0x256   : > { %v4298_v28 = vpop.f32.mrf.mxu0  ;;  %5832 = vmatpush1.msra.mxu1 %v5831_v44  ;;  %5948 = vmatpush1.msra.mxu0 %v26820_v34  ;;  %v4297_v29 = vadd.f32 %v4296_v18, %v4191_v15 }
 0x257   : > { %v4381_v46 = vpop.f32.mrf.mxu1  ;;  %5685 = vmatmul.mubr.f32.gmra.mxu1 %v26594_v45  ;;  %5778 = vmatmul.mubr.f32.gmra.mxu0 %v26677_v13  ;;  %v4182_v30 = vadd.f32 %v26811_v57, %v4086_v23  ;;  %v4104_v61 = vadd.f32 %v26825_v10, %v4003_v8  ;;  %v4200_v35 = vadd.f32 %v4199_v37, %v4102_v17 }
 0x258   : > { %v4303_v42 = vpop.f32.mrf.mxu0  ;;  %5838 = vmatprep.subr.mxu1 %v5837_v27  ;;  %5951 = vmatprep.subr.mxu0 %v26823_v60  ;;  %v4299_v57 = vadd.f32 %v4298_v28, %v4193_v7  ;;  %v32177_v28 = vand.u32 4294901760, %v26807_v55 }
 0x259   : > { %v4383_v1 = vpop.f32.mrf.mxu1  ;;  %5844 = vmatpush1.msra.mxu1 %v5843_v25  ;;  %5954 = vmatpush1.msra.mxu0 %v26834_v21  ;;  %v4290_v20 = vadd.f32 %v26843_v56, %v4182_v30  ;;  %v4202_v10 = vadd.f32 %v4201_v51, %v4104_v61 }
 0x25a   : > { %v4305_v52 = vpop.f32.mrf.mxu0  ;;  %v4384_v53 = vadd.f32 %v4383_v1, %v4292_v12  ;;  %5850 = vmatprep.subr.mxu1 %v5849_v49  ;;  %6139 = vmatprep.subr.mxu0 %v5823_v38  ;;  %v4304_v38 = vadd.f32 %v4303_v42, %v4200_v35 }
 0x25b   : > { %v4388_v33 = vpop.f32.mrf.mxu1  ;;  %5783 = vmatprep.mubr.f32.mxu0 %v32099_v2  ;;  %5856 = vmatpush1.msra.mxu1 %v5855_v39  ;;  %v4382_v47 = vadd.f32 %v4381_v46, %v4290_v20  ;;  %v4306_v44 = vadd.f32 %v4305_v52, %v4202_v10 }
 0x25c   : > { %v4389_v27 = vadd.f32 %v4388_v33, %v4297_v29  ;;  %v26904_v25 = vpop.f32.mrf.mxu0  ;;  %5889 = vmatprep.mubr.f32.mxu1 %v32099_v2  ;;  %5789 = vmatmul.mubr.f32.gmra.mxu0 %v26703_v32  ;;  %25053 = vtanh.f32 %v4384_v53 }
 0x25d   : > { %v4390_v62 = vpop.f32.mrf.mxu1  ;;  %5891 = vmatmul.mubr.f32.vlgmr.msra.gmra.mxu1 %v26554_v24  ;;  %6039 = vmatprep.subr.mxu1 %v26813_v9 }
 0x25e   : > { %v4391_v56 = vadd.f32 %v4390_v62, %v4299_v57  ;;  %v26910_v18 = vpop.f32.mrf.mxu0  ;;  %6041 = vmatpush1.msra.mxu1 %v26799_v63  ;;  %5896 = vmatprep.mubr.f32.mxu1 %v32099_v2  ;;  %25055 = vtanh.f32 %v4389_v27 }
 0x25f   : > { %v4395_v37 = vpop.f32.mrf.mxu1  ;;  %6043 = vmatprep.subr.mxu1 %v26781_v26  ;;  %5987 = vmatprep.mubr.f32.mxu0 %v32099_v2 }
 0x260   : > { %25057 = vtanh.f32 %v4391_v56  ;;  %v4396_v6 = vadd.f32 %v4395_v37, %v4304_v38  ;;  %v26916_v58 = vpop.f32.mrf.mxu0  ;;  %6045 = vmatpush1.msra.mxu1 %v26789_v59  ;;  %5990 = vmatmul.mubr.f32.vlgmr.msra.gmra.mxu0 %v26569_v40 }
 0x261   : > { %25059 = vtanh.f32 %v4382_v47  ;;  %v4397_v51 = vpop.f32.mrf.mxu1  ;;  %5898 = vmatmul.mubr.f32.gmra.mxu1 %v26571_v0  ;;  %6047 = vmatprep.subr.mxu1 %v26792_v16 }
 0x262   : > { %25061 = vtanh.f32 %v4396_v6  ;;  %v4398_v48 = vadd.f32 %v4397_v51, %v4306_v44  ;;  %v26922_v4 = vpop.f32.mrf.mxu0  ;;  %6143 = vmatpush1.msra.mxu0 %v32176_v54  ;;  %6049 = vmatpush1.msra.mxu1 %v26801_v22 }
 0x263   : > { %6147 = vmatprep.subr.mxu0 %v32177_v28  ;;  %6241 = vmatprep.subr.mxu1 %v26813_v9  ;;  %v32179_v9 = vand.u32 4294901760, %v26834_v21 }
 0x264   : > { %25063 = vtanh.f32 %v4398_v48  ;;  %v26930_v23 = vpop.f32.mrf.mxu0  ;;  %v26932_v3 = vpop.f32.mrf.mxu1  ;;  %6151 = vmatpush1.msra.mxu0 %v5841_v50  ;;  %5903 = vmatprep.mubr.f32.mxu1 %v32099_v2 }
 0x265   : > { %5995 = vmatprep.mubr.f32.mxu0 %v32099_v2  ;;  %6155 = vmatprep.subr.mxu0 %v32178_v43 }
 0x266   : > { %v26940_v46 = vpop.f32.mrf.mxu0  ;;  %v26942_v55 = vpop.f32.mrf.mxu1  ;;  %5905 = vmatmul.mubr.f32.gmra.mxu1 %v26594_v45  ;;  %5998 = vmatmul.mubr.f32.gmra.mxu0 %v26586_v19 }
 0x267   : > { %6159 = vmatpush1.msra.mxu0 %v32179_v9  ;;  %6003 = vmatprep.mubr.f32.mxu0 %v32099_v2 }
 0x268   : > { %v26949_v34 = vpop.f32.mrf.mxu0  ;;  %6082 = vmatprep.mubr.f32.mxu1 %v32099_v2 }
 0x269   : > { %v26952_v50 = vpop.f32.mrf.mxu1  ;;  %v25054_v41 = vpop.eup %25053 }
 0x26a   : > { %v26954_v60 = vpop.f32.mrf.mxu0  ;;  %6006 = vmatmul.mubr.f32.gmra.mxu0 %v26630_v31  ;;  %6086 = vmatmul.mubr.f32.vlgmr.msra.gmra.mxu1 %v26583_v11  ;;  %v26984_v1 = vand.u32 4294901760, %v25054_v41 }
 0x26b   : > { %v26958_v15 = vpop.f32.mrf.mxu1  ;;  %6243 = vmatpush1.msra.mxu1 %v26799_v63  ;;  %6091 = vmatprep.mubr.f32.mxu1 %v32099_v2  ;;  %v25056_v21 = vpop.eup %25055 }
 0x26c   : > { %6245 = vmatprep.subr.mxu1 %v26781_v26  ;;  %6192 = vmatprep.mubr.f32.mxu0 %v32099_v2  ;;  %v26975_v26 = vand.u32 4294901760, %v25056_v21  ;;  %v27013_v47 = vsub.f32 %v25054_v41, %v26984_v1  ;;  %v4604_v41 = vadd.f32 %v26942_v55, %v26910_v18  ;;  %v4609_v55 = vadd.f32 %v26952_v50, %v26916_v58 }
 0x26d   : > { %v25058_v12 = vpop.eup %25057  ;;  %6247 = vmatpush1.msra.mxu1 %v26789_v59 }
 0x26e   : > { %v25060_v42 = vpop.eup %25059  ;;  %v26965_v49 = vpop.f32.mrf.mxu1  ;;  %6249 = vmatprep.subr.mxu1 %v26792_v16  ;;  %6095 = vmatmul.mubr.f32.gmra.mxu1 %v26615_v36  ;;  %v26971_v63 = vand.u32 4294901760, %v25058_v12  ;;  %v27007_v35 = vsub.f32 %v25056_v21, %v26975_v26  ;;  %v6462_v28 = vand.u32 4294901760, %v27013_v47 }
 0x26f   : > { %v26967_v8 = vpop.f32.mrf.mxu0  ;;  %v25062_v17 = vpop.eup %25061  ;;  %6194 = vmatmul.mubr.f32.vlgmr.msra.gmra.mxu0 %v26554_v24  ;;  %6251 = vmatpush1.msra.mxu1 %v26801_v22  ;;  %v26994_v53 = vand.u32 4294901760, %v25060_v42 }
 0x270   : > { %v26977_v30 = vpop.f32.mrf.mxu1  ;;  %6100 = vmatprep.mubr.f32.mxu1 %v32099_v2  ;;  %6199 = vmatprep.mubr.f32.mxu0 %v32099_v2  ;;  %v5065_v16 = vsel %vm2530_vm3, %v25062_v17, 0  ;;  %v26997_v61 = vsub.f32 %v25058_v12, %v26971_v63  ;;  %v32080_v51 = vand.u32 4294901760, %v27007_v35  ;;  %v4709_v58 = vadd.f32 %v26967_v8, %v4609_v55 }
 0x271   : > { %v26979_v59 = vpop.f32.mrf.mxu0  ;;  %v25064_v39 = vpop.eup %25063  ;;  %v26986_v7 = vand.u32 4294901760, %v5065_v16  ;;  %v27024_v37 = vsub.f32 %v25060_v42, %v26994_v53 }
 0x272   : > { %v26990_v22 = vpop.f32.mrf.mxu1  ;;  %6104 = vmatmul.mubr.f32.gmra.mxu1 %v26653_v5  ;;  %v5068_v52 = vsel %vm2530_vm3, %v25064_v39, 0  ;;  %v32078_v56 = vand.u32 4294901760, %v26997_v61  ;;  %v6457_v18 = vsub.f32 %v27007_v35, %v32080_v51  ;;  %v4703_v39 = vadd.f32 %v26954_v60, %v4604_v41 }
 0x273   : > { %v26988_v29 = vpop.f32.mrf.mxu0  ;;  %6201 = vmatmul.mubr.f32.gmra.mxu0 %v26571_v0  ;;  %v27000_v20 = vand.u32 4294901760, %v5068_v52  ;;  %6284 = vmatprep.mubr.f32.mxu1 %v32099_v2  ;;  %v27004_v33 = vsub.f32 %v5065_v16, %v26986_v7  ;;  %v6468_v42 = vand.u32 4294901760, %v27024_v37  ;;  %v4611_v51 = vadd.f32 %v26958_v15, %v26922_v4 }
 0x274   : > { %v4798_v27 = vpop.f32.mrf.mxu1  ;;  %6206 = vmatprep.mubr.f32.mxu0 %v32099_v2  ;;  %v6451_v12 = vsub.f32 %v26997_v61, %v32078_v56 }
 0x275   : > { %v27009_v57 = vpop.f32.mrf.mxu0  ;;  %6333 = vmatprep.subr.mxu0 %v27000_v20  ;;  %v27017_v62 = vsub.f32 %v5068_v52, %v27000_v20  ;;  %v32079_v10 = vand.u32 4294901760, %v27004_v33  ;;  %v4799_v50 = vadd.f32 %v4798_v27, %v4703_v39  ;;  %v6469_v41 = vsub.f32 %v27024_v37, %v6468_v42 }
 0x276   : > { %v4805_v38 = vpop.f32.mrf.mxu1  ;;  %6335 = vmatpush1.msra.mxu0 %v26986_v7  ;;  %6286 = vmatmul.mubr.f32.vlgmr.msra.gmra.mxu1 %v26554_v24  ;;  %v4711_v4 = vadd.f32 %v26979_v59, %v4611_v51 }
 0x277   : > { %v27026_v44 = vpop.f32.mrf.mxu0  ;;  %6208 = vmatmul.mubr.f32.gmra.mxu0 %v26594_v45  ;;  %6337 = vmatprep.subr.mxu0 %v26971_v63  ;;  %v32081_v6 = vand.u32 4294901760, %v27017_v62  ;;  %v6445_v54 = vsub.f32 %v27004_v33, %v32079_v10  ;;  %v6463_v10 = vsub.f32 %v27013_v47, %v6462_v28  ;;  %v4806_v8 = vadd.f32 %v4805_v38, %v4709_v58 }
 0x278   : > { %v4807_v48 = vpop.f32.mrf.mxu1  ;;  %6339 = vmatpush1.msra.mxu0 %v26975_v26  ;;  %6291 = vmatprep.mubr.f32.mxu1 %v32099_v2 }
 0x279   : > { %v4906_v43 = vpop.f32.mrf.mxu0  ;;  %6341 = vmatprep.subr.mxu0 %v26984_v1  ;;  %6376 = vmatprep.mubr.f32.mxu0 %v32099_v2  ;;  %v6439_v9 = vsub.f32 %v27017_v62, %v32081_v6  ;;  %v6446_v56 = vand.u32 4294901760, %v6445_v54  ;;  %v6452_v54 = vand.u32 4294901760, %v6451_v12  ;;  %v4808_v59 = vadd.f32 %v4807_v48, %v4711_v4 }
 0x27a   : > { %v4814_v21 = vpop.f32.mrf.mxu1  ;;  %6343 = vmatpush1.msra.mxu0 %v26994_v53  ;;  %6293 = vmatmul.mubr.f32.gmra.mxu1 %v26571_v0  ;;  %v4907_v27 = vadd.f32 %v4906_v43, %v4799_v50  ;;  %v32181_v50 = vand.u32 4294901760, %v27004_v33 }
 0x27b   : > { %v4911_v17 = vpop.f32.mrf.mxu0  ;;  %6382 = vmatmul.mubr.f32.vlgmr.msra.gmra.mxu0 %v26644_v14  ;;  %6554 = vmatprep.subr.mxu0 %v27017_v62  ;;  %v6440_v16 = vand.u32 4294901760, %v6439_v9  ;;  %v4602_v9 = vadd.f32 %v26932_v3, %v26904_v25  ;;  %v4616_v25 = vadd.f32 %v26965_v49, %v26930_v23  ;;  %v6458_v3 = vand.u32 4294901760, %v6457_v18 }
 0x27c   : > { %v4816_v52 = vpop.f32.mrf.mxu1  ;;  %6557 = vmatpush1.msra.mxu0 %v27004_v33  ;;  %6298 = vmatprep.mubr.f32.mxu1 %v32099_v2  ;;  %v4618_v23 = vadd.f32 %v26977_v30, %v26940_v46  ;;  %v6470_v18 = vand.u32 4294901760, %v6469_v41  ;;  %v32180_v46 = vand.u32 4294901760, %v27017_v62 }
 0x27d   : > { %v4913_v6 = vpop.f32.mrf.mxu0  ;;  %6441 = vmatprep.subr.mxu1 %v6440_v16  ;;  %6560 = vmatprep.subr.mxu0 %v26997_v61  ;;  %v4701_v15 = vadd.f32 %v26949_v34, %v4602_v9  ;;  %v6464_v16 = vand.u32 4294901760, %v6463_v10  ;;  %v4717_v49 = vadd.f32 %v26988_v29, %v4616_v25  ;;  %v4912_v34 = vadd.f32 %v4911_v17, %v4806_v8 }
 0x27e   : > { %v4996_v60 = vpop.f32.mrf.mxu1  ;;  %6387 = vmatprep.mubr.f32.mxu0 %v32099_v2  ;;  %6447 = vmatpush1.msra.mxu1 %v6446_v56  ;;  %v4719_v10 = vadd.f32 %v27009_v57, %v4618_v23  ;;  %v4914_v39 = vadd.f32 %v4913_v6, %v4808_v59 }
 0x27f   : > { %6563 = vmatpush1.msra.mxu0 %v27007_v35  ;;  %6300 = vmatmul.mubr.f32.gmra.mxu1 %v26594_v45  ;;  %v4918_v56 = vpop.f32.mrf.mxu0  ;;  %v4797_v51 = vadd.f32 %v26990_v22, %v4701_v15  ;;  %v4815_v55 = vadd.f32 %v4814_v21, %v4717_v49 }
 0x280   : > { %v4998_v12 = vpop.f32.mrf.mxu1  ;;  %6393 = vmatmul.mubr.f32.gmra.mxu0 %v26677_v13  ;;  %6453 = vmatprep.subr.mxu1 %v6452_v54  ;;  %v4817_v17 = vadd.f32 %v4816_v52, %v4719_v10  ;;  %v32183_v54 = vand.u32 4294901760, %v27007_v35 }
 0x281   : > { %6566 = vmatprep.subr.mxu0 %v27013_v47  ;;  %6459 = vmatpush1.msra.mxu1 %v6458_v3  ;;  %v4999_v38 = vadd.f32 %v4998_v12, %v4907_v27  ;;  %v4905_v30 = vadd.f32 %v27026_v44, %v4797_v51  ;;  %v4920_v29 = vpop.f32.mrf.mxu0  ;;  %v4919_v9 = vadd.f32 %v4918_v56, %v4815_v55 }
 0x282   : > { %v5003_v43 = vpop.f32.mrf.mxu1  ;;  %6569 = vmatpush1.msra.mxu0 %v27024_v37  ;;  %6465 = vmatprep.subr.mxu1 %v6464_v16  ;;  %v4921_v44 = vadd.f32 %v4920_v29, %v4817_v17 }
 0x283   : > { %6754 = vmatprep.subr.mxu0 %v32180_v46  ;;  %6398 = vmatprep.mubr.f32.mxu0 %v32099_v2  ;;  %v5004_v22 = vadd.f32 %v5003_v43, %v4912_v34  ;;  %v4997_v57 = vadd.f32 %v4996_v60, %v4905_v30  ;;  %25065 = vtanh.f32 %v4999_v38  ;;  %v32182_v60 = vand.u32 4294901760, %v26997_v61 }
 0x284   : > { %v5005_v48 = vpop.f32.mrf.mxu1  ;;  %6471 = vmatpush1.msra.mxu1 %v6470_v18  ;;  %6504 = vmatprep.mubr.f32.mxu1 %v32099_v2 }
 0x285   : > { %v5006_v58 = vadd.f32 %v5005_v48, %v4914_v39  ;;  %6404 = vmatmul.mubr.f32.gmra.mxu0 %v26703_v32  ;;  %6506 = vmatmul.mubr.f32.vlgmr.msra.gmra.mxu1 %v26554_v24 }
 0x286   : > { %v5010_v62 = vpop.f32.mrf.mxu1  ;;  %6654 = vmatprep.subr.mxu1 %v27000_v20  ;;  %6511 = vmatprep.mubr.f32.mxu1 %v32099_v2 }
 0x287   : > { %25067 = vtanh.f32 %v5006_v58  ;;  %v5011_v6 = vadd.f32 %v5010_v62, %v4919_v9  ;;  %6656 = vmatpush1.msra.mxu1 %v26986_v7  ;;  %6602 = vmatprep.mubr.f32.mxu0 %v32099_v2 }
 0x288   : > { %25069 = vtanh.f32 %v5004_v22  ;;  %v5012_v21 = vpop.f32.mrf.mxu1  ;;  %6658 = vmatprep.subr.mxu1 %v26971_v63 }
 0x289   : > { %25071 = vtanh.f32 %v5011_v6  ;;  %v5013_v52 = vadd.f32 %v5012_v21, %v4921_v44  ;;  %6660 = vmatpush1.msra.mxu1 %v26975_v26  ;;  %6605 = vmatmul.mubr.f32.vlgmr.msra.gmra.mxu0 %v26569_v40 }
 0x28a   : > { %25073 = vtanh.f32 %v4997_v57  ;;  %6513 = vmatmul.mubr.f32.gmra.mxu1 %v26571_v0  ;;  %6662 = vmatprep.subr.mxu1 %v26984_v1 }
 0x28b   : > { %25075 = vtanh.f32 %v5013_v52  ;;  %6758 = vmatpush1.msra.mxu0 %v32181_v50  ;;  %6664 = vmatpush1.msra.mxu1 %v26994_v53 }
 0x28c   : > { %6762 = vmatprep.subr.mxu0 %v32182_v60  ;;  %6856 = vmatprep.subr.mxu1 %v27000_v20 }
 0x28d   : > { %6766 = vmatpush1.msra.mxu0 %v32183_v54  ;;  %6518 = vmatprep.mubr.f32.mxu1 %v32099_v2 }
 0x28e   : > { %6610 = vmatprep.mubr.f32.mxu0 %v32099_v2  ;;  %6770 = vmatprep.subr.mxu0 %v6462_v28 }
 0x28f   : > { %6520 = vmatmul.mubr.f32.gmra.mxu1 %v26594_v45  ;;  %6613 = vmatmul.mubr.f32.gmra.mxu0 %v26586_v19 }
 0x290   : > { %6774 = vmatpush1.msra.mxu0 %v6468_v42  ;;  %6618 = vmatprep.mubr.f32.mxu0 %v32099_v2  ;;  %v25066_v61 = vpop.eup %25065 }
 0x291   : > { %6697 = vmatprep.mubr.f32.mxu1 %v32099_v2 }
 0x293   : > { %6621 = vmatmul.mubr.f32.gmra.mxu0 %v26630_v31  ;;  %6701 = vmatmul.mubr.f32.vlgmr.msra.gmra.mxu1 %v26583_v11 }
 0x294   : > { %v25068_v20 = vpop.eup %25067  ;;  %6858 = vmatpush1.msra.mxu1 %v26986_v7  ;;  %6706 = vmatprep.mubr.f32.mxu1 %v32099_v2 }
 0x295   : > { %v25070_v33 = vpop.eup %25069  ;;  %6860 = vmatprep.subr.mxu1 %v26971_v63  ;;  %6807 = vmatprep.mubr.f32.mxu0 %v32099_v2  ;;  %v27132_v28 = vand.u32 4294901760, %v25068_v20 }
 0x296   : > { %v25072_v35 = vpop.eup %25071  ;;  %6862 = vmatpush1.msra.mxu1 %v26975_v26  ;;  %v27138_v42 = vand.u32 4294901760, %v25070_v33 }
 0x297   : > { %v25074_v47 = vpop.eup %25073  ;;  %6864 = vmatprep.subr.mxu1 %v26984_v1  ;;  %6710 = vmatmul.mubr.f32.gmra.mxu1 %v26615_v36  ;;  %v5071_v37 = vsel %vm2530_vm3, %v25072_v35, 0  ;;  %v27143_v1 = vand.u32 4294901760, %v25066_v61  ;;  %v27154_v4 = vsub.f32 %v25068_v20, %v27132_v28 }
 0x298   : > { %v25076_v7 = vpop.eup %25075  ;;  %6809 = vmatmul.mubr.f32.vlgmr.msra.gmra.mxu0 %v26554_v24  ;;  %6866 = vmatpush1.msra.mxu1 %v26994_v53  ;;  %v27136_v63 = vand.u32 4294901760, %v5071_v37  ;;  %v27151_v53 = vand.u32 4294901760, %v25074_v47  ;;  %v27160_v15 = vsub.f32 %v25070_v33, %v27138_v42 }
 0x299   : > { %6715 = vmatprep.mubr.f32.mxu1 %v32099_v2  ;;  %6814 = vmatprep.mubr.f32.mxu0 %v32099_v2  ;;  %v5074_v26 = vsel %vm2530_vm3, %v25076_v7, 0  ;;  %v27166_v27 = vsub.f32 %v25066_v61, %v27143_v1  ;;  %v7065_v12 = vand.u32 4294901760, %v27154_v4 }
 0x29a   : > { %v27145_v41 = vand.u32 4294901760, %v5074_v26  ;;  %v27148_v25 = vsub.f32 %v5071_v37, %v27136_v63  ;;  %v27173_v16 = vsub.f32 %v25074_v47, %v27151_v53  ;;  %v7071_v49 = vand.u32 4294901760, %v27160_v15 }
 0x29b   : > { %6719 = vmatmul.mubr.f32.gmra.mxu1 %v26653_v5  ;;  %v7077_v51 = vand.u32 4294901760, %v27166_v27  ;;  %v7066_v38 = vsub.f32 %v27154_v4, %v7065_v12 }
 0x29c   : > { %6816 = vmatmul.mubr.f32.gmra.mxu0 %v26571_v0  ;;  %6948 = vmatprep.subr.mxu0 %v27145_v41  ;;  %v7052_v3 = vsub.f32 %v5074_v26, %v27145_v41  ;;  %v7059_v8 = vand.u32 4294901760, %v27148_v25  ;;  %v7083_v43 = vand.u32 4294901760, %v27173_v16  ;;  %v7072_v18 = vsub.f32 %v27160_v15, %v7071_v49 }
 0x29d   : > { %6821 = vmatprep.mubr.f32.mxu0 %v32099_v2  ;;  %6899 = vmatprep.mubr.f32.mxu1 %v32099_v2  ;;  %v7078_v55 = vsub.f32 %v27166_v27, %v7077_v51  ;;  %v7067_v39 = vand.u32 4294901760, %v7066_v38 }
 0x29e   : > { %6950 = vmatpush1.msra.mxu0 %v27136_v63  ;;  %v7053_v56 = vand.u32 4294901760, %v7052_v3  ;;  %v7060_v59 = vsub.f32 %v27148_v25, %v7059_v8  ;;  %v7084_v46 = vsub.f32 %v27173_v16, %v7083_v43 }
 0x29f   : > { %6901 = vmatmul.mubr.f32.vlgmr.msra.gmra.mxu1 %v26554_v24  ;;  %6952 = vmatprep.subr.mxu0 %v27132_v28  ;;  %v7079_v30 = vand.u32 4294901760, %v7078_v55 }
 0x2a0   : > { %6823 = vmatmul.mubr.f32.gmra.mxu0 %v26594_v45  ;;  %6906 = vmatprep.mubr.f32.mxu1 %v32099_v2  ;;  %v7054_v23 = vsub.f32 %v7052_v3, %v7053_v56  ;;  %v7061_v10 = vand.u32 4294901760, %v7060_v59  ;;  %v7085_v29 = vand.u32 4294901760, %v7084_v46 }
 0x2a1   : > { %6954 = vmatpush1.msra.mxu0 %v27138_v42  ;;  %6991 = vmatprep.mubr.f32.mxu0 %v32099_v2 }
 0x2a2   : > { %6956 = vmatprep.subr.mxu0 %v27143_v1  ;;  %v7055_v34 = vand.u32 4294901760, %v7054_v23 }
 0x2a3   : > { %6958 = vmatpush1.msra.mxu0 %v27151_v53  ;;  %6908 = vmatmul.mubr.f32.gmra.mxu1 %v26571_v0 }
 0x2a4   : > { %6997 = vmatmul.mubr.f32.vlgmr.msra.gmra.mxu0 %v26644_v14  ;;  %7169 = vmatprep.subr.mxu0 %v7052_v3  ;;  %v7073_v14 = vand.u32 4294901760, %v7072_v18 }
 0x2a5   : > { %7172 = vmatpush1.msra.mxu0 %v27148_v25  ;;  %7056 = vmatprep.subr.mxu1 %v7055_v34 }
 0x2a6   : > { %7175 = vmatprep.subr.mxu0 %v27154_v4  ;;  %6913 = vmatprep.mubr.f32.mxu1 %v32099_v2 }
 0x2a7   : > { %7002 = vmatprep.mubr.f32.mxu0 %v32099_v2  ;;  %7062 = vmatpush1.msra.mxu1 %v7061_v10 }
 0x2a8   : > { %7178 = vmatpush1.msra.mxu0 %v27160_v15  ;;  %6915 = vmatmul.mubr.f32.gmra.mxu1 %v26594_v45 }
 0x2a9   : > { %7008 = vmatmul.mubr.f32.gmra.mxu0 %v26677_v13  ;;  %7068 = vmatprep.subr.mxu1 %v7067_v39 }
 0x2aa   : > { %7181 = vmatprep.subr.mxu0 %v27166_v27  ;;  %7074 = vmatpush1.msra.mxu1 %v7073_v14 }
 0x2ab   : > { %7184 = vmatpush1.msra.mxu0 %v27173_v16  ;;  %7080 = vmatprep.subr.mxu1 %v7079_v30 }
 0x2ac   : > { %7369 = vmatprep.subr.mxu0 %v7053_v56  ;;  %7013 = vmatprep.mubr.f32.mxu0 %v32099_v2 }
 0x2ad   : > { %7086 = vmatpush1.msra.mxu1 %v7085_v29  ;;  %7119 = vmatprep.mubr.f32.mxu1 %v32099_v2 }
 0x2ae   : > { %7019 = vmatmul.mubr.f32.gmra.mxu0 %v26703_v32  ;;  %7121 = vmatmul.mubr.f32.vlgmr.msra.gmra.mxu1 %v26554_v24 }
 0x2af   : > { %7269 = vmatprep.subr.mxu1 %v27145_v41  ;;  %7126 = vmatprep.mubr.f32.mxu1 %v32099_v2 }
 0x2b0   : > { %7271 = vmatpush1.msra.mxu1 %v27136_v63  ;;  %7217 = vmatprep.mubr.f32.mxu0 %v32099_v2 }
 0x2b1   : > { %7273 = vmatprep.subr.mxu1 %v27132_v28 }
 0x2b2   : > { %7275 = vmatpush1.msra.mxu1 %v27138_v42  ;;  %7220 = vmatmul.mubr.f32.vlgmr.msra.gmra.mxu0 %v26569_v40 }
 0x2b3   : > { %7128 = vmatmul.mubr.f32.gmra.mxu1 %v26571_v0  ;;  %7277 = vmatprep.subr.mxu1 %v27143_v1 }
 0x2b4   : > { %7373 = vmatpush1.msra.mxu0 %v7059_v8  ;;  %7279 = vmatpush1.msra.mxu1 %v27151_v53 }
 0x2b5   : > { %7377 = vmatprep.subr.mxu0 %v7065_v12  ;;  %7471 = vmatprep.subr.mxu1 %v27145_v41 }
 0x2b6   : > { %7381 = vmatpush1.msra.mxu0 %v7071_v49  ;;  %7133 = vmatprep.mubr.f32.mxu1 %v32099_v2 }
 0x2b7   : > { %7225 = vmatprep.mubr.f32.mxu0 %v32099_v2  ;;  %7385 = vmatprep.subr.mxu0 %v7077_v51 }
 0x2b8   : > { %7135 = vmatmul.mubr.f32.gmra.mxu1 %v26594_v45  ;;  %7228 = vmatmul.mubr.f32.gmra.mxu0 %v26586_v19 }
 0x2b9   : > { %7389 = vmatpush1.msra.mxu0 %v7083_v43  ;;  %7233 = vmatprep.mubr.f32.mxu0 %v32099_v2 }
 0x2ba   : > { %7312 = vmatprep.mubr.f32.mxu1 %v32099_v2 }
 0x2bc   : > { %7236 = vmatmul.mubr.f32.gmra.mxu0 %v26630_v31  ;;  %7316 = vmatmul.mubr.f32.vlgmr.msra.gmra.mxu1 %v26583_v11 }
 0x2bd   : > { %7473 = vmatpush1.msra.mxu1 %v27136_v63  ;;  %7321 = vmatprep.mubr.f32.mxu1 %v32099_v2 }
 0x2be   : > { %7475 = vmatprep.subr.mxu1 %v27132_v28  ;;  %7422 = vmatprep.mubr.f32.mxu0 %v32099_v2 }
 0x2bf   : > { %7477 = vmatpush1.msra.mxu1 %v27138_v42 }
 0x2c0   : > { %7479 = vmatprep.subr.mxu1 %v27143_v1  ;;  %7325 = vmatmul.mubr.f32.gmra.mxu1 %v26615_v36 }
 0x2c1   : > { %7424 = vmatmul.mubr.f32.vlgmr.msra.gmra.mxu0 %v26554_v24  ;;  %7481 = vmatpush1.msra.mxu1 %v27151_v53 }
 0x2c2   : > { %7330 = vmatprep.mubr.f32.mxu1 %v32099_v2  ;;  %7429 = vmatprep.mubr.f32.mxu0 %v32099_v2 }
 0x2c4   : > { %7334 = vmatmul.mubr.f32.gmra.mxu1 %v26653_v5 }
 0x2c5   : > { %7431 = vmatmul.mubr.f32.gmra.mxu0 %v26571_v0  ;;  %7514 = vmatprep.mubr.f32.mxu1 %v32099_v2 }
 0x2c6   : > { %7436 = vmatprep.mubr.f32.mxu0 %v32099_v2 }
 0x2c8   : > { %7516 = vmatmul.mubr.f32.vlgmr.msra.gmra.mxu1 %v26554_v24 }
 0x2c9   : > { %7438 = vmatmul.mubr.f32.gmra.mxu0 %v26594_v45  ;;  %7521 = vmatprep.mubr.f32.mxu1 %v32099_v2 }
 0x2ca   : > { %7667 = vmatprep.mubr.f32.mxu0 %v32099_v2 }
 0x2cc   : > { %7523 = vmatmul.mubr.f32.gmra.mxu1 %v26571_v0 }
 0x2cd   : > { %7528 = vmatprep.mubr.f32.mxu1 %v32099_v2 }
 0x2d0   : > { %7530 = vmatmul.mubr.f32.gmra.mxu1 %v26594_v45 }
 0x2d1   : > { %7795 = vmatprep.mubr.f32.mxu1 %v32099_v2 }
 0x2eb   : > { %v5153_v40 = vpop.f32.mrf.mxu0 }
 0x2ed   : > { %v5155_v11 = vpop.f32.mrf.mxu0 }
 0x2ef   : > { %v5164_v19 = vpop.f32.mrf.mxu0 }
 0x2f1   : > { %v5166_v36 = vpop.f32.mrf.mxu0 }
 0x2f3   : > { %v5175_v31 = vpop.f32.mrf.mxu0 }
 0x2f4   : > { %v5277_v24 = vpop.f32.mrf.mxu1 }
 0x2f5   : > { %v5177_v5 = vpop.f32.mrf.mxu0  ;;  %v5278_v7 = vadd.f32 %v5277_v24, %v5153_v40 }
 0x2f6   : > { %v5279_v32 = vpop.f32.mrf.mxu1 }
 0x2f7   : > { %v5376_v13 = vpop.f32.mrf.mxu0  ;;  %v5280_v33 = vadd.f32 %v5279_v32, %v5155_v11 }
 0x2f8   : > { %v5284_v22 = vpop.f32.mrf.mxu1  ;;  %v5377_v41 = vadd.f32 %v5376_v13, %v5278_v7 }
 0x2f9   : > { %v5378_v48 = vpop.f32.mrf.mxu0  ;;  %v5285_v61 = vadd.f32 %v5284_v22, %v5164_v19 }
 0x2fa   : > { %v5286_v17 = vpop.f32.mrf.mxu1  ;;  %v5379_v63 = vadd.f32 %v5378_v48, %v5280_v33 }
 0x2fb   : > { %v5287_v47 = vadd.f32 %v5286_v17, %v5166_v36  ;;  %v24913_v17 = vld [vmem:[%s32060_s2 + $0x38] sm:$0xff] }
 0x2fd   : > { %v5291_v9 = vpop.f32.mrf.mxu1  ;;  %v5384_v0 = vpop.f32.mrf.mxu0 }
 0x2fe   : > { %v5385_v37 = vadd.f32 %v5384_v0, %v5285_v61  ;;  %v5292_v3 = vadd.f32 %v5291_v9, %v5175_v31  ;;  %v24912_v31 = vld [vmem:[%s32060_s2 + $0x30] sm:$0xff] }
 0x2ff   : > { %v5293_v58 = vpop.f32.mrf.mxu1  ;;  %v5386_v57 = vpop.f32.mrf.mxu0  ;;  %v7565_v13 = vsel %vm2520_vm2, %v24912_v31, 0 }
 0x300   : > { %v5387_v26 = vadd.f32 %v5386_v57, %v5287_v47  ;;  %v5294_v23 = vadd.f32 %v5293_v58, %v5177_v5  ;;  %v27267_v0 = vand.u32 4294901760, %v7565_v13 }
 0x301   : > { %v5392_v62 = vpop.f32.mrf.mxu0  ;;  %v5472_v45 = vpop.f32.mrf.mxu1 }
 0x302   : > { %v5473_v27 = vadd.f32 %v5472_v45, %v5377_v41  ;;  %v5393_v49 = vadd.f32 %v5392_v62, %v5292_v3  ;;  %v7568_v62 = vsel %vm2520_vm2, %v24913_v17, 0  ;;  %v24914_v45 = vld [vmem:[%s32060_s2 + $0x40] sm:$0x1f] }
 0x303   : > { %v5394_v44 = vpop.f32.mrf.mxu0  ;;  %v5474_v6 = vpop.f32.mrf.mxu1  ;;  %v7571_v61 = vsel %vm2520_vm2, %v24914_v45, 0 }
 0x304   : > { %v5475_v25 = vadd.f32 %v5474_v6, %v5379_v63  ;;  %v5395_v10 = vadd.f32 %v5394_v44, %v5294_v23  ;;  %v27300_v63 = vand.u32 4294901760, %v7571_v61 }
 0x305   : > { %v5481_v21 = vpop.f32.mrf.mxu1 }
 0x306   : > { %v5580_v52 = vpop.f32.mrf.mxu0  ;;  %v5482_v1 = vadd.f32 %v5481_v21, %v5385_v37 }
 0x307   : > { %v5483_v50 = vpop.f32.mrf.mxu1  ;;  %v5581_v34 = vadd.f32 %v5580_v52, %v5473_v27  ;;  %v27282_v52 = vsub.f32 %v7565_v13, %v27267_v0 }
 0x308   : > { %v5582_v60 = vpop.f32.mrf.mxu0  ;;  %v5484_v15 = vadd.f32 %v5483_v50, %v5387_v26 }
 0x309   : > { %v5490_v54 = vpop.f32.mrf.mxu1  ;;  %v5583_v56 = vadd.f32 %v5582_v60, %v5475_v25  ;;  %v27298_v7 = vand.u32 4294901760, %v27282_v52 }
 0x30a   : > { %v5587_v20 = vpop.f32.mrf.mxu0  ;;  %v5491_v55 = vadd.f32 %v5490_v54, %v5393_v49  ;;  %v27286_v54 = vand.u32 4294901760, %v7568_v62  ;;  %v27330_v49 = vsub.f32 %v7571_v61, %v27300_v63 }
 0x30b   : > { %v5492_v35 = vpop.f32.mrf.mxu1  ;;  %v5588_v8 = vadd.f32 %v5587_v20, %v5482_v1 }
 0x30c   : > { %v5589_v28 = vpop.f32.mrf.mxu0  ;;  %v5493_v30 = vadd.f32 %v5492_v35, %v5395_v10  ;;  %v27305_v1 = vsub.f32 %v7568_v62, %v27286_v54 }
 0x30d   : > { %v5672_v42 = vpop.f32.mrf.mxu1  ;;  %v5590_v59 = vadd.f32 %v5589_v28, %v5484_v15 }
 0x30e   : > { %v5673_v46 = vadd.f32 %v5672_v42, %v5581_v34  ;;  %v27338_v34 = vand.u32 4294901760, %v27305_v1 }
 0x30f   : > { %v5594_v53 = vpop.f32.mrf.mxu0  ;;  %v5674_v4 = vpop.f32.mrf.mxu1 }
 0x310   : > { %v5675_v38 = vadd.f32 %v5674_v4, %v5583_v56  ;;  %v5595_v29 = vadd.f32 %v5594_v53, %v5491_v55 }
 0x311   : > { %v5596_v12 = vpop.f32.mrf.mxu0  ;;  %v5679_v16 = vpop.f32.mrf.mxu1 }
 0x312   : > { %v5680_v51 = vadd.f32 %v5679_v16, %v5588_v8  ;;  %v5597_v19 = vadd.f32 %v5596_v12, %v5493_v30  ;;  %v7671_v16 = vsub.f32 %v27282_v52, %v27298_v7 }
 0x313   : > { %v27246_v43 = vpop.f32.mrf.mxu0  ;;  %v5681_v18 = vpop.f32.mrf.mxu1 }
 0x314   : > { %v5682_v39 = vadd.f32 %v5681_v18, %v5590_v59  ;;  %25077 = vtanh.f32 %v5680_v51  ;;  %v27362_v31 = vand.u32 4294901760, %v7671_v16 }
 0x315   : > { %v27248_v14 = vpop.f32.mrf.mxu0 }
 0x316   : > { %25079 = vtanh.f32 %v5682_v39 }
 0x317   : > { %25081 = vtanh.f32 %v5675_v38  ;;  %v5686_v40 = vpop.f32.mrf.mxu1  ;;  %v27250_v11 = vpop.f32.mrf.mxu0 }
 0x318   : > { %v5687_v36 = vadd.f32 %v5686_v40, %v5595_v29  ;;  %25083 = vtanh.f32 %v5673_v46 }
 0x319   : > { %v5688_v24 = vpop.f32.mrf.mxu1  ;;  %v27255_v5 = vpop.f32.mrf.mxu0 }
 0x31a   : > { %25085 = vtanh.f32 %v5687_v36  ;;  %v5689_v32 = vadd.f32 %v5688_v24, %v5597_v19  ;;  %v27357_v19 = vand.u32 4294901760, %v27330_v49 }
 0x31c   : > { %25087 = vtanh.f32 %v5689_v32  ;;  %v27258_v22 = vpop.f32.mrf.mxu0  ;;  %v7682_v32 = vsub.f32 %v27305_v1, %v27338_v34 }
 0x31d   : > { %v27260_v48 = vpop.f32.mrf.mxu1 }
 0x31e   : > { %v27265_v9 = vpop.f32.mrf.mxu0  ;;  %v27390_v16 = vand.u32 4294901760, %v7682_v32 }
 0x31f   : > { %v27269_v58 = vpop.f32.mrf.mxu1 }
 0x320   : > { %v27271_v57 = vpop.f32.mrf.mxu0 }
 0x321   : > { %v27277_v44 = vpop.f32.mrf.mxu1  ;;  %v25078_v6 = vpop.eup %25077 }
 0x322   : > { %v27279_v21 = vpop.f32.mrf.mxu0  ;;  %v27295_v28 = vand.u32 4294901760, %v25078_v6 }
 0x323   : > { %v25080_v50 = vpop.eup %25079  ;;  %v27284_v60 = vpop.f32.mrf.mxu1 }
 0x324   : > { %v25082_v20 = vpop.eup %25081  ;;  %v27289_v33 = vand.u32 4294901760, %v25080_v50  ;;  %v27327_v23 = vsub.f32 %v25078_v6, %v27295_v28 }
 0x325   : > { %v25084_v35 = vpop.eup %25083  ;;  %v27302_v26 = vand.u32 4294901760, %v25082_v20 }
 0x326   : > { %v27291_v47 = vpop.f32.mrf.mxu1  ;;  %v27293_v37 = vpop.f32.mrf.mxu0  ;;  %v27314_v15 = vand.u32 4294901760, %v25084_v35  ;;  %v27317_v8 = vsub.f32 %v25080_v50, %v27289_v33  ;;  %v32083_v40 = vand.u32 4294901760, %v27327_v23 }
 0x327   : > { %v25086_v42 = vpop.eup %25085  ;;  %v27341_v38 = vsub.f32 %v25082_v20, %v27302_v26 }
 0x328   : > { %v27307_v41 = vpop.f32.mrf.mxu1  ;;  %v27309_v25 = vpop.f32.mrf.mxu0  ;;  %v7574_v53 = vsel %vm2530_vm3, %v25086_v42, 0  ;;  %v32082_v46 = vand.u32 4294901760, %v27317_v8  ;;  %v27352_v30 = vsub.f32 %v25084_v35, %v27314_v15  ;;  %v7748_v35 = vsub.f32 %v27327_v23, %v32083_v40 }
 0x329   : > { %v25088_v4 = vpop.eup %25087  ;;  %v27312_v3 = vand.u32 4294901760, %v7574_v53  ;;  %v32086_v13 = vand.u32 4294901760, %v27341_v38  ;;  %v7693_v42 = vsub.f32 %v27330_v49, %v27357_v19  ;;  %v5893_v40 = vadd.f32 %v27260_v48, %v27246_v43 }
 0x32a   : > { %v27319_v27 = vpop.f32.mrf.mxu0  ;;  %v27321_v56 = vpop.f32.mrf.mxu1  ;;  %v7577_v12 = vsel %vm2530_vm3, %v25088_v4, 0  ;;  %v7742_v50 = vsub.f32 %v27317_v8, %v32082_v46  ;;  %v7759_v61 = vand.u32 4294901760, %v27352_v30 }
 0x32b   : > { %v27332_v59 = vand.u32 4294901760, %v7577_v12  ;;  %v27335_v51 = vsub.f32 %v7574_v53, %v27312_v3  ;;  %v5900_v53 = vadd.f32 %v27277_v44, %v27250_v11  ;;  %v7754_v46 = vsub.f32 %v27341_v38, %v32086_v13 }
 0x32c   : > { %v27343_v18 = vpop.f32.mrf.mxu0  ;;  %v6089_v10 = vpop.f32.mrf.mxu1  ;;  %v5902_v44 = vadd.f32 %v27284_v60, %v27255_v5  ;;  %v7743_v13 = vand.u32 4294901760, %v7742_v50  ;;  %v7760_v43 = vsub.f32 %v27352_v30, %v7759_v61  ;;  %v5992_v5 = vadd.f32 %v27271_v57, %v5893_v40 }
 0x32d   : > { %7624 = vmatprep.subr.mxu0 %v27332_v59  ;;  %v27347_v55 = vsub.f32 %v7577_v12, %v27332_v59  ;;  %v32084_v39 = vand.u32 4294901760, %v27335_v51  ;;  %v6000_v32 = vadd.f32 %v27293_v37, %v5900_v53  ;;  %v7755_v50 = vand.u32 4294901760, %v7754_v46 }
 0x32e   : > { %v6096_v29 = vpop.f32.mrf.mxu1  ;;  %7626 = vmatpush1.msra.mxu0 %v27312_v3  ;;  %v6002_v60 = vadd.f32 %v27309_v25, %v5902_v44  ;;  %v7761_v25 = vand.u32 4294901760, %v7760_v43  ;;  %v5909_v46 = vadd.f32 %v27307_v41, %v27265_v9 }
 0x32f   : > { %v27359_v36 = vpop.f32.mrf.mxu0  ;;  %7628 = vmatprep.subr.mxu0 %v27289_v33  ;;  %v32085_v24 = vand.u32 4294901760, %v27347_v55  ;;  %v7736_v62 = vsub.f32 %v27335_v51, %v32084_v39  ;;  %v5895_v39 = vadd.f32 %v27269_v58, %v27248_v14  ;;  %v7749_v58 = vand.u32 4294901760, %v7748_v35 }
 0x330   : > { %v6098_v17 = vpop.f32.mrf.mxu1  ;;  %7630 = vmatpush1.msra.mxu0 %v27295_v28  ;;  %v6097_v37 = vadd.f32 %v6096_v29, %v6000_v32  ;;  %v6088_v35 = vadd.f32 %v27321_v56, %v5992_v5  ;;  %v6010_v9 = vadd.f32 %v27343_v18, %v5909_v46  ;;  %v32186_v5 = vand.u32 4294901760, %v27317_v8 }
 0x331   : > { %v6197_v45 = vpop.f32.mrf.mxu0  ;;  %7632 = vmatprep.subr.mxu0 %v27302_v26  ;;  %v7730_v6 = vsub.f32 %v27347_v55, %v32085_v24  ;;  %v7737_v11 = vand.u32 4294901760, %v7736_v62  ;;  %v5994_v14 = vadd.f32 %v27279_v21, %v5895_v39  ;;  %v27410_v62 = vand.u32 4294901760, %v7693_v42 }
 0x332   : > { %v6105_v20 = vpop.f32.mrf.mxu1  ;;  %7634 = vmatpush1.msra.mxu0 %v27314_v15  ;;  %v5907_v21 = vadd.f32 %v27291_v47, %v27258_v22  ;;  %v6099_v42 = vadd.f32 %v6098_v17, %v6002_v60  ;;  %v6196_v56 = vadd.f32 %v27359_v36, %v6088_v35  ;;  %v32187_v60 = vand.u32 4294901760, %v27327_v23 }
 0x333   : > { %v6202_v4 = vpop.f32.mrf.mxu0  ;;  %7673 = vmatmul.mubr.f32.vlgmr.msra.gmra.mxu0 %v27362_v31  ;;  %7845 = vmatprep.subr.mxu0 %v27347_v55  ;;  %v7731_v12 = vand.u32 4294901760, %v7730_v6  ;;  %v6090_v39 = vadd.f32 %v6089_v10, %v5994_v14  ;;  %v32184_v10 = vand.u32 4294901760, %v27347_v55  ;;  %v32185_v14 = vand.u32 4294901760, %v27335_v51 }
 0x334   : > { %v6107_v24 = vpop.f32.mrf.mxu1  ;;  %7848 = vmatpush1.msra.mxu0 %v27335_v51  ;;  %7678 = vmatprep.mubr.f32.mxu0 %v32099_v2  ;;  %v6203_v57 = vadd.f32 %v6202_v4, %v6097_v37  ;;  %v6008_v29 = vadd.f32 %v27319_v27, %v5907_v21  ;;  %v32188_v51 = vand.u32 4294901760, %v27341_v38 }
 0x335   : > { %v6204_v6 = vpop.f32.mrf.mxu0  ;;  %7732 = vmatprep.subr.mxu1 %v7731_v12  ;;  %7851 = vmatprep.subr.mxu0 %v27317_v8  ;;  %v6198_v22 = vadd.f32 %v6197_v45, %v6090_v39  ;;  %v6108_v36 = vadd.f32 %v6107_v24, %v6010_v9 }
 0x336   : > { %v6287_v48 = vpop.f32.mrf.mxu1  ;;  %7738 = vmatpush1.msra.mxu1 %v7737_v11  ;;  %7854 = vmatpush1.msra.mxu0 %v27327_v23  ;;  %v6106_v41 = vadd.f32 %v6105_v20, %v6008_v29 }
 0x337   : > { %v6209_v53 = vpop.f32.mrf.mxu0  ;;  %7684 = vmatmul.mubr.f32.gmra.mxu0 %v27390_v16  ;;  %7744 = vmatprep.subr.mxu1 %v7743_v13  ;;  %v6205_v13 = vadd.f32 %v6204_v6, %v6099_v42  ;;  %v6288_v55 = vadd.f32 %v6287_v48, %v6196_v56 }
 0x338   : > { %v6289_v12 = vpop.f32.mrf.mxu1  ;;  %7857 = vmatprep.subr.mxu0 %v27341_v38  ;;  %7750 = vmatpush1.msra.mxu1 %v7749_v58  ;;  %v6210_v32 = vadd.f32 %v6209_v53, %v6106_v41 }
 0x339   : > { %v6211_v40 = vpop.f32.mrf.mxu0  ;;  %7860 = vmatpush1.msra.mxu0 %v27352_v30  ;;  %7756 = vmatprep.subr.mxu1 %v7755_v50  ;;  %v6290_v27 = vadd.f32 %v6289_v12, %v6198_v22 }
 0x33a   : > { %v6294_v47 = vpop.f32.mrf.mxu1  ;;  %8045 = vmatprep.subr.mxu0 %v32184_v10  ;;  %7689 = vmatprep.mubr.f32.mxu0 %v32099_v2  ;;  %v6212_v20 = vadd.f32 %v6211_v40, %v6108_v36 }
 0x33b   : > { %v6295_v17 = vadd.f32 %v6294_v47, %v6203_v57  ;;  %v27427_v4 = vpop.f32.mrf.mxu0  ;;  %7762 = vmatpush1.msra.mxu1 %v7761_v25  ;;  %7695 = vmatmul.mubr.f32.gmra.mxu0 %v27410_v62 }
 0x33c   : > { %v6296_v45 = vpop.f32.mrf.mxu1  ;;  %7797 = vmatmul.mubr.f32.vlgmr.msra.gmra.mxu1 %v27267_v0  ;;  %7945 = vmatprep.subr.mxu1 %v27332_v59 }
 0x33d   : > { %v6297_v11 = vadd.f32 %v6296_v45, %v6205_v13  ;;  %v27433_v44 = vpop.f32.mrf.mxu0  ;;  %7947 = vmatpush1.msra.mxu1 %v27312_v3  ;;  %7802 = vmatprep.mubr.f32.mxu1 %v32099_v2  ;;  %25089 = vtanh.f32 %v6295_v17 }
 0x33e   : > { %7949 = vmatprep.subr.mxu1 %v27289_v33  ;;  %7893 = vmatprep.mubr.f32.mxu0 %v32099_v2 }
 0x33f   : > { %25091 = vtanh.f32 %v6297_v11  ;;  %v6301_v18 = vpop.f32.mrf.mxu1  ;;  %7951 = vmatpush1.msra.mxu1 %v27295_v28  ;;  %7896 = vmatmul.mubr.f32.vlgmr.msra.gmra.mxu0 %v27282_v52 }
 0x340   : > { %25093 = vtanh.f32 %v6290_v27  ;;  %v6302_v6 = vadd.f32 %v6301_v18, %v6210_v32  ;;  %v27441_v43 = vpop.f32.mrf.mxu0  ;;  %7804 = vmatmul.mubr.f32.gmra.mxu1 %v27286_v54  ;;  %7953 = vmatprep.subr.mxu1 %v27302_v26 }
 0x341   : > { %25095 = vtanh.f32 %v6288_v55  ;;  %v6303_v24 = vpop.f32.mrf.mxu1  ;;  %8049 = vmatpush1.msra.mxu0 %v32185_v14  ;;  %7955 = vmatpush1.msra.mxu1 %v27314_v15 }
 0x342   : > { %25097 = vtanh.f32 %v6302_v6  ;;  %v6304_v48 = vadd.f32 %v6303_v24, %v6212_v20  ;;  %v27448_v58 = vpop.f32.mrf.mxu0  ;;  %8053 = vmatprep.subr.mxu0 %v32186_v5  ;;  %8147 = vmatprep.subr.mxu1 %v27332_v59 }
 0x343   : > { %8057 = vmatpush1.msra.mxu0 %v32187_v60  ;;  %7809 = vmatprep.mubr.f32.mxu1 %v32099_v2 }
 0x344   : > { %25099 = vtanh.f32 %v6304_v48  ;;  %7901 = vmatprep.mubr.f32.mxu0 %v32099_v2  ;;  %8061 = vmatprep.subr.mxu0 %v32188_v51 }
 0x345   : > { %v27459_v37 = vpop.f32.mrf.mxu0  ;;  %v27461_v53 = vpop.f32.mrf.mxu1  ;;  %7811 = vmatmul.mubr.f32.gmra.mxu1 %v27300_v63  ;;  %7904 = vmatmul.mubr.f32.gmra.mxu0 %v27305_v1 }
 0x346   : > { %8065 = vmatpush1.msra.mxu0 %v7759_v61  ;;  %7909 = vmatprep.mubr.f32.mxu0 %v32099_v2 }
 0x347   : > { %v27468_v8 = vpop.f32.mrf.mxu0  ;;  %v27470_v23 = vpop.f32.mrf.mxu1  ;;  %7988 = vmatprep.mubr.f32.mxu1 %v32099_v2 }
 0x349   : > { %v27473_v59 = vpop.f32.mrf.mxu0  ;;  %7912 = vmatmul.mubr.f32.gmra.mxu0 %v27330_v49  ;;  %7992 = vmatmul.mubr.f32.vlgmr.msra.gmra.mxu1 %v27298_v7 }
 0x34a   : > { %v27477_v38 = vpop.f32.mrf.mxu1  ;;  %8149 = vmatpush1.msra.mxu1 %v27312_v3  ;;  %7997 = vmatprep.mubr.f32.mxu1 %v32099_v2  ;;  %v25090_v30 = vpop.eup %25089 }
 0x34b   : > { %v27481_v61 = vpop.f32.mrf.mxu0  ;;  %8151 = vmatprep.subr.mxu1 %v27289_v33  ;;  %8098 = vmatprep.mubr.f32.mxu0 %v32099_v2 }
 0x34c   : > { %v25092_v50 = vpop.eup %25091  ;;  %v27485_v21 = vpop.f32.mrf.mxu1  ;;  %8153 = vmatpush1.msra.mxu1 %v27295_v28  ;;  %v27500_v28 = vand.u32 4294901760, %v25090_v30 }
 0x34d   : > { %v25094_v39 = vpop.eup %25093  ;;  %8155 = vmatprep.subr.mxu1 %v27302_v26  ;;  %8001 = vmatmul.mubr.f32.gmra.mxu1 %v27338_v34  ;;  %v27492_v12 = vand.u32 4294901760, %v25092_v50 }
 0x34e   : > { %v25096_v3 = vpop.eup %25095  ;;  %8100 = vmatmul.mubr.f32.vlgmr.msra.gmra.mxu0 %v27267_v0  ;;  %8157 = vmatpush1.msra.mxu1 %v27314_v15  ;;  %v27503_v57 = vand.u32 4294901760, %v25094_v39  ;;  %v27531_v9 = vsub.f32 %v25090_v30, %v27500_v28 }
 0x34f   : > { %v25098_v33 = vpop.eup %25097  ;;  %v27494_v35 = vpop.f32.mrf.mxu1  ;;  %8006 = vmatprep.mubr.f32.mxu1 %v32099_v2  ;;  %8105 = vmatprep.mubr.f32.mxu0 %v32099_v2  ;;  %v27512_v29 = vand.u32 4294901760, %v25096_v3  ;;  %v27518_v47 = vsub.f32 %v25092_v50, %v27492_v12 }
 0x350   : > { %v27496_v42 = vpop.f32.mrf.mxu0  ;;  %v7580_v26 = vsel %vm2530_vm3, %v25098_v33, 0  ;;  %v27534_v41 = vsub.f32 %v25094_v39, %v27503_v57  ;;  %v32088_v6 = vand.u32 4294901760, %v27531_v9 }
 0x351   : > { %v25100_v40 = vpop.eup %25099  ;;  %v27505_v25 = vpop.f32.mrf.mxu1  ;;  %8010 = vmatmul.mubr.f32.gmra.mxu1 %v27357_v19  ;;  %v27510_v46 = vand.u32 4294901760, %v7580_v26  ;;  %v27547_v36 = vsub.f32 %v25096_v3, %v27512_v29  ;;  %v32087_v32 = vand.u32 4294901760, %v27518_v47 }
 0x352   : > { %v27507_v15 = vpop.f32.mrf.mxu0  ;;  %8107 = vmatmul.mubr.f32.gmra.mxu0 %v27286_v54  ;;  %v7583_v22 = vsel %vm2530_vm3, %v25100_v40, 0  ;;  %8190 = vmatprep.mubr.f32.mxu1 %v32099_v2  ;;  %v32089_v48 = vand.u32 4294901760, %v27534_v41  ;;  %v8363_v33 = vsub.f32 %v27531_v9, %v32088_v6 }
 0x353   : > { %v27522_v56 = vpop.f32.mrf.mxu1  ;;  %v27524_v13 = vand.u32 4294901760, %v7583_v22  ;;  %8112 = vmatprep.mubr.f32.mxu0 %v32099_v2  ;;  %v27528_v17 = vsub.f32 %v7580_v26, %v27510_v46  ;;  %v32090_v51 = vand.u32 4294901760, %v27547_v36  ;;  %v8357_v50 = vsub.f32 %v27518_v47, %v32087_v32 }
 0x354   : > { %v27520_v10 = vpop.f32.mrf.mxu0  ;;  %v6515_v26 = vadd.f32 %v27477_v38, %v27441_v43  ;;  %v8369_v32 = vsub.f32 %v27534_v41, %v32089_v48  ;;  %v6508_v38 = vadd.f32 %v27461_v53, %v27427_v4 }
 0x355   : > { %v27538_v45 = vpop.f32.mrf.mxu1  ;;  %8239 = vmatprep.subr.mxu0 %v27524_v13  ;;  %8192 = vmatmul.mubr.f32.vlgmr.msra.gmra.mxu1 %v27267_v0  ;;  %v27543_v55 = vsub.f32 %v7583_v22, %v27524_v13  ;;  %v8350_v11 = vand.u32 4294901760, %v27528_v17  ;;  %v8375_v43 = vsub.f32 %v27547_v36, %v32090_v51  ;;  %v8364_v51 = vand.u32 4294901760, %v8363_v33 }
 0x356   : > { %v27536_v27 = vpop.f32.mrf.mxu0  ;;  %8241 = vmatpush1.msra.mxu0 %v27510_v46  ;;  %8197 = vmatprep.mubr.f32.mxu1 %v32099_v2  ;;  %v6615_v6 = vadd.f32 %v27496_v42, %v6515_v26  ;;  %v6607_v4 = vadd.f32 %v27473_v59, %v6508_v38  ;;  %v8370_v42 = vand.u32 4294901760, %v8369_v32  ;;  %v6524_v32 = vadd.f32 %v27505_v25, %v27468_v8 }
 0x357   : > { %v6711_v18 = vpop.f32.mrf.mxu1  ;;  %8114 = vmatmul.mubr.f32.gmra.mxu0 %v27300_v63  ;;  %8243 = vmatprep.subr.mxu0 %v27492_v12  ;;  %v8344_v20 = vand.u32 4294901760, %v27543_v55  ;;  %v8351_v14 = vsub.f32 %v27528_v17, %v8350_v11  ;;  %v8376_v33 = vand.u32 4294901760, %v8375_v43 }
 0x358   : > { %v27556_v24 = vpop.f32.mrf.mxu0  ;;  %8245 = vmatpush1.msra.mxu0 %v27500_v28  ;;  %8282 = vmatprep.mubr.f32.mxu0 %v32099_v2  ;;  %v6703_v59 = vadd.f32 %v27522_v56, %v6607_v4 }
 0x359   : > { %v6713_v5 = vpop.f32.mrf.mxu1  ;;  %8247 = vmatprep.subr.mxu0 %v27503_v57  ;;  %8199 = vmatmul.mubr.f32.gmra.mxu1 %v27286_v54  ;;  %v8345_v60 = vsub.f32 %v27543_v55, %v8344_v20  ;;  %v8352_v22 = vand.u32 4294901760, %v8351_v14  ;;  %v6517_v14 = vadd.f32 %v27485_v21, %v27448_v58  ;;  %v6712_v58 = vadd.f32 %v6711_v18, %v6615_v6 }
 0x35a   : > { %v6812_v30 = vpop.f32.mrf.mxu0  ;;  %8249 = vmatpush1.msra.mxu0 %v27512_v29  ;;  %8204 = vmatprep.mubr.f32.mxu1 %v32099_v2 }
 0x35b   : > { %v6720_v39 = vpop.f32.mrf.mxu1  ;;  %8288 = vmatmul.mubr.f32.vlgmr.msra.gmra.mxu0 %v27362_v31  ;;  %8460 = vmatprep.subr.mxu0 %v27543_v55  ;;  %v8346_v3 = vand.u32 4294901760, %v8345_v60  ;;  %v6510_v55 = vadd.f32 %v27470_v23, %v27433_v44  ;;  %v8358_v44 = vand.u32 4294901760, %v8357_v50  ;;  %v6617_v53 = vadd.f32 %v27507_v15, %v6517_v14 }
 0x35c   : > { %v6817_v40 = vpop.f32.mrf.mxu0  ;;  %8463 = vmatpush1.msra.mxu0 %v27528_v17  ;;  %8293 = vmatprep.mubr.f32.mxu0 %v32099_v2  ;;  %v6522_v50 = vadd.f32 %v27494_v35, %v27459_v37  ;;  %v32191_v17 = vand.u32 4294901760, %v27534_v41 }
 0x35d   : > { %v6722_v60 = vpop.f32.mrf.mxu1  ;;  %8347 = vmatprep.subr.mxu1 %v8346_v3  ;;  %8466 = vmatprep.subr.mxu0 %v27518_v47  ;;  %v6609_v23 = vadd.f32 %v27481_v61, %v6510_v55  ;;  %v6818_v15 = vadd.f32 %v6817_v40, %v6712_v58 }
 0x35e   : > { %v6819_v48 = vpop.f32.mrf.mxu0  ;;  %8353 = vmatpush1.msra.mxu1 %v8352_v22  ;;  %8469 = vmatpush1.msra.mxu0 %v27531_v9  ;;  %v6714_v22 = vadd.f32 %v6713_v5, %v6617_v53  ;;  %v6623_v6 = vadd.f32 %v27520_v10, %v6522_v50 }
 0x35f   : > { %v6902_v3 = vpop.f32.mrf.mxu1  ;;  %8206 = vmatmul.mubr.f32.gmra.mxu1 %v27300_v63  ;;  %8299 = vmatmul.mubr.f32.gmra.mxu0 %v27390_v16  ;;  %v6705_v61 = vadd.f32 %v27538_v45, %v6609_v23  ;;  %v6811_v45 = vadd.f32 %v27556_v24, %v6703_v59  ;;  %v32189_v23 = vand.u32 4294901760, %v27518_v47  ;;  %v32192_v47 = vand.u32 4294901760, %v27547_v36 }
 0x360   : > { %v6824_v21 = vpop.f32.mrf.mxu0  ;;  %8359 = vmatprep.subr.mxu1 %v8358_v44  ;;  %8472 = vmatprep.subr.mxu0 %v27534_v41  ;;  %v6721_v8 = vadd.f32 %v6720_v39, %v6623_v6 }
 0x361   : > { %v6904_v26 = vpop.f32.mrf.mxu1  ;;  %8365 = vmatpush1.msra.mxu1 %v8364_v51  ;;  %8475 = vmatpush1.msra.mxu0 %v27547_v36  ;;  %v6813_v37 = vadd.f32 %v6812_v30, %v6705_v61  ;;  %v6820_v51 = vadd.f32 %v6819_v48, %v6714_v22  ;;  %v6903_v5 = vadd.f32 %v6902_v3, %v6811_v45  ;;  %v32190_v3 = vand.u32 4294901760, %v27531_v9 }
 0x362   : > { %v6826_v18 = vpop.f32.mrf.mxu0  ;;  %8371 = vmatprep.subr.mxu1 %v8370_v42  ;;  %8660 = vmatprep.subr.mxu0 %v8344_v20  ;;  %v6625_v20 = vadd.f32 %v27536_v27, %v6524_v32  ;;  %v6825_v40 = vadd.f32 %v6824_v21, %v6721_v8 }
 0x363   : > { %v6909_v35 = vpop.f32.mrf.mxu1  ;;  %8304 = vmatprep.mubr.f32.mxu0 %v32099_v2  ;;  %8377 = vmatpush1.msra.mxu1 %v8376_v33  ;;  %v6905_v25 = vadd.f32 %v6904_v26, %v6813_v37 }
 0x364   : > { %v6910_v55 = vadd.f32 %v6909_v35, %v6818_v15  ;;  %v27613_v56 = vpop.f32.mrf.mxu0  ;;  %8410 = vmatprep.mubr.f32.mxu1 %v32099_v2  ;;  %8310 = vmatmul.mubr.f32.gmra.mxu0 %v27410_v62  ;;  %v6723_v48 = vadd.f32 %v6722_v60, %v6625_v20 }
 0x365   : > { %v6911_v10 = vpop.f32.mrf.mxu1  ;;  %8412 = vmatmul.mubr.f32.vlgmr.msra.gmra.mxu1 %v27267_v0  ;;  %8560 = vmatprep.subr.mxu1 %v27524_v13 }
 0x366   : > { %v6912_v30 = vadd.f32 %v6911_v10, %v6820_v51  ;;  %v27620_v24 = vpop.f32.mrf.mxu0  ;;  %8562 = vmatpush1.msra.mxu1 %v27510_v46  ;;  %8417 = vmatprep.mubr.f32.mxu1 %v32099_v2  ;;  %25101 = vtanh.f32 %v6910_v55  ;;  %v6827_v39 = vadd.f32 %v6826_v18, %v6723_v48 }
 0x367   : > { %8564 = vmatprep.subr.mxu1 %v27492_v12  ;;  %8508 = vmatprep.mubr.f32.mxu0 %v32099_v2 }
 0x368   : > { %25103 = vtanh.f32 %v6912_v30  ;;  %v6916_v27 = vpop.f32.mrf.mxu1  ;;  %8566 = vmatpush1.msra.mxu1 %v27500_v28  ;;  %8511 = vmatmul.mubr.f32.vlgmr.msra.gmra.mxu0 %v27282_v52 }
 0x369   : > { %25105 = vtanh.f32 %v6905_v25  ;;  %v6917_v43 = vadd.f32 %v6916_v27, %v6825_v40  ;;  %v27628_v38 = vpop.f32.mrf.mxu0  ;;  %8419 = vmatmul.mubr.f32.gmra.mxu1 %v27286_v54  ;;  %8568 = vmatprep.subr.mxu1 %v27503_v57 }
 0x36a   : > { %25107 = vtanh.f32 %v6903_v5  ;;  %v6918_v60 = vpop.f32.mrf.mxu1  ;;  %8664 = vmatpush1.msra.mxu0 %v8350_v11  ;;  %8570 = vmatpush1.msra.mxu1 %v27512_v29 }
 0x36b   : > { %25109 = vtanh.f32 %v6917_v43  ;;  %v6919_v14 = vadd.f32 %v6918_v60, %v6827_v39  ;;  %v27635_v44 = vpop.f32.mrf.mxu0  ;;  %8668 = vmatprep.subr.mxu0 %v32189_v23  ;;  %8762 = vmatprep.subr.mxu1 %v27524_v13 }
 0x36c   : > { %8672 = vmatpush1.msra.mxu0 %v32190_v3  ;;  %8424 = vmatprep.mubr.f32.mxu1 %v32099_v2 }
 0x36d   : > { %25111 = vtanh.f32 %v6919_v14  ;;  %8516 = vmatprep.mubr.f32.mxu0 %v32099_v2  ;;  %8676 = vmatprep.subr.mxu0 %v32191_v17 }
 0x36e   : > { %v27646_v11 = vpop.f32.mrf.mxu0  ;;  %v27648_v4 = vpop.f32.mrf.mxu1  ;;  %8426 = vmatmul.mubr.f32.gmra.mxu1 %v27300_v63  ;;  %8519 = vmatmul.mubr.f32.gmra.mxu0 %v27305_v1 }
 0x36f   : > { %8680 = vmatpush1.msra.mxu0 %v32192_v47  ;;  %8524 = vmatprep.mubr.f32.mxu0 %v32099_v2 }
 0x370   : > { %v27655_v13 = vpop.f32.mrf.mxu0  ;;  %v27657_v9 = vpop.f32.mrf.mxu1  ;;  %8603 = vmatprep.mubr.f32.mxu1 %v32099_v2 }
 0x372   : > { %v27660_v41 = vpop.f32.mrf.mxu0  ;;  %8527 = vmatmul.mubr.f32.gmra.mxu0 %v27330_v49  ;;  %8607 = vmatmul.mubr.f32.vlgmr.msra.gmra.mxu1 %v27298_v7 }
 0x373   : > { %v27664_v53 = vpop.f32.mrf.mxu1  ;;  %8764 = vmatpush1.msra.mxu1 %v27510_v46  ;;  %8612 = vmatprep.mubr.f32.mxu1 %v32099_v2  ;;  %v25102_v36 = vpop.eup %25101 }
 0x374   : > { %v27668_v58 = vpop.f32.mrf.mxu0  ;;  %8766 = vmatprep.subr.mxu1 %v27492_v12  ;;  %8713 = vmatprep.mubr.f32.mxu0 %v32099_v2 }
 0x375   : > { %v25104_v21 = vpop.eup %25103  ;;  %v27672_v42 = vpop.f32.mrf.mxu1  ;;  %8768 = vmatpush1.msra.mxu1 %v27500_v28  ;;  %v27687_v28 = vand.u32 4294901760, %v25102_v36 }
 0x376   : > { %v25106_v50 = vpop.eup %25105  ;;  %8770 = vmatprep.subr.mxu1 %v27503_v57  ;;  %8616 = vmatmul.mubr.f32.gmra.mxu1 %v27338_v34  ;;  %v27679_v61 = vand.u32 4294901760, %v25104_v21 }
 0x377   : > { %v25108_v46 = vpop.eup %25107  ;;  %8715 = vmatmul.mubr.f32.vlgmr.msra.gmra.mxu0 %v27267_v0  ;;  %8772 = vmatpush1.msra.mxu1 %v27512_v29  ;;  %v27690_v59 = vand.u32 4294901760, %v25106_v50  ;;  %v27718_v20 = vsub.f32 %v25102_v36, %v27687_v28  ;;  %v7125_v36 = vadd.f32 %v27657_v9, %v27620_v24  ;;  %v7130_v24 = vadd.f32 %v27664_v53, %v27628_v38 }
 0x378   : > { %v25110_v12 = vpop.eup %25109  ;;  %v27681_v26 = vpop.f32.mrf.mxu1  ;;  %8621 = vmatprep.mubr.f32.mxu1 %v32099_v2  ;;  %8720 = vmatprep.mubr.f32.mxu0 %v32099_v2  ;;  %v27699_v32 = vand.u32 4294901760, %v25108_v46  ;;  %v27705_v37 = vsub.f32 %v25104_v21, %v27679_v61  ;;  %v7132_v53 = vadd.f32 %v27672_v42, %v27635_v44 }
 0x379   : > { %v27683_v33 = vpop.f32.mrf.mxu0  ;;  %v7586_v57 = vsel %vm2530_vm3, %v25110_v12, 0  ;;  %v27721_v8 = vsub.f32 %v25106_v50, %v27690_v59  ;;  %v8977_v43 = vand.u32 4294901760, %v27718_v20  ;;  %v7224_v9 = vadd.f32 %v27668_v58, %v7125_v36 }
 0x37a   : > { %v25112_v22 = vpop.eup %25111  ;;  %v27692_v15 = vpop.f32.mrf.mxu1  ;;  %8625 = vmatmul.mubr.f32.gmra.mxu1 %v27357_v19  ;;  %v27697_v18 = vand.u32 4294901760, %v7586_v57  ;;  %v27732_v48 = vsub.f32 %v25108_v46, %v27699_v32  ;;  %v32091_v40 = vand.u32 4294901760, %v27705_v37  ;;  %v7230_v58 = vadd.f32 %v27683_v33, %v7130_v24 }
 0x37b   : > { %v27694_v29 = vpop.f32.mrf.mxu0  ;;  %8722 = vmatmul.mubr.f32.gmra.mxu0 %v27286_v54  ;;  %v7589_v6 = vsel %vm2530_vm3, %v25112_v22, 0  ;;  %8805 = vmatprep.mubr.f32.mxu1 %v32099_v2  ;;  %v32093_v23 = vand.u32 4294901760, %v27721_v8 }
 0x37c   : > { %v27709_v45 = vpop.f32.mrf.mxu1  ;;  %v27711_v51 = vand.u32 4294901760, %v7589_v6  ;;  %8727 = vmatprep.mubr.f32.mxu0 %v32099_v2  ;;  %v27715_v55 = vsub.f32 %v7586_v57, %v27697_v18  ;;  %v32094_v47 = vand.u32 4294901760, %v27732_v48  ;;  %v8972_v50 = vsub.f32 %v27705_v37, %v32091_v40 }
 0x37d   : > { %v27707_v35 = vpop.f32.mrf.mxu0  ;;  %v8978_v57 = vsub.f32 %v27718_v20, %v8977_v43  ;;  %v8984_v40 = vsub.f32 %v27721_v8, %v32093_v23  ;;  %v7232_v44 = vadd.f32 %v27694_v29, %v7132_v53  ;;  %v32195_v53 = vand.u32 4294901760, %v27721_v8 }
 0x37e   : > { %v7319_v10 = vpop.f32.mrf.mxu1  ;;  %8854 = vmatprep.subr.mxu0 %v27711_v51  ;;  %8807 = vmatmul.mubr.f32.vlgmr.msra.gmra.mxu1 %v27267_v0  ;;  %v27728_v5 = vsub.f32 %v7589_v6, %v27711_v51  ;;  %v32092_v30 = vand.u32 4294901760, %v27715_v55  ;;  %v8990_v38 = vsub.f32 %v27732_v48, %v32094_v47  ;;  %v8973_v23 = vand.u32 4294901760, %v8972_v50 }
 0x37f   : > { %v27723_v25 = vpop.f32.mrf.mxu0  ;;  %8856 = vmatpush1.msra.mxu0 %v27697_v18  ;;  %8812 = vmatprep.mubr.f32.mxu1 %v32099_v2  ;;  %v8979_v47 = vand.u32 4294901760, %v8978_v57 }
 0x380   : > { %v7326_v27 = vpop.f32.mrf.mxu1  ;;  %8729 = vmatmul.mubr.f32.gmra.mxu0 %v27300_v63  ;;  %8858 = vmatprep.subr.mxu0 %v27679_v61  ;;  %v8959_v39 = vand.u32 4294901760, %v27728_v5  ;;  %v8966_v14 = vsub.f32 %v27715_v55, %v32092_v30  ;;  %v8991_v57 = vand.u32 4294901760, %v8990_v38  ;;  %v32194_v38 = vand.u32 4294901760, %v27705_v37 }
 0x381   : > { %v27741_v60 = vpop.f32.mrf.mxu0  ;;  %8860 = vmatpush1.msra.mxu0 %v27687_v28  ;;  %8897 = vmatprep.mubr.f32.mxu0 %v32099_v2  ;;  %v7327_v42 = vadd.f32 %v7326_v27, %v7230_v58 }
 0x382   : > { %v7328_v3 = vpop.f32.mrf.mxu1  ;;  %8862 = vmatprep.subr.mxu0 %v27690_v59  ;;  %8814 = vmatmul.mubr.f32.gmra.mxu1 %v27286_v54  ;;  %v8960_v17 = vsub.f32 %v27728_v5, %v8959_v39  ;;  %v8967_v6 = vand.u32 4294901760, %v8966_v14  ;;  %v7320_v14 = vadd.f32 %v7319_v10, %v7224_v9  ;;  %v8985_v10 = vand.u32 4294901760, %v8984_v40 }
 0x383   : > { %v7427_v21 = vpop.f32.mrf.mxu0  ;;  %8864 = vmatpush1.msra.mxu0 %v27699_v32  ;;  %8819 = vmatprep.mubr.f32.mxu1 %v32099_v2  ;;  %v7329_v29 = vadd.f32 %v7328_v3, %v7232_v44 }
 0x384   : > { %v7335_v46 = vpop.f32.mrf.mxu1  ;;  %8903 = vmatmul.mubr.f32.vlgmr.msra.gmra.mxu0 %v27362_v31  ;;  %9075 = vmatprep.subr.mxu0 %v27728_v5  ;;  %v8961_v12 = vand.u32 4294901760, %v8960_v17  ;;  %v7123_v17 = vadd.f32 %v27648_v4, %v27613_v56  ;;  %v7137_v4 = vadd.f32 %v27681_v26, %v27646_v11  ;;  %v7428_v33 = vadd.f32 %v7427_v21, %v7320_v14 }
 0x385   : > { %v7432_v22 = vpop.f32.mrf.mxu0  ;;  %9078 = vmatpush1.msra.mxu0 %v27715_v55  ;;  %8908 = vmatprep.mubr.f32.mxu0 %v32099_v2 }
 0x386   : > { %v7337_v30 = vpop.f32.mrf.mxu1  ;;  %8962 = vmatprep.subr.mxu1 %v8961_v12  ;;  %9081 = vmatprep.subr.mxu0 %v27705_v37  ;;  %v7222_v56 = vadd.f32 %v27660_v41, %v7123_v17  ;;  %v7139_v41 = vadd.f32 %v27692_v15, %v27655_v13  ;;  %v7238_v50 = vadd.f32 %v27707_v35, %v7137_v4  ;;  %v32193_v17 = vand.u32 4294901760, %v27715_v55 }
 0x387   : > { %v7434_v36 = vpop.f32.mrf.mxu0  ;;  %8968 = vmatpush1.msra.mxu1 %v8967_v6  ;;  %9084 = vmatpush1.msra.mxu0 %v27718_v20  ;;  %v7433_v27 = vadd.f32 %v7432_v22, %v7327_v42  ;;  %v32196_v37 = vand.u32 4294901760, %v27732_v48 }
 0x388   : > { %v7517_v12 = vpop.f32.mrf.mxu1  ;;  %8821 = vmatmul.mubr.f32.gmra.mxu1 %v27300_v63  ;;  %8914 = vmatmul.mubr.f32.gmra.mxu0 %v27390_v16  ;;  %v7318_v11 = vadd.f32 %v27709_v45, %v7222_v56  ;;  %v7240_v40 = vadd.f32 %v27723_v25, %v7139_v41  ;;  %v7336_v35 = vadd.f32 %v7335_v46, %v7238_v50 }
 0x389   : > { %8974 = vmatprep.subr.mxu1 %v8973_v23  ;;  %9087 = vmatprep.subr.mxu0 %v27721_v8  ;;  %v7439_v26 = vpop.f32.mrf.mxu0  ;;  %v7435_v45 = vadd.f32 %v7434_v36, %v7329_v29 }
 0x38a   : > { %v7519_v24 = vpop.f32.mrf.mxu1  ;;  %8980 = vmatpush1.msra.mxu1 %v8979_v47  ;;  %9090 = vmatpush1.msra.mxu0 %v27732_v48  ;;  %v7426_v13 = vadd.f32 %v27741_v60, %v7318_v11  ;;  %v7338_v25 = vadd.f32 %v7337_v30, %v7240_v40  ;;  %v7440_v5 = vadd.f32 %v7439_v26, %v7336_v35 }
 0x38b   : > { %v7520_v21 = vadd.f32 %v7519_v24, %v7428_v33  ;;  %8986 = vmatprep.subr.mxu1 %v8985_v10  ;;  %9275 = vmatprep.subr.mxu0 %v8959_v39  ;;  %v7441_v47 = vpop.f32.mrf.mxu0 }
 0x38c   : > { %v7524_v15 = vpop.f32.mrf.mxu1  ;;  %8919 = vmatprep.mubr.f32.mxu0 %v32099_v2  ;;  %8992 = vmatpush1.msra.mxu1 %v8991_v57  ;;  %v7518_v3 = vadd.f32 %v7517_v12, %v7426_v13  ;;  %v7442_v46 = vadd.f32 %v7441_v47, %v7338_v25 }
 0x38d   : > { %v7525_v23 = vadd.f32 %v7524_v15, %v7433_v27  ;;  %9025 = vmatprep.mubr.f32.mxu1 %v32099_v2  ;;  %8925 = vmatmul.mubr.f32.gmra.mxu0 %v27410_v62  ;;  %25113 = vtanh.f32 %v7520_v21 }
 0x38e   : > { %v7526_v9 = vpop.f32.mrf.mxu1  ;;  %9027 = vmatmul.mubr.f32.vlgmr.msra.gmra.mxu1 %v27267_v0  ;;  %9175 = vmatprep.subr.mxu1 %v27711_v51 }
 0x38f   : > { %v7527_v39 = vadd.f32 %v7526_v9, %v7435_v45  ;;  %9177 = vmatpush1.msra.mxu1 %v27697_v18  ;;  %9032 = vmatprep.mubr.f32.mxu1 %v32099_v2  ;;  %25115 = vtanh.f32 %v7525_v23 }
 0x390   : > { %v7531_v60 = vpop.f32.mrf.mxu1  ;;  %9179 = vmatprep.subr.mxu1 %v27679_v61  ;;  %9123 = vmatprep.mubr.f32.mxu0 %v32099_v2 }
 0x391   : > { %25117 = vtanh.f32 %v7527_v39  ;;  %v7532_v22 = vadd.f32 %v7531_v60, %v7440_v5  ;;  %9181 = vmatpush1.msra.mxu1 %v27687_v28  ;;  %9126 = vmatmul.mubr.f32.vlgmr.msra.gmra.mxu0 %v27282_v52 }
 0x392   : > { %25119 = vtanh.f32 %v7518_v3  ;;  %v7533_v30 = vpop.f32.mrf.mxu1  ;;  %9034 = vmatmul.mubr.f32.gmra.mxu1 %v27286_v54  ;;  %9183 = vmatprep.subr.mxu1 %v27690_v59 }
 0x393   : > { %25121 = vtanh.f32 %v7532_v22  ;;  %v7534_v6 = vadd.f32 %v7533_v30, %v7442_v46  ;;  %9279 = vmatpush1.msra.mxu0 %v32193_v17  ;;  %9185 = vmatpush1.msra.mxu1 %v27699_v32 }
 0x394   : > { %9283 = vmatprep.subr.mxu0 %v32194_v38  ;;  %9377 = vmatprep.subr.mxu1 %v27711_v51 }
 0x395   : > { %25123 = vtanh.f32 %v7534_v6  ;;  %9287 = vmatpush1.msra.mxu0 %v8977_v43  ;;  %9039 = vmatprep.mubr.f32.mxu1 %v32099_v2 }
 0x396   : > { %9131 = vmatprep.mubr.f32.mxu0 %v32099_v2  ;;  %9291 = vmatprep.subr.mxu0 %v32195_v53 }
 0x397   : > { %9041 = vmatmul.mubr.f32.gmra.mxu1 %v27300_v63  ;;  %9134 = vmatmul.mubr.f32.gmra.mxu0 %v27305_v1 }
 0x398   : > { %9295 = vmatpush1.msra.mxu0 %v32196_v37  ;;  %9139 = vmatprep.mubr.f32.mxu0 %v32099_v2 }
 0x399   : > { %9218 = vmatprep.mubr.f32.mxu1 %v32099_v2 }
 0x39a   : > { %v25114_v51 = vpop.eup %25113 }
 0x39b   : > { %9142 = vmatmul.mubr.f32.gmra.mxu0 %v27330_v49  ;;  %9222 = vmatmul.mubr.f32.vlgmr.msra.gmra.mxu1 %v27298_v7 }
 0x39c   : > { %9379 = vmatpush1.msra.mxu1 %v27697_v18  ;;  %9227 = vmatprep.mubr.f32.mxu1 %v32099_v2  ;;  %v25116_v55 = vpop.eup %25115 }
 0x39d   : > { %9381 = vmatprep.subr.mxu1 %v27679_v61  ;;  %9328 = vmatprep.mubr.f32.mxu0 %v32099_v2  ;;  %v27845_v18 = vand.u32 4294901760, %v25116_v55 }
 0x39e   : > { %v25118_v20 = vpop.eup %25117  ;;  %9383 = vmatpush1.msra.mxu1 %v27687_v28  ;;  %v27850_v28 = vand.u32 4294901760, %v25114_v51 }
 0x39f   : > { %v25120_v8 = vpop.eup %25119  ;;  %9385 = vmatprep.subr.mxu1 %v27690_v59  ;;  %9231 = vmatmul.mubr.f32.gmra.mxu1 %v27338_v34  ;;  %v27841_v48 = vand.u32 4294901760, %v25118_v20  ;;  %v27869_v12 = vsub.f32 %v25116_v55, %v27845_v18 }
 0x3a0   : > { %v25122_v43 = vpop.eup %25121  ;;  %9330 = vmatmul.mubr.f32.vlgmr.msra.gmra.mxu0 %v27267_v0  ;;  %9387 = vmatpush1.msra.mxu1 %v27699_v32  ;;  %v27856_v36 = vand.u32 4294901760, %v25120_v8  ;;  %v27873_v44 = vsub.f32 %v25114_v51, %v27850_v28 }
 0x3a1   : > { %9236 = vmatprep.mubr.f32.mxu1 %v32099_v2  ;;  %9335 = vmatprep.mubr.f32.mxu0 %v32099_v2  ;;  %v7592_v61 = vsel %vm2530_vm3, %v25122_v43, 0  ;;  %v27859_v32 = vsub.f32 %v25118_v20, %v27841_v48  ;;  %v9592_v11 = vand.u32 4294901760, %v27869_v12 }
 0x3a2   : > { %v25124_v59 = vpop.eup %25123  ;;  %v27852_v58 = vand.u32 4294901760, %v7592_v61  ;;  %v27882_v41 = vsub.f32 %v25120_v8, %v27856_v36  ;;  %v9598_v24 = vand.u32 4294901760, %v27873_v44 }
 0x3a3   : > { %9240 = vmatmul.mubr.f32.gmra.mxu1 %v27357_v19  ;;  %v7595_v14 = vsel %vm2530_vm3, %v25124_v59, 0  ;;  %v9586_v10 = vand.u32 4294901760, %v27859_v32  ;;  %v9593_v40 = vsub.f32 %v27869_v12, %v9592_v11 }
 0x3a4   : > { %9337 = vmatmul.mubr.f32.gmra.mxu0 %v27286_v54  ;;  %v27862_v56 = vand.u32 4294901760, %v7595_v14  ;;  %9420 = vmatprep.mubr.f32.mxu1 %v32099_v2  ;;  %v27866_v4 = vsub.f32 %v7592_v61, %v27852_v58  ;;  %v9604_v27 = vand.u32 4294901760, %v27882_v41  ;;  %v9599_v15 = vsub.f32 %v27873_v44, %v9598_v24 }
 0x3a5   : > { %9342 = vmatprep.mubr.f32.mxu0 %v32099_v2  ;;  %v9587_v29 = vsub.f32 %v27859_v32, %v9586_v10  ;;  %v9594_v45 = vand.u32 4294901760, %v9593_v40 }
 0x3a6   : > { %9469 = vmatprep.subr.mxu0 %v27862_v56  ;;  %v9573_v42 = vsub.f32 %v7595_v14, %v27862_v56  ;;  %v9580_v33 = vand.u32 4294901760, %v27866_v4  ;;  %v9600_v23 = vand.u32 4294901760, %v9599_v15 }
 0x3a7   : > { %9471 = vmatpush1.msra.mxu0 %v27852_v58  ;;  %9422 = vmatmul.mubr.f32.vlgmr.msra.gmra.mxu1 %v27267_v0  ;;  %v9588_v35 = vand.u32 4294901760, %v9587_v29 }
 0x3a8   : > { %9344 = vmatmul.mubr.f32.gmra.mxu0 %v27300_v63  ;;  %9473 = vmatprep.subr.mxu0 %v27841_v48  ;;  %v9574_v50 = vand.u32 4294901760, %v9573_v42  ;;  %v9581_v26 = vsub.f32 %v27866_v4, %v9580_v33 }
 0x3a9   : > { %9475 = vmatpush1.msra.mxu0 %v27845_v18  ;;  %9427 = vmatprep.mubr.f32.mxu1 %v32099_v2 }
 0x3aa   : > { %9477 = vmatprep.subr.mxu0 %v27850_v28  ;;  %9512 = vmatprep.mubr.f32.mxu0 %v32099_v2  ;;  %v9575_v57 = vsub.f32 %v9573_v42, %v9574_v50  ;;  %v9582_v13 = vand.u32 4294901760, %v9581_v26 }
 0x3ab   : > { %9479 = vmatpush1.msra.mxu0 %v27856_v36  ;;  %9429 = vmatmul.mubr.f32.gmra.mxu1 %v27286_v54 }
 0x3ac   : > { %9518 = vmatmul.mubr.f32.vlgmr.msra.gmra.mxu0 %v27362_v31  ;;  %9690 = vmatprep.subr.mxu0 %v9573_v42  ;;  %v9576_v21 = vand.u32 4294901760, %v9575_v57  ;;  %v9605_v31 = vsub.f32 %v27882_v41, %v9604_v27 }
 0x3ad   : > { %9693 = vmatpush1.msra.mxu0 %v27866_v4  ;;  %9434 = vmatprep.mubr.f32.mxu1 %v32099_v2 }
 0x3ae   : > { %9577 = vmatprep.subr.mxu1 %v9576_v21  ;;  %9696 = vmatprep.subr.mxu0 %v27859_v32  ;;  %v9606_v3 = vand.u32 4294901760, %v9605_v31 }
 0x3af   : > { %9523 = vmatprep.mubr.f32.mxu0 %v32099_v2  ;;  %9583 = vmatpush1.msra.mxu1 %v9582_v13 }
 0x3b0   : > { %9699 = vmatpush1.msra.mxu0 %v27869_v12  ;;  %9436 = vmatmul.mubr.f32.gmra.mxu1 %v27300_v63 }
 0x3b1   : > { %9529 = vmatmul.mubr.f32.gmra.mxu0 %v27390_v16  ;;  %9589 = vmatprep.subr.mxu1 %v9588_v35 }
 0x3b2   : > { %9702 = vmatprep.subr.mxu0 %v27873_v44  ;;  %9595 = vmatpush1.msra.mxu1 %v9594_v45 }
 0x3b3   : > { %9705 = vmatpush1.msra.mxu0 %v27882_v41  ;;  %9601 = vmatprep.subr.mxu1 %v9600_v23 }
 0x3b4   : > { %9890 = vmatprep.subr.mxu0 %v9574_v50  ;;  %9534 = vmatprep.mubr.f32.mxu0 %v32099_v2 }
 0x3b5   : > { %9607 = vmatpush1.msra.mxu1 %v9606_v3  ;;  %9640 = vmatprep.mubr.f32.mxu1 %v32099_v2 }
 0x3b6   : > { %9540 = vmatmul.mubr.f32.gmra.mxu0 %v27410_v62  ;;  %9642 = vmatmul.mubr.f32.vlgmr.msra.gmra.mxu1 %v27267_v0 }
 0x3b7   : > { %9790 = vmatprep.subr.mxu1 %v27862_v56  ;;  %9647 = vmatprep.mubr.f32.mxu1 %v32099_v2 }
 0x3b8   : > { %9792 = vmatpush1.msra.mxu1 %v27852_v58  ;;  %9738 = vmatprep.mubr.f32.mxu0 %v32099_v2 }
 0x3b9   : > { %9794 = vmatprep.subr.mxu1 %v27841_v48 }
 0x3ba   : > { %9796 = vmatpush1.msra.mxu1 %v27845_v18  ;;  %9741 = vmatmul.mubr.f32.vlgmr.msra.gmra.mxu0 %v27282_v52 }
 0x3bb   : > { %9649 = vmatmul.mubr.f32.gmra.mxu1 %v27286_v54  ;;  %9798 = vmatprep.subr.mxu1 %v27850_v28 }
 0x3bc   : > { %9894 = vmatpush1.msra.mxu0 %v9580_v33  ;;  %9800 = vmatpush1.msra.mxu1 %v27856_v36 }
 0x3bd   : > { %9898 = vmatprep.subr.mxu0 %v9586_v10  ;;  %9992 = vmatprep.subr.mxu1 %v27862_v56 }
 0x3be   : > { %9902 = vmatpush1.msra.mxu0 %v9592_v11  ;;  %9654 = vmatprep.mubr.f32.mxu1 %v32099_v2 }
 0x3bf   : > { %9746 = vmatprep.mubr.f32.mxu0 %v32099_v2  ;;  %9906 = vmatprep.subr.mxu0 %v9598_v24 }
 0x3c0   : > { %9656 = vmatmul.mubr.f32.gmra.mxu1 %v27300_v63  ;;  %9749 = vmatmul.mubr.f32.gmra.mxu0 %v27305_v1 }
 0x3c1   : > { %9910 = vmatpush1.msra.mxu0 %v9604_v27  ;;  %9754 = vmatprep.mubr.f32.mxu0 %v32099_v2 }
 0x3c2   : > { %9833 = vmatprep.mubr.f32.mxu1 %v32099_v2 }
 0x3c4   : > { %9757 = vmatmul.mubr.f32.gmra.mxu0 %v27330_v49  ;;  %9837 = vmatmul.mubr.f32.vlgmr.msra.gmra.mxu1 %v27298_v7 }
 0x3c5   : > { %9994 = vmatpush1.msra.mxu1 %v27852_v58  ;;  %9842 = vmatprep.mubr.f32.mxu1 %v32099_v2 }
 0x3c6   : > { %9996 = vmatprep.subr.mxu1 %v27841_v48  ;;  %9943 = vmatprep.mubr.f32.mxu0 %v32099_v2 }
 0x3c7   : > { %9998 = vmatpush1.msra.mxu1 %v27845_v18 }
 0x3c8   : > { %10000 = vmatprep.subr.mxu1 %v27850_v28  ;;  %9846 = vmatmul.mubr.f32.gmra.mxu1 %v27338_v34 }
 0x3c9   : > { %9945 = vmatmul.mubr.f32.vlgmr.msra.gmra.mxu0 %v27267_v0  ;;  %10002 = vmatpush1.msra.mxu1 %v27856_v36 }
 0x3ca   : > { %9851 = vmatprep.mubr.f32.mxu1 %v32099_v2  ;;  %9950 = vmatprep.mubr.f32.mxu0 %v32099_v2 }
 0x3cc   : > { %9855 = vmatmul.mubr.f32.gmra.mxu1 %v27357_v19 }
 0x3cd   : > { %9952 = vmatmul.mubr.f32.gmra.mxu0 %v27286_v54  ;;  %10035 = vmatprep.mubr.f32.mxu1 %v32099_v2 }
 0x3ce   : > { %9957 = vmatprep.mubr.f32.mxu0 %v32099_v2 }
 0x3d0   : > { %10037 = vmatmul.mubr.f32.vlgmr.msra.gmra.mxu1 %v27267_v0 }
 0x3d1   : > { %9959 = vmatmul.mubr.f32.gmra.mxu0 %v27300_v63  ;;  %10042 = vmatprep.mubr.f32.mxu1 %v32099_v2 }
 0x3d2   : > { %10188 = vmatprep.mubr.f32.mxu0 %v32099_v2 }
 0x3d4   : > { %10044 = vmatmul.mubr.f32.gmra.mxu1 %v27286_v54 }
 0x3d5   : > { %10049 = vmatprep.mubr.f32.mxu1 %v32099_v2 }
 0x3d8   : > { %10051 = vmatmul.mubr.f32.gmra.mxu1 %v27300_v63 }
 0x3d9   : > { %10316 = vmatprep.mubr.f32.mxu1 %v32099_v2 }
 0x3f3   : > { %v7674_v52 = vpop.f32.mrf.mxu0 }
 0x3f5   : > { %v7676_v7 = vpop.f32.mrf.mxu0 }
 0x3f7   : > { %v7685_v1 = vpop.f32.mrf.mxu0 }
 0x3f9   : > { %v7687_v49 = vpop.f32.mrf.mxu0 }
 0x3fb   : > { %v7696_v34 = vpop.f32.mrf.mxu0 }
 0x3fc   : > { %v7798_v0 = vpop.f32.mrf.mxu1 }
 0x3fd   : > { %v7698_v19 = vpop.f32.mrf.mxu0  ;;  %v7799_v61 = vadd.f32 %v7798_v0, %v7674_v52 }
 0x3fe   : > { %v7800_v16 = vpop.f32.mrf.mxu1 }
 0x3ff   : > { %v7897_v62 = vpop.f32.mrf.mxu0  ;;  %v7801_v20 = vadd.f32 %v7800_v16, %v7676_v7 }
 0x400   : > { %v7805_v47 = vpop.f32.mrf.mxu1  ;;  %v7898_v36 = vadd.f32 %v7897_v62, %v7799_v61 }
 0x401   : > { %v7899_v9 = vpop.f32.mrf.mxu0  ;;  %v7806_v51 = vadd.f32 %v7805_v47, %v7685_v1 }
 0x402   : > { %v7807_v25 = vpop.f32.mrf.mxu1  ;;  %v7900_v28 = vadd.f32 %v7899_v9, %v7801_v20  ;;  %v24916_v9 = vld [vmem:[%s32060_s2 + $0x50] sm:$0xff] }
 0x403   : > { %v7808_v48 = vadd.f32 %v7807_v25, %v7687_v49 }
 0x405   : > { %v7812_v5 = vpop.f32.mrf.mxu1  ;;  %v7905_v54 = vpop.f32.mrf.mxu0 }
 0x406   : > { %v7906_v43 = vadd.f32 %v7905_v54, %v7806_v51  ;;  %v7813_v12 = vadd.f32 %v7812_v5, %v7696_v34  ;;  %v24915_v34 = vld [vmem:[%s32060_s2 + $0x48] sm:$0xff] }
 0x407   : > { %v7814_v39 = vpop.f32.mrf.mxu1  ;;  %v7907_v60 = vpop.f32.mrf.mxu0  ;;  %v10086_v62 = vsel %vm2520_vm2, %v24915_v34, 0 }
 0x408   : > { %v7908_v58 = vadd.f32 %v7907_v60, %v7808_v48  ;;  %v7815_v11 = vadd.f32 %v7814_v39, %v7698_v19  ;;  %v27977_v54 = vand.u32 4294901760, %v10086_v62  ;;  %v10089_v60 = vsel %vm2520_vm2, %v24916_v9, 0 }
 0x409   : > { %v7913_v46 = vpop.f32.mrf.mxu0  ;;  %v7993_v63 = vpop.f32.mrf.mxu1 }
 0x40a   : > { %v7994_v33 = vadd.f32 %v7993_v63, %v7898_v36  ;;  %v7914_v26 = vadd.f32 %v7913_v46, %v7813_v12 }
 0x40b   : > { %v7915_v22 = vpop.f32.mrf.mxu0  ;;  %v7995_v30 = vpop.f32.mrf.mxu1 }
 0x40c   : > { %v7996_v32 = vadd.f32 %v7995_v30, %v7900_v28  ;;  %v7916_v13 = vadd.f32 %v7915_v22, %v7815_v11  ;;  %v24917_v22 = vld [vmem:[%s32060_s2 + $0x58] sm:$0x1f] }
 0x40d   : > { %v8002_v6 = vpop.f32.mrf.mxu1 }
 0x40e   : > { %v8101_v17 = vpop.f32.mrf.mxu0  ;;  %v8003_v14 = vadd.f32 %v8002_v6, %v7906_v43 }
 0x40f   : > { %v8004_v38 = vpop.f32.mrf.mxu1  ;;  %v8102_v29 = vadd.f32 %v8101_v17, %v7994_v33  ;;  %v27992_v17 = vsub.f32 %v10086_v62, %v27977_v54 }
 0x410   : > { %v8103_v53 = vpop.f32.mrf.mxu0  ;;  %v8005_v44 = vadd.f32 %v8004_v38, %v7908_v58  ;;  %v27994_v38 = vand.u32 4294901760, %v10089_v60 }
 0x411   : > { %v8011_v37 = vpop.f32.mrf.mxu1  ;;  %v8104_v10 = vadd.f32 %v8103_v53, %v7996_v32  ;;  %v28008_v61 = vand.u32 4294901760, %v27992_v17 }
 0x412   : > { %v8108_v55 = vpop.f32.mrf.mxu0  ;;  %v8012_v15 = vadd.f32 %v8011_v37, %v7914_v26  ;;  %v28011_v28 = vsub.f32 %v10089_v60, %v27994_v38 }
 0x413   : > { %v8013_v8 = vpop.f32.mrf.mxu1  ;;  %v8109_v42 = vadd.f32 %v8108_v55, %v8003_v14  ;;  %v10092_v55 = vsel %vm2520_vm2, %v24917_v22, 0 }
 0x414   : > { %v8110_v18 = vpop.f32.mrf.mxu0  ;;  %v8014_v23 = vadd.f32 %v8013_v8, %v7916_v13  ;;  %v28015_v14 = vand.u32 4294901760, %v10092_v55  ;;  %v28040_v26 = vand.u32 4294901760, %v28011_v28 }
 0x415   : > { %v8193_v59 = vpop.f32.mrf.mxu1  ;;  %v8111_v24 = vadd.f32 %v8110_v18, %v8005_v44 }
 0x416   : > { %v8194_v31 = vadd.f32 %v8193_v59, %v8102_v29 }
 0x417   : > { %v8115_v56 = vpop.f32.mrf.mxu0  ;;  %v8195_v4 = vpop.f32.mrf.mxu1 }
 0x418   : > { %v8196_v27 = vadd.f32 %v8195_v4, %v8104_v10  ;;  %v8116_v3 = vadd.f32 %v8115_v56, %v8012_v15 }
 0x419   : > { %v8117_v41 = vpop.f32.mrf.mxu0  ;;  %v8200_v50 = vpop.f32.mrf.mxu1 }
 0x41a   : > { %v8201_v57 = vadd.f32 %v8200_v50, %v8109_v42  ;;  %v8118_v1 = vadd.f32 %v8117_v41, %v8014_v23  ;;  %v10192_v50 = vsub.f32 %v27992_v17, %v28008_v61 }
 0x41b   : > { %v27956_v21 = vpop.f32.mrf.mxu0  ;;  %v8202_v40 = vpop.f32.mrf.mxu1 }
 0x41c   : > { %v8203_v35 = vadd.f32 %v8202_v40, %v8111_v24  ;;  %25125 = vtanh.f32 %v8201_v57 }
 0x41d   : > { %v27958_v45 = vpop.f32.mrf.mxu0 }
 0x41e   : > { %25127 = vtanh.f32 %v8203_v35 }
 0x41f   : > { %25129 = vtanh.f32 %v8196_v27  ;;  %v8207_v52 = vpop.f32.mrf.mxu1  ;;  %v27960_v7 = vpop.f32.mrf.mxu0  ;;  %v28051_v27 = vsub.f32 %v10092_v55, %v28015_v14 }
 0x420   : > { %v8208_v49 = vadd.f32 %v8207_v52, %v8116_v3  ;;  %25131 = vtanh.f32 %v8194_v31  ;;  %v28067_v52 = vand.u32 4294901760, %v10192_v50 }
 0x421   : > { %v8209_v0 = vpop.f32.mrf.mxu1  ;;  %v27965_v19 = vpop.f32.mrf.mxu0  ;;  %v28078_v62 = vand.u32 4294901760, %v28051_v27 }
 0x422   : > { %25133 = vtanh.f32 %v8208_v49  ;;  %v8210_v16 = vadd.f32 %v8209_v0, %v8118_v1  ;;  %v10203_v0 = vsub.f32 %v28011_v28, %v28040_v26 }
 0x423   : > { %v10214_v50 = vsub.f32 %v28051_v27, %v28078_v62 }
 0x424   : > { %25135 = vtanh.f32 %v8210_v16  ;;  %v27968_v47 = vpop.f32.mrf.mxu0 }
 0x425   : > { %v27973_v25 = vpop.f32.mrf.mxu1 }
 0x426   : > { %v27975_v5 = vpop.f32.mrf.mxu0 }
 0x427   : > { %v27979_v39 = vpop.f32.mrf.mxu1 }
 0x428   : > { %v27982_v46 = vpop.f32.mrf.mxu0 }
 0x429   : > { %v27984_v63 = vpop.f32.mrf.mxu1  ;;  %v25126_v30 = vpop.eup %25125 }
 0x42a   : > { %v27989_v6 = vpop.f32.mrf.mxu0  ;;  %v28005_v18 = vand.u32 4294901760, %v25126_v30 }
 0x42b   : > { %v25128_v53 = vpop.eup %25127  ;;  %v27996_v37 = vpop.f32.mrf.mxu1 }
 0x42c   : > { %v25130_v51 = vpop.eup %25129  ;;  %v27999_v20 = vand.u32 4294901760, %v25128_v53  ;;  %v28037_v11 = vsub.f32 %v25126_v30, %v28005_v18 }
 0x42d   : > { %v25132_v8 = vpop.eup %25131  ;;  %v28013_v58 = vand.u32 4294901760, %v25130_v51 }
 0x42e   : > { %v28001_v48 = vpop.f32.mrf.mxu1  ;;  %v28003_v43 = vpop.f32.mrf.mxu0  ;;  %v28024_v44 = vand.u32 4294901760, %v25132_v8  ;;  %v28027_v42 = vsub.f32 %v25128_v53, %v27999_v20  ;;  %v32098_v1 = vand.u32 4294901760, %v28037_v11 }
 0x42f   : > { %v25134_v59 = vpop.eup %25133  ;;  %v28048_v29 = vsub.f32 %v25130_v51, %v28013_v58 }
 0x430   : > { %v28017_v36 = vpop.f32.mrf.mxu1  ;;  %v28019_v32 = vpop.f32.mrf.mxu0  ;;  %v10095_v56 = vsel %vm2530_vm3, %v25134_v59, 0  ;;  %v32095_v31 = vand.u32 4294901760, %v28027_v42  ;;  %v28064_v23 = vsub.f32 %v25132_v8, %v28024_v44  ;;  %v10269_v8 = vsub.f32 %v28037_v11, %v32098_v1 }
 0x431   : > { %v25136_v4 = vpop.eup %25135  ;;  %v28022_v12 = vand.u32 4294901760, %v10095_v56  ;;  %v32097_v16 = vand.u32 4294901760, %v28048_v29 }
 0x432   : > { %v28029_v33 = vpop.f32.mrf.mxu0  ;;  %v28031_v10 = vpop.f32.mrf.mxu1  ;;  %v10098_v41 = vsel %vm2530_vm3, %v25136_v4, 0  ;;  %v10263_v53 = vsub.f32 %v28027_v42, %v32095_v31  ;;  %v10280_v51 = vand.u32 4294901760, %v28064_v23  ;;  %v28098_v4 = vand.u32 4294901760, %v10203_v0 }
 0x433   : > { %v28042_v24 = vand.u32 4294901760, %v10098_v41  ;;  %v28045_v57 = vsub.f32 %v10095_v56, %v28022_v12  ;;  %v8421_v31 = vadd.f32 %v27984_v63, %v27960_v7  ;;  %v8416_v0 = vadd.f32 %v27979_v39, %v27958_v45 }
 0x434   : > { %v28053_v40 = vpop.f32.mrf.mxu0  ;;  %v28055_v13 = vpop.f32.mrf.mxu1  ;;  %v10264_v1 = vand.u32 4294901760, %v10263_v53  ;;  %v10281_v7 = vsub.f32 %v28064_v23, %v10280_v51  ;;  %v8414_v63 = vadd.f32 %v27973_v25, %v27956_v21  ;;  %v10270_v45 = vand.u32 4294901760, %v10269_v8 }
 0x435   : > { %10145 = vmatprep.subr.mxu0 %v28042_v24  ;;  %v28059_v15 = vsub.f32 %v10098_v41, %v28042_v24  ;;  %v32096_v35 = vand.u32 4294901760, %v28045_v57  ;;  %v10275_v41 = vsub.f32 %v28048_v29, %v32097_v16  ;;  %v28126_v53 = vand.u32 4294901760, %v10214_v50 }
 0x436   : > { %v8617_v3 = vpop.f32.mrf.mxu1  ;;  %10147 = vmatpush1.msra.mxu0 %v28022_v12  ;;  %v8430_v8 = vadd.f32 %v28017_v36, %v27975_v5 }
 0x437   : > { %v28070_v49 = vpop.f32.mrf.mxu0  ;;  %10149 = vmatprep.subr.mxu0 %v27999_v20  ;;  %v10250_v34 = vand.u32 4294901760, %v28059_v15  ;;  %v10257_v60 = vsub.f32 %v28045_v57, %v32096_v35 }
 0x438   : > { %v8619_v9 = vpop.f32.mrf.mxu1  ;;  %10151 = vmatpush1.msra.mxu0 %v28005_v18 }
 0x439   : > { %v8718_v22 = vpop.f32.mrf.mxu0  ;;  %10153 = vmatprep.subr.mxu0 %v28013_v58  ;;  %v10251_v30 = vsub.f32 %v28059_v15, %v10250_v34 }
 0x43a   : > { %v28090_v55 = vpop.f32.mrf.mxu1  ;;  %10155 = vmatpush1.msra.mxu0 %v28024_v44 }
 0x43b   : > { %v8723_v59 = vpop.f32.mrf.mxu0  ;;  %10194 = vmatmul.mubr.f32.vlgmr.msra.gmra.mxu0 %v28067_v52  ;;  %10366 = vmatprep.subr.mxu0 %v28059_v15  ;;  %v10252_v56 = vand.u32 4294901760, %v10251_v30  ;;  %v10258_v15 = vand.u32 4294901760, %v10257_v60  ;;  %v8423_v30 = vadd.f32 %v27996_v37, %v27965_v19  ;;  %v8521_v60 = vadd.f32 %v28003_v43, %v8421_v31 }
 0x43c   : > { %v28107_v35 = vpop.f32.mrf.mxu1  ;;  %10369 = vmatpush1.msra.mxu0 %v28045_v57  ;;  %10199 = vmatprep.mubr.f32.mxu0 %v32099_v2  ;;  %v8515_v19 = vadd.f32 %v27989_v6, %v8416_v0  ;;  %v10276_v37 = vand.u32 4294901760, %v10275_v41  ;;  %v8428_v31 = vadd.f32 %v28001_v48, %v27968_v47 }
 0x43d   : > { %v8725_v16 = vpop.f32.mrf.mxu0  ;;  %10253 = vmatprep.subr.mxu1 %v10252_v56  ;;  %10372 = vmatprep.subr.mxu0 %v28027_v42  ;;  %v8523_v39 = vadd.f32 %v28019_v32, %v8423_v30  ;;  %v8513_v56 = vadd.f32 %v27982_v46, %v8414_v63  ;;  %v8618_v21 = vadd.f32 %v8617_v3, %v8521_v60  ;;  %v32198_v63 = vand.u32 4294901760, %v28045_v57 }
 0x43e   : > { %v8808_v2 = vpop.f32.mrf.mxu1  ;;  %10259 = vmatpush1.msra.mxu1 %v10258_v15  ;;  %10375 = vmatpush1.msra.mxu0 %v28037_v11  ;;  %v8611_v6 = vadd.f32 %v28055_v13, %v8515_v19  ;;  %v32197_v15 = vmov 0.0   ;;  %v8529_v47 = vadd.f32 %v28029_v33, %v8428_v31  ;;  %v32201_v57 = vand.u32 4294901760, %v28048_v29 }
 0x43f   : > { %10205 = vmatmul.mubr.f32.gmra.mxu0 %v28098_v4  ;;  %10265 = vmatprep.subr.mxu1 %v10264_v1  ;;  %v8620_v32 = vadd.f32 %v8619_v9, %v8523_v39  ;;  %v10282_v1 = vand.u32 4294901760, %v10281_v7  ;;  %v8609_v46 = vadd.f32 %v28031_v10, %v8513_v56  ;;  %v8724_v3 = vadd.f32 %v8723_v59, %v8618_v21 }
 0x440   : > { %v8730_v25 = vpop.f32.mrf.mxu0  ;;  %v8810_v43 = vpop.f32.mrf.mxu1  ;;  %10378 = vmatprep.subr.mxu0 %v28048_v29  ;;  %10271 = vmatpush1.msra.mxu1 %v10270_v45  ;;  %v8719_v48 = vadd.f32 %v8718_v22, %v8611_v6  ;;  %v8531_v9 = vadd.f32 %v28053_v40, %v8430_v8  ;;  %v32199_v45 = vand.u32 4294901760, %v28027_v42  ;;  %v32200_v39 = vand.u32 4294901760, %v28037_v11 }
 0x441   : > { %10381 = vmatpush1.msra.mxu0 %v28064_v23  ;;  %10277 = vmatprep.subr.mxu1 %v10276_v37  ;;  %v8726_v13 = vadd.f32 %v8725_v16, %v8620_v32  ;;  %v8717_v0 = vadd.f32 %v28070_v49, %v8609_v46 }
 0x442   : > { %v8732_v41 = vpop.f32.mrf.mxu0  ;;  %v8815_v50 = vpop.f32.mrf.mxu1  ;;  %10566 = vmatprep.subr.mxu0 %v10250_v34  ;;  %10210 = vmatprep.mubr.f32.mxu0 %v32197_v15  ;;  %v8627_v34 = vadd.f32 %v28090_v55, %v8529_v47  ;;  %v8811_v33 = vadd.f32 %v8810_v43, %v8719_v48  ;;  %v8629_v49 = vadd.f32 %v28107_v35, %v8531_v9 }
 0x443   : > { %10283 = vmatpush1.msra.mxu1 %v10282_v1  ;;  %10216 = vmatmul.mubr.f32.gmra.mxu0 %v28126_v53  ;;  %v8816_v5 = vadd.f32 %v8815_v50, %v8724_v3  ;;  %v8809_v16 = vadd.f32 %v8808_v2, %v8717_v0 }
 0x444   : > { %v28142_v36 = vpop.f32.mrf.mxu0  ;;  %v8817_v10 = vpop.f32.mrf.mxu1  ;;  %10318 = vmatmul.mubr.f32.vlgmr.msra.gmra.mxu1 %v27977_v54  ;;  %10466 = vmatprep.subr.mxu1 %v28042_v24  ;;  %v8731_v59 = vadd.f32 %v8730_v25, %v8627_v34  ;;  %v8733_v2 = vadd.f32 %v8732_v41, %v8629_v49 }
 0x445   : > { %v8818_v22 = vadd.f32 %v8817_v10, %v8726_v13  ;;  %10468 = vmatpush1.msra.mxu1 %v28022_v12  ;;  %10323 = vmatprep.mubr.f32.mxu1 %v32197_v15 }
 0x446   : > { %v28149_v40 = vpop.f32.mrf.mxu0  ;;  %10470 = vmatprep.subr.mxu1 %v27999_v20  ;;  %10414 = vmatprep.mubr.f32.mxu0 %v32197_v15 }
 0x447   : > { %25137 = vtanh.f32 %v8818_v22  ;;  %10472 = vmatpush1.msra.mxu1 %v28005_v18  ;;  %10417 = vmatmul.mubr.f32.vlgmr.msra.gmra.mxu0 %v27992_v17 }
 0x448   : > { %25139 = vtanh.f32 %v8816_v5  ;;  %v8822_v55 = vpop.f32.mrf.mxu1  ;;  %v28156_v30 = vpop.f32.mrf.mxu0  ;;  %10325 = vmatmul.mubr.f32.gmra.mxu1 %v27994_v38  ;;  %10474 = vmatprep.subr.mxu1 %v28013_v58 }
 0x449   : > { %25141 = vtanh.f32 %v8811_v33  ;;  %v8823_v7 = vadd.f32 %v8822_v55, %v8731_v59  ;;  %10570 = vmatpush1.msra.mxu0 %v32198_v63  ;;  %10476 = vmatpush1.msra.mxu1 %v28024_v44 }
 0x44a   : > { %25143 = vtanh.f32 %v8809_v16  ;;  %v8824_v35 = vpop.f32.mrf.mxu1  ;;  %v28163_v60 = vpop.f32.mrf.mxu0  ;;  %10574 = vmatprep.subr.mxu0 %v32199_v45  ;;  %10668 = vmatprep.subr.mxu1 %v28042_v24 }
 0x44b   : > { %25145 = vtanh.f32 %v8823_v7  ;;  %v8825_v19 = vadd.f32 %v8824_v35, %v8733_v2  ;;  %10578 = vmatpush1.msra.mxu0 %v32200_v39  ;;  %10330 = vmatprep.mubr.f32.mxu1 %v32197_v15 }
 0x44c   : > { %10422 = vmatprep.mubr.f32.mxu0 %v32197_v15  ;;  %10582 = vmatprep.subr.mxu0 %v32201_v57 }
 0x44d   : > { %25147 = vtanh.f32 %v8825_v19  ;;  %v28174_v37 = vpop.f32.mrf.mxu0  ;;  %10332 = vmatmul.mubr.f32.gmra.mxu1 %v28015_v14  ;;  %10425 = vmatmul.mubr.f32.gmra.mxu0 %v28011_v28 }
 0x44e   : > { %v28178_v42 = vpop.f32.mrf.mxu1  ;;  %10586 = vmatpush1.msra.mxu0 %v10280_v51  ;;  %10430 = vmatprep.mubr.f32.mxu0 %v32197_v15 }
 0x44f   : > { %v28183_v11 = vpop.f32.mrf.mxu0  ;;  %10509 = vmatprep.mubr.f32.mxu1 %v32197_v15 }
 0x450   : > { %v28186_v24 = vpop.f32.mrf.mxu1 }
 0x451   : > { %v28188_v29 = vpop.f32.mrf.mxu0  ;;  %10433 = vmatmul.mubr.f32.gmra.mxu0 %v28051_v27  ;;  %10513 = vmatmul.mubr.f32.vlgmr.msra.gmra.mxu1 %v28008_v61 }
 0x452   : > { %v28192_v56 = vpop.f32.mrf.mxu1  ;;  %10670 = vmatpush1.msra.mxu1 %v28022_v12  ;;  %10518 = vmatprep.mubr.f32.mxu1 %v32197_v15 }
 0x453   : > { %v28196_v23 = vpop.f32.mrf.mxu0  ;;  %10672 = vmatprep.subr.mxu1 %v27999_v20  ;;  %10619 = vmatprep.mubr.f32.mxu0 %v32197_v15 }
 0x454   : > { %v25138_v51 = vpop.eup %25137  ;;  %v28200_v21 = vpop.f32.mrf.mxu1  ;;  %10674 = vmatpush1.msra.mxu1 %v28005_v18 }
 0x455   : > { %v25140_v25 = vpop.eup %25139  ;;  %10676 = vmatprep.subr.mxu1 %v28013_v58  ;;  %10522 = vmatmul.mubr.f32.gmra.mxu1 %v28040_v26  ;;  %v28213_v18 = vand.u32 4294901760, %v25138_v51 }
 0x456   : > { %v25142_v43 = vpop.eup %25141  ;;  %10621 = vmatmul.mubr.f32.vlgmr.msra.gmra.mxu0 %v27977_v54  ;;  %10678 = vmatpush1.msra.mxu1 %v28024_v44  ;;  %v28215_v58 = vand.u32 4294901760, %v25140_v25 }
 0x457   : > { %v25144_v12 = vpop.eup %25143  ;;  %v28207_v31 = vpop.f32.mrf.mxu1  ;;  %10527 = vmatprep.mubr.f32.mxu1 %v32197_v15  ;;  %10626 = vmatprep.mubr.f32.mxu0 %v32197_v15  ;;  %v28223_v8 = vand.u32 4294901760, %v25142_v43  ;;  %v28238_v13 = vsub.f32 %v25138_v51, %v28213_v18 }
 0x458   : > { %v28209_v20 = vpop.f32.mrf.mxu0  ;;  %v25146_v6 = vpop.eup %25145  ;;  %v28229_v41 = vand.u32 4294901760, %v25144_v12  ;;  %v28246_v5 = vsub.f32 %v25140_v25, %v28215_v58 }
 0x459   : > { %v28217_v32 = vpop.f32.mrf.mxu1  ;;  %10531 = vmatmul.mubr.f32.gmra.mxu1 %v28078_v62  ;;  %v10101_v44 = vsel %vm2530_vm3, %v25146_v6, 0  ;;  %v28252_v33 = vsub.f32 %v25142_v43, %v28223_v8  ;;  %v32102_v55 = vand.u32 4294901760, %v28238_v13 }
 0x45a   : > { %v28219_v1 = vpop.f32.mrf.mxu0  ;;  %v25148_v46 = vpop.eup %25147  ;;  %10628 = vmatmul.mubr.f32.gmra.mxu0 %v27994_v38  ;;  %10711 = vmatprep.mubr.f32.mxu1 %v32197_v15  ;;  %v28227_v3 = vand.u32 4294901760, %v10101_v44  ;;  %v28261_v49 = vsub.f32 %v25144_v12, %v28229_v41  ;;  %v32103_v63 = vand.u32 4294901760, %v28246_v5  ;;  %v9036_v12 = vadd.f32 %v28192_v56, %v28156_v30 }
 0x45b   : > { %v28233_v47 = vpop.f32.mrf.mxu1  ;;  %v10104_v48 = vsel %vm2530_vm3, %v25148_v46, 0  ;;  %10633 = vmatprep.mubr.f32.mxu0 %v32197_v15  ;;  %v10889_v19 = vand.u32 4294901760, %v28252_v33  ;;  %v10878_v43 = vsub.f32 %v28238_v13, %v32102_v55 }
 0x45c   : > { %v28231_v50 = vpop.f32.mrf.mxu0  ;;  %v28240_v9 = vand.u32 4294901760, %v10104_v48  ;;  %v28243_v0 = vsub.f32 %v10101_v44, %v28227_v3  ;;  %v10895_v51 = vand.u32 4294901760, %v28261_v49  ;;  %v10884_v46 = vsub.f32 %v28246_v5, %v32103_v63 }
 0x45d   : > { %v9225_v34 = vpop.f32.mrf.mxu1  ;;  %10713 = vmatmul.mubr.f32.vlgmr.msra.gmra.mxu1 %v27977_v54  ;;  %v10890_v56 = vsub.f32 %v28252_v33, %v10889_v19  ;;  %v9136_v63 = vadd.f32 %v28209_v20, %v9036_v12 }
 0x45e   : > { %v28248_v10 = vpop.f32.mrf.mxu0  ;;  %10760 = vmatprep.subr.mxu0 %v28240_v9  ;;  %10635 = vmatmul.mubr.f32.gmra.mxu0 %v28015_v14  ;;  %v28257_v22 = vsub.f32 %v10104_v48, %v28240_v9  ;;  %v32101_v16 = vand.u32 4294901760, %v28243_v0  ;;  %v9029_v48 = vadd.f32 %v28178_v42, %v28142_v36  ;;  %v10896_v36 = vsub.f32 %v28261_v49, %v10895_v51 }
 0x45f   : > { %v9232_v59 = vpop.f32.mrf.mxu1  ;;  %10762 = vmatpush1.msra.mxu0 %v28227_v3  ;;  %10718 = vmatprep.mubr.f32.mxu1 %v32197_v15  ;;  %v10885_v12 = vand.u32 4294901760, %v10884_v46  ;;  %v9045_v46 = vadd.f32 %v28217_v32, %v28183_v11 }
 0x460   : > { %v28266_v2 = vpop.f32.mrf.mxu0  ;;  %10764 = vmatprep.subr.mxu0 %v28213_v18  ;;  %10803 = vmatprep.mubr.f32.mxu0 %v32197_v15  ;;  %v32104_v7 = vand.u32 4294901760, %v28257_v22  ;;  %v10872_v45 = vsub.f32 %v28243_v0, %v32101_v16  ;;  %v9031_v16 = vadd.f32 %v28186_v24, %v28149_v40  ;;  %v10879_v24 = vand.u32 4294901760, %v10878_v43 }
 0x461   : > { %v9234_v35 = vpop.f32.mrf.mxu1  ;;  %10766 = vmatpush1.msra.mxu0 %v28215_v58  ;;  %10720 = vmatmul.mubr.f32.gmra.mxu1 %v27994_v38  ;;  %v10891_v43 = vand.u32 4294901760, %v10890_v56 }
 0x462   : > { %v9333_v39 = vpop.f32.mrf.mxu0  ;;  %10768 = vmatprep.subr.mxu0 %v28223_v8  ;;  %v10866_v57 = vsub.f32 %v28257_v22, %v32104_v7  ;;  %10725 = vmatprep.mubr.f32.mxu1 %v32197_v15  ;;  %v10873_v30 = vand.u32 4294901760, %v10872_v45  ;;  %v9130_v40 = vadd.f32 %v28196_v23, %v9031_v16  ;;  %v9128_v45 = vadd.f32 %v28188_v29, %v9029_v48 }
 0x463   : > { %v9241_v25 = vpop.f32.mrf.mxu1  ;;  %10770 = vmatpush1.msra.mxu0 %v28229_v41 }
 0x464   : > { %v9338_v6 = vpop.f32.mrf.mxu0  ;;  %10809 = vmatmul.mubr.f32.vlgmr.msra.gmra.mxu0 %v28067_v52  ;;  %10981 = vmatprep.subr.mxu0 %v28257_v22  ;;  %v10867_v44 = vand.u32 4294901760, %v10866_v57  ;;  %v9038_v57 = vadd.f32 %v28200_v21, %v28163_v60  ;;  %v9233_v21 = vadd.f32 %v9232_v59, %v9136_v63  ;;  %v9226_v23 = vadd.f32 %v9225_v34, %v9130_v40 }
 0x465   : > { %v9243_v55 = vpop.f32.mrf.mxu1  ;;  %10984 = vmatpush1.msra.mxu0 %v28243_v0  ;;  %10814 = vmatprep.mubr.f32.mxu0 %v32197_v15  ;;  %v9224_v29 = vadd.f32 %v28233_v47, %v9128_v45  ;;  %v10897_v63 = vand.u32 4294901760, %v10896_v36 }
 0x466   : > { %v9340_v7 = vpop.f32.mrf.mxu0  ;;  %10868 = vmatprep.subr.mxu1 %v10867_v44  ;;  %10987 = vmatprep.subr.mxu0 %v28238_v13  ;;  %v9138_v60 = vadd.f32 %v28219_v1, %v9038_v57  ;;  %v9043_v44 = vadd.f32 %v28207_v31, %v28174_v37  ;;  %v9339_v1 = vadd.f32 %v9338_v6, %v9233_v21  ;;  %v32204_v21 = vand.u32 4294901760, %v28238_v13 }
 0x467   : > { %v9423_v42 = vpop.f32.mrf.mxu1  ;;  %10874 = vmatpush1.msra.mxu1 %v10873_v30  ;;  %10990 = vmatpush1.msra.mxu0 %v28246_v5  ;;  %v9334_v31 = vadd.f32 %v9333_v39, %v9226_v23  ;;  %v32202_v30 = vand.u32 4294901760, %v28257_v22  ;;  %v9332_v47 = vadd.f32 %v28266_v2, %v9224_v29  ;;  %v9146_v57 = vadd.f32 %v28248_v10, %v9045_v46 }
 0x468   : > { %v9345_v20 = vpop.f32.mrf.mxu0  ;;  %10727 = vmatmul.mubr.f32.gmra.mxu1 %v28015_v14  ;;  %10820 = vmatmul.mubr.f32.gmra.mxu0 %v28098_v4  ;;  %v9235_v48 = vadd.f32 %v9234_v35, %v9138_v60  ;;  %v9144_v37 = vadd.f32 %v28231_v50, %v9043_v44  ;;  %v32203_v60 = vand.u32 4294901760, %v28243_v0 }
 0x469   : > { %v9425_v16 = vpop.f32.mrf.mxu1  ;;  %10880 = vmatprep.subr.mxu1 %v10879_v24  ;;  %10993 = vmatprep.subr.mxu0 %v28252_v33  ;;  %v9424_v22 = vadd.f32 %v9423_v42, %v9332_v47  ;;  %v9244_v2 = vadd.f32 %v9243_v55, %v9146_v57 }
 0x46a   : > { %v9347_v59 = vpop.f32.mrf.mxu0  ;;  %10886 = vmatpush1.msra.mxu1 %v10885_v12  ;;  %10996 = vmatpush1.msra.mxu0 %v28261_v49  ;;  %v9341_v35 = vadd.f32 %v9340_v7, %v9235_v48  ;;  %v9242_v11 = vadd.f32 %v9241_v25, %v9144_v37  ;;  %v9426_v32 = vadd.f32 %v9425_v16, %v9334_v31 }
 0x46b   : > { %v9430_v34 = vpop.f32.mrf.mxu1  ;;  %10892 = vmatprep.subr.mxu1 %v10891_v43  ;;  %11181 = vmatprep.subr.mxu0 %v32202_v30  ;;  %v9348_v25 = vadd.f32 %v9347_v59, %v9244_v2 }
 0x46c   : > { %v9431_v6 = vadd.f32 %v9430_v34, %v9339_v1  ;;  %v28328_v56 = vpop.f32.mrf.mxu0  ;;  %10825 = vmatprep.mubr.f32.mxu0 %v32197_v15  ;;  %10898 = vmatpush1.msra.mxu1 %v10897_v63  ;;  %v9346_v7 = vadd.f32 %v9345_v20, %v9242_v11  ;;  %v32205_v20 = vand.u32 4294901760, %v28246_v5 }
 0x46d   : > { %v9432_v50 = vpop.f32.mrf.mxu1  ;;  %10931 = vmatprep.mubr.f32.mxu1 %v32197_v15  ;;  %10831 = vmatmul.mubr.f32.gmra.mxu0 %v28126_v53 }
 0x46e   : > { %v9433_v39 = vadd.f32 %v9432_v50, %v9341_v35  ;;  %v28334_v36 = vpop.f32.mrf.mxu0  ;;  %10933 = vmatmul.mubr.f32.vlgmr.msra.gmra.mxu1 %v27977_v54  ;;  %11081 = vmatprep.subr.mxu1 %v28240_v9  ;;  %25149 = vtanh.f32 %v9431_v6 }
 0x46f   : > { %11083 = vmatpush1.msra.mxu1 %v28227_v3  ;;  %10938 = vmatprep.mubr.f32.mxu1 %v32197_v15 }
 0x470   : > { %25151 = vtanh.f32 %v9433_v39  ;;  %v9437_v10 = vpop.f32.mrf.mxu1  ;;  %11085 = vmatprep.subr.mxu1 %v28213_v18  ;;  %11029 = vmatprep.mubr.f32.mxu0 %v32197_v15 }
 0x471   : > { %25153 = vtanh.f32 %v9426_v32  ;;  %v9438_v40 = vadd.f32 %v9437_v10, %v9346_v7  ;;  %v28342_v42 = vpop.f32.mrf.mxu0  ;;  %11087 = vmatpush1.msra.mxu1 %v28215_v58  ;;  %11032 = vmatmul.mubr.f32.vlgmr.msra.gmra.mxu0 %v27992_v17 }
 0x472   : > { %25155 = vtanh.f32 %v9424_v22  ;;  %v9439_v55 = vpop.f32.mrf.mxu1  ;;  %10940 = vmatmul.mubr.f32.gmra.mxu1 %v27994_v38  ;;  %11089 = vmatprep.subr.mxu1 %v28223_v8 }
 0x473   : > { %25157 = vtanh.f32 %v9438_v40  ;;  %v9440_v24 = vadd.f32 %v9439_v55, %v9348_v25  ;;  %v28348_v45 = vpop.f32.mrf.mxu0  ;;  %11185 = vmatpush1.msra.mxu0 %v32203_v60  ;;  %11091 = vmatpush1.msra.mxu1 %v28229_v41 }
 0x474   : > { %11189 = vmatprep.subr.mxu0 %v32204_v21  ;;  %11283 = vmatprep.subr.mxu1 %v28240_v9 }
 0x475   : > { %25159 = vtanh.f32 %v9440_v24  ;;  %11193 = vmatpush1.msra.mxu0 %v32205_v20  ;;  %10945 = vmatprep.mubr.f32.mxu1 %v32197_v15 }
 0x476   : > { %v28359_v12 = vpop.f32.mrf.mxu0  ;;  %v28361_v44 = vpop.f32.mrf.mxu1  ;;  %11037 = vmatprep.mubr.f32.mxu0 %v32197_v15  ;;  %11197 = vmatprep.subr.mxu0 %v10889_v19 }
 0x477   : > { %10947 = vmatmul.mubr.f32.gmra.mxu1 %v28015_v14  ;;  %11040 = vmatmul.mubr.f32.gmra.mxu0 %v28011_v28 }
 0x478   : > { %v28368_v13 = vpop.f32.mrf.mxu0  ;;  %v28370_v9 = vpop.f32.mrf.mxu1  ;;  %11201 = vmatpush1.msra.mxu0 %v10895_v51  ;;  %11045 = vmatprep.mubr.f32.mxu0 %v32197_v15 }
 0x479   : > { %11124 = vmatprep.mubr.f32.mxu1 %v32197_v15 }
 0x47a   : > { %v28376_v0 = vpop.f32.mrf.mxu0 }
 0x47b   : > { %v28378_v5 = vpop.f32.mrf.mxu1  ;;  %11048 = vmatmul.mubr.f32.gmra.mxu0 %v28051_v27  ;;  %11128 = vmatmul.mubr.f32.vlgmr.msra.gmra.mxu1 %v28008_v61  ;;  %v25150_v33 = vpop.eup %25149 }
 0x47c   : > { %v28382_v19 = vpop.f32.mrf.mxu0  ;;  %11285 = vmatpush1.msra.mxu1 %v28227_v3  ;;  %11133 = vmatprep.mubr.f32.mxu1 %v32197_v15 }
 0x47d   : > { %v25152_v49 = vpop.eup %25151  ;;  %v28386_v51 = vpop.f32.mrf.mxu1  ;;  %11287 = vmatprep.subr.mxu1 %v28213_v18  ;;  %11234 = vmatprep.mubr.f32.mxu0 %v32197_v15  ;;  %v28401_v18 = vand.u32 4294901760, %v25150_v33 }
 0x47e   : > { %v25154_v23 = vpop.eup %25153  ;;  %11289 = vmatpush1.msra.mxu1 %v28215_v58  ;;  %v28393_v43 = vand.u32 4294901760, %v25152_v49 }
 0x47f   : > { %v25156_v16 = vpop.eup %25155  ;;  %11291 = vmatprep.subr.mxu1 %v28223_v8  ;;  %11137 = vmatmul.mubr.f32.gmra.mxu1 %v28040_v26  ;;  %v28406_v8 = vand.u32 4294901760, %v25154_v23  ;;  %v28433_v6 = vsub.f32 %v25150_v33, %v28401_v18 }
 0x480   : > { %v25158_v3 = vpop.eup %25157  ;;  %v28395_v29 = vpop.f32.mrf.mxu1  ;;  %11236 = vmatmul.mubr.f32.vlgmr.msra.gmra.mxu0 %v27977_v54  ;;  %11293 = vmatpush1.msra.mxu1 %v28229_v41  ;;  %v28416_v37 = vand.u32 4294901760, %v25156_v16  ;;  %v28419_v31 = vsub.f32 %v25152_v49, %v28393_v43 }
 0x481   : > { %v28397_v48 = vpop.f32.mrf.mxu0  ;;  %11142 = vmatprep.mubr.f32.mxu1 %v32197_v15  ;;  %11241 = vmatprep.mubr.f32.mxu0 %v32197_v15  ;;  %v10107_v58 = vsel %vm2530_vm3, %v25158_v3, 0  ;;  %v28437_v57 = vsub.f32 %v25154_v23, %v28406_v8  ;;  %v32107_v25 = vand.u32 4294901760, %v28433_v6 }
 0x482   : > { %v25160_v1 = vpop.eup %25159  ;;  %v28408_v59 = vpop.f32.mrf.mxu1  ;;  %v28412_v46 = vand.u32 4294901760, %v10107_v58  ;;  %v32105_v39 = vand.u32 4294901760, %v28419_v31  ;;  %v28452_v2 = vsub.f32 %v25156_v16, %v28416_v37 }
 0x483   : > { %v28410_v63 = vpop.f32.mrf.mxu0  ;;  %11146 = vmatmul.mubr.f32.gmra.mxu1 %v28078_v62  ;;  %v10110_v41 = vsel %vm2530_vm3, %v25160_v1, 0  ;;  %v32108_v24 = vand.u32 4294901760, %v28437_v57  ;;  %v11499_v3 = vsub.f32 %v28433_v6, %v32107_v25 }
 0x484   : > { %v28423_v30 = vpop.f32.mrf.mxu1  ;;  %11243 = vmatmul.mubr.f32.gmra.mxu0 %v27994_v38  ;;  %v28426_v47 = vand.u32 4294901760, %v10110_v41  ;;  %11326 = vmatprep.mubr.f32.mxu1 %v32197_v15  ;;  %v28430_v35 = vsub.f32 %v10107_v58, %v28412_v46  ;;  %v11493_v33 = vsub.f32 %v28419_v31, %v32105_v39  ;;  %v11510_v49 = vand.u32 4294901760, %v28452_v2 }
 0x485   : > { %v28421_v34 = vpop.f32.mrf.mxu0  ;;  %11248 = vmatprep.mubr.f32.mxu0 %v32197_v15  ;;  %v9651_v58 = vadd.f32 %v28378_v5, %v28342_v42  ;;  %v11505_v39 = vsub.f32 %v28437_v57, %v32108_v24  ;;  %v9653_v42 = vadd.f32 %v28386_v51, %v28348_v45  ;;  %v11500_v45 = vand.u32 4294901760, %v11499_v3 }
 0x486   : > { %v28441_v32 = vpop.f32.mrf.mxu1  ;;  %11375 = vmatprep.subr.mxu0 %v28426_v47  ;;  %v28445_v50 = vsub.f32 %v10110_v41, %v28426_v47  ;;  %v32106_v22 = vand.u32 4294901760, %v28430_v35  ;;  %v11511_v24 = vsub.f32 %v28452_v2, %v11510_v49  ;;  %v9658_v51 = vadd.f32 %v28395_v29, %v28359_v12 }
 0x487   : > { %v28439_v11 = vpop.f32.mrf.mxu0  ;;  %11377 = vmatpush1.msra.mxu0 %v28412_v46  ;;  %11328 = vmatmul.mubr.f32.vlgmr.msra.gmra.mxu1 %v27977_v54  ;;  %v9751_v5 = vadd.f32 %v28397_v48, %v9651_v58  ;;  %v9753_v48 = vadd.f32 %v28410_v63, %v9653_v42  ;;  %v11506_v58 = vand.u32 4294901760, %v11505_v39 }
 0x488   : > { %v9847_v7 = vpop.f32.mrf.mxu1  ;;  %11250 = vmatmul.mubr.f32.gmra.mxu0 %v28015_v14  ;;  %11379 = vmatprep.subr.mxu0 %v28393_v43  ;;  %v11480_v10 = vand.u32 4294901760, %v28445_v50  ;;  %v11487_v55 = vsub.f32 %v28430_v35, %v32106_v22  ;;  %v9759_v12 = vadd.f32 %v28421_v34, %v9658_v51  ;;  %v11512_v39 = vand.u32 4294901760, %v11511_v24 }
 0x489   : > { %v28458_v40 = vpop.f32.mrf.mxu0  ;;  %11381 = vmatpush1.msra.mxu0 %v28401_v18  ;;  %11333 = vmatprep.mubr.f32.mxu1 %v32197_v15 }
 0x48a   : > { %v9849_v60 = vpop.f32.mrf.mxu1  ;;  %11383 = vmatprep.subr.mxu0 %v28406_v8  ;;  %11418 = vmatprep.mubr.f32.mxu0 %v32197_v15  ;;  %v11481_v21 = vsub.f32 %v28445_v50, %v11480_v10  ;;  %v11488_v41 = vand.u32 4294901760, %v11487_v55  ;;  %v11494_v55 = vand.u32 4294901760, %v11493_v33  ;;  %v9848_v33 = vadd.f32 %v9847_v7, %v9751_v5 }
 0x48b   : > { %v9948_v20 = vpop.f32.mrf.mxu0  ;;  %11385 = vmatpush1.msra.mxu0 %v28416_v37  ;;  %11335 = vmatmul.mubr.f32.gmra.mxu1 %v27994_v38  ;;  %v9850_v29 = vadd.f32 %v9849_v60, %v9753_v48  ;;  %v32206_v5 = vand.u32 4294901760, %v28430_v35 }
 0x48c   : > { %v9856_v23 = vpop.f32.mrf.mxu1  ;;  %11424 = vmatmul.mubr.f32.vlgmr.msra.gmra.mxu0 %v28067_v52  ;;  %11596 = vmatprep.subr.mxu0 %v28445_v50  ;;  %v11482_v16 = vand.u32 4294901760, %v11481_v21  ;;  %v9646_v21 = vadd.f32 %v28370_v9, %v28334_v36  ;;  %v9644_v36 = vadd.f32 %v28361_v44, %v28328_v56  ;;  %v9660_v44 = vadd.f32 %v28408_v59, %v28368_v13 }
 0x48d   : > { %v9953_v1 = vpop.f32.mrf.mxu0  ;;  %11599 = vmatpush1.msra.mxu0 %v28430_v35  ;;  %11340 = vmatprep.mubr.f32.mxu1 %v32197_v15 }
 0x48e   : > { %v9858_v22 = vpop.f32.mrf.mxu1  ;;  %11483 = vmatprep.subr.mxu1 %v11482_v16  ;;  %11602 = vmatprep.subr.mxu0 %v28419_v31  ;;  %v9745_v9 = vadd.f32 %v28382_v19, %v9646_v21  ;;  %v9743_v56 = vadd.f32 %v28376_v0, %v9644_v36  ;;  %v9954_v63 = vadd.f32 %v9953_v1, %v9848_v33  ;;  %v32208_v36 = vand.u32 4294901760, %v28433_v6 }
 0x48f   : > { %v9955_v25 = vpop.f32.mrf.mxu0  ;;  %11429 = vmatprep.mubr.f32.mxu0 %v32197_v15  ;;  %11489 = vmatpush1.msra.mxu1 %v11488_v41  ;;  %v9761_v7 = vadd.f32 %v28439_v11, %v9660_v44 }
 0x490   : > { %v10038_v16 = vpop.f32.mrf.mxu1  ;;  %11605 = vmatpush1.msra.mxu0 %v28433_v6  ;;  %11342 = vmatmul.mubr.f32.gmra.mxu1 %v28015_v14  ;;  %v9841_v19 = vadd.f32 %v28441_v32, %v9745_v9  ;;  %v9839_v0 = vadd.f32 %v28423_v30, %v9743_v56  ;;  %v9857_v32 = vadd.f32 %v9856_v23, %v9759_v12  ;;  %v32209_v9 = vand.u32 4294901760, %v28437_v57 }
 0x491   : > { %11435 = vmatmul.mubr.f32.gmra.mxu0 %v28098_v4  ;;  %11495 = vmatprep.subr.mxu1 %v11494_v55  ;;  %v9960_v41 = vpop.f32.mrf.mxu0  ;;  %v9956_v3 = vadd.f32 %v9955_v25, %v9850_v29  ;;  %v9859_v11 = vadd.f32 %v9858_v22, %v9761_v7  ;;  %v32207_v55 = vand.u32 4294901760, %v28419_v31 }
 0x492   : > { %v10040_v21 = vpop.f32.mrf.mxu1  ;;  %11608 = vmatprep.subr.mxu0 %v28437_v57  ;;  %11501 = vmatpush1.msra.mxu1 %v11500_v45  ;;  %v9949_v13 = vadd.f32 %v9948_v20, %v9841_v19  ;;  %v9947_v60 = vadd.f32 %v28458_v40, %v9839_v0  ;;  %v9961_v50 = vadd.f32 %v9960_v41, %v9857_v32 }
 0x493   : > { %11611 = vmatpush1.msra.mxu0 %v28452_v2  ;;  %11507 = vmatprep.subr.mxu1 %v11506_v58  ;;  %v9962_v24 = vpop.f32.mrf.mxu0 }
 0x494   : > { %v10045_v59 = vpop.f32.mrf.mxu1  ;;  %11796 = vmatprep.subr.mxu0 %v11480_v10  ;;  %11440 = vmatprep.mubr.f32.mxu0 %v32197_v15  ;;  %v10041_v1 = vadd.f32 %v10040_v21, %v9949_v13  ;;  %v10039_v25 = vadd.f32 %v10038_v16, %v9947_v60  ;;  %v9963_v40 = vadd.f32 %v9962_v24, %v9859_v11 }
 0x495   : > { %v10046_v34 = vadd.f32 %v10045_v59, %v9954_v63  ;;  %11513 = vmatpush1.msra.mxu1 %v11512_v39  ;;  %11546 = vmatprep.mubr.f32.mxu1 %v32197_v15 }
 0x496   : > { %v10047_v30 = vpop.f32.mrf.mxu1  ;;  %11446 = vmatmul.mubr.f32.gmra.mxu0 %v28126_v53  ;;  %11548 = vmatmul.mubr.f32.vlgmr.msra.gmra.mxu1 %v27977_v54 }
 0x497   : > { %v10048_v10 = vadd.f32 %v10047_v30, %v9956_v3  ;;  %11696 = vmatprep.subr.mxu1 %v28426_v47  ;;  %11553 = vmatprep.mubr.f32.mxu1 %v32197_v15  ;;  %25161 = vtanh.f32 %v10046_v34 }
 0x498   : > { %v10052_v20 = vpop.f32.mrf.mxu1  ;;  %11698 = vmatpush1.msra.mxu1 %v28412_v46  ;;  %11644 = vmatprep.mubr.f32.mxu0 %v32197_v15 }
 0x499   : > { %25163 = vtanh.f32 %v10048_v10  ;;  %v10053_v23 = vadd.f32 %v10052_v20, %v9961_v50  ;;  %11700 = vmatprep.subr.mxu1 %v28393_v43 }
 0x49a   : > { %25165 = vtanh.f32 %v10041_v1  ;;  %v10054_v22 = vpop.f32.mrf.mxu1  ;;  %11702 = vmatpush1.msra.mxu1 %v28401_v18  ;;  %11647 = vmatmul.mubr.f32.vlgmr.msra.gmra.mxu0 %v27992_v17 }
 0x49b   : > { %25167 = vtanh.f32 %v10053_v23  ;;  %v10055_v42 = vadd.f32 %v10054_v22, %v9963_v40  ;;  %11555 = vmatmul.mubr.f32.gmra.mxu1 %v27994_v38  ;;  %11704 = vmatprep.subr.mxu1 %v28406_v8 }
 0x49c   : > { %25169 = vtanh.f32 %v10039_v25  ;;  %11800 = vmatpush1.msra.mxu0 %v32206_v5  ;;  %11706 = vmatpush1.msra.mxu1 %v28416_v37 }
 0x49d   : > { %25171 = vtanh.f32 %v10055_v42  ;;  %11804 = vmatprep.subr.mxu0 %v32207_v55  ;;  %11898 = vmatprep.subr.mxu1 %v28426_v47 }
 0x49e   : > { %11808 = vmatpush1.msra.mxu0 %v32208_v36  ;;  %11560 = vmatprep.mubr.f32.mxu1 %v32197_v15 }
 0x49f   : > { %11652 = vmatprep.mubr.f32.mxu0 %v32197_v15  ;;  %11812 = vmatprep.subr.mxu0 %v32209_v9 }
 0x4a0   : > { %11562 = vmatmul.mubr.f32.gmra.mxu1 %v28015_v14  ;;  %11655 = vmatmul.mubr.f32.gmra.mxu0 %v28011_v28 }
 0x4a1   : > { %11816 = vmatpush1.msra.mxu0 %v11510_v49  ;;  %11660 = vmatprep.mubr.f32.mxu0 %v32197_v15 }
 0x4a2   : > { %11739 = vmatprep.mubr.f32.mxu1 %v32197_v15 }
 0x4a4   : > { %11663 = vmatmul.mubr.f32.gmra.mxu0 %v28051_v27  ;;  %11743 = vmatmul.mubr.f32.vlgmr.msra.gmra.mxu1 %v28008_v61  ;;  %v25162_v31 = vpop.eup %25161 }
 0x4a5   : > { %11900 = vmatpush1.msra.mxu1 %v28412_v46  ;;  %11748 = vmatprep.mubr.f32.mxu1 %v32197_v15 }
 0x4a6   : > { %v25164_v47 = vpop.eup %25163  ;;  %11902 = vmatprep.subr.mxu1 %v28393_v43  ;;  %11849 = vmatprep.mubr.f32.mxu0 %v32197_v15  ;;  %v28565_v43 = vand.u32 4294901760, %v25162_v31 }
 0x4a7   : > { %v25166_v35 = vpop.eup %25165  ;;  %11904 = vmatpush1.msra.mxu1 %v28401_v18  ;;  %v28560_v57 = vand.u32 4294901760, %v25164_v47 }
 0x4a8   : > { %v25168_v6 = vpop.eup %25167  ;;  %11906 = vmatprep.subr.mxu1 %v28406_v8  ;;  %11752 = vmatmul.mubr.f32.gmra.mxu1 %v28040_v26  ;;  %v28571_v8 = vand.u32 4294901760, %v25166_v35  ;;  %v28588_v33 = vsub.f32 %v25162_v31, %v28565_v43 }
 0x4a9   : > { %v25170_v2 = vpop.eup %25169  ;;  %11851 = vmatmul.mubr.f32.vlgmr.msra.gmra.mxu0 %v27977_v54  ;;  %11908 = vmatpush1.msra.mxu1 %v28416_v37  ;;  %v10113_v46 = vsel %vm2530_vm3, %v25168_v6, 0  ;;  %v28583_v48 = vsub.f32 %v25164_v47, %v28560_v57 }
 0x4aa   : > { %v25172_v49 = vpop.eup %25171  ;;  %11757 = vmatprep.mubr.f32.mxu1 %v32197_v15  ;;  %11856 = vmatprep.mubr.f32.mxu0 %v32197_v15  ;;  %v28569_v18 = vand.u32 4294901760, %v10113_v46  ;;  %v28577_v37 = vand.u32 4294901760, %v25170_v2  ;;  %v28595_v44 = vsub.f32 %v25166_v35, %v28571_v8  ;;  %v12113_v12 = vand.u32 4294901760, %v28588_v33 }
 0x4ab   : > { %v10116_v16 = vsel %vm2530_vm3, %v25172_v49, 0  ;;  %v12107_v41 = vand.u32 4294901760, %v28583_v48 }
 0x4ac   : > { %11761 = vmatmul.mubr.f32.gmra.mxu1 %v28078_v62  ;;  %v28575_v45 = vand.u32 4294901760, %v10116_v16  ;;  %v28580_v51 = vsub.f32 %v10113_v46, %v28569_v18  ;;  %v28602_v21 = vsub.f32 %v25170_v2, %v28577_v37  ;;  %v12119_v39 = vand.u32 4294901760, %v28595_v44 }
 0x4ad   : > { %11858 = vmatmul.mubr.f32.gmra.mxu0 %v27994_v38  ;;  %11941 = vmatprep.mubr.f32.mxu1 %v32197_v15  ;;  %v12108_v7 = vsub.f32 %v28583_v48, %v12107_v41  ;;  %v12114_v59 = vsub.f32 %v28588_v33, %v12113_v12 }
 0x4ae   : > { %11990 = vmatprep.subr.mxu0 %v28575_v45  ;;  %11863 = vmatprep.mubr.f32.mxu0 %v32197_v15  ;;  %v12094_v58 = vsub.f32 %v10116_v16, %v28575_v45  ;;  %v12101_v56 = vand.u32 4294901760, %v28580_v51  ;;  %v12125_v13 = vand.u32 4294901760, %v28602_v21  ;;  %v12120_v3 = vsub.f32 %v28595_v44, %v12119_v39 }
 0x4af   : > { %11992 = vmatpush1.msra.mxu0 %v28569_v18  ;;  %v12109_v34 = vand.u32 4294901760, %v12108_v7 }
 0x4b0   : > { %11943 = vmatmul.mubr.f32.vlgmr.msra.gmra.mxu1 %v27977_v54  ;;  %11994 = vmatprep.subr.mxu0 %v28560_v57  ;;  %v12095_v19 = vand.u32 4294901760, %v12094_v58  ;;  %v12102_v63 = vsub.f32 %v28580_v51, %v12101_v56  ;;  %v12126_v60 = vsub.f32 %v28602_v21, %v12125_v13  ;;  %v12121_v24 = vand.u32 4294901760, %v12120_v3 }
 0x4b1   : > { %11865 = vmatmul.mubr.f32.gmra.mxu0 %v28015_v14  ;;  %11948 = vmatprep.mubr.f32.mxu1 %v32197_v15 }
 0x4b2   : > { %11996 = vmatpush1.msra.mxu0 %v28565_v43  ;;  %12033 = vmatprep.mubr.f32.mxu0 %v32197_v15  ;;  %v12096_v29 = vsub.f32 %v12094_v58, %v12095_v19  ;;  %v12103_v32 = vand.u32 4294901760, %v12102_v63  ;;  %v12127_v1 = vand.u32 4294901760, %v12126_v60 }
 0x4b3   : > { %11998 = vmatprep.subr.mxu0 %v28571_v8 }
 0x4b4   : > { %12000 = vmatpush1.msra.mxu0 %v28577_v37  ;;  %11950 = vmatmul.mubr.f32.gmra.mxu1 %v27994_v38  ;;  %v12097_v0 = vand.u32 4294901760, %v12096_v29 }
 0x4b5   : > { %12039 = vmatmul.mubr.f32.vlgmr.msra.gmra.mxu0 %v28067_v52  ;;  %12211 = vmatprep.subr.mxu0 %v12094_v58  ;;  %v12115_v52 = vand.u32 4294901760, %v12114_v59 }
 0x4b6   : > { %12214 = vmatpush1.msra.mxu0 %v28580_v51  ;;  %12098 = vmatprep.subr.mxu1 %v12097_v0 }
 0x4b7   : > { %12217 = vmatprep.subr.mxu0 %v28583_v48  ;;  %11955 = vmatprep.mubr.f32.mxu1 %v32197_v15 }
 0x4b8   : > { %12044 = vmatprep.mubr.f32.mxu0 %v32197_v15  ;;  %12104 = vmatpush1.msra.mxu1 %v12103_v32 }
 0x4b9   : > { %12220 = vmatpush1.msra.mxu0 %v28588_v33  ;;  %11957 = vmatmul.mubr.f32.gmra.mxu1 %v28015_v14 }
 0x4ba   : > { %12050 = vmatmul.mubr.f32.gmra.mxu0 %v28098_v4  ;;  %12110 = vmatprep.subr.mxu1 %v12109_v34 }
 0x4bb   : > { %12223 = vmatprep.subr.mxu0 %v28595_v44  ;;  %12116 = vmatpush1.msra.mxu1 %v12115_v52 }
 0x4bc   : > { %12226 = vmatpush1.msra.mxu0 %v28602_v21  ;;  %12122 = vmatprep.subr.mxu1 %v12121_v24 }
 0x4bd   : > { %12411 = vmatprep.subr.mxu0 %v12095_v19  ;;  %12055 = vmatprep.mubr.f32.mxu0 %v32197_v15 }
 0x4be   : > { %12128 = vmatpush1.msra.mxu1 %v12127_v1  ;;  %12161 = vmatprep.mubr.f32.mxu1 %v32197_v15 }
 0x4bf   : > { %12061 = vmatmul.mubr.f32.gmra.mxu0 %v28126_v53  ;;  %12163 = vmatmul.mubr.f32.vlgmr.msra.gmra.mxu1 %v27977_v54 }
 0x4c0   : > { %12311 = vmatprep.subr.mxu1 %v28575_v45  ;;  %12168 = vmatprep.mubr.f32.mxu1 %v32197_v15 }
 0x4c1   : > { %12313 = vmatpush1.msra.mxu1 %v28569_v18  ;;  %12259 = vmatprep.mubr.f32.mxu0 %v32197_v15 }
 0x4c2   : > { %12315 = vmatprep.subr.mxu1 %v28560_v57 }
 0x4c3   : > { %12317 = vmatpush1.msra.mxu1 %v28565_v43  ;;  %12262 = vmatmul.mubr.f32.vlgmr.msra.gmra.mxu0 %v27992_v17 }
 0x4c4   : > { %12170 = vmatmul.mubr.f32.gmra.mxu1 %v27994_v38  ;;  %12319 = vmatprep.subr.mxu1 %v28571_v8 }
 0x4c5   : > { %12415 = vmatpush1.msra.mxu0 %v12101_v56  ;;  %12321 = vmatpush1.msra.mxu1 %v28577_v37 }
 0x4c6   : > { %12419 = vmatprep.subr.mxu0 %v12107_v41  ;;  %12513 = vmatprep.subr.mxu1 %v28575_v45 }
 0x4c7   : > { %12423 = vmatpush1.msra.mxu0 %v12113_v12  ;;  %12175 = vmatprep.mubr.f32.mxu1 %v32197_v15 }
 0x4c8   : > { %12267 = vmatprep.mubr.f32.mxu0 %v32197_v15  ;;  %12427 = vmatprep.subr.mxu0 %v12119_v39 }
 0x4c9   : > { %12177 = vmatmul.mubr.f32.gmra.mxu1 %v28015_v14  ;;  %12270 = vmatmul.mubr.f32.gmra.mxu0 %v28011_v28 }
 0x4ca   : > { %12431 = vmatpush1.msra.mxu0 %v12125_v13  ;;  %12275 = vmatprep.mubr.f32.mxu0 %v32197_v15 }
 0x4cb   : > { %12354 = vmatprep.mubr.f32.mxu1 %v32197_v15 }
 0x4cd   : > { %12278 = vmatmul.mubr.f32.gmra.mxu0 %v28051_v27  ;;  %12358 = vmatmul.mubr.f32.vlgmr.msra.gmra.mxu1 %v28008_v61 }
 0x4ce   : > { %12515 = vmatpush1.msra.mxu1 %v28569_v18  ;;  %12363 = vmatprep.mubr.f32.mxu1 %v32197_v15 }
 0x4cf   : > { %12517 = vmatprep.subr.mxu1 %v28560_v57  ;;  %12464 = vmatprep.mubr.f32.mxu0 %v32197_v15 }
 0x4d0   : > { %12519 = vmatpush1.msra.mxu1 %v28565_v43 }
 0x4d1   : > { %12521 = vmatprep.subr.mxu1 %v28571_v8  ;;  %12367 = vmatmul.mubr.f32.gmra.mxu1 %v28040_v26 }
 0x4d2   : > { %12466 = vmatmul.mubr.f32.vlgmr.msra.gmra.mxu0 %v27977_v54  ;;  %12523 = vmatpush1.msra.mxu1 %v28577_v37 }
 0x4d3   : > { %12372 = vmatprep.mubr.f32.mxu1 %v32197_v15  ;;  %12471 = vmatprep.mubr.f32.mxu0 %v32197_v15 }
 0x4d5   : > { %12376 = vmatmul.mubr.f32.gmra.mxu1 %v28078_v62 }
 0x4d6   : > { %12473 = vmatmul.mubr.f32.gmra.mxu0 %v27994_v38  ;;  %12556 = vmatprep.mubr.f32.mxu1 %v32197_v15 }
 0x4d7   : > { %12478 = vmatprep.mubr.f32.mxu0 %v32197_v15 }
 0x4d9   : > { %12558 = vmatmul.mubr.f32.vlgmr.msra.gmra.mxu1 %v27977_v54 }
 0x4da   : > { %12480 = vmatmul.mubr.f32.gmra.mxu0 %v28015_v14  ;;  %12563 = vmatprep.mubr.f32.mxu1 %v32197_v15 }
 0x4db   : > { %12709 = vmatprep.mubr.f32.mxu0 %v32197_v15 }
 0x4dd   : > { %12565 = vmatmul.mubr.f32.gmra.mxu1 %v27994_v38 }
 0x4de   : > { %12570 = vmatprep.mubr.f32.mxu1 %v32197_v15 }
 0x4e1   : > { %12572 = vmatmul.mubr.f32.gmra.mxu1 %v28015_v14 }
 0x4e2   : > { %12837 = vmatprep.mubr.f32.mxu1 %v32197_v15 }
 0x4fb   : > { %v10195_v17 = vpop.f32.mrf.mxu0 }
 0x4fd   : > { %v10197_v61 = vpop.f32.mrf.mxu0 }
 0x4ff   : > { %v10206_v28 = vpop.f32.mrf.mxu0 }
 0x501   : > { %v10208_v26 = vpop.f32.mrf.mxu0 }
 0x503   : > { %v10217_v27 = vpop.f32.mrf.mxu0 }
 0x504   : > { %v10319_v54 = vpop.f32.mrf.mxu1 }
 0x505   : > { %v10219_v62 = vpop.f32.mrf.mxu0  ;;  %v10320_v49 = vadd.f32 %v10319_v54, %v10195_v17 }
 0x506   : > { %v10321_v4 = vpop.f32.mrf.mxu1 }
 0x507   : > { %v10418_v53 = vpop.f32.mrf.mxu0  ;;  %v10322_v6 = vadd.f32 %v10321_v4, %v10197_v61 }
 0x508   : > { %v10326_v30 = vpop.f32.mrf.mxu1  ;;  %v10419_v51 = vadd.f32 %v10418_v53, %v10320_v49 }
 0x509   : > { %v10420_v11 = vpop.f32.mrf.mxu0  ;;  %v10327_v47 = vadd.f32 %v10326_v30, %v10206_v28 }
 0x50a   : > { %v10328_v50 = vpop.f32.mrf.mxu1  ;;  %v10421_v18 = vadd.f32 %v10420_v11, %v10322_v6 }
 0x50b   : > { %v10329_v57 = vadd.f32 %v10328_v50, %v10208_v26  ;;  %v24919_v50 = vld [vmem:[%s32060_s2 + $0x68] sm:$0xff] }
 0x50d   : > { %v10333_v10 = vpop.f32.mrf.mxu1  ;;  %v10426_v38 = vpop.f32.mrf.mxu0 }
 0x50e   : > { %v10427_v46 = vadd.f32 %v10426_v38, %v10327_v47  ;;  %v10334_v56 = vadd.f32 %v10333_v10, %v10217_v27  ;;  %v24918_v27 = vld [vmem:[%s32060_s2 + $0x60] sm:$0xff] }
 0x50f   : > { %v10335_v25 = vpop.f32.mrf.mxu1  ;;  %v10428_v20 = vpop.f32.mrf.mxu0  ;;  %v12607_v53 = vsel %vm2520_vm2, %v24918_v27, 0 }
 0x510   : > { %v10429_v8 = vadd.f32 %v10428_v20, %v10329_v57  ;;  %v10336_v29 = vadd.f32 %v10335_v25, %v10219_v62  ;;  %v28696_v38 = vand.u32 4294901760, %v12607_v53 }
 0x511   : > { %v10434_v40 = vpop.f32.mrf.mxu0  ;;  %v10514_v14 = vpop.f32.mrf.mxu1 }
 0x512   : > { %v10515_v41 = vadd.f32 %v10514_v14, %v10419_v51  ;;  %v10435_v63 = vadd.f32 %v10434_v40, %v10334_v56  ;;  %v12610_v40 = vsel %vm2520_vm2, %v24919_v50, 0  ;;  %v24920_v14 = vld [vmem:[%s32060_s2 + $0x70] sm:$0x1f] }
 0x513   : > { %v10436_v23 = vpop.f32.mrf.mxu0  ;;  %v10516_v22 = vpop.f32.mrf.mxu1 }
 0x514   : > { %v10517_v48 = vadd.f32 %v10516_v22, %v10421_v18  ;;  %v10437_v3 = vadd.f32 %v10436_v23, %v10336_v29 }
 0x515   : > { %v10523_v42 = vpop.f32.mrf.mxu1 }
 0x516   : > { %v10622_v5 = vpop.f32.mrf.mxu0  ;;  %v10524_v45 = vadd.f32 %v10523_v42, %v10427_v46 }
 0x517   : > { %v10525_v55 = vpop.f32.mrf.mxu1  ;;  %v10623_v7 = vadd.f32 %v10622_v5, %v10515_v41  ;;  %v28711_v5 = vsub.f32 %v12607_v53, %v28696_v38 }
 0x518   : > { %v10624_v36 = vpop.f32.mrf.mxu0  ;;  %v10526_v33 = vadd.f32 %v10525_v55, %v10429_v8 }
 0x519   : > { %v10532_v9 = vpop.f32.mrf.mxu1  ;;  %v10625_v21 = vadd.f32 %v10624_v36, %v10517_v48 }
 0x51a   : > { %v10629_v31 = vpop.f32.mrf.mxu0  ;;  %v10533_v34 = vadd.f32 %v10532_v9, %v10435_v63  ;;  %v28715_v9 = vand.u32 4294901760, %v12610_v40 }
 0x51b   : > { %v10534_v35 = vpop.f32.mrf.mxu1  ;;  %v10630_v44 = vadd.f32 %v10629_v31, %v10524_v45  ;;  %v12613_v31 = vsel %vm2520_vm2, %v24920_v14, 0 }
 0x51c   : > { %v10631_v2 = vpop.f32.mrf.mxu0  ;;  %v10535_v24 = vadd.f32 %v10534_v35, %v10437_v3  ;;  %v28729_v49 = vand.u32 4294901760, %v12613_v31 }
 0x51d   : > { %v10714_v43 = vpop.f32.mrf.mxu1  ;;  %v10632_v12 = vadd.f32 %v10631_v2, %v10526_v33 }
 0x51e   : > { %v10636_v16 = vpop.f32.mrf.mxu0  ;;  %v10715_v60 = vadd.f32 %v10714_v43, %v10623_v7  ;;  %v28727_v43 = vand.u32 4294901760, %v28711_v5  ;;  %v28759_v29 = vsub.f32 %v12613_v31, %v28729_v49 }
 0x51f   : > { %v10716_v37 = vpop.f32.mrf.mxu1  ;;  %v10637_v1 = vadd.f32 %v10636_v16, %v10533_v34  ;;  %v28734_v16 = vsub.f32 %v12610_v40, %v28715_v9 }
 0x520   : > { %v10638_v58 = vpop.f32.mrf.mxu0  ;;  %v10717_v13 = vadd.f32 %v10716_v37, %v10625_v21  ;;  %v12713_v21 = vsub.f32 %v28711_v5, %v28727_v43 }
 0x521   : > { %v10721_v19 = vpop.f32.mrf.mxu1  ;;  %v10639_v28 = vadd.f32 %v10638_v58, %v10535_v24 }
 0x522   : > { %v10722_v39 = vadd.f32 %v10721_v19, %v10630_v44  ;;  %v28791_v27 = vand.u32 4294901760, %v12713_v21 }
 0x523   : > { %v10723_v0 = vpop.f32.mrf.mxu1 }
 0x524   : > { %v28675_v59 = vpop.f32.mrf.mxu0  ;;  %v10724_v32 = vadd.f32 %v10723_v0, %v10632_v12  ;;  %v28767_v0 = vand.u32 4294901760, %v28734_v16 }
 0x526   : > { %25173 = vtanh.f32 %v10724_v32  ;;  %v28677_v52 = vpop.f32.mrf.mxu0 }
 0x527   : > { %25175 = vtanh.f32 %v10722_v39 }
 0x528   : > { %25177 = vtanh.f32 %v10717_v13  ;;  %v10728_v17 = vpop.f32.mrf.mxu1  ;;  %v28679_v61 = vpop.f32.mrf.mxu0 }
 0x529   : > { %v10729_v26 = vadd.f32 %v10728_v17, %v10637_v1  ;;  %25179 = vtanh.f32 %v10715_v60 }
 0x52a   : > { %v10730_v54 = vpop.f32.mrf.mxu1  ;;  %v28684_v62 = vpop.f32.mrf.mxu0 }
 0x52b   : > { %25181 = vtanh.f32 %v10729_v26  ;;  %v10731_v4 = vadd.f32 %v10730_v54, %v10639_v28  ;;  %v28786_v28 = vand.u32 4294901760, %v28759_v29 }
 0x52d   : > { %25183 = vtanh.f32 %v10731_v4  ;;  %v28687_v30 = vpop.f32.mrf.mxu0  ;;  %v12724_v4 = vsub.f32 %v28734_v16, %v28767_v0 }
 0x52e   : > { %v28689_v11 = vpop.f32.mrf.mxu1 }
 0x52f   : > { %v28694_v10 = vpop.f32.mrf.mxu0  ;;  %v28819_v21 = vand.u32 4294901760, %v12724_v4 }
 0x530   : > { %v28698_v25 = vpop.f32.mrf.mxu1 }
 0x531   : > { %v28700_v20 = vpop.f32.mrf.mxu0 }
 0x532   : > { %v28706_v23 = vpop.f32.mrf.mxu1 }
 0x533   : > { %v25174_v22 = vpop.eup %25173  ;;  %v28708_v42 = vpop.f32.mrf.mxu0 }
 0x534   : > { %v25176_v55 = vpop.eup %25175  ;;  %v28713_v36 = vpop.f32.mrf.mxu1  ;;  %v28718_v35 = vand.u32 4294901760, %v25174_v22 }
 0x535   : > { %v25178_v47 = vpop.eup %25177  ;;  %v28724_v46 = vand.u32 4294901760, %v25176_v55 }
 0x536   : > { %v25180_v6 = vpop.eup %25179  ;;  %v28731_v8 = vand.u32 4294901760, %v25178_v47  ;;  %v28746_v56 = vsub.f32 %v25174_v22, %v28718_v35 }
 0x537   : > { %v28720_v57 = vpop.f32.mrf.mxu1  ;;  %v28722_v2 = vpop.f32.mrf.mxu0  ;;  %v28743_v58 = vand.u32 4294901760, %v25180_v6  ;;  %v28756_v12 = vsub.f32 %v25176_v55, %v28724_v46 }
 0x538   : > { %v25182_v18 = vpop.eup %25181  ;;  %v28770_v7 = vsub.f32 %v25178_v47, %v28731_v8  ;;  %v32109_v60 = vand.u32 4294901760, %v28746_v56 }
 0x539   : > { %v28736_v45 = vpop.f32.mrf.mxu1  ;;  %v28738_v37 = vpop.f32.mrf.mxu0  ;;  %v12616_v51 = vsel %vm2530_vm3, %v25182_v18, 0  ;;  %v28781_v24 = vsub.f32 %v25180_v6, %v28743_v58  ;;  %v32110_v17 = vand.u32 4294901760, %v28756_v12  ;;  %v12735_v18 = vsub.f32 %v28759_v29, %v28786_v28 }
 0x53a   : > { %v25184_v48 = vpop.eup %25183  ;;  %v28741_v33 = vand.u32 4294901760, %v12616_v51  ;;  %v32113_v53 = vand.u32 4294901760, %v28770_v7  ;;  %v12784_v55 = vsub.f32 %v28746_v56, %v32109_v60 }
 0x53b   : > { %v28748_v44 = vpop.f32.mrf.mxu0  ;;  %v28750_v19 = vpop.f32.mrf.mxu1  ;;  %v12619_v41 = vsel %vm2530_vm3, %v25184_v48, 0  ;;  %v12801_v31 = vand.u32 4294901760, %v28781_v24  ;;  %v12790_v6 = vsub.f32 %v28756_v12, %v32110_v17  ;;  %v10935_v17 = vadd.f32 %v28689_v11, %v28675_v59 }
 0x53c   : > { %v28761_v63 = vand.u32 4294901760, %v12619_v41  ;;  %v28764_v39 = vsub.f32 %v12616_v51, %v28741_v33  ;;  %v10942_v51 = vadd.f32 %v28706_v23, %v28679_v61  ;;  %v12796_v60 = vsub.f32 %v28770_v7, %v32113_v53 }
 0x53d   : > { %v28772_v13 = vpop.f32.mrf.mxu0  ;;  %v11131_v32 = vpop.f32.mrf.mxu1  ;;  %v10944_v23 = vadd.f32 %v28713_v36, %v28684_v62  ;;  %v12785_v53 = vand.u32 4294901760, %v12784_v55  ;;  %v12802_v59 = vsub.f32 %v28781_v24, %v12801_v31  ;;  %v11034_v62 = vadd.f32 %v28700_v20, %v10935_v17 }
 0x53e   : > { %12666 = vmatprep.subr.mxu0 %v28761_v63  ;;  %v28776_v3 = vsub.f32 %v12619_v41, %v28761_v63  ;;  %v32111_v34 = vand.u32 4294901760, %v28764_v39  ;;  %v11042_v4 = vadd.f32 %v28722_v2, %v10942_v51  ;;  %v12797_v55 = vand.u32 4294901760, %v12796_v60 }
 0x53f   : > { %v11138_v1 = vpop.f32.mrf.mxu1  ;;  %12668 = vmatpush1.msra.mxu0 %v28741_v33  ;;  %v11044_v36 = vadd.f32 %v28738_v37, %v10944_v23  ;;  %v12803_v37 = vand.u32 4294901760, %v12802_v59  ;;  %v10951_v60 = vadd.f32 %v28736_v45, %v28694_v10 }
 0x540   : > { %v28788_v26 = vpop.f32.mrf.mxu0  ;;  %12670 = vmatprep.subr.mxu0 %v28718_v35  ;;  %v32112_v54 = vand.u32 4294901760, %v28776_v3  ;;  %v12778_v40 = vsub.f32 %v28764_v39, %v32111_v34  ;;  %v10937_v34 = vadd.f32 %v28698_v25, %v28677_v52  ;;  %v12791_v25 = vand.u32 4294901760, %v12790_v6 }
 0x541   : > { %v11140_v50 = vpop.f32.mrf.mxu1  ;;  %12672 = vmatpush1.msra.mxu0 %v28724_v46  ;;  %v11139_v2 = vadd.f32 %v11138_v1, %v11042_v4  ;;  %v11130_v6 = vadd.f32 %v28750_v19, %v11034_v62  ;;  %v11052_v10 = vadd.f32 %v28772_v13, %v10951_v60  ;;  %v32212_v62 = vand.u32 4294901760, %v28746_v56 }
 0x542   : > { %v11239_v14 = vpop.f32.mrf.mxu0  ;;  %12674 = vmatprep.subr.mxu0 %v28731_v8  ;;  %v12772_v22 = vsub.f32 %v28776_v3, %v32112_v54  ;;  %v12779_v61 = vand.u32 4294901760, %v12778_v40  ;;  %v11036_v52 = vadd.f32 %v28708_v42, %v10937_v34  ;;  %v28839_v40 = vand.u32 4294901760, %v12735_v18 }
 0x543   : > { %v11147_v47 = vpop.f32.mrf.mxu1  ;;  %12676 = vmatpush1.msra.mxu0 %v28743_v58  ;;  %v10949_v42 = vadd.f32 %v28720_v57, %v28687_v30  ;;  %v11141_v18 = vadd.f32 %v11140_v50, %v11044_v36  ;;  %v11238_v19 = vadd.f32 %v28788_v26, %v11130_v6  ;;  %v32213_v36 = vand.u32 4294901760, %v28756_v12 }
 0x544   : > { %v11244_v48 = vpop.f32.mrf.mxu0  ;;  %12715 = vmatmul.mubr.f32.vlgmr.msra.gmra.mxu0 %v28791_v27  ;;  %12887 = vmatprep.subr.mxu0 %v28776_v3  ;;  %v12773_v41 = vand.u32 4294901760, %v12772_v22  ;;  %v11132_v34 = vadd.f32 %v11131_v32, %v11036_v52  ;;  %v32210_v32 = vand.u32 4294901760, %v28776_v3  ;;  %v32211_v52 = vand.u32 4294901760, %v28764_v39 }
 0x545   : > { %v11149_v54 = vpop.f32.mrf.mxu1  ;;  %12890 = vmatpush1.msra.mxu0 %v28764_v39  ;;  %12720 = vmatprep.mubr.f32.mxu0 %v32197_v15  ;;  %v11245_v20 = vadd.f32 %v11244_v48, %v11139_v2  ;;  %v11050_v1 = vadd.f32 %v28748_v44, %v10949_v42  ;;  %v32214_v39 = vand.u32 4294901760, %v28770_v7 }
 0x546   : > { %v11246_v22 = vpop.f32.mrf.mxu0  ;;  %12774 = vmatprep.subr.mxu1 %v12773_v41  ;;  %12893 = vmatprep.subr.mxu0 %v28746_v56  ;;  %v11240_v30 = vadd.f32 %v11239_v14, %v11132_v34  ;;  %v11150_v26 = vadd.f32 %v11149_v54, %v11052_v10 }
 0x547   : > { %v11329_v11 = vpop.f32.mrf.mxu1  ;;  %12780 = vmatpush1.msra.mxu1 %v12779_v61  ;;  %12896 = vmatpush1.msra.mxu0 %v28756_v12  ;;  %v11148_v45 = vadd.f32 %v11147_v47, %v11050_v1 }
 0x548   : > { %v11251_v51 = vpop.f32.mrf.mxu0  ;;  %12726 = vmatmul.mubr.f32.gmra.mxu0 %v28819_v21  ;;  %12786 = vmatprep.subr.mxu1 %v12785_v53  ;;  %v11247_v53 = vadd.f32 %v11246_v22, %v11141_v18  ;;  %v11330_v3 = vadd.f32 %v11329_v11, %v11238_v19 }
 0x549   : > { %v11331_v41 = vpop.f32.mrf.mxu1  ;;  %12899 = vmatprep.subr.mxu0 %v28770_v7  ;;  %12792 = vmatpush1.msra.mxu1 %v12791_v25  ;;  %v11252_v4 = vadd.f32 %v11251_v51, %v11148_v45 }
 0x54a   : > { %v11253_v17 = vpop.f32.mrf.mxu0  ;;  %12902 = vmatpush1.msra.mxu0 %v28781_v24  ;;  %12798 = vmatprep.subr.mxu1 %v12797_v55  ;;  %v11332_v44 = vadd.f32 %v11331_v41, %v11240_v30 }
 0x54b   : > { %v11336_v57 = vpop.f32.mrf.mxu1  ;;  %13087 = vmatprep.subr.mxu0 %v32210_v32  ;;  %12731 = vmatprep.mubr.f32.mxu0 %v32197_v15  ;;  %v11254_v47 = vadd.f32 %v11253_v17, %v11150_v26 }
 0x54c   : > { %v11337_v50 = vadd.f32 %v11336_v57, %v11245_v20  ;;  %v28856_v48 = vpop.f32.mrf.mxu0  ;;  %12804 = vmatpush1.msra.mxu1 %v12803_v37  ;;  %12737 = vmatmul.mubr.f32.gmra.mxu0 %v28839_v40 }
 0x54d   : > { %v11338_v14 = vpop.f32.mrf.mxu1  ;;  %12839 = vmatmul.mubr.f32.vlgmr.msra.gmra.mxu1 %v28696_v38  ;;  %12987 = vmatprep.subr.mxu1 %v28761_v63 }
 0x54e   : > { %v11339_v61 = vadd.f32 %v11338_v14, %v11247_v53  ;;  %v28862_v23 = vpop.f32.mrf.mxu0  ;;  %12989 = vmatpush1.msra.mxu1 %v28741_v33  ;;  %12844 = vmatprep.mubr.f32.mxu1 %v32197_v15  ;;  %25185 = vtanh.f32 %v11337_v50 }
 0x54f   : > { %12991 = vmatprep.subr.mxu1 %v28718_v35  ;;  %12935 = vmatprep.mubr.f32.mxu0 %v32197_v15 }
 0x550   : > { %25187 = vtanh.f32 %v11339_v61  ;;  %v11343_v13 = vpop.f32.mrf.mxu1  ;;  %12993 = vmatpush1.msra.mxu1 %v28724_v46  ;;  %12938 = vmatmul.mubr.f32.vlgmr.msra.gmra.mxu0 %v28711_v5 }
 0x551   : > { %25189 = vtanh.f32 %v11332_v44  ;;  %v11344_v22 = vadd.f32 %v11343_v13, %v11252_v4  ;;  %v28870_v59 = vpop.f32.mrf.mxu0  ;;  %12846 = vmatmul.mubr.f32.gmra.mxu1 %v28715_v9  ;;  %12995 = vmatprep.subr.mxu1 %v28731_v8 }
 0x552   : > { %25191 = vtanh.f32 %v11330_v3  ;;  %v11345_v54 = vpop.f32.mrf.mxu1  ;;  %13091 = vmatpush1.msra.mxu0 %v32211_v52  ;;  %12997 = vmatpush1.msra.mxu1 %v28743_v58 }
 0x553   : > { %25193 = vtanh.f32 %v11344_v22  ;;  %v11346_v11 = vadd.f32 %v11345_v54, %v11254_v47  ;;  %v28877_v25 = vpop.f32.mrf.mxu0  ;;  %13095 = vmatprep.subr.mxu0 %v32212_v62  ;;  %13189 = vmatprep.subr.mxu1 %v28761_v63 }
 0x554   : > { %13099 = vmatpush1.msra.mxu0 %v32213_v36  ;;  %12851 = vmatprep.mubr.f32.mxu1 %v32197_v15 }
 0x555   : > { %25195 = vtanh.f32 %v11346_v11  ;;  %12943 = vmatprep.mubr.f32.mxu0 %v32197_v15  ;;  %13103 = vmatprep.subr.mxu0 %v32214_v39 }
 0x556   : > { %v28888_v2 = vpop.f32.mrf.mxu0  ;;  %v28890_v51 = vpop.f32.mrf.mxu1  ;;  %12853 = vmatmul.mubr.f32.gmra.mxu1 %v28729_v49  ;;  %12946 = vmatmul.mubr.f32.gmra.mxu0 %v28734_v16 }
 0x557   : > { %13107 = vmatpush1.msra.mxu0 %v12801_v31  ;;  %12951 = vmatprep.mubr.f32.mxu0 %v32197_v15 }
 0x558   : > { %v28897_v56 = vpop.f32.mrf.mxu0  ;;  %v28899_v12 = vpop.f32.mrf.mxu1  ;;  %13030 = vmatprep.mubr.f32.mxu1 %v32197_v15 }
 0x55a   : > { %v28902_v63 = vpop.f32.mrf.mxu0  ;;  %12954 = vmatmul.mubr.f32.gmra.mxu0 %v28759_v29  ;;  %13034 = vmatmul.mubr.f32.vlgmr.msra.gmra.mxu1 %v28727_v43 }
 0x55b   : > { %v28906_v7 = vpop.f32.mrf.mxu1  ;;  %13191 = vmatpush1.msra.mxu1 %v28741_v33  ;;  %13039 = vmatprep.mubr.f32.mxu1 %v32197_v15  ;;  %v25186_v24 = vpop.eup %25185 }
 0x55c   : > { %v28910_v31 = vpop.f32.mrf.mxu0  ;;  %13193 = vmatprep.subr.mxu1 %v28718_v35  ;;  %13140 = vmatprep.mubr.f32.mxu0 %v32197_v15 }
 0x55d   : > { %v25188_v55 = vpop.eup %25187  ;;  %v28914_v42 = vpop.f32.mrf.mxu1  ;;  %13195 = vmatpush1.msra.mxu1 %v28724_v46  ;;  %v28929_v46 = vand.u32 4294901760, %v25186_v24 }
 0x55e   : > { %v25190_v34 = vpop.eup %25189  ;;  %13197 = vmatprep.subr.mxu1 %v28731_v8  ;;  %13043 = vmatmul.mubr.f32.gmra.mxu1 %v28767_v0  ;;  %v28921_v41 = vand.u32 4294901760, %v25188_v55 }
 0x55f   : > { %v25192_v33 = vpop.eup %25191  ;;  %13142 = vmatmul.mubr.f32.vlgmr.msra.gmra.mxu0 %v28696_v38  ;;  %13199 = vmatpush1.msra.mxu1 %v28743_v58  ;;  %v28932_v20 = vand.u32 4294901760, %v25190_v34  ;;  %v28960_v10 = vsub.f32 %v25186_v24, %v28929_v46 }
 0x560   : > { %v25194_v35 = vpop.eup %25193  ;;  %v28923_v6 = vpop.f32.mrf.mxu1  ;;  %13048 = vmatprep.mubr.f32.mxu1 %v32197_v15  ;;  %13147 = vmatprep.mubr.f32.mxu0 %v32197_v15  ;;  %v28941_v1 = vand.u32 4294901760, %v25192_v33  ;;  %v28947_v57 = vsub.f32 %v25188_v55, %v28921_v41 }
 0x561   : > { %v28925_v18 = vpop.f32.mrf.mxu0  ;;  %v12622_v8 = vsel %vm2530_vm3, %v25194_v35, 0  ;;  %v28963_v45 = vsub.f32 %v25190_v34, %v28932_v20  ;;  %v32115_v22 = vand.u32 4294901760, %v28960_v10 }
 0x562   : > { %v25196_v17 = vpop.eup %25195  ;;  %v28934_v37 = vpop.f32.mrf.mxu1  ;;  %13052 = vmatmul.mubr.f32.gmra.mxu1 %v28786_v28  ;;  %v28939_v60 = vand.u32 4294901760, %v12622_v8  ;;  %v28976_v26 = vsub.f32 %v25192_v33, %v28941_v1  ;;  %v32114_v4 = vand.u32 4294901760, %v28947_v57 }
 0x563   : > { %v28936_v58 = vpop.f32.mrf.mxu0  ;;  %13149 = vmatmul.mubr.f32.gmra.mxu0 %v28715_v9  ;;  %v12625_v30 = vsel %vm2530_vm3, %v25196_v17, 0  ;;  %13232 = vmatprep.mubr.f32.mxu1 %v32197_v15  ;;  %v32116_v11 = vand.u32 4294901760, %v28963_v45  ;;  %v13405_v35 = vsub.f32 %v28960_v10, %v32115_v22 }
 0x564   : > { %v28951_v19 = vpop.f32.mrf.mxu1  ;;  %v28953_v53 = vand.u32 4294901760, %v12625_v30  ;;  %13154 = vmatprep.mubr.f32.mxu0 %v32197_v15  ;;  %v28957_v50 = vsub.f32 %v12622_v8, %v28939_v60  ;;  %v32117_v39 = vand.u32 4294901760, %v28976_v26  ;;  %v13399_v55 = vsub.f32 %v28947_v57, %v32114_v4 }
 0x565   : > { %v28949_v32 = vpop.f32.mrf.mxu0  ;;  %v11557_v8 = vadd.f32 %v28906_v7, %v28870_v59  ;;  %v13411_v4 = vsub.f32 %v28963_v45, %v32116_v11  ;;  %v11550_v7 = vadd.f32 %v28890_v51, %v28856_v48 }
 0x566   : > { %v28967_v14 = vpop.f32.mrf.mxu1  ;;  %13281 = vmatprep.subr.mxu0 %v28953_v53  ;;  %13234 = vmatmul.mubr.f32.vlgmr.msra.gmra.mxu1 %v28696_v38  ;;  %v28972_v3 = vsub.f32 %v12625_v30, %v28953_v53  ;;  %v13392_v61 = vand.u32 4294901760, %v28957_v50  ;;  %v13417_v59 = vsub.f32 %v28976_v26, %v32117_v39  ;;  %v13406_v39 = vand.u32 4294901760, %v13405_v35 }
 0x567   : > { %v28965_v44 = vpop.f32.mrf.mxu0  ;;  %13283 = vmatpush1.msra.mxu0 %v28939_v60  ;;  %13239 = vmatprep.mubr.f32.mxu1 %v32197_v15  ;;  %v11657_v22 = vadd.f32 %v28925_v18, %v11557_v8  ;;  %v11649_v48 = vadd.f32 %v28902_v63, %v11550_v7  ;;  %v13412_v18 = vand.u32 4294901760, %v13411_v4  ;;  %v11566_v4 = vadd.f32 %v28934_v37, %v28897_v56 }
 0x568   : > { %v11753_v13 = vpop.f32.mrf.mxu1  ;;  %13156 = vmatmul.mubr.f32.gmra.mxu0 %v28729_v49  ;;  %13285 = vmatprep.subr.mxu0 %v28921_v41  ;;  %v13386_v47 = vand.u32 4294901760, %v28972_v3  ;;  %v13393_v52 = vsub.f32 %v28957_v50, %v13392_v61  ;;  %v13418_v35 = vand.u32 4294901760, %v13417_v59 }
 0x569   : > { %v28985_v54 = vpop.f32.mrf.mxu0  ;;  %13287 = vmatpush1.msra.mxu0 %v28929_v46  ;;  %13324 = vmatprep.mubr.f32.mxu0 %v32197_v15  ;;  %v11745_v63 = vadd.f32 %v28951_v19, %v11649_v48 }
 0x56a   : > { %v11755_v62 = vpop.f32.mrf.mxu1  ;;  %13289 = vmatprep.subr.mxu0 %v28932_v20  ;;  %13241 = vmatmul.mubr.f32.gmra.mxu1 %v28715_v9  ;;  %v13387_v36 = vsub.f32 %v28972_v3, %v13386_v47  ;;  %v13394_v30 = vand.u32 4294901760, %v13393_v52  ;;  %v11559_v52 = vadd.f32 %v28914_v42, %v28877_v25  ;;  %v11754_v25 = vadd.f32 %v11753_v13, %v11657_v22 }
 0x56b   : > { %v11854_v24 = vpop.f32.mrf.mxu0  ;;  %13291 = vmatpush1.msra.mxu0 %v28941_v1  ;;  %13246 = vmatprep.mubr.f32.mxu1 %v32197_v15 }
 0x56c   : > { %v11762_v34 = vpop.f32.mrf.mxu1  ;;  %13330 = vmatmul.mubr.f32.vlgmr.msra.gmra.mxu0 %v28791_v27  ;;  %13502 = vmatprep.subr.mxu0 %v28972_v3  ;;  %v13388_v33 = vand.u32 4294901760, %v13387_v36  ;;  %v11552_v3 = vadd.f32 %v28899_v12, %v28862_v23  ;;  %v13400_v23 = vand.u32 4294901760, %v13399_v55  ;;  %v11659_v51 = vadd.f32 %v28936_v58, %v11559_v52 }
 0x56d   : > { %v11859_v17 = vpop.f32.mrf.mxu0  ;;  %13505 = vmatpush1.msra.mxu0 %v28957_v50  ;;  %13335 = vmatprep.mubr.f32.mxu0 %v32197_v15  ;;  %v11564_v55 = vadd.f32 %v28923_v6, %v28888_v2  ;;  %v32217_v50 = vand.u32 4294901760, %v28963_v45 }
 0x56e   : > { %v11764_v36 = vpop.f32.mrf.mxu1  ;;  %13389 = vmatprep.subr.mxu1 %v13388_v33  ;;  %13508 = vmatprep.subr.mxu0 %v28947_v57  ;;  %v11651_v12 = vadd.f32 %v28910_v31, %v11552_v3  ;;  %v11860_v58 = vadd.f32 %v11859_v17, %v11754_v25 }
 0x56f   : > { %v11861_v11 = vpop.f32.mrf.mxu0  ;;  %13395 = vmatpush1.msra.mxu1 %v13394_v30  ;;  %13511 = vmatpush1.msra.mxu0 %v28960_v10  ;;  %v11756_v30 = vadd.f32 %v11755_v62, %v11659_v51  ;;  %v11665_v22 = vadd.f32 %v28949_v32, %v11564_v55 }
 0x570   : > { %v11944_v33 = vpop.f32.mrf.mxu1  ;;  %13248 = vmatmul.mubr.f32.gmra.mxu1 %v28729_v49  ;;  %13341 = vmatmul.mubr.f32.gmra.mxu0 %v28819_v21  ;;  %v11747_v31 = vadd.f32 %v28967_v14, %v11651_v12  ;;  %v11853_v14 = vadd.f32 %v28985_v54, %v11745_v63  ;;  %v32215_v12 = vand.u32 4294901760, %v28947_v57  ;;  %v32218_v57 = vand.u32 4294901760, %v28976_v26 }
 0x571   : > { %v11866_v42 = vpop.f32.mrf.mxu0  ;;  %13401 = vmatprep.subr.mxu1 %v13400_v23  ;;  %13514 = vmatprep.subr.mxu0 %v28963_v45  ;;  %v11763_v56 = vadd.f32 %v11762_v34, %v11665_v22 }
 0x572   : > { %v11946_v8 = vpop.f32.mrf.mxu1  ;;  %13407 = vmatpush1.msra.mxu1 %v13406_v39  ;;  %13517 = vmatpush1.msra.mxu0 %v28976_v26  ;;  %v11855_v2 = vadd.f32 %v11854_v24, %v11747_v31  ;;  %v11862_v39 = vadd.f32 %v11861_v11, %v11756_v30  ;;  %v11945_v62 = vadd.f32 %v11944_v33, %v11853_v14  ;;  %v32216_v33 = vand.u32 4294901760, %v28960_v10 }
 0x573   : > { %v11868_v13 = vpop.f32.mrf.mxu0  ;;  %13413 = vmatprep.subr.mxu1 %v13412_v18  ;;  %13702 = vmatprep.subr.mxu0 %v13386_v47  ;;  %v11667_v47 = vadd.f32 %v28965_v44, %v11566_v4  ;;  %v11867_v17 = vadd.f32 %v11866_v42, %v11763_v56 }
 0x574   : > { %v11951_v6 = vpop.f32.mrf.mxu1  ;;  %13346 = vmatprep.mubr.f32.mxu0 %v32197_v15  ;;  %13419 = vmatpush1.msra.mxu1 %v13418_v35  ;;  %v11947_v37 = vadd.f32 %v11946_v8, %v11855_v2 }
 0x575   : > { %v11952_v3 = vadd.f32 %v11951_v6, %v11860_v58  ;;  %v29042_v19 = vpop.f32.mrf.mxu0  ;;  %13452 = vmatprep.mubr.f32.mxu1 %v32197_v15  ;;  %13352 = vmatmul.mubr.f32.gmra.mxu0 %v28839_v40  ;;  %v11765_v11 = vadd.f32 %v11764_v36, %v11667_v47 }
 0x576   : > { %v11953_v32 = vpop.f32.mrf.mxu1  ;;  %13454 = vmatmul.mubr.f32.vlgmr.msra.gmra.mxu1 %v28696_v38  ;;  %13602 = vmatprep.subr.mxu1 %v28953_v53 }
 0x577   : > { %v11954_v24 = vadd.f32 %v11953_v32, %v11862_v39  ;;  %v29049_v54 = vpop.f32.mrf.mxu0  ;;  %13604 = vmatpush1.msra.mxu1 %v28939_v60  ;;  %13459 = vmatprep.mubr.f32.mxu1 %v32197_v15  ;;  %25197 = vtanh.f32 %v11952_v3  ;;  %v11869_v34 = vadd.f32 %v11868_v13, %v11765_v11 }
 0x578   : > { %13606 = vmatprep.subr.mxu1 %v28921_v41  ;;  %13550 = vmatprep.mubr.f32.mxu0 %v32197_v15 }
 0x579   : > { %25199 = vtanh.f32 %v11954_v24  ;;  %v11958_v44 = vpop.f32.mrf.mxu1  ;;  %13608 = vmatpush1.msra.mxu1 %v28929_v46  ;;  %13553 = vmatmul.mubr.f32.vlgmr.msra.gmra.mxu0 %v28711_v5 }
 0x57a   : > { %25201 = vtanh.f32 %v11947_v37  ;;  %v11959_v59 = vadd.f32 %v11958_v44, %v11867_v17  ;;  %v29057_v7 = vpop.f32.mrf.mxu0  ;;  %13461 = vmatmul.mubr.f32.gmra.mxu1 %v28715_v9  ;;  %13610 = vmatprep.subr.mxu1 %v28932_v20 }
 0x57b   : > { %25203 = vtanh.f32 %v11945_v62  ;;  %v11960_v36 = vpop.f32.mrf.mxu1  ;;  %13706 = vmatpush1.msra.mxu0 %v13392_v61  ;;  %13612 = vmatpush1.msra.mxu1 %v28941_v1 }
 0x57c   : > { %25205 = vtanh.f32 %v11959_v59  ;;  %v11961_v52 = vadd.f32 %v11960_v36, %v11869_v34  ;;  %v29064_v23 = vpop.f32.mrf.mxu0  ;;  %13710 = vmatprep.subr.mxu0 %v32215_v12  ;;  %13804 = vmatprep.subr.mxu1 %v28953_v53 }
 0x57d   : > { %13714 = vmatpush1.msra.mxu0 %v32216_v33  ;;  %13466 = vmatprep.mubr.f32.mxu1 %v32197_v15 }
 0x57e   : > { %25207 = vtanh.f32 %v11961_v52  ;;  %13558 = vmatprep.mubr.f32.mxu0 %v32197_v15  ;;  %13718 = vmatprep.subr.mxu0 %v32217_v50 }
 0x57f   : > { %v29075_v61 = vpop.f32.mrf.mxu0  ;;  %v29077_v48 = vpop.f32.mrf.mxu1  ;;  %13468 = vmatmul.mubr.f32.gmra.mxu1 %v28729_v49  ;;  %13561 = vmatmul.mubr.f32.gmra.mxu0 %v28734_v16 }
 0x580   : > { %13722 = vmatpush1.msra.mxu0 %v32218_v57  ;;  %13566 = vmatprep.mubr.f32.mxu0 %v32197_v15 }
 0x581   : > { %v29084_v53 = vpop.f32.mrf.mxu0  ;;  %v29086_v10 = vpop.f32.mrf.mxu1  ;;  %13645 = vmatprep.mubr.f32.mxu1 %v32197_v15 }
 0x583   : > { %v29089_v45 = vpop.f32.mrf.mxu0  ;;  %13569 = vmatmul.mubr.f32.gmra.mxu0 %v28759_v29  ;;  %13649 = vmatmul.mubr.f32.vlgmr.msra.gmra.mxu1 %v28727_v43 }
 0x584   : > { %v29093_v51 = vpop.f32.mrf.mxu1  ;;  %13806 = vmatpush1.msra.mxu1 %v28939_v60  ;;  %13654 = vmatprep.mubr.f32.mxu1 %v32197_v15  ;;  %v25198_v26 = vpop.eup %25197 }
 0x585   : > { %v29097_v25 = vpop.f32.mrf.mxu0  ;;  %13808 = vmatprep.subr.mxu1 %v28921_v41  ;;  %13755 = vmatprep.mubr.f32.mxu0 %v32197_v15 }
 0x586   : > { %v25200_v42 = vpop.eup %25199  ;;  %v29101_v18 = vpop.f32.mrf.mxu1  ;;  %13810 = vmatpush1.msra.mxu1 %v28929_v46  ;;  %v29116_v46 = vand.u32 4294901760, %v25198_v26 }
 0x587   : > { %v25202_v55 = vpop.eup %25201  ;;  %13812 = vmatprep.subr.mxu1 %v28932_v20  ;;  %13658 = vmatmul.mubr.f32.gmra.mxu1 %v28767_v0  ;;  %v29108_v31 = vand.u32 4294901760, %v25200_v42 }
 0x588   : > { %v25204_v60 = vpop.eup %25203  ;;  %13757 = vmatmul.mubr.f32.vlgmr.msra.gmra.mxu0 %v28696_v38  ;;  %13814 = vmatpush1.msra.mxu1 %v28941_v1  ;;  %v29119_v63 = vand.u32 4294901760, %v25202_v55  ;;  %v29147_v47 = vsub.f32 %v25198_v26, %v29116_v46  ;;  %v12167_v26 = vadd.f32 %v29086_v10, %v29049_v54  ;;  %v12172_v54 = vadd.f32 %v29093_v51, %v29057_v7 }
 0x589   : > { %v25206_v41 = vpop.eup %25205  ;;  %v29110_v8 = vpop.f32.mrf.mxu1  ;;  %13663 = vmatprep.mubr.f32.mxu1 %v32197_v15  ;;  %13762 = vmatprep.mubr.f32.mxu0 %v32197_v15  ;;  %v29128_v4 = vand.u32 4294901760, %v25204_v60  ;;  %v29134_v2 = vsub.f32 %v25200_v42, %v29108_v31  ;;  %v12174_v51 = vadd.f32 %v29101_v18, %v29064_v23 }
 0x58a   : > { %v29112_v35 = vpop.f32.mrf.mxu0  ;;  %v12628_v20 = vsel %vm2530_vm3, %v25206_v41, 0  ;;  %v29150_v56 = vsub.f32 %v25202_v55, %v29119_v63  ;;  %v14019_v59 = vand.u32 4294901760, %v29147_v47  ;;  %v12266_v10 = vadd.f32 %v29097_v25, %v12167_v26 }
 0x58b   : > { %v25208_v30 = vpop.eup %25207  ;;  %v29121_v58 = vpop.f32.mrf.mxu1  ;;  %13667 = vmatmul.mubr.f32.gmra.mxu1 %v28786_v28  ;;  %v29126_v13 = vand.u32 4294901760, %v12628_v20  ;;  %v29161_v11 = vsub.f32 %v25204_v60, %v29128_v4  ;;  %v32118_v17 = vand.u32 4294901760, %v29134_v2  ;;  %v12272_v25 = vadd.f32 %v29112_v35, %v12172_v54 }
 0x58c   : > { %v29123_v1 = vpop.f32.mrf.mxu0  ;;  %13764 = vmatmul.mubr.f32.gmra.mxu0 %v28715_v9  ;;  %v12631_v22 = vsel %vm2530_vm3, %v25208_v30, 0  ;;  %13847 = vmatprep.mubr.f32.mxu1 %v32197_v15  ;;  %v32120_v12 = vand.u32 4294901760, %v29150_v56 }
 0x58d   : > { %v29138_v14 = vpop.f32.mrf.mxu1  ;;  %v29140_v39 = vand.u32 4294901760, %v12631_v22  ;;  %13769 = vmatprep.mubr.f32.mxu0 %v32197_v15  ;;  %v29144_v3 = vsub.f32 %v12628_v20, %v29126_v13  ;;  %v32121_v57 = vand.u32 4294901760, %v29161_v11  ;;  %v14014_v55 = vsub.f32 %v29134_v2, %v32118_v17 }
 0x58e   : > { %v29136_v6 = vpop.f32.mrf.mxu0  ;;  %v14020_v20 = vsub.f32 %v29147_v47, %v14019_v59  ;;  %v14026_v17 = vsub.f32 %v29150_v56, %v32120_v12  ;;  %v12274_v23 = vadd.f32 %v29123_v1, %v12174_v51  ;;  %v32221_v51 = vand.u32 4294901760, %v29150_v56 }
 0x58f   : > { %v12361_v32 = vpop.f32.mrf.mxu1  ;;  %13896 = vmatprep.subr.mxu0 %v29140_v39  ;;  %13849 = vmatmul.mubr.f32.vlgmr.msra.gmra.mxu1 %v28696_v38  ;;  %v29157_v62 = vsub.f32 %v12631_v22, %v29140_v39  ;;  %v32119_v24 = vand.u32 4294901760, %v29144_v3  ;;  %v14032_v7 = vsub.f32 %v29161_v11, %v32121_v57  ;;  %v14015_v12 = vand.u32 4294901760, %v14014_v55 }
 0x590   : > { %v29152_v37 = vpop.f32.mrf.mxu0  ;;  %13898 = vmatpush1.msra.mxu0 %v29126_v13  ;;  %13854 = vmatprep.mubr.f32.mxu1 %v32197_v15  ;;  %v14021_v57 = vand.u32 4294901760, %v14020_v20 }
 0x591   : > { %v12368_v44 = vpop.f32.mrf.mxu1  ;;  %13771 = vmatmul.mubr.f32.gmra.mxu0 %v28729_v49  ;;  %13900 = vmatprep.subr.mxu0 %v29108_v31  ;;  %v14001_v34 = vand.u32 4294901760, %v29157_v62  ;;  %v14008_v52 = vsub.f32 %v29144_v3, %v32119_v24  ;;  %v14033_v20 = vand.u32 4294901760, %v14032_v7  ;;  %v32220_v7 = vand.u32 4294901760, %v29134_v2 }
 0x592   : > { %v29170_v36 = vpop.f32.mrf.mxu0  ;;  %13902 = vmatpush1.msra.mxu0 %v29116_v46  ;;  %13939 = vmatprep.mubr.f32.mxu0 %v32197_v15  ;;  %v12369_v18 = vadd.f32 %v12368_v44, %v12272_v25 }
 0x593   : > { %v12370_v33 = vpop.f32.mrf.mxu1  ;;  %13904 = vmatprep.subr.mxu0 %v29119_v63  ;;  %13856 = vmatmul.mubr.f32.gmra.mxu1 %v28715_v9  ;;  %v14002_v50 = vsub.f32 %v29157_v62, %v14001_v34  ;;  %v14009_v22 = vand.u32 4294901760, %v14008_v52  ;;  %v12362_v52 = vadd.f32 %v12361_v32, %v12266_v10  ;;  %v14027_v32 = vand.u32 4294901760, %v14026_v17 }
 0x594   : > { %v12469_v42 = vpop.f32.mrf.mxu0  ;;  %13906 = vmatpush1.msra.mxu0 %v29128_v4  ;;  %13861 = vmatprep.mubr.f32.mxu1 %v32197_v15  ;;  %v12371_v1 = vadd.f32 %v12370_v33, %v12274_v23 }
 0x595   : > { %v12377_v60 = vpop.f32.mrf.mxu1  ;;  %13945 = vmatmul.mubr.f32.vlgmr.msra.gmra.mxu0 %v28791_v27  ;;  %14117 = vmatprep.subr.mxu0 %v29157_v62  ;;  %v14003_v41 = vand.u32 4294901760, %v14002_v50  ;;  %v12165_v50 = vadd.f32 %v29077_v48, %v29042_v19  ;;  %v12179_v48 = vadd.f32 %v29110_v8, %v29075_v61  ;;  %v12470_v35 = vadd.f32 %v12469_v42, %v12362_v52 }
 0x596   : > { %v12474_v30 = vpop.f32.mrf.mxu0  ;;  %14120 = vmatpush1.msra.mxu0 %v29144_v3  ;;  %13950 = vmatprep.mubr.f32.mxu0 %v32197_v15 }
 0x597   : > { %v12379_v24 = vpop.f32.mrf.mxu1  ;;  %14004 = vmatprep.subr.mxu1 %v14003_v41  ;;  %14123 = vmatprep.subr.mxu0 %v29134_v2  ;;  %v12264_v19 = vadd.f32 %v29089_v45, %v12165_v50  ;;  %v12181_v45 = vadd.f32 %v29121_v58, %v29084_v53  ;;  %v12280_v55 = vadd.f32 %v29136_v6, %v12179_v48  ;;  %v32219_v50 = vand.u32 4294901760, %v29144_v3 }
 0x598   : > { %v12476_v26 = vpop.f32.mrf.mxu0  ;;  %14010 = vmatpush1.msra.mxu1 %v14009_v22  ;;  %14126 = vmatpush1.msra.mxu0 %v29147_v47  ;;  %v12475_v44 = vadd.f32 %v12474_v30, %v12369_v18  ;;  %v32222_v2 = vand.u32 4294901760, %v29161_v11 }
 0x599   : > { %v12559_v41 = vpop.f32.mrf.mxu1  ;;  %13863 = vmatmul.mubr.f32.gmra.mxu1 %v28729_v49  ;;  %13956 = vmatmul.mubr.f32.gmra.mxu0 %v28819_v21  ;;  %v12360_v61 = vadd.f32 %v29138_v14, %v12264_v19  ;;  %v12282_v17 = vadd.f32 %v29152_v37, %v12181_v45  ;;  %v12378_v6 = vadd.f32 %v12377_v60, %v12280_v55 }
 0x59a   : > { %14016 = vmatprep.subr.mxu1 %v14015_v12  ;;  %14129 = vmatprep.subr.mxu0 %v29150_v56  ;;  %v12481_v8 = vpop.f32.mrf.mxu0  ;;  %v12477_v14 = vadd.f32 %v12476_v26, %v12371_v1 }
 0x59b   : > { %v12561_v54 = vpop.f32.mrf.mxu1  ;;  %14022 = vmatpush1.msra.mxu1 %v14021_v57  ;;  %14132 = vmatpush1.msra.mxu0 %v29161_v11  ;;  %v12468_v53 = vadd.f32 %v29170_v36, %v12360_v61  ;;  %v12380_v37 = vadd.f32 %v12379_v24, %v12282_v17  ;;  %v12482_v62 = vadd.f32 %v12481_v8, %v12378_v6 }
 0x59c   : > { %v12562_v42 = vadd.f32 %v12561_v54, %v12470_v35  ;;  %14028 = vmatprep.subr.mxu1 %v14027_v32  ;;  %14317 = vmatprep.subr.mxu0 %v14001_v34  ;;  %v12483_v57 = vpop.f32.mrf.mxu0 }
 0x59d   : > { %v12566_v58 = vpop.f32.mrf.mxu1  ;;  %13961 = vmatprep.mubr.f32.mxu0 %v32197_v15  ;;  %14034 = vmatpush1.msra.mxu1 %v14033_v20  ;;  %v12560_v33 = vadd.f32 %v12559_v41, %v12468_v53  ;;  %v12484_v60 = vadd.f32 %v12483_v57, %v12380_v37 }
 0x59e   : > { %v12567_v12 = vadd.f32 %v12566_v58, %v12475_v44  ;;  %14067 = vmatprep.mubr.f32.mxu1 %v32197_v15  ;;  %13967 = vmatmul.mubr.f32.gmra.mxu0 %v28839_v40  ;;  %25209 = vtanh.f32 %v12562_v42 }
 0x59f   : > { %v12568_v10 = vpop.f32.mrf.mxu1  ;;  %14069 = vmatmul.mubr.f32.vlgmr.msra.gmra.mxu1 %v28696_v38  ;;  %14217 = vmatprep.subr.mxu1 %v29140_v39 }
 0x5a0   : > { %v12569_v34 = vadd.f32 %v12568_v10, %v12477_v14  ;;  %14219 = vmatpush1.msra.mxu1 %v29126_v13  ;;  %14074 = vmatprep.mubr.f32.mxu1 %v32197_v15  ;;  %25211 = vtanh.f32 %v12567_v12 }
 0x5a1   : > { %v12573_v36 = vpop.f32.mrf.mxu1  ;;  %14221 = vmatprep.subr.mxu1 %v29108_v31  ;;  %14165 = vmatprep.mubr.f32.mxu0 %v32197_v15 }
 0x5a2   : > { %25213 = vtanh.f32 %v12569_v34  ;;  %v12574_v30 = vadd.f32 %v12573_v36, %v12482_v62  ;;  %14223 = vmatpush1.msra.mxu1 %v29116_v46  ;;  %14168 = vmatmul.mubr.f32.vlgmr.msra.gmra.mxu0 %v28711_v5 }
 0x5a3   : > { %25215 = vtanh.f32 %v12560_v33  ;;  %v12575_v24 = vpop.f32.mrf.mxu1  ;;  %14076 = vmatmul.mubr.f32.gmra.mxu1 %v28715_v9  ;;  %14225 = vmatprep.subr.mxu1 %v29119_v63 }
 0x5a4   : > { %25217 = vtanh.f32 %v12574_v30  ;;  %v12576_v22 = vadd.f32 %v12575_v24, %v12484_v60  ;;  %14321 = vmatpush1.msra.mxu0 %v32219_v50  ;;  %14227 = vmatpush1.msra.mxu1 %v29128_v4 }
 0x5a5   : > { %14325 = vmatprep.subr.mxu0 %v32220_v7  ;;  %14419 = vmatprep.subr.mxu1 %v29140_v39 }
 0x5a6   : > { %25219 = vtanh.f32 %v12576_v22  ;;  %14329 = vmatpush1.msra.mxu0 %v14019_v59  ;;  %14081 = vmatprep.mubr.f32.mxu1 %v32197_v15 }
 0x5a7   : > { %14173 = vmatprep.mubr.f32.mxu0 %v32197_v15  ;;  %14333 = vmatprep.subr.mxu0 %v32221_v51 }
 0x5a8   : > { %14083 = vmatmul.mubr.f32.gmra.mxu1 %v28729_v49  ;;  %14176 = vmatmul.mubr.f32.gmra.mxu0 %v28734_v16 }
 0x5a9   : > { %14337 = vmatpush1.msra.mxu0 %v32222_v2  ;;  %14181 = vmatprep.mubr.f32.mxu0 %v32197_v15 }
 0x5aa   : > { %14260 = vmatprep.mubr.f32.mxu1 %v32197_v15 }
 0x5ab   : > { %v25210_v39 = vpop.eup %25209 }
 0x5ac   : > { %14184 = vmatmul.mubr.f32.gmra.mxu0 %v28759_v29  ;;  %14264 = vmatmul.mubr.f32.vlgmr.msra.gmra.mxu1 %v28727_v43 }
 0x5ad   : > { %14421 = vmatpush1.msra.mxu1 %v29126_v13  ;;  %14269 = vmatprep.mubr.f32.mxu1 %v32197_v15  ;;  %v25212_v3 = vpop.eup %25211 }
 0x5ae   : > { %14423 = vmatprep.subr.mxu1 %v29108_v31  ;;  %14370 = vmatprep.mubr.f32.mxu0 %v32197_v15  ;;  %v29274_v13 = vand.u32 4294901760, %v25212_v3 }
 0x5af   : > { %v25214_v47 = vpop.eup %25213  ;;  %14425 = vmatpush1.msra.mxu1 %v29116_v46  ;;  %v29279_v46 = vand.u32 4294901760, %v25210_v39 }
 0x5b0   : > { %v25216_v56 = vpop.eup %25215  ;;  %14427 = vmatprep.subr.mxu1 %v29119_v63  ;;  %14273 = vmatmul.mubr.f32.gmra.mxu1 %v28767_v0  ;;  %v29270_v11 = vand.u32 4294901760, %v25214_v47  ;;  %v29298_v41 = vsub.f32 %v25212_v3, %v29274_v13 }
 0x5b1   : > { %v25218_v59 = vpop.eup %25217  ;;  %14372 = vmatmul.mubr.f32.vlgmr.msra.gmra.mxu0 %v28696_v38  ;;  %14429 = vmatpush1.msra.mxu1 %v29128_v4  ;;  %v29285_v26 = vand.u32 4294901760, %v25216_v56  ;;  %v29302_v23 = vsub.f32 %v25210_v39, %v29279_v46 }
 0x5b2   : > { %14278 = vmatprep.mubr.f32.mxu1 %v32197_v15  ;;  %14377 = vmatprep.mubr.f32.mxu0 %v32197_v15  ;;  %v12634_v31 = vsel %vm2530_vm3, %v25218_v59, 0  ;;  %v29288_v4 = vsub.f32 %v25214_v47, %v29270_v11  ;;  %v14634_v61 = vand.u32 4294901760, %v29298_v41 }
 0x5b3   : > { %v25220_v63 = vpop.eup %25219  ;;  %v29281_v25 = vand.u32 4294901760, %v12634_v31  ;;  %v29311_v45 = vsub.f32 %v25216_v56, %v29285_v26  ;;  %v14640_v54 = vand.u32 4294901760, %v29302_v23 }
 0x5b4   : > { %14282 = vmatmul.mubr.f32.gmra.mxu1 %v28786_v28  ;;  %v12637_v52 = vsel %vm2530_vm3, %v25220_v63, 0  ;;  %v14628_v32 = vand.u32 4294901760, %v29288_v4  ;;  %v14635_v17 = vsub.f32 %v29298_v41, %v14634_v61 }
 0x5b5   : > { %14379 = vmatmul.mubr.f32.gmra.mxu0 %v28715_v9  ;;  %v29291_v19 = vand.u32 4294901760, %v12637_v52  ;;  %14462 = vmatprep.mubr.f32.mxu1 %v32197_v15  ;;  %v29295_v48 = vsub.f32 %v12634_v31, %v29281_v25  ;;  %v14646_v44 = vand.u32 4294901760, %v29311_v45  ;;  %v14641_v58 = vsub.f32 %v29302_v23, %v14640_v54 }
 0x5b6   : > { %14384 = vmatprep.mubr.f32.mxu0 %v32197_v15  ;;  %v14629_v1 = vsub.f32 %v29288_v4, %v14628_v32  ;;  %v14636_v14 = vand.u32 4294901760, %v14635_v17 }
 0x5b7   : > { %14511 = vmatprep.subr.mxu0 %v29291_v19  ;;  %v14615_v18 = vsub.f32 %v12637_v52, %v29291_v19  ;;  %v14622_v35 = vand.u32 4294901760, %v29295_v48  ;;  %v14642_v12 = vand.u32 4294901760, %v14641_v58 }
 0x5b8   : > { %14513 = vmatpush1.msra.mxu0 %v29281_v25  ;;  %14464 = vmatmul.mubr.f32.vlgmr.msra.gmra.mxu1 %v28696_v38  ;;  %v14630_v6 = vand.u32 4294901760, %v14629_v1 }
 0x5b9   : > { %14386 = vmatmul.mubr.f32.gmra.mxu0 %v28729_v49  ;;  %14515 = vmatprep.subr.mxu0 %v29270_v11  ;;  %v14616_v55 = vand.u32 4294901760, %v14615_v18  ;;  %v14623_v8 = vsub.f32 %v29295_v48, %v14622_v35 }
 0x5ba   : > { %14517 = vmatpush1.msra.mxu0 %v29274_v13  ;;  %14469 = vmatprep.mubr.f32.mxu1 %v32197_v15 }
 0x5bb   : > { %14519 = vmatprep.subr.mxu0 %v29279_v46  ;;  %14554 = vmatprep.mubr.f32.mxu0 %v32197_v15  ;;  %v14617_v20 = vsub.f32 %v14615_v18, %v14616_v55  ;;  %v14624_v53 = vand.u32 4294901760, %v14623_v8 }
 0x5bc   : > { %14521 = vmatpush1.msra.mxu0 %v29285_v26  ;;  %14471 = vmatmul.mubr.f32.gmra.mxu1 %v28715_v9 }
 0x5bd   : > { %14560 = vmatmul.mubr.f32.vlgmr.msra.gmra.mxu0 %v28791_v27  ;;  %14732 = vmatprep.subr.mxu0 %v14615_v18  ;;  %v14618_v42 = vand.u32 4294901760, %v14617_v20  ;;  %v14647_v27 = vsub.f32 %v29311_v45, %v14646_v44 }
 0x5be   : > { %14735 = vmatpush1.msra.mxu0 %v29295_v48  ;;  %14476 = vmatprep.mubr.f32.mxu1 %v32197_v15 }
 0x5bf   : > { %14619 = vmatprep.subr.mxu1 %v14618_v42  ;;  %14738 = vmatprep.subr.mxu0 %v29288_v4  ;;  %v14648_v33 = vand.u32 4294901760, %v14647_v27 }
 0x5c0   : > { %14565 = vmatprep.mubr.f32.mxu0 %v32197_v15  ;;  %14625 = vmatpush1.msra.mxu1 %v14624_v53 }
 0x5c1   : > { %14741 = vmatpush1.msra.mxu0 %v29298_v41  ;;  %14478 = vmatmul.mubr.f32.gmra.mxu1 %v28729_v49 }
 0x5c2   : > { %14571 = vmatmul.mubr.f32.gmra.mxu0 %v28819_v21  ;;  %14631 = vmatprep.subr.mxu1 %v14630_v6 }
 0x5c3   : > { %14744 = vmatprep.subr.mxu0 %v29302_v23  ;;  %14637 = vmatpush1.msra.mxu1 %v14636_v14 }
 0x5c4   : > { %14747 = vmatpush1.msra.mxu0 %v29311_v45  ;;  %14643 = vmatprep.subr.mxu1 %v14642_v12 }
 0x5c5   : > { %14932 = vmatprep.subr.mxu0 %v14616_v55  ;;  %14576 = vmatprep.mubr.f32.mxu0 %v32197_v15 }
 0x5c6   : > { %14649 = vmatpush1.msra.mxu1 %v14648_v33  ;;  %14682 = vmatprep.mubr.f32.mxu1 %v32197_v15 }
 0x5c7   : > { %14582 = vmatmul.mubr.f32.gmra.mxu0 %v28839_v40  ;;  %14684 = vmatmul.mubr.f32.vlgmr.msra.gmra.mxu1 %v28696_v38 }
 0x5c8   : > { %14832 = vmatprep.subr.mxu1 %v29291_v19  ;;  %14689 = vmatprep.mubr.f32.mxu1 %v32197_v15 }
 0x5c9   : > { %14834 = vmatpush1.msra.mxu1 %v29281_v25  ;;  %14780 = vmatprep.mubr.f32.mxu0 %v32197_v15 }
 0x5ca   : > { %14836 = vmatprep.subr.mxu1 %v29270_v11 }
 0x5cb   : > { %14838 = vmatpush1.msra.mxu1 %v29274_v13  ;;  %14783 = vmatmul.mubr.f32.vlgmr.msra.gmra.mxu0 %v28711_v5 }
 0x5cc   : > { %14691 = vmatmul.mubr.f32.gmra.mxu1 %v28715_v9  ;;  %14840 = vmatprep.subr.mxu1 %v29279_v46 }
 0x5cd   : > { %14936 = vmatpush1.msra.mxu0 %v14622_v35  ;;  %14842 = vmatpush1.msra.mxu1 %v29285_v26 }
 0x5ce   : > { %14940 = vmatprep.subr.mxu0 %v14628_v32  ;;  %15034 = vmatprep.subr.mxu1 %v29291_v19 }
 0x5cf   : > { %14944 = vmatpush1.msra.mxu0 %v14634_v61  ;;  %14696 = vmatprep.mubr.f32.mxu1 %v32197_v15 }
 0x5d0   : > { %14788 = vmatprep.mubr.f32.mxu0 %v32197_v15  ;;  %14948 = vmatprep.subr.mxu0 %v14640_v54 }
 0x5d1   : > { %14698 = vmatmul.mubr.f32.gmra.mxu1 %v28729_v49  ;;  %14791 = vmatmul.mubr.f32.gmra.mxu0 %v28734_v16 }
 0x5d2   : > { %14952 = vmatpush1.msra.mxu0 %v14646_v44  ;;  %14796 = vmatprep.mubr.f32.mxu0 %v32197_v15 }
 0x5d3   : > { %14875 = vmatprep.mubr.f32.mxu1 %v32197_v15 }
 0x5d5   : > { %14799 = vmatmul.mubr.f32.gmra.mxu0 %v28759_v29  ;;  %14879 = vmatmul.mubr.f32.vlgmr.msra.gmra.mxu1 %v28727_v43 }
 0x5d6   : > { %15036 = vmatpush1.msra.mxu1 %v29281_v25  ;;  %14884 = vmatprep.mubr.f32.mxu1 %v32197_v15 }
 0x5d7   : > { %15038 = vmatprep.subr.mxu1 %v29270_v11  ;;  %14985 = vmatprep.mubr.f32.mxu0 %v32197_v15 }
 0x5d8   : > { %15040 = vmatpush1.msra.mxu1 %v29274_v13 }
 0x5d9   : > { %15042 = vmatprep.subr.mxu1 %v29279_v46  ;;  %14888 = vmatmul.mubr.f32.gmra.mxu1 %v28767_v0 }
 0x5da   : > { %14987 = vmatmul.mubr.f32.vlgmr.msra.gmra.mxu0 %v28696_v38  ;;  %15044 = vmatpush1.msra.mxu1 %v29285_v26 }
 0x5db   : > { %14893 = vmatprep.mubr.f32.mxu1 %v32197_v15  ;;  %14992 = vmatprep.mubr.f32.mxu0 %v32197_v15 }
 0x5dd   : > { %14897 = vmatmul.mubr.f32.gmra.mxu1 %v28786_v28 }
 0x5de   : > { %14994 = vmatmul.mubr.f32.gmra.mxu0 %v28715_v9  ;;  %15077 = vmatprep.mubr.f32.mxu1 %v32197_v15 }
 0x5df   : > { %14999 = vmatprep.mubr.f32.mxu0 %v32197_v15 }
 0x5e1   : > { %15079 = vmatmul.mubr.f32.vlgmr.msra.gmra.mxu1 %v28696_v38 }
 0x5e2   : > { %15001 = vmatmul.mubr.f32.gmra.mxu0 %v28729_v49  ;;  %15084 = vmatprep.mubr.f32.mxu1 %v32197_v15 }
 0x5e3   : > { %15230 = vmatprep.mubr.f32.mxu0 %v32197_v15 }
 0x5e5   : > { %15086 = vmatmul.mubr.f32.gmra.mxu1 %v28715_v9 }
 0x5e6   : > { %15091 = vmatprep.mubr.f32.mxu1 %v32197_v15 }
 0x5e9   : > { %15093 = vmatmul.mubr.f32.gmra.mxu1 %v28729_v49 }
 0x5ea   : > { %15358 = vmatprep.mubr.f32.mxu1 %v32197_v15 }
 0x604   : > { %v12716_v5 = vpop.f32.mrf.mxu0 }
 0x606   : > { %v12718_v43 = vpop.f32.mrf.mxu0 }
 0x608   : > { %v12727_v16 = vpop.f32.mrf.mxu0 }
 0x60a   : > { %v12729_v29 = vpop.f32.mrf.mxu0 }
 0x60c   : > { %v12738_v0 = vpop.f32.mrf.mxu0 }
 0x60d   : > { %v12840_v38 = vpop.f32.mrf.mxu1 }
 0x60e   : > { %v12740_v28 = vpop.f32.mrf.mxu0  ;;  %v12841_v31 = vadd.f32 %v12840_v38, %v12716_v5 }
 0x60f   : > { %v12842_v21 = vpop.f32.mrf.mxu1 }
 0x610   : > { %v12939_v40 = vpop.f32.mrf.mxu0  ;;  %v12843_v47 = vadd.f32 %v12842_v21, %v12718_v43 }
 0x611   : > { %v12847_v57 = vpop.f32.mrf.mxu1  ;;  %v12940_v26 = vadd.f32 %v12939_v40, %v12841_v31 }
 0x612   : > { %v12941_v10 = vpop.f32.mrf.mxu0  ;;  %v12848_v39 = vadd.f32 %v12847_v57, %v12727_v16 }
 0x613   : > { %v12849_v37 = vpop.f32.mrf.mxu1  ;;  %v12942_v46 = vadd.f32 %v12941_v10, %v12843_v47  ;;  %v24922_v10 = vld [vmem:[%s32060_s2 + $0x80] sm:$0xff] }
 0x614   : > { %v12850_v11 = vadd.f32 %v12849_v37, %v12729_v29 }
 0x616   : > { %v12854_v62 = vpop.f32.mrf.mxu1  ;;  %v12947_v9 = vpop.f32.mrf.mxu0 }
 0x617   : > { %v12948_v59 = vadd.f32 %v12947_v9, %v12848_v39  ;;  %v12855_v41 = vadd.f32 %v12854_v62, %v12738_v0  ;;  %v24921_v0 = vld [vmem:[%s32060_s2 + $0x78] sm:$0xff] }
 0x618   : > { %v12856_v34 = vpop.f32.mrf.mxu1  ;;  %v12949_v36 = vpop.f32.mrf.mxu0  ;;  %v15128_v40 = vsel %vm2520_vm2, %v24921_v0, 0 }
 0x619   : > { %v12950_v25 = vadd.f32 %v12949_v36, %v12850_v11  ;;  %v12857_v61 = vadd.f32 %v12856_v34, %v12740_v28  ;;  %v29406_v9 = vand.u32 4294901760, %v15128_v40  ;;  %v15131_v36 = vsel %vm2520_vm2, %v24922_v10, 0 }
 0x61a   : > { %v12955_v60 = vpop.f32.mrf.mxu0  ;;  %v13035_v49 = vpop.f32.mrf.mxu1 }
 0x61b   : > { %v13036_v35 = vadd.f32 %v13035_v49, %v12940_v26  ;;  %v12956_v8 = vadd.f32 %v12955_v60, %v12855_v41 }
 0x61c   : > { %v12957_v30 = vpop.f32.mrf.mxu0  ;;  %v13037_v24 = vpop.f32.mrf.mxu1 }
 0x61d   : > { %v13038_v4 = vadd.f32 %v13037_v24, %v12942_v46  ;;  %v12958_v53 = vadd.f32 %v12957_v30, %v12857_v61  ;;  %v24923_v30 = vld [vmem:[%s32060_s2 + $0x88] sm:$0x1f] }
 0x61e   : > { %v13044_v22 = vpop.f32.mrf.mxu1 }
 0x61f   : > { %v13143_v50 = vpop.f32.mrf.mxu0  ;;  %v13045_v52 = vadd.f32 %v13044_v22, %v12948_v59 }
 0x620   : > { %v13046_v7 = vpop.f32.mrf.mxu1  ;;  %v13144_v1 = vadd.f32 %v13143_v50, %v13036_v35  ;;  %v29421_v50 = vsub.f32 %v15128_v40, %v29406_v9 }
 0x621   : > { %v13145_v51 = vpop.f32.mrf.mxu0  ;;  %v13047_v23 = vadd.f32 %v13046_v7, %v12950_v25  ;;  %v29423_v7 = vand.u32 4294901760, %v15131_v36 }
 0x622   : > { %v13053_v2 = vpop.f32.mrf.mxu1  ;;  %v13146_v32 = vadd.f32 %v13145_v51, %v13038_v4  ;;  %v29437_v31 = vand.u32 4294901760, %v29421_v50 }
 0x623   : > { %v13150_v3 = vpop.f32.mrf.mxu0  ;;  %v13054_v58 = vadd.f32 %v13053_v2, %v12956_v8  ;;  %v29440_v46 = vsub.f32 %v15131_v36, %v29423_v7 }
 0x624   : > { %v13055_v56 = vpop.f32.mrf.mxu1  ;;  %v13151_v18 = vadd.f32 %v13150_v3, %v13045_v52  ;;  %v15134_v3 = vsel %vm2520_vm2, %v24923_v30, 0 }
 0x625   : > { %v13152_v13 = vpop.f32.mrf.mxu0  ;;  %v13056_v12 = vadd.f32 %v13055_v56, %v12958_v53  ;;  %v29444_v52 = vand.u32 4294901760, %v15134_v3  ;;  %v29469_v8 = vand.u32 4294901760, %v29440_v46 }
 0x626   : > { %v13235_v63 = vpop.f32.mrf.mxu1  ;;  %v13153_v54 = vadd.f32 %v13152_v13, %v13047_v23 }
 0x627   : > { %v13236_v27 = vadd.f32 %v13235_v63, %v13144_v1 }
 0x628   : > { %v13157_v19 = vpop.f32.mrf.mxu0  ;;  %v13237_v48 = vpop.f32.mrf.mxu1 }
 0x629   : > { %v13238_v44 = vadd.f32 %v13237_v48, %v13146_v32  ;;  %v13158_v33 = vadd.f32 %v13157_v19, %v13054_v58 }
 0x62a   : > { %v13159_v45 = vpop.f32.mrf.mxu0  ;;  %v13242_v55 = vpop.f32.mrf.mxu1 }
 0x62b   : > { %v13243_v20 = vadd.f32 %v13242_v55, %v13151_v18  ;;  %v13160_v16 = vadd.f32 %v13159_v45, %v13056_v12  ;;  %v15234_v55 = vsub.f32 %v29421_v50, %v29437_v31 }
 0x62c   : > { %v29385_v42 = vpop.f32.mrf.mxu0  ;;  %v13244_v17 = vpop.f32.mrf.mxu1 }
 0x62d   : > { %v13245_v6 = vadd.f32 %v13244_v17, %v13153_v54  ;;  %25221 = vtanh.f32 %v13243_v20 }
 0x62e   : > { %v29387_v14 = vpop.f32.mrf.mxu0 }
 0x62f   : > { %25223 = vtanh.f32 %v13245_v6 }
 0x630   : > { %25225 = vtanh.f32 %v13238_v44  ;;  %v13249_v5 = vpop.f32.mrf.mxu1  ;;  %v29389_v43 = vpop.f32.mrf.mxu0  ;;  %v29480_v44 = vsub.f32 %v15134_v3, %v29444_v52 }
 0x631   : > { %v13250_v29 = vadd.f32 %v13249_v5, %v13158_v33  ;;  %25227 = vtanh.f32 %v13236_v27  ;;  %v29496_v5 = vand.u32 4294901760, %v15234_v55 }
 0x632   : > { %v13251_v38 = vpop.f32.mrf.mxu1  ;;  %v29394_v28 = vpop.f32.mrf.mxu0  ;;  %v29507_v40 = vand.u32 4294901760, %v29480_v44 }
 0x633   : > { %25229 = vtanh.f32 %v13250_v29  ;;  %v13252_v21 = vadd.f32 %v13251_v38, %v13160_v16  ;;  %32223 = vst [vmem:[#allocation5_spill] sm:$0xff] %v29496_v5  ;;  %v15245_v38 = vsub.f32 %v29440_v46, %v29469_v8 }
 0x634   : > { %v15256_v55 = vsub.f32 %v29480_v44, %v29507_v40 }
 0x635   : > { %25231 = vtanh.f32 %v13252_v21  ;;  %v29397_v57 = vpop.f32.mrf.mxu0 }
 0x636   : > { %v29402_v37 = vpop.f32.mrf.mxu1 }
 0x637   : > { %v29404_v62 = vpop.f32.mrf.mxu0 }
 0x638   : > { %v29408_v34 = vpop.f32.mrf.mxu1 }
 0x639   : > { %v29411_v60 = vpop.f32.mrf.mxu0 }
 0x63a   : > { %v29413_v49 = vpop.f32.mrf.mxu1  ;;  %v25222_v24 = vpop.eup %25221 }
 0x63b   : > { %v29418_v22 = vpop.f32.mrf.mxu0  ;;  %v29434_v13 = vand.u32 4294901760, %v25222_v24 }
 0x63c   : > { %v25224_v51 = vpop.eup %25223  ;;  %v29425_v2 = vpop.f32.mrf.mxu1 }
 0x63d   : > { %v25226_v39 = vpop.eup %25225  ;;  %v29428_v47 = vand.u32 4294901760, %v25224_v51  ;;  %v29466_v61 = vsub.f32 %v25222_v24, %v29434_v13 }
 0x63e   : > { %v25228_v56 = vpop.eup %25227  ;;  %v29442_v25 = vand.u32 4294901760, %v25226_v39 }
 0x63f   : > { %v29430_v11 = vpop.f32.mrf.mxu1  ;;  %v29432_v59 = vpop.f32.mrf.mxu0  ;;  %v29453_v23 = vand.u32 4294901760, %v25228_v56  ;;  %v29456_v18 = vsub.f32 %v25224_v51, %v29428_v47  ;;  %v32125_v16 = vand.u32 4294901760, %v29466_v61 }
 0x640   : > { %v25230_v63 = vpop.eup %25229  ;;  %v29477_v1 = vsub.f32 %v25226_v39, %v29442_v25 }
 0x641   : > { %v29446_v26 = vpop.f32.mrf.mxu1  ;;  %v29448_v4 = vpop.f32.mrf.mxu0  ;;  %v15137_v19 = vsel %vm2530_vm3, %v25230_v63, 0  ;;  %v32122_v27 = vand.u32 4294901760, %v29456_v18  ;;  %v29493_v12 = vsub.f32 %v25228_v56, %v29453_v23  ;;  %v15311_v56 = vsub.f32 %v29466_v61, %v32125_v16 }
 0x642   : > { %v25232_v48 = vpop.eup %25231  ;;  %v29451_v41 = vand.u32 4294901760, %v15137_v19  ;;  %v32124_v21 = vand.u32 4294901760, %v29477_v1 }
 0x643   : > { %v29458_v35 = vpop.f32.mrf.mxu0  ;;  %v29460_v32 = vpop.f32.mrf.mxu1  ;;  %v15140_v45 = vsel %vm2530_vm3, %v25232_v48, 0  ;;  %v15305_v51 = vsub.f32 %v29456_v18, %v32122_v27  ;;  %v15322_v39 = vand.u32 4294901760, %v29493_v12  ;;  %v29527_v48 = vand.u32 4294901760, %v15245_v38 }
 0x644   : > { %v29471_v54 = vand.u32 4294901760, %v15140_v45  ;;  %v29474_v20 = vsub.f32 %v15137_v19, %v29451_v41  ;;  %v13463_v27 = vadd.f32 %v29413_v49, %v29389_v43  ;;  %v13458_v38 = vadd.f32 %v29408_v34, %v29387_v14 }
 0x645   : > { %v29482_v17 = vpop.f32.mrf.mxu0  ;;  %v29484_v53 = vpop.f32.mrf.mxu1  ;;  %v15306_v16 = vand.u32 4294901760, %v15305_v51  ;;  %v15323_v43 = vsub.f32 %v29493_v12, %v15322_v39  ;;  %v13456_v49 = vadd.f32 %v29402_v37, %v29385_v42  ;;  %v15312_v14 = vand.u32 4294901760, %v15311_v56 }
 0x646   : > { %15187 = vmatprep.subr.mxu0 %v29471_v54  ;;  %v29488_v58 = vsub.f32 %v15140_v45, %v29471_v54  ;;  %v32123_v6 = vand.u32 4294901760, %v29474_v20  ;;  %v15317_v45 = vsub.f32 %v29477_v1, %v32124_v21  ;;  %v29555_v51 = vand.u32 4294901760, %v15256_v55 }
 0x647   : > { %v13659_v33 = vpop.f32.mrf.mxu1  ;;  %15189 = vmatpush1.msra.mxu0 %v29451_v41  ;;  %v13472_v56 = vadd.f32 %v29446_v26, %v29404_v62 }
 0x648   : > { %v29499_v29 = vpop.f32.mrf.mxu0  ;;  %15191 = vmatprep.subr.mxu0 %v29428_v47  ;;  %v15292_v0 = vand.u32 4294901760, %v29488_v58  ;;  %v15299_v36 = vsub.f32 %v29474_v20, %v32123_v6 }
 0x649   : > { %v13661_v10 = vpop.f32.mrf.mxu1  ;;  %15193 = vmatpush1.msra.mxu0 %v29434_v13 }
 0x64a   : > { %v13760_v30 = vpop.f32.mrf.mxu0  ;;  %15195 = vmatprep.subr.mxu0 %v29442_v25  ;;  %v15293_v24 = vsub.f32 %v29488_v58, %v15292_v0 }
 0x64b   : > { %v29519_v3 = vpop.f32.mrf.mxu1  ;;  %15197 = vmatpush1.msra.mxu0 %v29453_v23 }
 0x64c   : > { %v13765_v63 = vpop.f32.mrf.mxu0  ;;  %15236 = vmatmul.mubr.f32.vlgmr.msra.gmra.mxu0 %v29496_v5  ;;  %15408 = vmatprep.subr.mxu0 %v29488_v58  ;;  %v15294_v19 = vand.u32 4294901760, %v15293_v24  ;;  %v15300_v58 = vand.u32 4294901760, %v15299_v36  ;;  %v13465_v24 = vadd.f32 %v29425_v2, %v29394_v28  ;;  %v13563_v36 = vadd.f32 %v29432_v59, %v13463_v27 }
 0x64d   : > { %v29536_v6 = vpop.f32.mrf.mxu1  ;;  %15411 = vmatpush1.msra.mxu0 %v29474_v20  ;;  %15241 = vmatprep.mubr.f32.mxu0 %v32197_v15  ;;  %v13557_v28 = vadd.f32 %v29418_v22, %v13458_v38  ;;  %v15318_v2 = vand.u32 4294901760, %v15317_v45  ;;  %v13470_v27 = vadd.f32 %v29430_v11, %v29397_v57 }
 0x64e   : > { %v13767_v21 = vpop.f32.mrf.mxu0  ;;  %15295 = vmatprep.subr.mxu1 %v15294_v19  ;;  %15414 = vmatprep.subr.mxu0 %v29456_v18  ;;  %v13565_v34 = vadd.f32 %v29448_v4, %v13465_v24  ;;  %v13555_v19 = vadd.f32 %v29411_v60, %v13456_v49  ;;  %v13660_v42 = vadd.f32 %v13659_v33, %v13563_v36  ;;  %v32225_v36 = vand.u32 4294901760, %v29456_v18 }
 0x64f   : > { %v13850_v5 = vpop.f32.mrf.mxu1  ;;  %15301 = vmatpush1.msra.mxu1 %v15300_v58  ;;  %15417 = vmatpush1.msra.mxu0 %v29466_v61  ;;  %v13653_v22 = vadd.f32 %v29484_v53, %v13557_v28  ;;  %v13571_v57 = vadd.f32 %v29458_v35, %v13470_v27  ;;  %v32226_v28 = vand.u32 4294901760, %v29466_v61 }
 0x650   : > { %15247 = vmatmul.mubr.f32.gmra.mxu0 %v29527_v48  ;;  %15307 = vmatprep.subr.mxu1 %v15306_v16  ;;  %v13662_v4 = vadd.f32 %v13661_v10, %v13565_v34  ;;  %v15324_v16 = vand.u32 4294901760, %v15323_v43  ;;  %v13651_v60 = vadd.f32 %v29460_v32, %v13555_v19  ;;  %v13766_v33 = vadd.f32 %v13765_v63, %v13660_v42 }
 0x651   : > { %v13772_v37 = vpop.f32.mrf.mxu0  ;;  %v13852_v59 = vpop.f32.mrf.mxu1  ;;  %15420 = vmatprep.subr.mxu0 %v29477_v1  ;;  %15313 = vmatpush1.msra.mxu1 %v15312_v14  ;;  %v13761_v11 = vadd.f32 %v13760_v30, %v13653_v22  ;;  %v13573_v10 = vadd.f32 %v29482_v17, %v13472_v56  ;;  %v32224_v43 = vand.u32 4294901760, %v29474_v20  ;;  %v32227_v20 = vand.u32 4294901760, %v29477_v1 }
 0x652   : > { %15423 = vmatpush1.msra.mxu0 %v29493_v12  ;;  %15319 = vmatprep.subr.mxu1 %v15318_v2  ;;  %v13768_v53 = vadd.f32 %v13767_v21, %v13662_v4  ;;  %v13759_v58 = vadd.f32 %v29499_v29, %v13651_v60 }
 0x653   : > { %v13774_v45 = vpop.f32.mrf.mxu0  ;;  %v13857_v55 = vpop.f32.mrf.mxu1  ;;  %15608 = vmatprep.subr.mxu0 %v15292_v0  ;;  %15252 = vmatprep.mubr.f32.mxu0 %v32197_v15  ;;  %v13669_v0 = vadd.f32 %v29519_v3, %v13571_v57  ;;  %v13853_v35 = vadd.f32 %v13852_v59, %v13761_v11  ;;  %v13671_v29 = vadd.f32 %v29536_v6, %v13573_v10 }
 0x654   : > { %15325 = vmatpush1.msra.mxu1 %v15324_v16  ;;  %15258 = vmatmul.mubr.f32.gmra.mxu0 %v29555_v51  ;;  %v13858_v62 = vadd.f32 %v13857_v55, %v13766_v33  ;;  %v13851_v21 = vadd.f32 %v13850_v5, %v13759_v58 }
 0x655   : > { %v29571_v26 = vpop.f32.mrf.mxu0  ;;  %v13859_v32 = vpop.f32.mrf.mxu1  ;;  %15360 = vmatmul.mubr.f32.vlgmr.msra.gmra.mxu1 %v29406_v9  ;;  %15508 = vmatprep.subr.mxu1 %v29471_v54  ;;  %v13773_v63 = vadd.f32 %v13772_v37, %v13669_v0  ;;  %v13775_v5 = vadd.f32 %v13774_v45, %v13671_v29 }
 0x656   : > { %v13860_v30 = vadd.f32 %v13859_v32, %v13768_v53  ;;  %15510 = vmatpush1.msra.mxu1 %v29451_v41  ;;  %15365 = vmatprep.mubr.f32.mxu1 %v32197_v15 }
 0x657   : > { %v29578_v17 = vpop.f32.mrf.mxu0  ;;  %15512 = vmatprep.subr.mxu1 %v29428_v47  ;;  %15456 = vmatprep.mubr.f32.mxu0 %v32197_v15 }
 0x658   : > { %25233 = vtanh.f32 %v13860_v30  ;;  %15514 = vmatpush1.msra.mxu1 %v29434_v13  ;;  %15459 = vmatmul.mubr.f32.vlgmr.msra.gmra.mxu0 %v29421_v50 }
 0x659   : > { %25235 = vtanh.f32 %v13858_v62  ;;  %v13864_v3 = vpop.f32.mrf.mxu1  ;;  %v29585_v38 = vpop.f32.mrf.mxu0  ;;  %15367 = vmatmul.mubr.f32.gmra.mxu1 %v29423_v7  ;;  %15516 = vmatprep.subr.mxu1 %v29442_v25 }
 0x65a   : > { %25237 = vtanh.f32 %v13853_v35  ;;  %v13865_v24 = vadd.f32 %v13864_v3, %v13773_v63  ;;  %15612 = vmatpush1.msra.mxu0 %v32224_v43  ;;  %15518 = vmatpush1.msra.mxu1 %v29453_v23 }
 0x65b   : > { %25239 = vtanh.f32 %v13851_v21  ;;  %v13866_v6 = vpop.f32.mrf.mxu1  ;;  %v29592_v49 = vpop.f32.mrf.mxu0  ;;  %15616 = vmatprep.subr.mxu0 %v32225_v36  ;;  %15710 = vmatprep.subr.mxu1 %v29471_v54 }
 0x65c   : > { %25241 = vtanh.f32 %v13865_v24  ;;  %v13867_v14 = vadd.f32 %v13866_v6, %v13775_v5  ;;  %15620 = vmatpush1.msra.mxu0 %v32226_v28  ;;  %15372 = vmatprep.mubr.f32.mxu1 %v32197_v15 }
 0x65d   : > { %15464 = vmatprep.mubr.f32.mxu0 %v32197_v15  ;;  %15624 = vmatprep.subr.mxu0 %v32227_v20 }
 0x65e   : > { %25243 = vtanh.f32 %v13867_v14  ;;  %v29603_v34 = vpop.f32.mrf.mxu0  ;;  %15374 = vmatmul.mubr.f32.gmra.mxu1 %v29444_v52  ;;  %15467 = vmatmul.mubr.f32.gmra.mxu0 %v29440_v46 }
 0x65f   : > { %v29607_v18 = vpop.f32.mrf.mxu1  ;;  %15628 = vmatpush1.msra.mxu0 %v15322_v39  ;;  %15472 = vmatprep.mubr.f32.mxu0 %v32197_v15 }
 0x660   : > { %v29612_v61 = vpop.f32.mrf.mxu0  ;;  %15551 = vmatprep.mubr.f32.mxu1 %v32197_v15 }
 0x661   : > { %v29615_v54 = vpop.f32.mrf.mxu1 }
 0x662   : > { %v29617_v1 = vpop.f32.mrf.mxu0  ;;  %15475 = vmatmul.mubr.f32.gmra.mxu0 %v29480_v44  ;;  %15555 = vmatmul.mubr.f32.vlgmr.msra.gmra.mxu1 %v29437_v31 }
 0x663   : > { %v29621_v2 = vpop.f32.mrf.mxu1  ;;  %15712 = vmatpush1.msra.mxu1 %v29451_v41  ;;  %15560 = vmatprep.mubr.f32.mxu1 %v32197_v15 }
 0x664   : > { %v29625_v12 = vpop.f32.mrf.mxu0  ;;  %15714 = vmatprep.subr.mxu1 %v29428_v47  ;;  %15661 = vmatprep.mubr.f32.mxu0 %v32197_v15 }
 0x665   : > { %v25234_v39 = vpop.eup %25233  ;;  %v29629_v19 = vpop.f32.mrf.mxu1  ;;  %15716 = vmatpush1.msra.mxu1 %v29434_v13 }
 0x666   : > { %v25236_v42 = vpop.eup %25235  ;;  %15718 = vmatprep.subr.mxu1 %v29442_v25  ;;  %15564 = vmatmul.mubr.f32.gmra.mxu1 %v29469_v8  ;;  %v29642_v13 = vand.u32 4294901760, %v25234_v39 }
 0x667   : > { %v25238_v37 = vpop.eup %25237  ;;  %15663 = vmatmul.mubr.f32.vlgmr.msra.gmra.mxu0 %v29406_v9  ;;  %15720 = vmatpush1.msra.mxu1 %v29453_v23  ;;  %v29644_v25 = vand.u32 4294901760, %v25236_v42 }
 0x668   : > { %v25240_v41 = vpop.eup %25239  ;;  %v29636_v59 = vpop.f32.mrf.mxu1  ;;  %15569 = vmatprep.mubr.f32.mxu1 %v32197_v15  ;;  %15668 = vmatprep.mubr.f32.mxu0 %v32197_v15  ;;  %v29652_v16 = vand.u32 4294901760, %v25238_v37  ;;  %v29667_v11 = vsub.f32 %v25234_v39, %v29642_v13 }
 0x669   : > { %v29638_v47 = vpop.f32.mrf.mxu0  ;;  %v25242_v27 = vpop.eup %25241  ;;  %v29658_v33 = vand.u32 4294901760, %v25240_v41  ;;  %v29675_v58 = vsub.f32 %v25236_v42, %v29644_v25 }
 0x66a   : > { %v29646_v22 = vpop.f32.mrf.mxu1  ;;  %15573 = vmatmul.mubr.f32.gmra.mxu1 %v29507_v40  ;;  %v15143_v23 = vsel %vm2530_vm3, %v25242_v27, 0  ;;  %v29681_v0 = vsub.f32 %v25238_v37, %v29652_v16  ;;  %v32129_v63 = vand.u32 4294901760, %v29667_v11  ;;  %v14078_v37 = vadd.f32 %v29621_v2, %v29585_v38  ;;  %v32228_v27 = vld [vmem:[#allocation5_spill] sm:$0xff] }
 0x66b   : > { %v29648_v4 = vpop.f32.mrf.mxu0  ;;  %v25244_v56 = vpop.eup %25243  ;;  %15670 = vmatmul.mubr.f32.gmra.mxu0 %v29423_v7  ;;  %15753 = vmatprep.mubr.f32.mxu1 %v32197_v15  ;;  %v29656_v60 = vand.u32 4294901760, %v15143_v23  ;;  %v29690_v21 = vsub.f32 %v25240_v41, %v29658_v33  ;;  %v32130_v24 = vand.u32 4294901760, %v29675_v58 }
 0x66c   : > { %v29662_v55 = vpop.f32.mrf.mxu1  ;;  %v15146_v57 = vsel %vm2530_vm3, %v25244_v56, 0  ;;  %15675 = vmatprep.mubr.f32.mxu0 %v32197_v15  ;;  %v15931_v36 = vand.u32 4294901760, %v29681_v0  ;;  %v15920_v42 = vsub.f32 %v29667_v11, %v32129_v63 }
 0x66d   : > { %v29660_v45 = vpop.f32.mrf.mxu0  ;;  %v29669_v53 = vand.u32 4294901760, %v15146_v57  ;;  %v29672_v10 = vsub.f32 %v15143_v23, %v29656_v60  ;;  %v15937_v20 = vand.u32 4294901760, %v29690_v21  ;;  %v15926_v56 = vsub.f32 %v29675_v58, %v32130_v24 }
 0x66e   : > { %v14267_v32 = vpop.f32.mrf.mxu1  ;;  %15755 = vmatmul.mubr.f32.vlgmr.msra.gmra.mxu1 %v29406_v9  ;;  %v15932_v2 = vsub.f32 %v29681_v0, %v15931_v36  ;;  %v14178_v24 = vadd.f32 %v29638_v47, %v14078_v37 }
 0x66f   : > { %v29677_v62 = vpop.f32.mrf.mxu0  ;;  %15802 = vmatprep.subr.mxu0 %v29669_v53  ;;  %15677 = vmatmul.mubr.f32.gmra.mxu0 %v29444_v52  ;;  %v29686_v35 = vsub.f32 %v15146_v57, %v29669_v53  ;;  %v32128_v30 = vand.u32 4294901760, %v29672_v10  ;;  %v14071_v57 = vadd.f32 %v29607_v18, %v29571_v26  ;;  %v15938_v26 = vsub.f32 %v29690_v21, %v15937_v20 }
 0x670   : > { %v14274_v29 = vpop.f32.mrf.mxu1  ;;  %15804 = vmatpush1.msra.mxu0 %v29656_v60  ;;  %15760 = vmatprep.mubr.f32.mxu1 %v32197_v15  ;;  %v15927_v37 = vand.u32 4294901760, %v15926_v56  ;;  %v14087_v56 = vadd.f32 %v29646_v22, %v29612_v61 }
 0x671   : > { %v29695_v3 = vpop.f32.mrf.mxu0  ;;  %15806 = vmatprep.subr.mxu0 %v29642_v13  ;;  %15845 = vmatprep.mubr.f32.mxu0 %v32197_v15  ;;  %v32131_v5 = vand.u32 4294901760, %v29686_v35  ;;  %v15914_v6 = vsub.f32 %v29672_v10, %v32128_v30  ;;  %v14073_v30 = vadd.f32 %v29615_v54, %v29578_v17  ;;  %v15921_v54 = vand.u32 4294901760, %v15920_v42 }
 0x672   : > { %v14276_v43 = vpop.f32.mrf.mxu1  ;;  %15808 = vmatpush1.msra.mxu0 %v29644_v25  ;;  %15762 = vmatmul.mubr.f32.gmra.mxu1 %v29423_v7  ;;  %v15933_v42 = vand.u32 4294901760, %v15932_v2 }
 0x673   : > { %v14375_v14 = vpop.f32.mrf.mxu0  ;;  %15810 = vmatprep.subr.mxu0 %v29652_v16  ;;  %v15908_v28 = vsub.f32 %v29686_v35, %v32131_v5  ;;  %15767 = vmatprep.mubr.f32.mxu1 %v32197_v15  ;;  %v15915_v38 = vand.u32 4294901760, %v15914_v6  ;;  %v14172_v17 = vadd.f32 %v29625_v12, %v14073_v30  ;;  %v14170_v6 = vadd.f32 %v29617_v1, %v14071_v57 }
 0x674   : > { %v14283_v39 = vpop.f32.mrf.mxu1  ;;  %15812 = vmatpush1.msra.mxu0 %v29658_v33 }
 0x675   : > { %v14380_v41 = vpop.f32.mrf.mxu0  ;;  %15851 = vmatmul.mubr.f32.vlgmr.msra.gmra.mxu0 %v32228_v27  ;;  %16023 = vmatprep.subr.mxu0 %v29686_v35  ;;  %v15909_v23 = vand.u32 4294901760, %v15908_v28  ;;  %v14080_v28 = vadd.f32 %v29629_v19, %v29592_v49  ;;  %v14275_v19 = vadd.f32 %v14274_v29, %v14178_v24  ;;  %v14268_v12 = vadd.f32 %v14267_v32, %v14172_v17 }
 0x676   : > { %v14285_v63 = vpop.f32.mrf.mxu1  ;;  %16026 = vmatpush1.msra.mxu0 %v29672_v10  ;;  %15856 = vmatprep.mubr.f32.mxu0 %v32197_v15  ;;  %v14266_v1 = vadd.f32 %v29662_v55, %v14170_v6  ;;  %v15939_v24 = vand.u32 4294901760, %v15938_v26 }
 0x677   : > { %v14382_v5 = vpop.f32.mrf.mxu0  ;;  %15910 = vmatprep.subr.mxu1 %v15909_v23  ;;  %16029 = vmatprep.subr.mxu0 %v29667_v11  ;;  %v14180_v49 = vadd.f32 %v29648_v4, %v14080_v28  ;;  %v14085_v23 = vadd.f32 %v29636_v59, %v29603_v34  ;;  %v14381_v4 = vadd.f32 %v14380_v41, %v14275_v19  ;;  %v32231_v19 = vand.u32 4294901760, %v29667_v11 }
 0x678   : > { %v14465_v18 = vpop.f32.mrf.mxu1  ;;  %15916 = vmatpush1.msra.mxu1 %v15915_v38  ;;  %16032 = vmatpush1.msra.mxu0 %v29675_v58  ;;  %v14376_v59 = vadd.f32 %v14375_v14, %v14268_v12  ;;  %v32229_v38 = vand.u32 4294901760, %v29686_v35  ;;  %v14374_v55 = vadd.f32 %v29695_v3, %v14266_v1  ;;  %v14188_v28 = vadd.f32 %v29677_v62, %v14087_v56 }
 0x679   : > { %v14387_v47 = vpop.f32.mrf.mxu0  ;;  %15769 = vmatmul.mubr.f32.gmra.mxu1 %v29444_v52  ;;  %15862 = vmatmul.mubr.f32.gmra.mxu0 %v29527_v48  ;;  %v14277_v57 = vadd.f32 %v14276_v43, %v14180_v49  ;;  %v14186_v34 = vadd.f32 %v29660_v45, %v14085_v23  ;;  %v32230_v49 = vand.u32 4294901760, %v29672_v10 }
 0x67a   : > { %v14467_v30 = vpop.f32.mrf.mxu1  ;;  %15922 = vmatprep.subr.mxu1 %v15921_v54  ;;  %16035 = vmatprep.subr.mxu0 %v29681_v0  ;;  %v14466_v35 = vadd.f32 %v14465_v18, %v14374_v55  ;;  %v14286_v3 = vadd.f32 %v14285_v63, %v14188_v28 }
 0x67b   : > { %v14389_v29 = vpop.f32.mrf.mxu0  ;;  %15928 = vmatpush1.msra.mxu1 %v15927_v37  ;;  %16038 = vmatpush1.msra.mxu0 %v29690_v21  ;;  %v14383_v43 = vadd.f32 %v14382_v5, %v14277_v57  ;;  %v14284_v61 = vadd.f32 %v14283_v39, %v14186_v34  ;;  %v14468_v22 = vadd.f32 %v14467_v30, %v14376_v59 }
 0x67c   : > { %v14472_v32 = vpop.f32.mrf.mxu1  ;;  %15934 = vmatprep.subr.mxu1 %v15933_v42  ;;  %16223 = vmatprep.subr.mxu0 %v32229_v38  ;;  %v14390_v39 = vadd.f32 %v14389_v29, %v14286_v3 }
 0x67d   : > { %v14473_v41 = vadd.f32 %v14472_v32, %v14381_v4  ;;  %v29757_v2 = vpop.f32.mrf.mxu0  ;;  %15867 = vmatprep.mubr.f32.mxu0 %v32197_v15  ;;  %15940 = vmatpush1.msra.mxu1 %v15939_v24  ;;  %v14388_v5 = vadd.f32 %v14387_v47, %v14284_v61  ;;  %v32232_v47 = vand.u32 4294901760, %v29675_v58 }
 0x67e   : > { %v14474_v45 = vpop.f32.mrf.mxu1  ;;  %15973 = vmatprep.mubr.f32.mxu1 %v32197_v15  ;;  %15873 = vmatmul.mubr.f32.gmra.mxu0 %v29555_v51 }
 0x67f   : > { %v14475_v14 = vadd.f32 %v14474_v45, %v14383_v43  ;;  %v29763_v26 = vpop.f32.mrf.mxu0  ;;  %15975 = vmatmul.mubr.f32.vlgmr.msra.gmra.mxu1 %v29406_v9  ;;  %16123 = vmatprep.subr.mxu1 %v29669_v53  ;;  %25245 = vtanh.f32 %v14473_v41 }
 0x680   : > { %16125 = vmatpush1.msra.mxu1 %v29656_v60  ;;  %15980 = vmatprep.mubr.f32.mxu1 %v32197_v15 }
 0x681   : > { %25247 = vtanh.f32 %v14475_v14  ;;  %v14479_v62 = vpop.f32.mrf.mxu1  ;;  %16127 = vmatprep.subr.mxu1 %v29642_v13  ;;  %16071 = vmatprep.mubr.f32.mxu0 %v32197_v15 }
 0x682   : > { %25249 = vtanh.f32 %v14468_v22  ;;  %v14480_v17 = vadd.f32 %v14479_v62, %v14388_v5  ;;  %v29771_v18 = vpop.f32.mrf.mxu0  ;;  %16129 = vmatpush1.msra.mxu1 %v29644_v25  ;;  %16074 = vmatmul.mubr.f32.vlgmr.msra.gmra.mxu0 %v29421_v50 }
 0x683   : > { %25251 = vtanh.f32 %v14466_v35  ;;  %v14481_v63 = vpop.f32.mrf.mxu1  ;;  %15982 = vmatmul.mubr.f32.gmra.mxu1 %v29423_v7  ;;  %16131 = vmatprep.subr.mxu1 %v29652_v16 }
 0x684   : > { %25253 = vtanh.f32 %v14480_v17  ;;  %v14482_v54 = vadd.f32 %v14481_v63, %v14390_v39  ;;  %v29777_v6 = vpop.f32.mrf.mxu0  ;;  %16227 = vmatpush1.msra.mxu0 %v32230_v49  ;;  %16133 = vmatpush1.msra.mxu1 %v29658_v33 }
 0x685   : > { %16231 = vmatprep.subr.mxu0 %v32231_v19  ;;  %16325 = vmatprep.subr.mxu1 %v29669_v53 }
 0x686   : > { %25255 = vtanh.f32 %v14482_v54  ;;  %16235 = vmatpush1.msra.mxu0 %v32232_v47  ;;  %15987 = vmatprep.mubr.f32.mxu1 %v32197_v15 }
 0x687   : > { %v29788_v37 = vpop.f32.mrf.mxu0  ;;  %v29790_v23 = vpop.f32.mrf.mxu1  ;;  %16079 = vmatprep.mubr.f32.mxu0 %v32197_v15  ;;  %16239 = vmatprep.subr.mxu0 %v15931_v36 }
 0x688   : > { %15989 = vmatmul.mubr.f32.gmra.mxu1 %v29444_v52  ;;  %16082 = vmatmul.mubr.f32.gmra.mxu0 %v29440_v46 }
 0x689   : > { %v29797_v11 = vpop.f32.mrf.mxu0  ;;  %v29799_v53 = vpop.f32.mrf.mxu1  ;;  %16243 = vmatpush1.msra.mxu0 %v15937_v20  ;;  %16087 = vmatprep.mubr.f32.mxu0 %v32197_v15 }
 0x68a   : > { %16166 = vmatprep.mubr.f32.mxu1 %v32197_v15 }
 0x68b   : > { %v29805_v10 = vpop.f32.mrf.mxu0 }
 0x68c   : > { %v29807_v58 = vpop.f32.mrf.mxu1  ;;  %16090 = vmatmul.mubr.f32.gmra.mxu0 %v29480_v44  ;;  %16170 = vmatmul.mubr.f32.vlgmr.msra.gmra.mxu1 %v29437_v31  ;;  %v25246_v0 = vpop.eup %25245 }
 0x68d   : > { %v29811_v36 = vpop.f32.mrf.mxu0  ;;  %16327 = vmatpush1.msra.mxu1 %v29656_v60  ;;  %16175 = vmatprep.mubr.f32.mxu1 %v32197_v15 }
 0x68e   : > { %v25248_v21 = vpop.eup %25247  ;;  %v29815_v20 = vpop.f32.mrf.mxu1  ;;  %16329 = vmatprep.subr.mxu1 %v29642_v13  ;;  %16276 = vmatprep.mubr.f32.mxu0 %v32197_v15  ;;  %v29830_v13 = vand.u32 4294901760, %v25246_v0 }
 0x68f   : > { %v25250_v12 = vpop.eup %25249  ;;  %16331 = vmatpush1.msra.mxu1 %v29644_v25  ;;  %v29822_v42 = vand.u32 4294901760, %v25248_v21 }
 0x690   : > { %v25252_v30 = vpop.eup %25251  ;;  %16333 = vmatprep.subr.mxu1 %v29652_v16  ;;  %16179 = vmatmul.mubr.f32.gmra.mxu1 %v29469_v8  ;;  %v29835_v16 = vand.u32 4294901760, %v25250_v12  ;;  %v29862_v41 = vsub.f32 %v25246_v0, %v29830_v13 }
 0x691   : > { %v25254_v60 = vpop.eup %25253  ;;  %v29824_v1 = vpop.f32.mrf.mxu1  ;;  %16278 = vmatmul.mubr.f32.vlgmr.msra.gmra.mxu0 %v29406_v9  ;;  %16335 = vmatpush1.msra.mxu1 %v29658_v33  ;;  %v29845_v34 = vand.u32 4294901760, %v25252_v30  ;;  %v29848_v59 = vsub.f32 %v25248_v21, %v29822_v42 }
 0x692   : > { %v29826_v57 = vpop.f32.mrf.mxu0  ;;  %16184 = vmatprep.mubr.f32.mxu1 %v32197_v15  ;;  %16283 = vmatprep.mubr.f32.mxu0 %v32197_v15  ;;  %v15149_v25 = vsel %vm2530_vm3, %v25254_v60, 0  ;;  %v29866_v28 = vsub.f32 %v25250_v12, %v29835_v16  ;;  %v32134_v39 = vand.u32 4294901760, %v29862_v41 }
 0x693   : > { %v25256_v4 = vpop.eup %25255  ;;  %v29837_v29 = vpop.f32.mrf.mxu1  ;;  %v29841_v56 = vand.u32 4294901760, %v15149_v25  ;;  %v32132_v14 = vand.u32 4294901760, %v29848_v59  ;;  %v29881_v3 = vsub.f32 %v25252_v30, %v29845_v34 }
 0x694   : > { %v29839_v24 = vpop.f32.mrf.mxu0  ;;  %16188 = vmatmul.mubr.f32.gmra.mxu1 %v29507_v40  ;;  %v15152_v33 = vsel %vm2530_vm3, %v25256_v4, 0  ;;  %v32135_v54 = vand.u32 4294901760, %v29866_v28  ;;  %v16541_v60 = vsub.f32 %v29862_v41, %v32134_v39 }
 0x695   : > { %v29852_v38 = vpop.f32.mrf.mxu1  ;;  %16285 = vmatmul.mubr.f32.gmra.mxu0 %v29423_v7  ;;  %v29855_v55 = vand.u32 4294901760, %v15152_v33  ;;  %16368 = vmatprep.mubr.f32.mxu1 %v32197_v15  ;;  %v29859_v43 = vsub.f32 %v15149_v25, %v29841_v56  ;;  %v16535_v0 = vsub.f32 %v29848_v59, %v32132_v14  ;;  %v16552_v21 = vand.u32 4294901760, %v29881_v3 }
 0x696   : > { %v29850_v32 = vpop.f32.mrf.mxu0  ;;  %16290 = vmatprep.mubr.f32.mxu0 %v32197_v15  ;;  %v14693_v25 = vadd.f32 %v29807_v58, %v29771_v18  ;;  %v16547_v14 = vsub.f32 %v29866_v28, %v32135_v54  ;;  %v14695_v18 = vadd.f32 %v29815_v20, %v29777_v6  ;;  %v16542_v6 = vand.u32 4294901760, %v16541_v60 }
 0x697   : > { %v29870_v22 = vpop.f32.mrf.mxu1  ;;  %16417 = vmatprep.subr.mxu0 %v29855_v55  ;;  %v29874_v45 = vsub.f32 %v15152_v33, %v29855_v55  ;;  %v32133_v35 = vand.u32 4294901760, %v29859_v43  ;;  %v16553_v54 = vsub.f32 %v29881_v3, %v16552_v21  ;;  %v14700_v20 = vadd.f32 %v29824_v1, %v29788_v37 }
 0x698   : > { %v29868_v61 = vpop.f32.mrf.mxu0  ;;  %16419 = vmatpush1.msra.mxu0 %v29841_v56  ;;  %16370 = vmatmul.mubr.f32.vlgmr.msra.gmra.mxu1 %v29406_v9  ;;  %v14793_v58 = vadd.f32 %v29826_v57, %v14693_v25  ;;  %v14795_v57 = vadd.f32 %v29839_v24, %v14695_v18  ;;  %v16548_v25 = vand.u32 4294901760, %v16547_v14 }
 0x699   : > { %v14889_v5 = vpop.f32.mrf.mxu1  ;;  %16292 = vmatmul.mubr.f32.gmra.mxu0 %v29444_v52  ;;  %16421 = vmatprep.subr.mxu0 %v29822_v42  ;;  %v16522_v62 = vand.u32 4294901760, %v29874_v45  ;;  %v16529_v63 = vsub.f32 %v29859_v43, %v32133_v35  ;;  %v14801_v37 = vadd.f32 %v29850_v32, %v14700_v20  ;;  %v16554_v14 = vand.u32 4294901760, %v16553_v54 }
 0x69a   : > { %v29887_v17 = vpop.f32.mrf.mxu0  ;;  %16423 = vmatpush1.msra.mxu0 %v29830_v13  ;;  %16375 = vmatprep.mubr.f32.mxu1 %v32197_v15 }
 0x69b   : > { %v14891_v49 = vpop.f32.mrf.mxu1  ;;  %16425 = vmatprep.subr.mxu0 %v29835_v16  ;;  %16460 = vmatprep.mubr.f32.mxu0 %v32197_v15  ;;  %v16523_v19 = vsub.f32 %v29874_v45, %v16522_v62  ;;  %v16530_v33 = vand.u32 4294901760, %v16529_v63  ;;  %v16536_v63 = vand.u32 4294901760, %v16535_v0  ;;  %v14890_v0 = vadd.f32 %v14889_v5, %v14793_v58 }
 0x69c   : > { %v14990_v47 = vpop.f32.mrf.mxu0  ;;  %16427 = vmatpush1.msra.mxu0 %v29845_v34  ;;  %16377 = vmatmul.mubr.f32.gmra.mxu1 %v29423_v7  ;;  %v14892_v1 = vadd.f32 %v14891_v49, %v14795_v57  ;;  %v32233_v58 = vand.u32 4294901760, %v29859_v43 }
 0x69d   : > { %v14898_v12 = vpop.f32.mrf.mxu1  ;;  %16466 = vmatmul.mubr.f32.vlgmr.msra.gmra.mxu0 %v32228_v27  ;;  %16638 = vmatprep.subr.mxu0 %v29874_v45  ;;  %v16524_v30 = vand.u32 4294901760, %v16523_v19  ;;  %v14688_v19 = vadd.f32 %v29799_v53, %v29763_v26  ;;  %v14686_v26 = vadd.f32 %v29790_v23, %v29757_v2  ;;  %v14702_v23 = vadd.f32 %v29837_v29, %v29797_v11 }
 0x69e   : > { %v14995_v4 = vpop.f32.mrf.mxu0  ;;  %16641 = vmatpush1.msra.mxu0 %v29859_v43  ;;  %16382 = vmatprep.mubr.f32.mxu1 %v32197_v15 }
 0x69f   : > { %v14900_v35 = vpop.f32.mrf.mxu1  ;;  %16525 = vmatprep.subr.mxu1 %v16524_v30  ;;  %16644 = vmatprep.subr.mxu0 %v29848_v59  ;;  %v14787_v53 = vadd.f32 %v29811_v36, %v14688_v19  ;;  %v14785_v2 = vadd.f32 %v29805_v10, %v14686_v26  ;;  %v14996_v24 = vadd.f32 %v14995_v4, %v14890_v0  ;;  %v32235_v26 = vand.u32 4294901760, %v29862_v41 }
 0x6a0   : > { %v14997_v39 = vpop.f32.mrf.mxu0  ;;  %16471 = vmatprep.mubr.f32.mxu0 %v32197_v15  ;;  %16531 = vmatpush1.msra.mxu1 %v16530_v33  ;;  %v14803_v5 = vadd.f32 %v29868_v61, %v14702_v23 }
 0x6a1   : > { %v15080_v30 = vpop.f32.mrf.mxu1  ;;  %16647 = vmatpush1.msra.mxu0 %v29862_v41  ;;  %16384 = vmatmul.mubr.f32.gmra.mxu1 %v29444_v52  ;;  %v14883_v36 = vadd.f32 %v29870_v22, %v14787_v53  ;;  %v14881_v10 = vadd.f32 %v29852_v38, %v14785_v2  ;;  %v14899_v22 = vadd.f32 %v14898_v12, %v14801_v37  ;;  %v32236_v53 = vand.u32 4294901760, %v29866_v28 }
 0x6a2   : > { %16477 = vmatmul.mubr.f32.gmra.mxu0 %v29527_v48  ;;  %16537 = vmatprep.subr.mxu1 %v16536_v63  ;;  %v15002_v33 = vpop.f32.mrf.mxu0  ;;  %v14998_v60 = vadd.f32 %v14997_v39, %v14892_v1  ;;  %v14901_v61 = vadd.f32 %v14900_v35, %v14803_v5  ;;  %v32234_v63 = vand.u32 4294901760, %v29848_v59 }
 0x6a3   : > { %v15082_v19 = vpop.f32.mrf.mxu1  ;;  %16650 = vmatprep.subr.mxu0 %v29866_v28  ;;  %16543 = vmatpush1.msra.mxu1 %v16542_v6  ;;  %v14991_v11 = vadd.f32 %v14990_v47, %v14883_v36  ;;  %v14989_v49 = vadd.f32 %v29887_v17, %v14881_v10  ;;  %v15003_v45 = vadd.f32 %v15002_v33, %v14899_v22 }
 0x6a4   : > { %16653 = vmatpush1.msra.mxu0 %v29881_v3  ;;  %16549 = vmatprep.subr.mxu1 %v16548_v25  ;;  %v15004_v54 = vpop.f32.mrf.mxu0 }
 0x6a5   : > { %v15087_v29 = vpop.f32.mrf.mxu1  ;;  %16838 = vmatprep.subr.mxu0 %v16522_v62  ;;  %16482 = vmatprep.mubr.f32.mxu0 %v32197_v15  ;;  %v15083_v4 = vadd.f32 %v15082_v19, %v14991_v11  ;;  %v15081_v39 = vadd.f32 %v15080_v30, %v14989_v49  ;;  %v15005_v17 = vadd.f32 %v15004_v54, %v14901_v61 }
 0x6a6   : > { %v15088_v32 = vadd.f32 %v15087_v29, %v14996_v24  ;;  %16555 = vmatpush1.msra.mxu1 %v16554_v14  ;;  %16588 = vmatprep.mubr.f32.mxu1 %v32197_v15 }
 0x6a7   : > { %v15089_v38 = vpop.f32.mrf.mxu1  ;;  %16488 = vmatmul.mubr.f32.gmra.mxu0 %v29555_v51  ;;  %16590 = vmatmul.mubr.f32.vlgmr.msra.gmra.mxu1 %v29406_v9 }
 0x6a8   : > { %v15090_v62 = vadd.f32 %v15089_v38, %v14998_v60  ;;  %16738 = vmatprep.subr.mxu1 %v29855_v55  ;;  %16595 = vmatprep.mubr.f32.mxu1 %v32197_v15  ;;  %25257 = vtanh.f32 %v15088_v32 }
 0x6a9   : > { %v15094_v47 = vpop.f32.mrf.mxu1  ;;  %16740 = vmatpush1.msra.mxu1 %v29841_v56  ;;  %16686 = vmatprep.mubr.f32.mxu0 %v32197_v15 }
 0x6aa   : > { %25259 = vtanh.f32 %v15090_v62  ;;  %v15095_v12 = vadd.f32 %v15094_v47, %v15003_v45  ;;  %16742 = vmatprep.subr.mxu1 %v29822_v42 }
 0x6ab   : > { %25261 = vtanh.f32 %v15083_v4  ;;  %v15096_v35 = vpop.f32.mrf.mxu1  ;;  %16744 = vmatpush1.msra.mxu1 %v29830_v13  ;;  %16689 = vmatmul.mubr.f32.vlgmr.msra.gmra.mxu0 %v29421_v50 }
 0x6ac   : > { %25263 = vtanh.f32 %v15095_v12  ;;  %v15097_v18 = vadd.f32 %v15096_v35, %v15005_v17  ;;  %16597 = vmatmul.mubr.f32.gmra.mxu1 %v29423_v7  ;;  %16746 = vmatprep.subr.mxu1 %v29835_v16 }
 0x6ad   : > { %25265 = vtanh.f32 %v15081_v39  ;;  %16842 = vmatpush1.msra.mxu0 %v32233_v58  ;;  %16748 = vmatpush1.msra.mxu1 %v29845_v34 }
 0x6ae   : > { %25267 = vtanh.f32 %v15097_v18  ;;  %16846 = vmatprep.subr.mxu0 %v32234_v63  ;;  %16940 = vmatprep.subr.mxu1 %v29855_v55 }
 0x6af   : > { %16850 = vmatpush1.msra.mxu0 %v32235_v26  ;;  %16602 = vmatprep.mubr.f32.mxu1 %v32197_v15 }
 0x6b0   : > { %16694 = vmatprep.mubr.f32.mxu0 %v32197_v15  ;;  %16854 = vmatprep.subr.mxu0 %v32236_v53 }
 0x6b1   : > { %16604 = vmatmul.mubr.f32.gmra.mxu1 %v29444_v52  ;;  %16697 = vmatmul.mubr.f32.gmra.mxu0 %v29440_v46 }
 0x6b2   : > { %16858 = vmatpush1.msra.mxu0 %v16552_v21  ;;  %16702 = vmatprep.mubr.f32.mxu0 %v32197_v15 }
 0x6b3   : > { %16781 = vmatprep.mubr.f32.mxu1 %v32197_v15 }
 0x6b5   : > { %16705 = vmatmul.mubr.f32.gmra.mxu0 %v29480_v44  ;;  %16785 = vmatmul.mubr.f32.vlgmr.msra.gmra.mxu1 %v29437_v31  ;;  %v25258_v59 = vpop.eup %25257 }
 0x6b6   : > { %16942 = vmatpush1.msra.mxu1 %v29841_v56  ;;  %16790 = vmatprep.mubr.f32.mxu1 %v32197_v15 }
 0x6b7   : > { %v25260_v55 = vpop.eup %25259  ;;  %16944 = vmatprep.subr.mxu1 %v29822_v42  ;;  %16891 = vmatprep.mubr.f32.mxu0 %v32197_v15  ;;  %v29994_v42 = vand.u32 4294901760, %v25258_v59 }
 0x6b8   : > { %v25262_v43 = vpop.eup %25261  ;;  %16946 = vmatpush1.msra.mxu1 %v29830_v13  ;;  %v29989_v28 = vand.u32 4294901760, %v25260_v55 }
 0x6b9   : > { %v25264_v41 = vpop.eup %25263  ;;  %16948 = vmatprep.subr.mxu1 %v29835_v16  ;;  %16794 = vmatmul.mubr.f32.gmra.mxu1 %v29469_v8  ;;  %v30000_v16 = vand.u32 4294901760, %v25262_v43  ;;  %v30017_v0 = vsub.f32 %v25258_v59, %v29994_v42 }
 0x6ba   : > { %v25266_v3 = vpop.eup %25265  ;;  %16893 = vmatmul.mubr.f32.vlgmr.msra.gmra.mxu0 %v29406_v9  ;;  %16950 = vmatpush1.msra.mxu1 %v29845_v34  ;;  %v15155_v56 = vsel %vm2530_vm3, %v25264_v41, 0  ;;  %v30012_v57 = vsub.f32 %v25260_v55, %v29989_v28 }
 0x6bb   : > { %v25268_v21 = vpop.eup %25267  ;;  %16799 = vmatprep.mubr.f32.mxu1 %v32197_v15  ;;  %16898 = vmatprep.mubr.f32.mxu0 %v32197_v15  ;;  %v29998_v13 = vand.u32 4294901760, %v15155_v56  ;;  %v30006_v34 = vand.u32 4294901760, %v25266_v3  ;;  %v30024_v23 = vsub.f32 %v25262_v43, %v30000_v16  ;;  %v17155_v37 = vand.u32 4294901760, %v30017_v0 }
 0x6bc   : > { %v15158_v30 = vsel %vm2530_vm3, %v25268_v21, 0  ;;  %v17149_v33 = vand.u32 4294901760, %v30012_v57 }
 0x6bd   : > { %16803 = vmatmul.mubr.f32.gmra.mxu1 %v29507_v40  ;;  %v30004_v6 = vand.u32 4294901760, %v15158_v30  ;;  %v30009_v20 = vsub.f32 %v15155_v56, %v29998_v13  ;;  %v30031_v19 = vsub.f32 %v25266_v3, %v30006_v34  ;;  %v17161_v14 = vand.u32 4294901760, %v30024_v23 }
 0x6be   : > { %16900 = vmatmul.mubr.f32.gmra.mxu0 %v29423_v7  ;;  %16983 = vmatprep.mubr.f32.mxu1 %v32197_v15  ;;  %v17150_v5 = vsub.f32 %v30012_v57, %v17149_v33  ;;  %v17156_v29 = vsub.f32 %v30017_v0, %v17155_v37 }
 0x6bf   : > { %17032 = vmatprep.subr.mxu0 %v30004_v6  ;;  %16905 = vmatprep.mubr.f32.mxu0 %v32197_v15  ;;  %v17136_v25 = vsub.f32 %v15158_v30, %v30004_v6  ;;  %v17143_v2 = vand.u32 4294901760, %v30009_v20  ;;  %v17167_v11 = vand.u32 4294901760, %v30031_v19  ;;  %v17162_v60 = vsub.f32 %v30024_v23, %v17161_v14 }
 0x6c0   : > { %17034 = vmatpush1.msra.mxu0 %v29998_v13  ;;  %v17151_v32 = vand.u32 4294901760, %v17150_v5 }
 0x6c1   : > { %16985 = vmatmul.mubr.f32.vlgmr.msra.gmra.mxu1 %v29406_v9  ;;  %17036 = vmatprep.subr.mxu0 %v29989_v28  ;;  %v17137_v36 = vand.u32 4294901760, %v17136_v25  ;;  %v17144_v24 = vsub.f32 %v30009_v20, %v17143_v2  ;;  %v17168_v49 = vsub.f32 %v30031_v19, %v17167_v11  ;;  %v17163_v54 = vand.u32 4294901760, %v17162_v60 }
 0x6c2   : > { %16907 = vmatmul.mubr.f32.gmra.mxu0 %v29444_v52  ;;  %16990 = vmatprep.mubr.f32.mxu1 %v32197_v15 }
 0x6c3   : > { %17038 = vmatpush1.msra.mxu0 %v29994_v42  ;;  %17075 = vmatprep.mubr.f32.mxu0 %v32197_v15  ;;  %v17138_v1 = vsub.f32 %v17136_v25, %v17137_v36  ;;  %v17145_v22 = vand.u32 4294901760, %v17144_v24  ;;  %v17169_v4 = vand.u32 4294901760, %v17168_v49 }
 0x6c4   : > { %17040 = vmatprep.subr.mxu0 %v30000_v16 }
 0x6c5   : > { %17042 = vmatpush1.msra.mxu0 %v30006_v34  ;;  %16992 = vmatmul.mubr.f32.gmra.mxu1 %v29423_v7  ;;  %v17139_v10 = vand.u32 4294901760, %v17138_v1 }
 0x6c6   : > { %17081 = vmatmul.mubr.f32.vlgmr.msra.gmra.mxu0 %v32228_v27  ;;  %17253 = vmatprep.subr.mxu0 %v17136_v25  ;;  %v17157_v27 = vand.u32 4294901760, %v17156_v29 }
 0x6c7   : > { %17256 = vmatpush1.msra.mxu0 %v30009_v20  ;;  %17140 = vmatprep.subr.mxu1 %v17139_v10 }
 0x6c8   : > { %17259 = vmatprep.subr.mxu0 %v30012_v57  ;;  %16997 = vmatprep.mubr.f32.mxu1 %v32197_v15 }
 0x6c9   : > { %17086 = vmatprep.mubr.f32.mxu0 %v32197_v15  ;;  %17146 = vmatpush1.msra.mxu1 %v17145_v22 }
 0x6ca   : > { %17262 = vmatpush1.msra.mxu0 %v30017_v0  ;;  %16999 = vmatmul.mubr.f32.gmra.mxu1 %v29444_v52 }
 0x6cb   : > { %17092 = vmatmul.mubr.f32.gmra.mxu0 %v29527_v48  ;;  %17152 = vmatprep.subr.mxu1 %v17151_v32 }
 0x6cc   : > { %17265 = vmatprep.subr.mxu0 %v30024_v23  ;;  %17158 = vmatpush1.msra.mxu1 %v17157_v27 }
 0x6cd   : > { %17268 = vmatpush1.msra.mxu0 %v30031_v19  ;;  %17164 = vmatprep.subr.mxu1 %v17163_v54 }
 0x6ce   : > { %17453 = vmatprep.subr.mxu0 %v17137_v36  ;;  %17097 = vmatprep.mubr.f32.mxu0 %v32197_v15 }
 0x6cf   : > { %17170 = vmatpush1.msra.mxu1 %v17169_v4  ;;  %17203 = vmatprep.mubr.f32.mxu1 %v32197_v15 }
 0x6d0   : > { %17103 = vmatmul.mubr.f32.gmra.mxu0 %v29555_v51  ;;  %17205 = vmatmul.mubr.f32.vlgmr.msra.gmra.mxu1 %v29406_v9 }
 0x6d1   : > { %17353 = vmatprep.subr.mxu1 %v30004_v6  ;;  %17210 = vmatprep.mubr.f32.mxu1 %v32197_v15 }
 0x6d2   : > { %17355 = vmatpush1.msra.mxu1 %v29998_v13  ;;  %17301 = vmatprep.mubr.f32.mxu0 %v32197_v15 }
 0x6d3   : > { %17357 = vmatprep.subr.mxu1 %v29989_v28 }
 0x6d4   : > { %17359 = vmatpush1.msra.mxu1 %v29994_v42  ;;  %17304 = vmatmul.mubr.f32.vlgmr.msra.gmra.mxu0 %v29421_v50 }
 0x6d5   : > { %17212 = vmatmul.mubr.f32.gmra.mxu1 %v29423_v7  ;;  %17361 = vmatprep.subr.mxu1 %v30000_v16 }
 0x6d6   : > { %17457 = vmatpush1.msra.mxu0 %v17143_v2  ;;  %17363 = vmatpush1.msra.mxu1 %v30006_v34 }
 0x6d7   : > { %17461 = vmatprep.subr.mxu0 %v17149_v33  ;;  %17555 = vmatprep.subr.mxu1 %v30004_v6 }
 0x6d8   : > { %17465 = vmatpush1.msra.mxu0 %v17155_v37  ;;  %17217 = vmatprep.mubr.f32.mxu1 %v32197_v15 }
 0x6d9   : > { %17309 = vmatprep.mubr.f32.mxu0 %v32197_v15  ;;  %17469 = vmatprep.subr.mxu0 %v17161_v14 }
 0x6da   : > { %17219 = vmatmul.mubr.f32.gmra.mxu1 %v29444_v52  ;;  %17312 = vmatmul.mubr.f32.gmra.mxu0 %v29440_v46 }
 0x6db   : > { %17473 = vmatpush1.msra.mxu0 %v17167_v11  ;;  %17317 = vmatprep.mubr.f32.mxu0 %v32197_v15 }
 0x6dc   : > { %17396 = vmatprep.mubr.f32.mxu1 %v32197_v15 }
 0x6de   : > { %17320 = vmatmul.mubr.f32.gmra.mxu0 %v29480_v44  ;;  %17400 = vmatmul.mubr.f32.vlgmr.msra.gmra.mxu1 %v29437_v31 }
 0x6df   : > { %17557 = vmatpush1.msra.mxu1 %v29998_v13  ;;  %17405 = vmatprep.mubr.f32.mxu1 %v32197_v15 }
 0x6e0   : > { %17559 = vmatprep.subr.mxu1 %v29989_v28  ;;  %17506 = vmatprep.mubr.f32.mxu0 %v32197_v15 }
 0x6e1   : > { %17561 = vmatpush1.msra.mxu1 %v29994_v42 }
 0x6e2   : > { %17563 = vmatprep.subr.mxu1 %v30000_v16  ;;  %17409 = vmatmul.mubr.f32.gmra.mxu1 %v29469_v8 }
 0x6e3   : > { %17508 = vmatmul.mubr.f32.vlgmr.msra.gmra.mxu0 %v29406_v9  ;;  %17565 = vmatpush1.msra.mxu1 %v30006_v34 }
 0x6e4   : > { %17414 = vmatprep.mubr.f32.mxu1 %v32197_v15  ;;  %17513 = vmatprep.mubr.f32.mxu0 %v32197_v15 }
 0x6e6   : > { %17418 = vmatmul.mubr.f32.gmra.mxu1 %v29507_v40 }
 0x6e7   : > { %17515 = vmatmul.mubr.f32.gmra.mxu0 %v29423_v7  ;;  %17598 = vmatprep.mubr.f32.mxu1 %v32197_v15 }
 0x6e8   : > { %17520 = vmatprep.mubr.f32.mxu0 %v32197_v15 }
 0x6ea   : > { %17600 = vmatmul.mubr.f32.vlgmr.msra.gmra.mxu1 %v29406_v9 }
 0x6eb   : > { %17522 = vmatmul.mubr.f32.gmra.mxu0 %v29444_v52  ;;  %17605 = vmatprep.mubr.f32.mxu1 %v32197_v15 }
 0x6ec   : > { %17751 = vmatprep.mubr.f32.mxu0 %v32197_v15 }
 0x6ee   : > { %17607 = vmatmul.mubr.f32.gmra.mxu1 %v29423_v7 }
 0x6ef   : > { %17612 = vmatprep.mubr.f32.mxu1 %v32197_v15 }
 0x6f2   : > { %17614 = vmatmul.mubr.f32.gmra.mxu1 %v29444_v52 }
 0x6f3   : > { %17879 = vmatprep.mubr.f32.mxu1 %v32197_v15 }
 0x70c   : > { %v15237_v50 = vpop.f32.mrf.mxu0 }
 0x70e   : > { %v15239_v31 = vpop.f32.mrf.mxu0 }
 0x710   : > { %v15248_v46 = vpop.f32.mrf.mxu0 }
 0x712   : > { %v15250_v8 = vpop.f32.mrf.mxu0 }
 0x714   : > { %v15259_v44 = vpop.f32.mrf.mxu0 }
 0x715   : > { %v15361_v9 = vpop.f32.mrf.mxu1 }
 0x716   : > { %v15261_v40 = vpop.f32.mrf.mxu0  ;;  %v15362_v21 = vadd.f32 %v15361_v9, %v15237_v50 }
 0x717   : > { %v15363_v48 = vpop.f32.mrf.mxu1 }
 0x718   : > { %v15460_v51 = vpop.f32.mrf.mxu0  ;;  %v15364_v41 = vadd.f32 %v15363_v48, %v15239_v31 }
 0x719   : > { %v15368_v38 = vpop.f32.mrf.mxu1  ;;  %v15461_v20 = vadd.f32 %v15460_v51, %v15362_v21 }
 0x71a   : > { %v15462_v61 = vpop.f32.mrf.mxu0  ;;  %v15369_v55 = vadd.f32 %v15368_v38, %v15248_v46 }
 0x71b   : > { %v15370_v45 = vpop.f32.mrf.mxu1  ;;  %v15463_v13 = vadd.f32 %v15462_v61, %v15364_v41 }
 0x71c   : > { %v15371_v28 = vadd.f32 %v15370_v45, %v15250_v8  ;;  %v24925_v45 = vld [vmem:[%s32060_s2 + $0x98] sm:$0xff] }
 0x71e   : > { %v15375_v62 = vpop.f32.mrf.mxu1  ;;  %v15468_v7 = vpop.f32.mrf.mxu0 }
 0x71f   : > { %v15469_v56 = vadd.f32 %v15468_v7, %v15369_v55  ;;  %v15376_v2 = vadd.f32 %v15375_v62, %v15259_v44  ;;  %v24924_v44 = vld [vmem:[%s32060_s2 + $0x90] sm:$0xff] }
 0x720   : > { %v15377_v39 = vpop.f32.mrf.mxu1  ;;  %v15470_v47 = vpop.f32.mrf.mxu0  ;;  %v17649_v51 = vsel %vm2520_vm2, %v24924_v44, 0 }
 0x721   : > { %v15471_v16 = vadd.f32 %v15470_v47, %v15371_v28  ;;  %v15378_v1 = vadd.f32 %v15377_v39, %v15261_v40  ;;  %v30125_v7 = vand.u32 4294901760, %v17649_v51 }
 0x722   : > { %v15476_v17 = vpop.f32.mrf.mxu0  ;;  %v15556_v52 = vpop.f32.mrf.mxu1 }
 0x723   : > { %v15557_v33 = vadd.f32 %v15556_v52, %v15461_v20  ;;  %v15477_v24 = vadd.f32 %v15476_v17, %v15376_v2  ;;  %v17652_v17 = vsel %vm2520_vm2, %v24925_v45, 0  ;;  %v24926_v52 = vld [vmem:[%s32060_s2 + $0xa0] sm:$0x1f] }
 0x724   : > { %v15478_v12 = vpop.f32.mrf.mxu0  ;;  %v15558_v35 = vpop.f32.mrf.mxu1 }
 0x725   : > { %v15559_v57 = vadd.f32 %v15558_v35, %v15463_v13  ;;  %v15479_v60 = vadd.f32 %v15478_v12, %v15378_v1 }
 0x726   : > { %v15565_v18 = vpop.f32.mrf.mxu1 }
 0x727   : > { %v15664_v58 = vpop.f32.mrf.mxu0  ;;  %v15566_v6 = vadd.f32 %v15565_v18, %v15469_v56 }
 0x728   : > { %v15567_v63 = vpop.f32.mrf.mxu1  ;;  %v15665_v5 = vadd.f32 %v15664_v58, %v15557_v33  ;;  %v30140_v58 = vsub.f32 %v17649_v51, %v30125_v7 }
 0x729   : > { %v15666_v26 = vpop.f32.mrf.mxu0  ;;  %v15568_v0 = vadd.f32 %v15567_v63, %v15471_v16 }
 0x72a   : > { %v15574_v53 = vpop.f32.mrf.mxu1  ;;  %v15667_v19 = vadd.f32 %v15666_v26, %v15559_v57 }
 0x72b   : > { %v15671_v59 = vpop.f32.mrf.mxu0  ;;  %v15575_v32 = vadd.f32 %v15574_v53, %v15477_v24  ;;  %v30144_v53 = vand.u32 4294901760, %v17652_v17 }
 0x72c   : > { %v15576_v43 = vpop.f32.mrf.mxu1  ;;  %v15672_v23 = vadd.f32 %v15671_v59, %v15566_v6  ;;  %v17655_v59 = vsel %vm2520_vm2, %v24926_v52, 0 }
 0x72d   : > { %v15673_v3 = vpop.f32.mrf.mxu0  ;;  %v15577_v54 = vadd.f32 %v15576_v43, %v15479_v60  ;;  %v30158_v21 = vand.u32 4294901760, %v17655_v59 }
 0x72e   : > { %v15756_v42 = vpop.f32.mrf.mxu1  ;;  %v15674_v37 = vadd.f32 %v15673_v3, %v15568_v0 }
 0x72f   : > { %v15678_v30 = vpop.f32.mrf.mxu0  ;;  %v15757_v49 = vadd.f32 %v15756_v42, %v15665_v5  ;;  %v30156_v42 = vand.u32 4294901760, %v30140_v58  ;;  %v30188_v1 = vsub.f32 %v17655_v59, %v30158_v21 }
 0x730   : > { %v15758_v34 = vpop.f32.mrf.mxu1  ;;  %v15679_v4 = vadd.f32 %v15678_v30, %v15575_v32  ;;  %v30163_v30 = vsub.f32 %v17652_v17, %v30144_v53 }
 0x731   : > { %v15680_v25 = vpop.f32.mrf.mxu0  ;;  %v15759_v11 = vadd.f32 %v15758_v34, %v15667_v19  ;;  %v17755_v19 = vsub.f32 %v30140_v58, %v30156_v42 }
 0x732   : > { %v15763_v36 = vpop.f32.mrf.mxu1  ;;  %v15681_v46 = vadd.f32 %v15680_v25, %v15577_v54 }
 0x733   : > { %v15764_v14 = vadd.f32 %v15763_v36, %v15672_v23  ;;  %v30220_v44 = vand.u32 4294901760, %v17755_v19 }
 0x734   : > { %v15765_v10 = vpop.f32.mrf.mxu1 }
 0x735   : > { %v30104_v29 = vpop.f32.mrf.mxu0  ;;  %v15766_v22 = vadd.f32 %v15765_v10, %v15674_v37  ;;  %v30196_v10 = vand.u32 4294901760, %v30163_v30 }
 0x737   : > { %25269 = vtanh.f32 %v15766_v22  ;;  %v30106_v27 = vpop.f32.mrf.mxu0 }
 0x738   : > { %25271 = vtanh.f32 %v15764_v14 }
 0x739   : > { %25273 = vtanh.f32 %v15759_v11  ;;  %v15770_v50 = vpop.f32.mrf.mxu1  ;;  %v30108_v31 = vpop.f32.mrf.mxu0 }
 0x73a   : > { %v15771_v8 = vadd.f32 %v15770_v50, %v15679_v4  ;;  %25275 = vtanh.f32 %v15757_v49 }
 0x73b   : > { %v15772_v9 = vpop.f32.mrf.mxu1  ;;  %v30113_v40 = vpop.f32.mrf.mxu0 }
 0x73c   : > { %25277 = vtanh.f32 %v15771_v8  ;;  %v15773_v48 = vadd.f32 %v15772_v9, %v15681_v46  ;;  %v30215_v46 = vand.u32 4294901760, %v30188_v1 }
 0x73e   : > { %25279 = vtanh.f32 %v15773_v48  ;;  %v30116_v38 = vpop.f32.mrf.mxu0  ;;  %v17766_v48 = vsub.f32 %v30163_v30, %v30196_v10 }
 0x73f   : > { %v30118_v61 = vpop.f32.mrf.mxu1 }
 0x740   : > { %v30123_v62 = vpop.f32.mrf.mxu0  ;;  %v30248_v19 = vand.u32 4294901760, %v17766_v48 }
 0x741   : > { %v30127_v39 = vpop.f32.mrf.mxu1 }
 0x742   : > { %v30129_v47 = vpop.f32.mrf.mxu0 }
 0x743   : > { %v30135_v12 = vpop.f32.mrf.mxu1 }
 0x744   : > { %v25270_v35 = vpop.eup %25269  ;;  %v30137_v18 = vpop.f32.mrf.mxu0 }
 0x745   : > { %v25272_v63 = vpop.eup %25271  ;;  %v30142_v26 = vpop.f32.mrf.mxu1  ;;  %v30147_v43 = vand.u32 4294901760, %v25270_v35 }
 0x746   : > { %v25274_v55 = vpop.eup %25273  ;;  %v30153_v56 = vand.u32 4294901760, %v25272_v63 }
 0x747   : > { %v25276_v41 = vpop.eup %25275  ;;  %v30160_v16 = vand.u32 4294901760, %v25274_v55  ;;  %v30175_v2 = vsub.f32 %v25270_v35, %v30147_v43 }
 0x748   : > { %v30149_v28 = vpop.f32.mrf.mxu1  ;;  %v30151_v3 = vpop.f32.mrf.mxu0  ;;  %v30172_v25 = vand.u32 4294901760, %v25276_v41  ;;  %v30185_v37 = vsub.f32 %v25272_v63, %v30153_v56 }
 0x749   : > { %v25278_v13 = vpop.eup %25277  ;;  %v30199_v5 = vsub.f32 %v25274_v55, %v30160_v16  ;;  %v32136_v49 = vand.u32 4294901760, %v30175_v2 }
 0x74a   : > { %v30165_v6 = vpop.f32.mrf.mxu1  ;;  %v30167_v34 = vpop.f32.mrf.mxu0  ;;  %v17658_v20 = vsel %vm2530_vm3, %v25278_v13, 0  ;;  %v30210_v54 = vsub.f32 %v25276_v41, %v30172_v25  ;;  %v32137_v50 = vand.u32 4294901760, %v30185_v37  ;;  %v17777_v13 = vsub.f32 %v30188_v1, %v30215_v46 }
 0x74b   : > { %v25280_v57 = vpop.eup %25279  ;;  %v30170_v0 = vand.u32 4294901760, %v17658_v20  ;;  %v32140_v51 = vand.u32 4294901760, %v30199_v5  ;;  %v17826_v63 = vsub.f32 %v30175_v2, %v32136_v49 }
 0x74c   : > { %v30177_v23 = vpop.f32.mrf.mxu0  ;;  %v30179_v36 = vpop.f32.mrf.mxu1  ;;  %v17661_v33 = vsel %vm2530_vm3, %v25280_v57, 0  ;;  %v17843_v59 = vand.u32 4294901760, %v30210_v54  ;;  %v17832_v41 = vsub.f32 %v30185_v37, %v32137_v50  ;;  %v15977_v50 = vadd.f32 %v30118_v61, %v30104_v29 }
 0x74d   : > { %v30190_v24 = vand.u32 4294901760, %v17661_v33  ;;  %v30193_v14 = vsub.f32 %v17658_v20, %v30170_v0  ;;  %v15984_v20 = vadd.f32 %v30135_v12, %v30108_v31  ;;  %v17838_v49 = vsub.f32 %v30199_v5, %v32140_v51 }
 0x74e   : > { %v30201_v11 = vpop.f32.mrf.mxu0  ;;  %v16173_v22 = vpop.f32.mrf.mxu1  ;;  %v15986_v12 = vadd.f32 %v30142_v26, %v30113_v40  ;;  %v17827_v51 = vand.u32 4294901760, %v17826_v63  ;;  %v17844_v29 = vsub.f32 %v30210_v54, %v17843_v59  ;;  %v16076_v40 = vadd.f32 %v30129_v47, %v15977_v50 }
 0x74f   : > { %17708 = vmatprep.subr.mxu0 %v30190_v24  ;;  %v30205_v60 = vsub.f32 %v17661_v33, %v30190_v24  ;;  %v32138_v32 = vand.u32 4294901760, %v30193_v14  ;;  %v16084_v48 = vadd.f32 %v30151_v3, %v15984_v20  ;;  %v17839_v63 = vand.u32 4294901760, %v17838_v49 }
 0x750   : > { %v16180_v4 = vpop.f32.mrf.mxu1  ;;  %17710 = vmatpush1.msra.mxu0 %v30170_v0  ;;  %v16086_v26 = vadd.f32 %v30167_v34, %v15986_v12  ;;  %v17845_v34 = vand.u32 4294901760, %v17844_v29  ;;  %v15993_v49 = vadd.f32 %v30165_v6, %v30123_v62 }
 0x751   : > { %v30217_v8 = vpop.f32.mrf.mxu0  ;;  %17712 = vmatprep.subr.mxu0 %v30147_v43  ;;  %v32139_v9 = vand.u32 4294901760, %v30205_v60  ;;  %v17820_v17 = vsub.f32 %v30193_v14, %v32138_v32  ;;  %v15979_v32 = vadd.f32 %v30127_v39, %v30106_v27  ;;  %v17833_v39 = vand.u32 4294901760, %v17832_v41 }
 0x752   : > { %v16182_v45 = vpop.f32.mrf.mxu1  ;;  %17714 = vmatpush1.msra.mxu0 %v30153_v56  ;;  %v16181_v3 = vadd.f32 %v16180_v4, %v16084_v48  ;;  %v16172_v41 = vadd.f32 %v30179_v36, %v16076_v40  ;;  %v16094_v62 = vadd.f32 %v30201_v11, %v15993_v49  ;;  %v32239_v40 = vand.u32 4294901760, %v30175_v2 }
 0x753   : > { %v16281_v52 = vpop.f32.mrf.mxu0  ;;  %17716 = vmatprep.subr.mxu0 %v30160_v16  ;;  %v17814_v35 = vsub.f32 %v30205_v60, %v32139_v9  ;;  %v17821_v31 = vand.u32 4294901760, %v17820_v17  ;;  %v16078_v27 = vadd.f32 %v30137_v18, %v15979_v32  ;;  %v30268_v17 = vand.u32 4294901760, %v17777_v13 }
 0x754   : > { %v16189_v55 = vpop.f32.mrf.mxu1  ;;  %17718 = vmatpush1.msra.mxu0 %v30172_v25  ;;  %v15991_v18 = vadd.f32 %v30149_v28, %v30116_v38  ;;  %v16183_v13 = vadd.f32 %v16182_v45, %v16086_v26  ;;  %v16280_v36 = vadd.f32 %v30217_v8, %v16172_v41  ;;  %v32240_v26 = vand.u32 4294901760, %v30185_v37 }
 0x755   : > { %v16286_v57 = vpop.f32.mrf.mxu0  ;;  %17757 = vmatmul.mubr.f32.vlgmr.msra.gmra.mxu0 %v30220_v44  ;;  %17929 = vmatprep.subr.mxu0 %v30205_v60  ;;  %v17815_v33 = vand.u32 4294901760, %v17814_v35  ;;  %v16174_v32 = vadd.f32 %v16173_v22, %v16078_v27  ;;  %v32237_v22 = vand.u32 4294901760, %v30205_v60  ;;  %v32238_v27 = vand.u32 4294901760, %v30193_v14 }
 0x756   : > { %v16191_v9 = vpop.f32.mrf.mxu1  ;;  %17932 = vmatpush1.msra.mxu0 %v30193_v14  ;;  %17762 = vmatprep.mubr.f32.mxu0 %v32197_v15  ;;  %v16287_v47 = vadd.f32 %v16286_v57, %v16181_v3  ;;  %v16092_v4 = vadd.f32 %v30177_v23, %v15991_v18  ;;  %v32241_v14 = vand.u32 4294901760, %v30199_v5 }
 0x757   : > { %v16288_v35 = vpop.f32.mrf.mxu0  ;;  %17816 = vmatprep.subr.mxu1 %v17815_v33  ;;  %17935 = vmatprep.subr.mxu0 %v30175_v2  ;;  %v16282_v38 = vadd.f32 %v16281_v52, %v16174_v32  ;;  %v16192_v8 = vadd.f32 %v16191_v9, %v16094_v62 }
 0x758   : > { %v16371_v61 = vpop.f32.mrf.mxu1  ;;  %17822 = vmatpush1.msra.mxu1 %v17821_v31  ;;  %17938 = vmatpush1.msra.mxu0 %v30185_v37  ;;  %v16190_v6 = vadd.f32 %v16189_v55, %v16092_v4 }
 0x759   : > { %v16293_v20 = vpop.f32.mrf.mxu0  ;;  %17768 = vmatmul.mubr.f32.gmra.mxu0 %v30248_v19  ;;  %17828 = vmatprep.subr.mxu1 %v17827_v51  ;;  %v16289_v51 = vadd.f32 %v16288_v35, %v16183_v13  ;;  %v16372_v60 = vadd.f32 %v16371_v61, %v16280_v36 }
 0x75a   : > { %v16373_v33 = vpop.f32.mrf.mxu1  ;;  %17941 = vmatprep.subr.mxu0 %v30199_v5  ;;  %17834 = vmatpush1.msra.mxu1 %v17833_v39  ;;  %v16294_v48 = vadd.f32 %v16293_v20, %v16190_v6 }
 0x75b   : > { %v16295_v50 = vpop.f32.mrf.mxu0  ;;  %17944 = vmatpush1.msra.mxu0 %v30210_v54  ;;  %17840 = vmatprep.subr.mxu1 %v17839_v63  ;;  %v16374_v23 = vadd.f32 %v16373_v33, %v16282_v38 }
 0x75c   : > { %v16378_v28 = vpop.f32.mrf.mxu1  ;;  %18129 = vmatprep.subr.mxu0 %v32237_v22  ;;  %17773 = vmatprep.mubr.f32.mxu0 %v32197_v15  ;;  %v16296_v55 = vadd.f32 %v16295_v50, %v16192_v8 }
 0x75d   : > { %v16379_v45 = vadd.f32 %v16378_v28, %v16287_v47  ;;  %v30285_v57 = vpop.f32.mrf.mxu0  ;;  %17846 = vmatpush1.msra.mxu1 %v17845_v34  ;;  %17779 = vmatmul.mubr.f32.gmra.mxu0 %v30268_v17 }
 0x75e   : > { %v16380_v52 = vpop.f32.mrf.mxu1  ;;  %17881 = vmatmul.mubr.f32.vlgmr.msra.gmra.mxu1 %v30125_v7  ;;  %18029 = vmatprep.subr.mxu1 %v30190_v24 }
 0x75f   : > { %v16381_v31 = vadd.f32 %v16380_v52, %v16289_v51  ;;  %v30291_v12 = vpop.f32.mrf.mxu0  ;;  %18031 = vmatpush1.msra.mxu1 %v30170_v0  ;;  %17886 = vmatprep.mubr.f32.mxu1 %v32197_v15  ;;  %25281 = vtanh.f32 %v16379_v45 }
 0x760   : > { %18033 = vmatprep.subr.mxu1 %v30147_v43  ;;  %17977 = vmatprep.mubr.f32.mxu0 %v32197_v15 }
 0x761   : > { %25283 = vtanh.f32 %v16381_v31  ;;  %v16385_v11 = vpop.f32.mrf.mxu1  ;;  %18035 = vmatpush1.msra.mxu1 %v30153_v56  ;;  %17980 = vmatmul.mubr.f32.vlgmr.msra.gmra.mxu0 %v30140_v58 }
 0x762   : > { %25285 = vtanh.f32 %v16374_v23  ;;  %v16386_v35 = vadd.f32 %v16385_v11, %v16294_v48  ;;  %v30299_v29 = vpop.f32.mrf.mxu0  ;;  %17888 = vmatmul.mubr.f32.gmra.mxu1 %v30144_v53  ;;  %18037 = vmatprep.subr.mxu1 %v30160_v16 }
 0x763   : > { %25287 = vtanh.f32 %v16372_v60  ;;  %v16387_v9 = vpop.f32.mrf.mxu1  ;;  %18133 = vmatpush1.msra.mxu0 %v32238_v27  ;;  %18039 = vmatpush1.msra.mxu1 %v30172_v25 }
 0x764   : > { %25289 = vtanh.f32 %v16386_v35  ;;  %v16388_v61 = vadd.f32 %v16387_v9, %v16296_v55  ;;  %v30306_v39 = vpop.f32.mrf.mxu0  ;;  %18137 = vmatprep.subr.mxu0 %v32239_v40  ;;  %18231 = vmatprep.subr.mxu1 %v30190_v24 }
 0x765   : > { %18141 = vmatpush1.msra.mxu0 %v32240_v26  ;;  %17893 = vmatprep.mubr.f32.mxu1 %v32197_v15 }
 0x766   : > { %25291 = vtanh.f32 %v16388_v61  ;;  %17985 = vmatprep.mubr.f32.mxu0 %v32197_v15  ;;  %18145 = vmatprep.subr.mxu0 %v32241_v14 }
 0x767   : > { %v30317_v3 = vpop.f32.mrf.mxu0  ;;  %v30319_v20 = vpop.f32.mrf.mxu1  ;;  %17895 = vmatmul.mubr.f32.gmra.mxu1 %v30158_v21  ;;  %17988 = vmatmul.mubr.f32.gmra.mxu0 %v30163_v30 }
 0x768   : > { %18149 = vmatpush1.msra.mxu0 %v17843_v59  ;;  %17993 = vmatprep.mubr.f32.mxu0 %v32197_v15 }
 0x769   : > { %v30326_v2 = vpop.f32.mrf.mxu0  ;;  %v30328_v37 = vpop.f32.mrf.mxu1  ;;  %18072 = vmatprep.mubr.f32.mxu1 %v32197_v15 }
 0x76b   : > { %v30331_v24 = vpop.f32.mrf.mxu0  ;;  %17996 = vmatmul.mubr.f32.gmra.mxu0 %v30188_v1  ;;  %18076 = vmatmul.mubr.f32.vlgmr.msra.gmra.mxu1 %v30156_v42 }
 0x76c   : > { %v30335_v5 = vpop.f32.mrf.mxu1  ;;  %18233 = vmatpush1.msra.mxu1 %v30170_v0  ;;  %18081 = vmatprep.mubr.f32.mxu1 %v32197_v15  ;;  %v25282_v54 = vpop.eup %25281 }
 0x76d   : > { %v30339_v59 = vpop.f32.mrf.mxu0  ;;  %18235 = vmatprep.subr.mxu1 %v30147_v43  ;;  %18182 = vmatprep.mubr.f32.mxu0 %v32197_v15 }
 0x76e   : > { %v25284_v63 = vpop.eup %25283  ;;  %v30343_v18 = vpop.f32.mrf.mxu1  ;;  %18237 = vmatpush1.msra.mxu1 %v30153_v56  ;;  %v30358_v56 = vand.u32 4294901760, %v25282_v54 }
 0x76f   : > { %v25286_v32 = vpop.eup %25285  ;;  %18239 = vmatprep.subr.mxu1 %v30160_v16  ;;  %18085 = vmatmul.mubr.f32.gmra.mxu1 %v30196_v10  ;;  %v30350_v33 = vand.u32 4294901760, %v25284_v63 }
 0x770   : > { %v25288_v0 = vpop.eup %25287  ;;  %18184 = vmatmul.mubr.f32.vlgmr.msra.gmra.mxu0 %v30125_v7  ;;  %18241 = vmatpush1.msra.mxu1 %v30172_v25  ;;  %v30361_v47 = vand.u32 4294901760, %v25286_v32  ;;  %v30389_v62 = vsub.f32 %v25282_v54, %v30358_v56 }
 0x771   : > { %v25290_v43 = vpop.eup %25289  ;;  %v30352_v41 = vpop.f32.mrf.mxu1  ;;  %18090 = vmatprep.mubr.f32.mxu1 %v32197_v15  ;;  %18189 = vmatprep.mubr.f32.mxu0 %v32197_v15  ;;  %v30370_v4 = vand.u32 4294901760, %v25288_v0  ;;  %v30376_v28 = vsub.f32 %v25284_v63, %v30350_v33 }
 0x772   : > { %v30354_v13 = vpop.f32.mrf.mxu0  ;;  %v17664_v16 = vsel %vm2530_vm3, %v25290_v43, 0  ;;  %v30392_v6 = vsub.f32 %v25286_v32, %v30361_v47  ;;  %v32142_v35 = vand.u32 4294901760, %v30389_v62 }
 0x773   : > { %v25292_v50 = vpop.eup %25291  ;;  %v30363_v34 = vpop.f32.mrf.mxu1  ;;  %18094 = vmatmul.mubr.f32.gmra.mxu1 %v30215_v46  ;;  %v30368_v49 = vand.u32 4294901760, %v17664_v16  ;;  %v30405_v8 = vsub.f32 %v25288_v0, %v30370_v4  ;;  %v32141_v48 = vand.u32 4294901760, %v30376_v28 }
 0x774   : > { %v30365_v25 = vpop.f32.mrf.mxu0  ;;  %18191 = vmatmul.mubr.f32.gmra.mxu0 %v30144_v53  ;;  %v17667_v38 = vsel %vm2530_vm3, %v25292_v50, 0  ;;  %18274 = vmatprep.mubr.f32.mxu1 %v32197_v15  ;;  %v32143_v61 = vand.u32 4294901760, %v30392_v6  ;;  %v18447_v43 = vsub.f32 %v30389_v62, %v32142_v35 }
 0x775   : > { %v30380_v36 = vpop.f32.mrf.mxu1  ;;  %v30382_v51 = vand.u32 4294901760, %v17667_v38  ;;  %18196 = vmatprep.mubr.f32.mxu0 %v32197_v15  ;;  %v30386_v45 = vsub.f32 %v17664_v16, %v30368_v49  ;;  %v32144_v14 = vand.u32 4294901760, %v30405_v8  ;;  %v18441_v63 = vsub.f32 %v30376_v28, %v32141_v48 }
 0x776   : > { %v30378_v22 = vpop.f32.mrf.mxu0  ;;  %v16599_v16 = vadd.f32 %v30335_v5, %v30299_v29  ;;  %v18453_v48 = vsub.f32 %v30392_v6, %v32143_v61  ;;  %v16592_v5 = vadd.f32 %v30319_v20, %v30285_v57 }
 0x777   : > { %v30396_v52 = vpop.f32.mrf.mxu1  ;;  %18323 = vmatprep.subr.mxu0 %v30382_v51  ;;  %18276 = vmatmul.mubr.f32.vlgmr.msra.gmra.mxu1 %v30125_v7  ;;  %v30401_v60 = vsub.f32 %v17667_v38, %v30382_v51  ;;  %v18434_v31 = vand.u32 4294901760, %v30386_v45  ;;  %v18459_v29 = vsub.f32 %v30405_v8, %v32144_v14  ;;  %v18448_v14 = vand.u32 4294901760, %v18447_v43 }
 0x778   : > { %v30394_v23 = vpop.f32.mrf.mxu0  ;;  %18325 = vmatpush1.msra.mxu0 %v30368_v49  ;;  %18281 = vmatprep.mubr.f32.mxu1 %v32197_v15  ;;  %v16699_v35 = vadd.f32 %v30354_v13, %v16599_v16  ;;  %v16691_v57 = vadd.f32 %v30331_v24, %v16592_v5  ;;  %v18454_v13 = vand.u32 4294901760, %v18453_v48  ;;  %v16608_v48 = vadd.f32 %v30363_v34, %v30326_v2 }
 0x779   : > { %v16795_v11 = vpop.f32.mrf.mxu1  ;;  %18198 = vmatmul.mubr.f32.gmra.mxu0 %v30158_v21  ;;  %18327 = vmatprep.subr.mxu0 %v30350_v33  ;;  %v18428_v55 = vand.u32 4294901760, %v30401_v60  ;;  %v18435_v27 = vsub.f32 %v30386_v45, %v18434_v31  ;;  %v18460_v43 = vand.u32 4294901760, %v18459_v29 }
 0x77a   : > { %v30414_v9 = vpop.f32.mrf.mxu0  ;;  %18329 = vmatpush1.msra.mxu0 %v30358_v56  ;;  %18366 = vmatprep.mubr.f32.mxu0 %v32197_v15  ;;  %v16787_v24 = vadd.f32 %v30380_v36, %v16691_v57 }
 0x77b   : > { %v16797_v40 = vpop.f32.mrf.mxu1  ;;  %18331 = vmatprep.subr.mxu0 %v30361_v47  ;;  %18283 = vmatmul.mubr.f32.gmra.mxu1 %v30144_v53  ;;  %v18429_v26 = vsub.f32 %v30401_v60, %v18428_v55  ;;  %v18436_v38 = vand.u32 4294901760, %v18435_v27  ;;  %v16601_v27 = vadd.f32 %v30343_v18, %v30306_v39  ;;  %v16796_v39 = vadd.f32 %v16795_v11, %v16699_v35 }
 0x77c   : > { %v16896_v54 = vpop.f32.mrf.mxu0  ;;  %18333 = vmatpush1.msra.mxu0 %v30370_v4  ;;  %18288 = vmatprep.mubr.f32.mxu1 %v32197_v15 }
 0x77d   : > { %v16804_v32 = vpop.f32.mrf.mxu1  ;;  %18372 = vmatmul.mubr.f32.vlgmr.msra.gmra.mxu0 %v30220_v44  ;;  %18544 = vmatprep.subr.mxu0 %v30401_v60  ;;  %v18430_v0 = vand.u32 4294901760, %v18429_v26  ;;  %v16594_v60 = vadd.f32 %v30328_v37, %v30291_v12  ;;  %v18442_v12 = vand.u32 4294901760, %v18441_v63  ;;  %v16701_v20 = vadd.f32 %v30365_v25, %v16601_v27 }
 0x77e   : > { %v16901_v50 = vpop.f32.mrf.mxu0  ;;  %18547 = vmatpush1.msra.mxu0 %v30386_v45  ;;  %18377 = vmatprep.mubr.f32.mxu0 %v32197_v15  ;;  %v16606_v63 = vadd.f32 %v30352_v41, %v30317_v3  ;;  %v32244_v45 = vand.u32 4294901760, %v30392_v6 }
 0x77f   : > { %v16806_v26 = vpop.f32.mrf.mxu1  ;;  %18431 = vmatprep.subr.mxu1 %v18430_v0  ;;  %18550 = vmatprep.subr.mxu0 %v30376_v28  ;;  %v16693_v37 = vadd.f32 %v30339_v59, %v16594_v60  ;;  %v16902_v25 = vadd.f32 %v16901_v50, %v16796_v39 }
 0x780   : > { %v16903_v61 = vpop.f32.mrf.mxu0  ;;  %18437 = vmatpush1.msra.mxu1 %v18436_v38  ;;  %18553 = vmatpush1.msra.mxu0 %v30389_v62  ;;  %v16798_v38 = vadd.f32 %v16797_v40, %v16701_v20  ;;  %v16707_v35 = vadd.f32 %v30378_v22, %v16606_v63 }
 0x781   : > { %v16986_v0 = vpop.f32.mrf.mxu1  ;;  %18290 = vmatmul.mubr.f32.gmra.mxu1 %v30158_v21  ;;  %18383 = vmatmul.mubr.f32.gmra.mxu0 %v30248_v19  ;;  %v16789_v59 = vadd.f32 %v30396_v52, %v16693_v37  ;;  %v16895_v52 = vadd.f32 %v30414_v9, %v16787_v24  ;;  %v32242_v37 = vand.u32 4294901760, %v30376_v28  ;;  %v32245_v28 = vand.u32 4294901760, %v30405_v8 }
 0x782   : > { %v16908_v18 = vpop.f32.mrf.mxu0  ;;  %18443 = vmatprep.subr.mxu1 %v18442_v12  ;;  %18556 = vmatprep.subr.mxu0 %v30392_v6  ;;  %v16805_v2 = vadd.f32 %v16804_v32, %v16707_v35 }
 0x783   : > { %v16988_v16 = vpop.f32.mrf.mxu1  ;;  %18449 = vmatpush1.msra.mxu1 %v18448_v14  ;;  %18559 = vmatpush1.msra.mxu0 %v30405_v8  ;;  %v16897_v3 = vadd.f32 %v16896_v54, %v16789_v59  ;;  %v16904_v14 = vadd.f32 %v16903_v61, %v16798_v38  ;;  %v16987_v40 = vadd.f32 %v16986_v0, %v16895_v52  ;;  %v32243_v0 = vand.u32 4294901760, %v30389_v62 }
 0x784   : > { %v16910_v11 = vpop.f32.mrf.mxu0  ;;  %18455 = vmatprep.subr.mxu1 %v18454_v13  ;;  %18744 = vmatprep.subr.mxu0 %v18428_v55  ;;  %v16709_v55 = vadd.f32 %v30394_v23, %v16608_v48  ;;  %v16909_v50 = vadd.f32 %v16908_v18, %v16805_v2 }
 0x785   : > { %v16993_v41 = vpop.f32.mrf.mxu1  ;;  %18388 = vmatprep.mubr.f32.mxu0 %v32197_v15  ;;  %18461 = vmatpush1.msra.mxu1 %v18460_v43  ;;  %v16989_v34 = vadd.f32 %v16988_v16, %v16897_v3 }
 0x786   : > { %v16994_v60 = vadd.f32 %v16993_v41, %v16902_v25  ;;  %v30471_v36 = vpop.f32.mrf.mxu0  ;;  %18494 = vmatprep.mubr.f32.mxu1 %v32197_v15  ;;  %18394 = vmatmul.mubr.f32.gmra.mxu0 %v30268_v17  ;;  %v16807_v61 = vadd.f32 %v16806_v26, %v16709_v55 }
 0x787   : > { %v16995_v22 = vpop.f32.mrf.mxu1  ;;  %18496 = vmatmul.mubr.f32.vlgmr.msra.gmra.mxu1 %v30125_v7  ;;  %18644 = vmatprep.subr.mxu1 %v30382_v51 }
 0x788   : > { %v16996_v54 = vadd.f32 %v16995_v22, %v16904_v14  ;;  %v30478_v9 = vpop.f32.mrf.mxu0  ;;  %18646 = vmatpush1.msra.mxu1 %v30368_v49  ;;  %18501 = vmatprep.mubr.f32.mxu1 %v32197_v15  ;;  %25293 = vtanh.f32 %v16994_v60  ;;  %v16911_v32 = vadd.f32 %v16910_v11, %v16807_v61 }
 0x789   : > { %18648 = vmatprep.subr.mxu1 %v30350_v33  ;;  %18592 = vmatprep.mubr.f32.mxu0 %v32197_v15 }
 0x78a   : > { %25295 = vtanh.f32 %v16996_v54  ;;  %v17000_v23 = vpop.f32.mrf.mxu1  ;;  %18650 = vmatpush1.msra.mxu1 %v30358_v56  ;;  %18595 = vmatmul.mubr.f32.vlgmr.msra.gmra.mxu0 %v30140_v58 }
 0x78b   : > { %25297 = vtanh.f32 %v16989_v34  ;;  %v17001_v29 = vadd.f32 %v17000_v23, %v16909_v50  ;;  %v30486_v5 = vpop.f32.mrf.mxu0  ;;  %18503 = vmatmul.mubr.f32.gmra.mxu1 %v30144_v53  ;;  %18652 = vmatprep.subr.mxu1 %v30361_v47 }
 0x78c   : > { %25299 = vtanh.f32 %v16987_v40  ;;  %v17002_v26 = vpop.f32.mrf.mxu1  ;;  %18748 = vmatpush1.msra.mxu0 %v18434_v31  ;;  %18654 = vmatpush1.msra.mxu1 %v30370_v4 }
 0x78d   : > { %25301 = vtanh.f32 %v17001_v29  ;;  %v17003_v27 = vadd.f32 %v17002_v26, %v16911_v32  ;;  %v30493_v12 = vpop.f32.mrf.mxu0  ;;  %18752 = vmatprep.subr.mxu0 %v32242_v37  ;;  %18846 = vmatprep.subr.mxu1 %v30382_v51 }
 0x78e   : > { %18756 = vmatpush1.msra.mxu0 %v32243_v0  ;;  %18508 = vmatprep.mubr.f32.mxu1 %v32197_v15 }
 0x78f   : > { %25303 = vtanh.f32 %v17003_v27  ;;  %18600 = vmatprep.mubr.f32.mxu0 %v32197_v15  ;;  %18760 = vmatprep.subr.mxu0 %v32244_v45 }
 0x790   : > { %v30504_v31 = vpop.f32.mrf.mxu0  ;;  %v30506_v57 = vpop.f32.mrf.mxu1  ;;  %18510 = vmatmul.mubr.f32.gmra.mxu1 %v30158_v21  ;;  %18603 = vmatmul.mubr.f32.gmra.mxu0 %v30163_v30 }
 0x791   : > { %18764 = vmatpush1.msra.mxu0 %v32245_v28  ;;  %18608 = vmatprep.mubr.f32.mxu0 %v32197_v15 }
 0x792   : > { %v30513_v51 = vpop.f32.mrf.mxu0  ;;  %v30515_v62 = vpop.f32.mrf.mxu1  ;;  %18687 = vmatprep.mubr.f32.mxu1 %v32197_v15 }
 0x794   : > { %v30518_v6 = vpop.f32.mrf.mxu0  ;;  %18611 = vmatmul.mubr.f32.gmra.mxu0 %v30188_v1  ;;  %18691 = vmatmul.mubr.f32.vlgmr.msra.gmra.mxu1 %v30156_v42 }
 0x795   : > { %v30522_v20 = vpop.f32.mrf.mxu1  ;;  %18848 = vmatpush1.msra.mxu1 %v30368_v49  ;;  %18696 = vmatprep.mubr.f32.mxu1 %v32197_v15  ;;  %v25294_v8 = vpop.eup %25293 }
 0x796   : > { %v30526_v39 = vpop.f32.mrf.mxu0  ;;  %18850 = vmatprep.subr.mxu1 %v30350_v33  ;;  %18797 = vmatprep.mubr.f32.mxu0 %v32197_v15 }
 0x797   : > { %v25296_v18 = vpop.eup %25295  ;;  %v30530_v13 = vpop.f32.mrf.mxu1  ;;  %18852 = vmatpush1.msra.mxu1 %v30358_v56  ;;  %v30545_v56 = vand.u32 4294901760, %v25294_v8 }
 0x798   : > { %v25298_v63 = vpop.eup %25297  ;;  %18854 = vmatprep.subr.mxu1 %v30361_v47  ;;  %18700 = vmatmul.mubr.f32.gmra.mxu1 %v30196_v10  ;;  %v30537_v59 = vand.u32 4294901760, %v25296_v18 }
 0x799   : > { %v25300_v49 = vpop.eup %25299  ;;  %18799 = vmatmul.mubr.f32.vlgmr.msra.gmra.mxu0 %v30125_v7  ;;  %18856 = vmatpush1.msra.mxu1 %v30370_v4  ;;  %v30548_v24 = vand.u32 4294901760, %v25298_v63  ;;  %v30576_v55 = vsub.f32 %v25294_v8, %v30545_v56  ;;  %v17209_v8 = vadd.f32 %v30515_v62, %v30478_v9  ;;  %v17214_v9 = vadd.f32 %v30522_v20, %v30486_v5 }
 0x79a   : > { %v25302_v33 = vpop.eup %25301  ;;  %v30539_v16 = vpop.f32.mrf.mxu1  ;;  %18705 = vmatprep.mubr.f32.mxu1 %v32197_v15  ;;  %18804 = vmatprep.mubr.f32.mxu0 %v32197_v15  ;;  %v30557_v48 = vand.u32 4294901760, %v25300_v49  ;;  %v30563_v3 = vsub.f32 %v25296_v18, %v30537_v59  ;;  %v17216_v20 = vadd.f32 %v30530_v13, %v30493_v12 }
 0x79b   : > { %v30541_v43 = vpop.f32.mrf.mxu0  ;;  %v17670_v47 = vsel %vm2530_vm3, %v25302_v33, 0  ;;  %v30579_v2 = vsub.f32 %v25298_v63, %v30548_v24  ;;  %v19061_v29 = vand.u32 4294901760, %v30576_v55  ;;  %v17308_v62 = vadd.f32 %v30526_v39, %v17209_v8 }
 0x79c   : > { %v25304_v38 = vpop.eup %25303  ;;  %v30550_v25 = vpop.f32.mrf.mxu1  ;;  %18709 = vmatmul.mubr.f32.gmra.mxu1 %v30215_v46  ;;  %v30555_v11 = vand.u32 4294901760, %v17670_v47  ;;  %v30590_v61 = vsub.f32 %v25300_v49, %v30557_v48  ;;  %v32145_v50 = vand.u32 4294901760, %v30563_v3  ;;  %v17314_v39 = vadd.f32 %v30541_v43, %v17214_v9 }
 0x79d   : > { %v30552_v4 = vpop.f32.mrf.mxu0  ;;  %18806 = vmatmul.mubr.f32.gmra.mxu0 %v30144_v53  ;;  %v17673_v35 = vsel %vm2530_vm3, %v25304_v38, 0  ;;  %18889 = vmatprep.mubr.f32.mxu1 %v32197_v15  ;;  %v32147_v37 = vand.u32 4294901760, %v30579_v2 }
 0x79e   : > { %v30567_v52 = vpop.f32.mrf.mxu1  ;;  %v30569_v14 = vand.u32 4294901760, %v17673_v35  ;;  %18811 = vmatprep.mubr.f32.mxu0 %v32197_v15  ;;  %v30573_v60 = vsub.f32 %v17670_v47, %v30555_v11  ;;  %v32148_v28 = vand.u32 4294901760, %v30590_v61  ;;  %v19056_v63 = vsub.f32 %v30563_v3, %v32145_v50 }
 0x79f   : > { %v30565_v41 = vpop.f32.mrf.mxu0  ;;  %v19062_v47 = vsub.f32 %v30576_v55, %v19061_v29  ;;  %v19068_v50 = vsub.f32 %v30579_v2, %v32147_v37  ;;  %v17316_v12 = vadd.f32 %v30552_v4, %v17216_v20  ;;  %v32248_v20 = vand.u32 4294901760, %v30579_v2 }
 0x7a0   : > { %v17403_v22 = vpop.f32.mrf.mxu1  ;;  %18938 = vmatprep.subr.mxu0 %v30569_v14  ;;  %18891 = vmatmul.mubr.f32.vlgmr.msra.gmra.mxu1 %v30125_v7  ;;  %v30586_v40 = vsub.f32 %v17673_v35, %v30569_v14  ;;  %v32146_v54 = vand.u32 4294901760, %v30573_v60  ;;  %v19074_v5 = vsub.f32 %v30590_v61, %v32148_v28  ;;  %v19057_v37 = vand.u32 4294901760, %v19056_v63 }
 0x7a1   : > { %v30581_v34 = vpop.f32.mrf.mxu0  ;;  %18940 = vmatpush1.msra.mxu0 %v30555_v11  ;;  %18896 = vmatprep.mubr.f32.mxu1 %v32197_v15  ;;  %v19063_v28 = vand.u32 4294901760, %v19062_v47 }
 0x7a2   : > { %v17410_v23 = vpop.f32.mrf.mxu1  ;;  %18813 = vmatmul.mubr.f32.gmra.mxu0 %v30158_v21  ;;  %18942 = vmatprep.subr.mxu0 %v30537_v59  ;;  %v19043_v32 = vand.u32 4294901760, %v30586_v40  ;;  %v19050_v27 = vsub.f32 %v30573_v60, %v32146_v54  ;;  %v19075_v47 = vand.u32 4294901760, %v19074_v5  ;;  %v32247_v5 = vand.u32 4294901760, %v30563_v3 }
 0x7a3   : > { %v30599_v26 = vpop.f32.mrf.mxu0  ;;  %18944 = vmatpush1.msra.mxu0 %v30545_v56  ;;  %18981 = vmatprep.mubr.f32.mxu0 %v32197_v15  ;;  %v17411_v13 = vadd.f32 %v17410_v23, %v17314_v39 }
 0x7a4   : > { %v17412_v0 = vpop.f32.mrf.mxu1  ;;  %18946 = vmatprep.subr.mxu0 %v30548_v24  ;;  %18898 = vmatmul.mubr.f32.gmra.mxu1 %v30144_v53  ;;  %v19044_v45 = vsub.f32 %v30586_v40, %v19043_v32  ;;  %v19051_v35 = vand.u32 4294901760, %v19050_v27  ;;  %v17404_v27 = vadd.f32 %v17403_v22, %v17308_v62  ;;  %v19069_v22 = vand.u32 4294901760, %v19068_v50 }
 0x7a5   : > { %v17511_v18 = vpop.f32.mrf.mxu0  ;;  %18948 = vmatpush1.msra.mxu0 %v30557_v48  ;;  %18903 = vmatprep.mubr.f32.mxu1 %v32197_v15  ;;  %v17413_v4 = vadd.f32 %v17412_v0, %v17316_v12 }
 0x7a6   : > { %v17419_v49 = vpop.f32.mrf.mxu1  ;;  %18987 = vmatmul.mubr.f32.vlgmr.msra.gmra.mxu0 %v30220_v44  ;;  %19159 = vmatprep.subr.mxu0 %v30586_v40  ;;  %v19045_v33 = vand.u32 4294901760, %v19044_v45  ;;  %v17207_v45 = vadd.f32 %v30506_v57, %v30471_v36  ;;  %v17221_v57 = vadd.f32 %v30539_v16, %v30504_v31  ;;  %v17512_v43 = vadd.f32 %v17511_v18, %v17404_v27 }
 0x7a7   : > { %v17516_v38 = vpop.f32.mrf.mxu0  ;;  %19162 = vmatpush1.msra.mxu0 %v30573_v60  ;;  %18992 = vmatprep.mubr.f32.mxu0 %v32197_v15 }
 0x7a8   : > { %v17421_v54 = vpop.f32.mrf.mxu1  ;;  %19046 = vmatprep.subr.mxu1 %v19045_v33  ;;  %19165 = vmatprep.subr.mxu0 %v30563_v3  ;;  %v17306_v36 = vadd.f32 %v30518_v6, %v17207_v45  ;;  %v17223_v6 = vadd.f32 %v30550_v25, %v30513_v51  ;;  %v17322_v63 = vadd.f32 %v30565_v41, %v17221_v57  ;;  %v32246_v45 = vand.u32 4294901760, %v30573_v60 }
 0x7a9   : > { %v17518_v8 = vpop.f32.mrf.mxu0  ;;  %19052 = vmatpush1.msra.mxu1 %v19051_v35  ;;  %19168 = vmatpush1.msra.mxu0 %v30576_v55  ;;  %v17517_v23 = vadd.f32 %v17516_v38, %v17411_v13  ;;  %v32249_v3 = vand.u32 4294901760, %v30590_v61 }
 0x7aa   : > { %v17601_v33 = vpop.f32.mrf.mxu1  ;;  %18905 = vmatmul.mubr.f32.gmra.mxu1 %v30158_v21  ;;  %18998 = vmatmul.mubr.f32.gmra.mxu0 %v30248_v19  ;;  %v17402_v31 = vadd.f32 %v30567_v52, %v17306_v36  ;;  %v17324_v50 = vadd.f32 %v30581_v34, %v17223_v6  ;;  %v17420_v41 = vadd.f32 %v17419_v49, %v17322_v63 }
 0x7ab   : > { %19058 = vmatprep.subr.mxu1 %v19057_v37  ;;  %19171 = vmatprep.subr.mxu0 %v30579_v2  ;;  %v17523_v16 = vpop.f32.mrf.mxu0  ;;  %v17519_v52 = vadd.f32 %v17518_v8, %v17413_v4 }
 0x7ac   : > { %v17603_v9 = vpop.f32.mrf.mxu1  ;;  %19064 = vmatpush1.msra.mxu1 %v19063_v28  ;;  %19174 = vmatpush1.msra.mxu0 %v30590_v61  ;;  %v17510_v51 = vadd.f32 %v30599_v26, %v17402_v31  ;;  %v17422_v34 = vadd.f32 %v17421_v54, %v17324_v50  ;;  %v17524_v40 = vadd.f32 %v17523_v16, %v17420_v41 }
 0x7ad   : > { %v17604_v18 = vadd.f32 %v17603_v9, %v17512_v43  ;;  %19070 = vmatprep.subr.mxu1 %v19069_v22  ;;  %19359 = vmatprep.subr.mxu0 %v19043_v32  ;;  %v17525_v28 = vpop.f32.mrf.mxu0 }
 0x7ae   : > { %v17608_v25 = vpop.f32.mrf.mxu1  ;;  %19003 = vmatprep.mubr.f32.mxu0 %v32197_v15  ;;  %19076 = vmatpush1.msra.mxu1 %v19075_v47  ;;  %v17602_v0 = vadd.f32 %v17601_v33, %v17510_v51  ;;  %v17526_v49 = vadd.f32 %v17525_v28, %v17422_v34 }
 0x7af   : > { %v17609_v37 = vadd.f32 %v17608_v25, %v17517_v23  ;;  %19109 = vmatprep.mubr.f32.mxu1 %v32197_v15  ;;  %19009 = vmatmul.mubr.f32.gmra.mxu0 %v30268_v17  ;;  %25305 = vtanh.f32 %v17604_v18 }
 0x7b0   : > { %v17610_v62 = vpop.f32.mrf.mxu1  ;;  %19111 = vmatmul.mubr.f32.vlgmr.msra.gmra.mxu1 %v30125_v7  ;;  %19259 = vmatprep.subr.mxu1 %v30569_v14 }
 0x7b1   : > { %v17611_v32 = vadd.f32 %v17610_v62, %v17519_v52  ;;  %19261 = vmatpush1.msra.mxu1 %v30555_v11  ;;  %19116 = vmatprep.mubr.f32.mxu1 %v32197_v15  ;;  %25307 = vtanh.f32 %v17609_v37 }
 0x7b2   : > { %v17615_v26 = vpop.f32.mrf.mxu1  ;;  %19263 = vmatprep.subr.mxu1 %v30537_v59  ;;  %19207 = vmatprep.mubr.f32.mxu0 %v32197_v15 }
 0x7b3   : > { %25309 = vtanh.f32 %v17611_v32  ;;  %v17616_v38 = vadd.f32 %v17615_v26, %v17524_v40  ;;  %19265 = vmatpush1.msra.mxu1 %v30545_v56  ;;  %19210 = vmatmul.mubr.f32.vlgmr.msra.gmra.mxu0 %v30140_v58 }
 0x7b4   : > { %25311 = vtanh.f32 %v17602_v0  ;;  %v17617_v54 = vpop.f32.mrf.mxu1  ;;  %19118 = vmatmul.mubr.f32.gmra.mxu1 %v30144_v53  ;;  %19267 = vmatprep.subr.mxu1 %v30548_v24 }
 0x7b5   : > { %25313 = vtanh.f32 %v17616_v38  ;;  %v17618_v35 = vadd.f32 %v17617_v54, %v17526_v49  ;;  %19363 = vmatpush1.msra.mxu0 %v32246_v45  ;;  %19269 = vmatpush1.msra.mxu1 %v30557_v48 }
 0x7b6   : > { %19367 = vmatprep.subr.mxu0 %v32247_v5  ;;  %19461 = vmatprep.subr.mxu1 %v30569_v14 }
 0x7b7   : > { %25315 = vtanh.f32 %v17618_v35  ;;  %19371 = vmatpush1.msra.mxu0 %v19061_v29  ;;  %19123 = vmatprep.mubr.f32.mxu1 %v32197_v15 }
 0x7b8   : > { %19215 = vmatprep.mubr.f32.mxu0 %v32197_v15  ;;  %19375 = vmatprep.subr.mxu0 %v32248_v20 }
 0x7b9   : > { %19125 = vmatmul.mubr.f32.gmra.mxu1 %v30158_v21  ;;  %19218 = vmatmul.mubr.f32.gmra.mxu0 %v30163_v30 }
 0x7ba   : > { %19379 = vmatpush1.msra.mxu0 %v32249_v3  ;;  %19223 = vmatprep.mubr.f32.mxu0 %v32197_v15 }
 0x7bb   : > { %19302 = vmatprep.mubr.f32.mxu1 %v32197_v15 }
 0x7bc   : > { %v25306_v14 = vpop.eup %25305 }
 0x7bd   : > { %19226 = vmatmul.mubr.f32.gmra.mxu0 %v30188_v1  ;;  %19306 = vmatmul.mubr.f32.vlgmr.msra.gmra.mxu1 %v30156_v42 }
 0x7be   : > { %19463 = vmatpush1.msra.mxu1 %v30555_v11  ;;  %19311 = vmatprep.mubr.f32.mxu1 %v32197_v15  ;;  %v25308_v60 = vpop.eup %25307 }
 0x7bf   : > { %19465 = vmatprep.subr.mxu1 %v30537_v59  ;;  %19412 = vmatprep.mubr.f32.mxu0 %v32197_v15  ;;  %v30703_v11 = vand.u32 4294901760, %v25308_v60 }
 0x7c0   : > { %v25310_v55 = vpop.eup %25309  ;;  %19467 = vmatpush1.msra.mxu1 %v30545_v56  ;;  %v30708_v56 = vand.u32 4294901760, %v25306_v14 }
 0x7c1   : > { %v25312_v2 = vpop.eup %25311  ;;  %19469 = vmatprep.subr.mxu1 %v30548_v24  ;;  %19315 = vmatmul.mubr.f32.gmra.mxu1 %v30196_v10  ;;  %v30699_v61 = vand.u32 4294901760, %v25310_v55  ;;  %v30727_v33 = vsub.f32 %v25308_v60, %v30703_v11 }
 0x7c2   : > { %v25314_v29 = vpop.eup %25313  ;;  %19414 = vmatmul.mubr.f32.vlgmr.msra.gmra.mxu0 %v30125_v7  ;;  %19471 = vmatpush1.msra.mxu1 %v30557_v48  ;;  %v30714_v8 = vand.u32 4294901760, %v25312_v2  ;;  %v30731_v12 = vsub.f32 %v25306_v14, %v30708_v56 }
 0x7c3   : > { %19320 = vmatprep.mubr.f32.mxu1 %v32197_v15  ;;  %19419 = vmatprep.mubr.f32.mxu0 %v32197_v15  ;;  %v17676_v59 = vsel %vm2530_vm3, %v25314_v29, 0  ;;  %v30717_v48 = vsub.f32 %v25310_v55, %v30699_v61  ;;  %v19676_v31 = vand.u32 4294901760, %v30727_v33 }
 0x7c4   : > { %v25316_v24 = vpop.eup %25315  ;;  %v30710_v39 = vand.u32 4294901760, %v17676_v59  ;;  %v30740_v6 = vsub.f32 %v25312_v2, %v30714_v8  ;;  %v19682_v9 = vand.u32 4294901760, %v30731_v12 }
 0x7c5   : > { %19324 = vmatmul.mubr.f32.gmra.mxu1 %v30215_v46  ;;  %v17679_v27 = vsel %vm2530_vm3, %v25316_v24, 0  ;;  %v19670_v22 = vand.u32 4294901760, %v30717_v48  ;;  %v19677_v50 = vsub.f32 %v30727_v33, %v19676_v31 }
 0x7c6   : > { %19421 = vmatmul.mubr.f32.gmra.mxu0 %v30144_v53  ;;  %v30720_v36 = vand.u32 4294901760, %v17679_v27  ;;  %19504 = vmatprep.mubr.f32.mxu1 %v32197_v15  ;;  %v30724_v57 = vsub.f32 %v17676_v59, %v30710_v39  ;;  %v19688_v23 = vand.u32 4294901760, %v30740_v6  ;;  %v19683_v25 = vsub.f32 %v30731_v12, %v19682_v9 }
 0x7c7   : > { %19426 = vmatprep.mubr.f32.mxu0 %v32197_v15  ;;  %v19671_v4 = vsub.f32 %v30717_v48, %v19670_v22  ;;  %v19678_v52 = vand.u32 4294901760, %v19677_v50 }
 0x7c8   : > { %19553 = vmatprep.subr.mxu0 %v30720_v36  ;;  %v19657_v13 = vsub.f32 %v17679_v27, %v30720_v36  ;;  %v19664_v43 = vand.u32 4294901760, %v30724_v57  ;;  %v19684_v37 = vand.u32 4294901760, %v19683_v25 }
 0x7c9   : > { %19555 = vmatpush1.msra.mxu0 %v30710_v39  ;;  %19506 = vmatmul.mubr.f32.vlgmr.msra.gmra.mxu1 %v30125_v7  ;;  %v19672_v41 = vand.u32 4294901760, %v19671_v4 }
 0x7ca   : > { %19428 = vmatmul.mubr.f32.gmra.mxu0 %v30158_v21  ;;  %19557 = vmatprep.subr.mxu0 %v30699_v61  ;;  %v19658_v63 = vand.u32 4294901760, %v19657_v13  ;;  %v19665_v16 = vsub.f32 %v30724_v57, %v19664_v43 }
 0x7cb   : > { %19559 = vmatpush1.msra.mxu0 %v30703_v11  ;;  %19511 = vmatprep.mubr.f32.mxu1 %v32197_v15 }
 0x7cc   : > { %19561 = vmatprep.subr.mxu0 %v30708_v56  ;;  %19596 = vmatprep.mubr.f32.mxu0 %v32197_v15  ;;  %v19659_v47 = vsub.f32 %v19657_v13, %v19658_v63  ;;  %v19666_v51 = vand.u32 4294901760, %v19665_v16 }
 0x7cd   : > { %19563 = vmatpush1.msra.mxu0 %v30714_v8  ;;  %19513 = vmatmul.mubr.f32.gmra.mxu1 %v30144_v53 }
 0x7ce   : > { %19602 = vmatmul.mubr.f32.vlgmr.msra.gmra.mxu0 %v30220_v44  ;;  %19774 = vmatprep.subr.mxu0 %v19657_v13  ;;  %v19660_v18 = vand.u32 4294901760, %v19659_v47  ;;  %v19689_v44 = vsub.f32 %v30740_v6, %v19688_v23 }
 0x7cf   : > { %19777 = vmatpush1.msra.mxu0 %v30724_v57  ;;  %19518 = vmatprep.mubr.f32.mxu1 %v32197_v15 }
 0x7d0   : > { %19661 = vmatprep.subr.mxu1 %v19660_v18  ;;  %19780 = vmatprep.subr.mxu0 %v30717_v48  ;;  %v19690_v0 = vand.u32 4294901760, %v19689_v44 }
 0x7d1   : > { %19607 = vmatprep.mubr.f32.mxu0 %v32197_v15  ;;  %19667 = vmatpush1.msra.mxu1 %v19666_v51 }
 0x7d2   : > { %19783 = vmatpush1.msra.mxu0 %v30727_v33  ;;  %19520 = vmatmul.mubr.f32.gmra.mxu1 %v30158_v21 }
 0x7d3   : > { %19613 = vmatmul.mubr.f32.gmra.mxu0 %v30248_v19  ;;  %19673 = vmatprep.subr.mxu1 %v19672_v41 }
 0x7d4   : > { %19786 = vmatprep.subr.mxu0 %v30731_v12  ;;  %19679 = vmatpush1.msra.mxu1 %v19678_v52 }
 0x7d5   : > { %19789 = vmatpush1.msra.mxu0 %v30740_v6  ;;  %19685 = vmatprep.subr.mxu1 %v19684_v37 }
 0x7d6   : > { %19974 = vmatprep.subr.mxu0 %v19658_v63  ;;  %19618 = vmatprep.mubr.f32.mxu0 %v32197_v15 }
 0x7d7   : > { %19691 = vmatpush1.msra.mxu1 %v19690_v0  ;;  %19724 = vmatprep.mubr.f32.mxu1 %v32197_v15 }
 0x7d8   : > { %19624 = vmatmul.mubr.f32.gmra.mxu0 %v30268_v17  ;;  %19726 = vmatmul.mubr.f32.vlgmr.msra.gmra.mxu1 %v30125_v7 }
 0x7d9   : > { %19874 = vmatprep.subr.mxu1 %v30720_v36  ;;  %19731 = vmatprep.mubr.f32.mxu1 %v32197_v15 }
 0x7da   : > { %19876 = vmatpush1.msra.mxu1 %v30710_v39  ;;  %19822 = vmatprep.mubr.f32.mxu0 %v32197_v15 }
 0x7db   : > { %19878 = vmatprep.subr.mxu1 %v30699_v61 }
 0x7dc   : > { %19880 = vmatpush1.msra.mxu1 %v30703_v11  ;;  %19825 = vmatmul.mubr.f32.vlgmr.msra.gmra.mxu0 %v30140_v58 }
 0x7dd   : > { %19733 = vmatmul.mubr.f32.gmra.mxu1 %v30144_v53  ;;  %19882 = vmatprep.subr.mxu1 %v30708_v56 }
 0x7de   : > { %19978 = vmatpush1.msra.mxu0 %v19664_v43  ;;  %19884 = vmatpush1.msra.mxu1 %v30714_v8 }
 0x7df   : > { %19982 = vmatprep.subr.mxu0 %v19670_v22  ;;  %20076 = vmatprep.subr.mxu1 %v30720_v36 }
 0x7e0   : > { %19986 = vmatpush1.msra.mxu0 %v19676_v31  ;;  %19738 = vmatprep.mubr.f32.mxu1 %v32197_v15 }
 0x7e1   : > { %19830 = vmatprep.mubr.f32.mxu0 %v32197_v15  ;;  %19990 = vmatprep.subr.mxu0 %v19682_v9 }
 0x7e2   : > { %19740 = vmatmul.mubr.f32.gmra.mxu1 %v30158_v21  ;;  %19833 = vmatmul.mubr.f32.gmra.mxu0 %v30163_v30 }
 0x7e3   : > { %19994 = vmatpush1.msra.mxu0 %v19688_v23  ;;  %19838 = vmatprep.mubr.f32.mxu0 %v32197_v15 }
 0x7e4   : > { %19917 = vmatprep.mubr.f32.mxu1 %v32197_v15 }
 0x7e6   : > { %19841 = vmatmul.mubr.f32.gmra.mxu0 %v30188_v1  ;;  %19921 = vmatmul.mubr.f32.vlgmr.msra.gmra.mxu1 %v30156_v42 }
 0x7e7   : > { %20078 = vmatpush1.msra.mxu1 %v30710_v39  ;;  %19926 = vmatprep.mubr.f32.mxu1 %v32197_v15 }
 0x7e8   : > { %20080 = vmatprep.subr.mxu1 %v30699_v61  ;;  %20027 = vmatprep.mubr.f32.mxu0 %v32197_v15 }
 0x7e9   : > { %20082 = vmatpush1.msra.mxu1 %v30703_v11 }
 0x7ea   : > { %20084 = vmatprep.subr.mxu1 %v30708_v56  ;;  %19930 = vmatmul.mubr.f32.gmra.mxu1 %v30196_v10 }
 0x7eb   : > { %20029 = vmatmul.mubr.f32.vlgmr.msra.gmra.mxu0 %v30125_v7  ;;  %20086 = vmatpush1.msra.mxu1 %v30714_v8 }
 0x7ec   : > { %19935 = vmatprep.mubr.f32.mxu1 %v32197_v15  ;;  %20034 = vmatprep.mubr.f32.mxu0 %v32197_v15 }
 0x7ee   : > { %19939 = vmatmul.mubr.f32.gmra.mxu1 %v30215_v46 }
 0x7ef   : > { %20036 = vmatmul.mubr.f32.gmra.mxu0 %v30144_v53  ;;  %20119 = vmatprep.mubr.f32.mxu1 %v32197_v15 }
 0x7f0   : > { %20041 = vmatprep.mubr.f32.mxu0 %v32197_v15 }
 0x7f2   : > { %20121 = vmatmul.mubr.f32.vlgmr.msra.gmra.mxu1 %v30125_v7 }
 0x7f3   : > { %20043 = vmatmul.mubr.f32.gmra.mxu0 %v30158_v21  ;;  %20126 = vmatprep.mubr.f32.mxu1 %v32197_v15 }
 0x7f4   : > { %20272 = vmatprep.mubr.f32.mxu0 %v32197_v15 }
 0x7f6   : > { %20128 = vmatmul.mubr.f32.gmra.mxu1 %v30144_v53 }
 0x7f7   : > { %20133 = vmatprep.mubr.f32.mxu1 %v32197_v15 }
 0x7fa   : > { %20135 = vmatmul.mubr.f32.gmra.mxu1 %v30158_v21 }
 0x7fb   : > { %20400 = vmatprep.mubr.f32.mxu1 %v32197_v15 }
 0x815   : > { %v17758_v58 = vpop.f32.mrf.mxu0 }
 0x817   : > { %v17760_v42 = vpop.f32.mrf.mxu0 }
 0x819   : > { %v17769_v30 = vpop.f32.mrf.mxu0 }
 0x81b   : > { %v17771_v1 = vpop.f32.mrf.mxu0 }
 0x81d   : > { %v17780_v10 = vpop.f32.mrf.mxu0 }
 0x81e   : > { %v17882_v7 = vpop.f32.mrf.mxu1 }
 0x81f   : > { %v17782_v46 = vpop.f32.mrf.mxu0  ;;  %v17883_v59 = vadd.f32 %v17882_v7, %v17758_v58 }
 0x820   : > { %v17884_v19 = vpop.f32.mrf.mxu1 }
 0x821   : > { %v17981_v17 = vpop.f32.mrf.mxu0  ;;  %v17885_v55 = vadd.f32 %v17884_v19, %v17760_v42 }
 0x822   : > { %v17889_v28 = vpop.f32.mrf.mxu1  ;;  %v17982_v8 = vadd.f32 %v17981_v17, %v17883_v59 }
 0x823   : > { %v17983_v62 = vpop.f32.mrf.mxu0  ;;  %v17890_v14 = vadd.f32 %v17889_v28, %v17769_v30 }
 0x824   : > { %v17891_v34 = vpop.f32.mrf.mxu1  ;;  %v17984_v56 = vadd.f32 %v17983_v62, %v17885_v55  ;;  %v24928_v62 = vld [vmem:[%s32060_s2 + $0xb0] sm:$0xff] }
 0x825   : > { %v17892_v61 = vadd.f32 %v17891_v34, %v17771_v1 }
 0x827   : > { %v17896_v40 = vpop.f32.mrf.mxu1  ;;  %v17989_v53 = vpop.f32.mrf.mxu0 }
 0x828   : > { %v17990_v29 = vadd.f32 %v17989_v53, %v17890_v14  ;;  %v17897_v33 = vadd.f32 %v17896_v40, %v17780_v10  ;;  %v24927_v10 = vld [vmem:[%s32060_s2 + $0xa8] sm:$0xff] }
 0x829   : > { %v17898_v32 = vpop.f32.mrf.mxu1  ;;  %v17991_v26 = vpop.f32.mrf.mxu0  ;;  %v20170_v17 = vsel %vm2520_vm2, %v24927_v10, 0 }
 0x82a   : > { %v17992_v39 = vadd.f32 %v17991_v26, %v17892_v61  ;;  %v17899_v31 = vadd.f32 %v17898_v32, %v17782_v46  ;;  %v30835_v53 = vand.u32 4294901760, %v20170_v17  ;;  %v20173_v26 = vsel %vm2520_vm2, %v24928_v62, 0 }
 0x82b   : > { %v17997_v49 = vpop.f32.mrf.mxu0  ;;  %v18077_v21 = vpop.f32.mrf.mxu1 }
 0x82c   : > { %v18078_v43 = vadd.f32 %v18077_v21, %v17982_v8  ;;  %v17998_v16 = vadd.f32 %v17997_v49, %v17897_v33 }
 0x82d   : > { %v17999_v38 = vpop.f32.mrf.mxu0  ;;  %v18079_v54 = vpop.f32.mrf.mxu1 }
 0x82e   : > { %v18080_v48 = vadd.f32 %v18079_v54, %v17984_v56  ;;  %v18000_v51 = vadd.f32 %v17999_v38, %v17899_v31  ;;  %v24929_v38 = vld [vmem:[%s32060_s2 + $0xb8] sm:$0x1f] }
 0x82f   : > { %v18086_v35 = vpop.f32.mrf.mxu1 }
 0x830   : > { %v18185_v45 = vpop.f32.mrf.mxu0  ;;  %v18087_v27 = vadd.f32 %v18086_v35, %v17990_v29 }
 0x831   : > { %v18088_v5 = vpop.f32.mrf.mxu1  ;;  %v18186_v4 = vadd.f32 %v18185_v45, %v18078_v43  ;;  %v30850_v45 = vsub.f32 %v20170_v17, %v30835_v53 }
 0x832   : > { %v18187_v20 = vpop.f32.mrf.mxu0  ;;  %v18089_v12 = vadd.f32 %v18088_v5, %v17992_v39  ;;  %v30852_v5 = vand.u32 4294901760, %v20173_v26 }
 0x833   : > { %v18095_v3 = vpop.f32.mrf.mxu1  ;;  %v18188_v22 = vadd.f32 %v18187_v20, %v18080_v48  ;;  %v30866_v59 = vand.u32 4294901760, %v30850_v45 }
 0x834   : > { %v18192_v60 = vpop.f32.mrf.mxu0  ;;  %v18096_v25 = vadd.f32 %v18095_v3, %v17998_v16  ;;  %v30869_v56 = vsub.f32 %v20173_v26, %v30852_v5 }
 0x835   : > { %v18097_v2 = vpop.f32.mrf.mxu1  ;;  %v18193_v13 = vadd.f32 %v18192_v60, %v18087_v27  ;;  %v20176_v60 = vsel %vm2520_vm2, %v24929_v38, 0 }
 0x836   : > { %v18194_v11 = vpop.f32.mrf.mxu0  ;;  %v18098_v37 = vadd.f32 %v18097_v2, %v18000_v51  ;;  %v30873_v27 = vand.u32 4294901760, %v20176_v60  ;;  %v30898_v16 = vand.u32 4294901760, %v30869_v56 }
 0x837   : > { %v18277_v24 = vpop.f32.mrf.mxu1  ;;  %v18195_v9 = vadd.f32 %v18194_v11, %v18089_v12 }
 0x838   : > { %v18278_v44 = vadd.f32 %v18277_v24, %v18186_v4 }
 0x839   : > { %v18199_v36 = vpop.f32.mrf.mxu0  ;;  %v18279_v57 = vpop.f32.mrf.mxu1 }
 0x83a   : > { %v18280_v23 = vadd.f32 %v18279_v57, %v18188_v22  ;;  %v18200_v0 = vadd.f32 %v18199_v36, %v18096_v25 }
 0x83b   : > { %v18201_v6 = vpop.f32.mrf.mxu0  ;;  %v18284_v63 = vpop.f32.mrf.mxu1 }
 0x83c   : > { %v18285_v47 = vadd.f32 %v18284_v63, %v18193_v13  ;;  %v18202_v30 = vadd.f32 %v18201_v6, %v18098_v37  ;;  %v20276_v63 = vsub.f32 %v30850_v45, %v30866_v59 }
 0x83d   : > { %v30814_v18 = vpop.f32.mrf.mxu0  ;;  %v18286_v50 = vpop.f32.mrf.mxu1 }
 0x83e   : > { %v18287_v41 = vadd.f32 %v18286_v50, %v18195_v9  ;;  %25317 = vtanh.f32 %v18285_v47 }
 0x83f   : > { %v30816_v52 = vpop.f32.mrf.mxu0 }
 0x840   : > { %25319 = vtanh.f32 %v18287_v41 }
 0x841   : > { %25321 = vtanh.f32 %v18280_v23  ;;  %v18291_v58 = vpop.f32.mrf.mxu1  ;;  %v30818_v42 = vpop.f32.mrf.mxu0  ;;  %v30909_v23 = vsub.f32 %v20176_v60, %v30873_v27 }
 0x842   : > { %v18292_v1 = vadd.f32 %v18291_v58, %v18200_v0  ;;  %25323 = vtanh.f32 %v18278_v44  ;;  %v30925_v58 = vand.u32 4294901760, %v20276_v63 }
 0x843   : > { %v18293_v7 = vpop.f32.mrf.mxu1  ;;  %v30823_v46 = vpop.f32.mrf.mxu0  ;;  %v30936_v17 = vand.u32 4294901760, %v30909_v23 }
 0x844   : > { %25325 = vtanh.f32 %v18292_v1  ;;  %v18294_v19 = vadd.f32 %v18293_v7, %v18202_v30  ;;  %32250 = vst [vmem:[#allocation5_spill] sm:$0xff] %v30925_v58  ;;  %v20287_v7 = vsub.f32 %v30869_v56, %v30898_v16 }
 0x845   : > { %v20298_v63 = vsub.f32 %v30909_v23, %v30936_v17 }
 0x846   : > { %25327 = vtanh.f32 %v18294_v19  ;;  %v30826_v28 = vpop.f32.mrf.mxu0 }
 0x847   : > { %v30831_v34 = vpop.f32.mrf.mxu1 }
 0x848   : > { %v30833_v40 = vpop.f32.mrf.mxu0 }
 0x849   : > { %v30837_v32 = vpop.f32.mrf.mxu1 }
 0x84a   : > { %v30840_v49 = vpop.f32.mrf.mxu0 }
 0x84b   : > { %v30842_v21 = vpop.f32.mrf.mxu1  ;;  %v25318_v54 = vpop.eup %25317 }
 0x84c   : > { %v30847_v35 = vpop.f32.mrf.mxu0  ;;  %v30863_v11 = vand.u32 4294901760, %v25318_v54 }
 0x84d   : > { %v25320_v20 = vpop.eup %25319  ;;  %v30854_v3 = vpop.f32.mrf.mxu1 }
 0x84e   : > { %v25322_v14 = vpop.eup %25321  ;;  %v30857_v55 = vand.u32 4294901760, %v25320_v20  ;;  %v30895_v31 = vsub.f32 %v25318_v54, %v30863_v11 }
 0x84f   : > { %v25324_v2 = vpop.eup %25323  ;;  %v30871_v39 = vand.u32 4294901760, %v25322_v14 }
 0x850   : > { %v30859_v61 = vpop.f32.mrf.mxu1  ;;  %v30861_v29 = vpop.f32.mrf.mxu0  ;;  %v30882_v12 = vand.u32 4294901760, %v25324_v2  ;;  %v30885_v13 = vsub.f32 %v25320_v20, %v30857_v55  ;;  %v32152_v30 = vand.u32 4294901760, %v30895_v31 }
 0x851   : > { %v25326_v24 = vpop.eup %25325  ;;  %v30906_v4 = vsub.f32 %v25322_v14, %v30871_v39 }
 0x852   : > { %v30875_v8 = vpop.f32.mrf.mxu1  ;;  %v30877_v48 = vpop.f32.mrf.mxu0  ;;  %v20179_v36 = vsel %vm2530_vm3, %v25326_v24, 0  ;;  %v32149_v44 = vand.u32 4294901760, %v30885_v13  ;;  %v30922_v37 = vsub.f32 %v25324_v2, %v30882_v12  ;;  %v20353_v2 = vsub.f32 %v30895_v31, %v32152_v30 }
 0x853   : > { %v25328_v57 = vpop.eup %25327  ;;  %v30880_v33 = vand.u32 4294901760, %v20179_v36  ;;  %v32151_v19 = vand.u32 4294901760, %v30906_v4 }
 0x854   : > { %v30887_v43 = vpop.f32.mrf.mxu0  ;;  %v30889_v22 = vpop.f32.mrf.mxu1  ;;  %v20182_v6 = vsel %vm2530_vm3, %v25328_v57, 0  ;;  %v20347_v20 = vsub.f32 %v30885_v13, %v32149_v44  ;;  %v20364_v14 = vand.u32 4294901760, %v30922_v37  ;;  %v30956_v57 = vand.u32 4294901760, %v20287_v7 }
 0x855   : > { %v30900_v9 = vand.u32 4294901760, %v20182_v6  ;;  %v30903_v47 = vsub.f32 %v20179_v36, %v30880_v33  ;;  %v18505_v44 = vadd.f32 %v30842_v21, %v30818_v42  ;;  %v18500_v7 = vadd.f32 %v30837_v32, %v30816_v52 }
 0x856   : > { %v30911_v50 = vpop.f32.mrf.mxu0  ;;  %v30913_v51 = vpop.f32.mrf.mxu1  ;;  %v20348_v30 = vand.u32 4294901760, %v20347_v20  ;;  %v20365_v42 = vsub.f32 %v30922_v37, %v20364_v14  ;;  %v18498_v21 = vadd.f32 %v30831_v34, %v30814_v18  ;;  %v20354_v52 = vand.u32 4294901760, %v20353_v2 }
 0x857   : > { %20229 = vmatprep.subr.mxu0 %v30900_v9  ;;  %v30917_v25 = vsub.f32 %v20182_v6, %v30900_v9  ;;  %v32150_v41 = vand.u32 4294901760, %v30903_v47  ;;  %v20359_v6 = vsub.f32 %v30906_v4, %v32151_v19  ;;  %v30984_v20 = vand.u32 4294901760, %v20298_v63 }
 0x858   : > { %v18701_v0 = vpop.f32.mrf.mxu1  ;;  %20231 = vmatpush1.msra.mxu0 %v30880_v33  ;;  %v18514_v2 = vadd.f32 %v30875_v8, %v30833_v40 }
 0x859   : > { %v30928_v1 = vpop.f32.mrf.mxu0  ;;  %20233 = vmatprep.subr.mxu0 %v30857_v55  ;;  %v20334_v10 = vand.u32 4294901760, %v30917_v25  ;;  %v20341_v26 = vsub.f32 %v30903_v47, %v32150_v41 }
 0x85a   : > { %v18703_v62 = vpop.f32.mrf.mxu1  ;;  %20235 = vmatpush1.msra.mxu0 %v30863_v11 }
 0x85b   : > { %v18802_v38 = vpop.f32.mrf.mxu0  ;;  %20237 = vmatprep.subr.mxu0 %v30871_v39  ;;  %v20335_v54 = vsub.f32 %v30917_v25, %v20334_v10 }
 0x85c   : > { %v30948_v60 = vpop.f32.mrf.mxu1  ;;  %20239 = vmatpush1.msra.mxu0 %v30882_v12 }
 0x85d   : > { %v18807_v24 = vpop.f32.mrf.mxu0  ;;  %20278 = vmatmul.mubr.f32.vlgmr.msra.gmra.mxu0 %v30925_v58  ;;  %20450 = vmatprep.subr.mxu0 %v30917_v25  ;;  %v20336_v36 = vand.u32 4294901760, %v20335_v54  ;;  %v20342_v25 = vand.u32 4294901760, %v20341_v26  ;;  %v18507_v54 = vadd.f32 %v30854_v3, %v30823_v46  ;;  %v18605_v26 = vadd.f32 %v30861_v29, %v18505_v44 }
 0x85e   : > { %v30965_v41 = vpop.f32.mrf.mxu1  ;;  %20453 = vmatpush1.msra.mxu0 %v30903_v47  ;;  %20283 = vmatprep.mubr.f32.mxu0 %v32197_v15  ;;  %v18599_v46 = vadd.f32 %v30847_v35, %v18500_v7  ;;  %v20360_v3 = vand.u32 4294901760, %v20359_v6  ;;  %v18512_v44 = vadd.f32 %v30859_v61, %v30826_v28 }
 0x85f   : > { %v18809_v19 = vpop.f32.mrf.mxu0  ;;  %20337 = vmatprep.subr.mxu1 %v20336_v36  ;;  %20456 = vmatprep.subr.mxu0 %v30885_v13  ;;  %v18607_v32 = vadd.f32 %v30877_v48, %v18507_v54  ;;  %v18597_v36 = vadd.f32 %v30840_v49, %v18498_v21  ;;  %v18702_v18 = vadd.f32 %v18701_v0, %v18605_v26  ;;  %v32252_v26 = vand.u32 4294901760, %v30885_v13 }
 0x860   : > { %v18892_v58 = vpop.f32.mrf.mxu1  ;;  %20343 = vmatpush1.msra.mxu1 %v20342_v25  ;;  %20459 = vmatpush1.msra.mxu0 %v30895_v31  ;;  %v18695_v35 = vadd.f32 %v30913_v51, %v18599_v46  ;;  %v18613_v28 = vadd.f32 %v30887_v43, %v18512_v44  ;;  %v32253_v46 = vand.u32 4294901760, %v30895_v31 }
 0x861   : > { %20289 = vmatmul.mubr.f32.gmra.mxu0 %v30956_v57  ;;  %20349 = vmatprep.subr.mxu1 %v20348_v30  ;;  %v18704_v48 = vadd.f32 %v18703_v62, %v18607_v32  ;;  %v20366_v30 = vand.u32 4294901760, %v20365_v42  ;;  %v18693_v49 = vadd.f32 %v30889_v22, %v18597_v36  ;;  %v18808_v0 = vadd.f32 %v18807_v24, %v18702_v18 }
 0x862   : > { %v18814_v34 = vpop.f32.mrf.mxu0  ;;  %v18894_v29 = vpop.f32.mrf.mxu1  ;;  %20462 = vmatprep.subr.mxu0 %v30906_v4  ;;  %20355 = vmatpush1.msra.mxu1 %v20354_v52  ;;  %v18803_v61 = vadd.f32 %v18802_v38, %v18695_v35  ;;  %v18615_v62 = vadd.f32 %v30911_v50, %v18514_v2  ;;  %v32251_v42 = vand.u32 4294901760, %v30903_v47  ;;  %v32254_v47 = vand.u32 4294901760, %v30906_v4 }
 0x863   : > { %20465 = vmatpush1.msra.mxu0 %v30922_v37  ;;  %20361 = vmatprep.subr.mxu1 %v20360_v3  ;;  %v18810_v51 = vadd.f32 %v18809_v19, %v18704_v48  ;;  %v18801_v25 = vadd.f32 %v30928_v1, %v18693_v49 }
 0x864   : > { %v18816_v6 = vpop.f32.mrf.mxu0  ;;  %v18899_v63 = vpop.f32.mrf.mxu1  ;;  %20650 = vmatprep.subr.mxu0 %v20334_v10  ;;  %20294 = vmatprep.mubr.f32.mxu0 %v32197_v15  ;;  %v18711_v10 = vadd.f32 %v30948_v60, %v18613_v28  ;;  %v18895_v43 = vadd.f32 %v18894_v29, %v18803_v61  ;;  %v18713_v1 = vadd.f32 %v30965_v41, %v18615_v62 }
 0x865   : > { %20367 = vmatpush1.msra.mxu1 %v20366_v30  ;;  %20300 = vmatmul.mubr.f32.gmra.mxu0 %v30984_v20  ;;  %v18900_v40 = vadd.f32 %v18899_v63, %v18808_v0  ;;  %v18893_v19 = vadd.f32 %v18892_v58, %v18801_v25 }
 0x866   : > { %v31000_v8 = vpop.f32.mrf.mxu0  ;;  %v18901_v22 = vpop.f32.mrf.mxu1  ;;  %20402 = vmatmul.mubr.f32.vlgmr.msra.gmra.mxu1 %v30835_v53  ;;  %20550 = vmatprep.subr.mxu1 %v30900_v9  ;;  %v18815_v24 = vadd.f32 %v18814_v34, %v18711_v10  ;;  %v18817_v58 = vadd.f32 %v18816_v6, %v18713_v1 }
 0x867   : > { %v18902_v38 = vadd.f32 %v18901_v22, %v18810_v51  ;;  %20552 = vmatpush1.msra.mxu1 %v30880_v33  ;;  %20407 = vmatprep.mubr.f32.mxu1 %v32197_v15 }
 0x868   : > { %v31007_v50 = vpop.f32.mrf.mxu0  ;;  %20554 = vmatprep.subr.mxu1 %v30857_v55  ;;  %20498 = vmatprep.mubr.f32.mxu0 %v32197_v15 }
 0x869   : > { %25329 = vtanh.f32 %v18902_v38  ;;  %20556 = vmatpush1.msra.mxu1 %v30863_v11  ;;  %20501 = vmatmul.mubr.f32.vlgmr.msra.gmra.mxu0 %v30850_v45 }
 0x86a   : > { %25331 = vtanh.f32 %v18900_v40  ;;  %v18906_v60 = vpop.f32.mrf.mxu1  ;;  %v31014_v7 = vpop.f32.mrf.mxu0  ;;  %20409 = vmatmul.mubr.f32.gmra.mxu1 %v30852_v5  ;;  %20558 = vmatprep.subr.mxu1 %v30871_v39 }
 0x86b   : > { %25333 = vtanh.f32 %v18895_v43  ;;  %v18907_v54 = vadd.f32 %v18906_v60, %v18815_v24  ;;  %20654 = vmatpush1.msra.mxu0 %v32251_v42  ;;  %20560 = vmatpush1.msra.mxu1 %v30882_v12 }
 0x86c   : > { %25335 = vtanh.f32 %v18893_v19  ;;  %v18908_v41 = vpop.f32.mrf.mxu1  ;;  %v31021_v21 = vpop.f32.mrf.mxu0  ;;  %20658 = vmatprep.subr.mxu0 %v32252_v26  ;;  %20752 = vmatprep.subr.mxu1 %v30900_v9 }
 0x86d   : > { %25337 = vtanh.f32 %v18907_v54  ;;  %v18909_v52 = vadd.f32 %v18908_v41, %v18817_v58  ;;  %20662 = vmatpush1.msra.mxu0 %v32253_v46  ;;  %20414 = vmatprep.mubr.f32.mxu1 %v32197_v15 }
 0x86e   : > { %20506 = vmatprep.mubr.f32.mxu0 %v32197_v15  ;;  %20666 = vmatprep.subr.mxu0 %v32254_v47 }
 0x86f   : > { %25339 = vtanh.f32 %v18909_v52  ;;  %v31032_v32 = vpop.f32.mrf.mxu0  ;;  %20416 = vmatmul.mubr.f32.gmra.mxu1 %v30873_v27  ;;  %20509 = vmatmul.mubr.f32.gmra.mxu0 %v30869_v56 }
 0x870   : > { %v31036_v13 = vpop.f32.mrf.mxu1  ;;  %20670 = vmatpush1.msra.mxu0 %v20364_v14  ;;  %20514 = vmatprep.mubr.f32.mxu0 %v32197_v15 }
 0x871   : > { %v31041_v31 = vpop.f32.mrf.mxu0  ;;  %20593 = vmatprep.mubr.f32.mxu1 %v32197_v15 }
 0x872   : > { %v31044_v9 = vpop.f32.mrf.mxu1 }
 0x873   : > { %v31046_v4 = vpop.f32.mrf.mxu0  ;;  %20517 = vmatmul.mubr.f32.gmra.mxu0 %v30909_v23  ;;  %20597 = vmatmul.mubr.f32.vlgmr.msra.gmra.mxu1 %v30866_v59 }
 0x874   : > { %v31050_v3 = vpop.f32.mrf.mxu1  ;;  %20754 = vmatpush1.msra.mxu1 %v30880_v33  ;;  %20602 = vmatprep.mubr.f32.mxu1 %v32197_v15 }
 0x875   : > { %v31054_v37 = vpop.f32.mrf.mxu0  ;;  %20756 = vmatprep.subr.mxu1 %v30857_v55  ;;  %20703 = vmatprep.mubr.f32.mxu0 %v32197_v15 }
 0x876   : > { %v25330_v14 = vpop.eup %25329  ;;  %v31058_v36 = vpop.f32.mrf.mxu1  ;;  %20758 = vmatpush1.msra.mxu1 %v30863_v11 }
 0x877   : > { %v25332_v18 = vpop.eup %25331  ;;  %20760 = vmatprep.subr.mxu1 %v30871_v39  ;;  %20606 = vmatmul.mubr.f32.gmra.mxu1 %v30898_v16  ;;  %v31071_v11 = vand.u32 4294901760, %v25330_v14 }
 0x878   : > { %v25334_v34 = vpop.eup %25333  ;;  %20705 = vmatmul.mubr.f32.vlgmr.msra.gmra.mxu0 %v30835_v53  ;;  %20762 = vmatpush1.msra.mxu1 %v30882_v12  ;;  %v31073_v39 = vand.u32 4294901760, %v25332_v18 }
 0x879   : > { %v25336_v33 = vpop.eup %25335  ;;  %v31065_v29 = vpop.f32.mrf.mxu1  ;;  %20611 = vmatprep.mubr.f32.mxu1 %v32197_v15  ;;  %20710 = vmatprep.mubr.f32.mxu0 %v32197_v15  ;;  %v31081_v30 = vand.u32 4294901760, %v25334_v34  ;;  %v31096_v61 = vsub.f32 %v25330_v14, %v31071_v11 }
 0x87a   : > { %v31067_v55 = vpop.f32.mrf.mxu0  ;;  %v25338_v44 = vpop.eup %25337  ;;  %v31087_v0 = vand.u32 4294901760, %v25336_v33  ;;  %v31104_v25 = vsub.f32 %v25332_v18, %v31073_v39 }
 0x87b   : > { %v31075_v35 = vpop.f32.mrf.mxu1  ;;  %20615 = vmatmul.mubr.f32.gmra.mxu1 %v30936_v17  ;;  %v20185_v12 = vsel %vm2530_vm3, %v25338_v44, 0  ;;  %v31110_v10 = vsub.f32 %v25334_v34, %v31081_v30  ;;  %v32156_v24 = vand.u32 4294901760, %v31096_v61  ;;  %v19120_v34 = vadd.f32 %v31050_v3, %v31014_v7  ;;  %v32255_v44 = vld [vmem:[#allocation5_spill] sm:$0xff] }
 0x87c   : > { %v31077_v48 = vpop.f32.mrf.mxu0  ;;  %v25340_v2 = vpop.eup %25339  ;;  %20712 = vmatmul.mubr.f32.gmra.mxu0 %v30852_v5  ;;  %20795 = vmatprep.mubr.f32.mxu1 %v32197_v15  ;;  %v31085_v49 = vand.u32 4294901760, %v20185_v12  ;;  %v31119_v19 = vsub.f32 %v25336_v33, %v31087_v0  ;;  %v32157_v54 = vand.u32 4294901760, %v31104_v25 }
 0x87d   : > { %v31091_v63 = vpop.f32.mrf.mxu1  ;;  %v20188_v28 = vsel %vm2530_vm3, %v25340_v2, 0  ;;  %20717 = vmatprep.mubr.f32.mxu0 %v32197_v15  ;;  %v20973_v26 = vand.u32 4294901760, %v31110_v10  ;;  %v20962_v18 = vsub.f32 %v31096_v61, %v32156_v24 }
 0x87e   : > { %v31089_v6 = vpop.f32.mrf.mxu0  ;;  %v31098_v51 = vand.u32 4294901760, %v20188_v28  ;;  %v31101_v62 = vsub.f32 %v20185_v12, %v31085_v49  ;;  %v20979_v47 = vand.u32 4294901760, %v31119_v19  ;;  %v20968_v2 = vsub.f32 %v31104_v25, %v32157_v54 }
 0x87f   : > { %v19309_v22 = vpop.f32.mrf.mxu1  ;;  %20797 = vmatmul.mubr.f32.vlgmr.msra.gmra.mxu1 %v30835_v53  ;;  %v20974_v3 = vsub.f32 %v31110_v10, %v20973_v26  ;;  %v19220_v54 = vadd.f32 %v31067_v55, %v19120_v34 }
 0x880   : > { %v31106_v40 = vpop.f32.mrf.mxu0  ;;  %20844 = vmatprep.subr.mxu0 %v31098_v51  ;;  %20719 = vmatmul.mubr.f32.gmra.mxu0 %v30873_v27  ;;  %v31115_v43 = vsub.f32 %v20188_v28, %v31098_v51  ;;  %v32155_v38 = vand.u32 4294901760, %v31101_v62  ;;  %v19113_v28 = vadd.f32 %v31036_v13, %v31000_v8  ;;  %v20980_v8 = vsub.f32 %v31119_v19, %v20979_v47 }
 0x881   : > { %v19316_v1 = vpop.f32.mrf.mxu1  ;;  %20846 = vmatpush1.msra.mxu0 %v31085_v49  ;;  %20802 = vmatprep.mubr.f32.mxu1 %v32197_v15  ;;  %v20969_v34 = vand.u32 4294901760, %v20968_v2  ;;  %v19129_v2 = vadd.f32 %v31075_v35, %v31041_v31 }
 0x882   : > { %v31124_v60 = vpop.f32.mrf.mxu0  ;;  %20848 = vmatprep.subr.mxu0 %v31071_v11  ;;  %20887 = vmatprep.mubr.f32.mxu0 %v32197_v15  ;;  %v32158_v58 = vand.u32 4294901760, %v31115_v43  ;;  %v20956_v41 = vsub.f32 %v31101_v62, %v32155_v38  ;;  %v19115_v38 = vadd.f32 %v31044_v9, %v31007_v50  ;;  %v20963_v9 = vand.u32 4294901760, %v20962_v18 }
 0x883   : > { %v19318_v42 = vpop.f32.mrf.mxu1  ;;  %20850 = vmatpush1.msra.mxu0 %v31073_v39  ;;  %20804 = vmatmul.mubr.f32.gmra.mxu1 %v30852_v5  ;;  %v20975_v18 = vand.u32 4294901760, %v20974_v3 }
 0x884   : > { %v19417_v52 = vpop.f32.mrf.mxu0  ;;  %20852 = vmatprep.subr.mxu0 %v31081_v30  ;;  %v20950_v46 = vsub.f32 %v31115_v43, %v32158_v58  ;;  %20809 = vmatprep.mubr.f32.mxu1 %v32197_v15  ;;  %v20957_v7 = vand.u32 4294901760, %v20956_v41  ;;  %v19214_v50 = vadd.f32 %v31054_v37, %v19115_v38  ;;  %v19212_v41 = vadd.f32 %v31046_v4, %v19113_v28 }
 0x885   : > { %v19325_v14 = vpop.f32.mrf.mxu1  ;;  %20854 = vmatpush1.msra.mxu0 %v31087_v0 }
 0x886   : > { %v19422_v33 = vpop.f32.mrf.mxu0  ;;  %20893 = vmatmul.mubr.f32.vlgmr.msra.gmra.mxu0 %v32255_v44  ;;  %21065 = vmatprep.subr.mxu0 %v31115_v43  ;;  %v20951_v12 = vand.u32 4294901760, %v20950_v46  ;;  %v19122_v46 = vadd.f32 %v31058_v36, %v31021_v21  ;;  %v19317_v36 = vadd.f32 %v19316_v1, %v19220_v54  ;;  %v19310_v37 = vadd.f32 %v19309_v22, %v19214_v50 }
 0x887   : > { %v19327_v24 = vpop.f32.mrf.mxu1  ;;  %21068 = vmatpush1.msra.mxu0 %v31101_v62  ;;  %20898 = vmatprep.mubr.f32.mxu0 %v32197_v15  ;;  %v19308_v4 = vadd.f32 %v31091_v63, %v19212_v41  ;;  %v20981_v54 = vand.u32 4294901760, %v20980_v8 }
 0x888   : > { %v19424_v58 = vpop.f32.mrf.mxu0  ;;  %20952 = vmatprep.subr.mxu1 %v20951_v12  ;;  %21071 = vmatprep.subr.mxu0 %v31096_v61  ;;  %v19222_v21 = vadd.f32 %v31077_v48, %v19122_v46  ;;  %v19127_v12 = vadd.f32 %v31065_v29, %v31032_v32  ;;  %v19423_v48 = vadd.f32 %v19422_v33, %v19317_v36  ;;  %v32258_v36 = vand.u32 4294901760, %v31096_v61 }
 0x889   : > { %v19507_v13 = vpop.f32.mrf.mxu1  ;;  %20958 = vmatpush1.msra.mxu1 %v20957_v7  ;;  %21074 = vmatpush1.msra.mxu0 %v31104_v25  ;;  %v19418_v29 = vadd.f32 %v19417_v52, %v19310_v37  ;;  %v32256_v7 = vand.u32 4294901760, %v31115_v43  ;;  %v19416_v63 = vadd.f32 %v31124_v60, %v19308_v4  ;;  %v19230_v46 = vadd.f32 %v31106_v40, %v19129_v2 }
 0x88a   : > { %v19429_v55 = vpop.f32.mrf.mxu0  ;;  %20811 = vmatmul.mubr.f32.gmra.mxu1 %v30873_v27  ;;  %20904 = vmatmul.mubr.f32.gmra.mxu0 %v30956_v57  ;;  %v19319_v28 = vadd.f32 %v19318_v42, %v19222_v21  ;;  %v19228_v32 = vadd.f32 %v31089_v6, %v19127_v12  ;;  %v32257_v21 = vand.u32 4294901760, %v31101_v62 }
 0x88b   : > { %v19509_v38 = vpop.f32.mrf.mxu1  ;;  %20964 = vmatprep.subr.mxu1 %v20963_v9  ;;  %21077 = vmatprep.subr.mxu0 %v31110_v10  ;;  %v19508_v43 = vadd.f32 %v19507_v13, %v19416_v63  ;;  %v19328_v60 = vadd.f32 %v19327_v24, %v19230_v46 }
 0x88c   : > { %v19431_v1 = vpop.f32.mrf.mxu0  ;;  %20970 = vmatpush1.msra.mxu1 %v20969_v34  ;;  %21080 = vmatpush1.msra.mxu0 %v31119_v19  ;;  %v19425_v42 = vadd.f32 %v19424_v58, %v19319_v28  ;;  %v19326_v31 = vadd.f32 %v19325_v14, %v19228_v32  ;;  %v19510_v35 = vadd.f32 %v19509_v38, %v19418_v29 }
 0x88d   : > { %v19514_v22 = vpop.f32.mrf.mxu1  ;;  %20976 = vmatprep.subr.mxu1 %v20975_v18  ;;  %21265 = vmatprep.subr.mxu0 %v32256_v7  ;;  %v19432_v14 = vadd.f32 %v19431_v1, %v19328_v60 }
 0x88e   : > { %v19515_v33 = vadd.f32 %v19514_v22, %v19423_v48  ;;  %v31186_v3 = vpop.f32.mrf.mxu0  ;;  %20909 = vmatprep.mubr.f32.mxu0 %v32197_v15  ;;  %20982 = vmatpush1.msra.mxu1 %v20981_v54  ;;  %v19430_v58 = vadd.f32 %v19429_v55, %v19326_v31  ;;  %v32259_v55 = vand.u32 4294901760, %v31104_v25 }
 0x88f   : > { %v19516_v6 = vpop.f32.mrf.mxu1  ;;  %21015 = vmatprep.mubr.f32.mxu1 %v32197_v15  ;;  %20915 = vmatmul.mubr.f32.gmra.mxu0 %v30984_v20 }
 0x890   : > { %v19517_v52 = vadd.f32 %v19516_v6, %v19425_v42  ;;  %v31192_v8 = vpop.f32.mrf.mxu0  ;;  %21017 = vmatmul.mubr.f32.vlgmr.msra.gmra.mxu1 %v30835_v53  ;;  %21165 = vmatprep.subr.mxu1 %v31098_v51  ;;  %25341 = vtanh.f32 %v19515_v33 }
 0x891   : > { %21167 = vmatpush1.msra.mxu1 %v31085_v49  ;;  %21022 = vmatprep.mubr.f32.mxu1 %v32197_v15 }
 0x892   : > { %25343 = vtanh.f32 %v19517_v52  ;;  %v19521_v40 = vpop.f32.mrf.mxu1  ;;  %21169 = vmatprep.subr.mxu1 %v31071_v11  ;;  %21113 = vmatprep.mubr.f32.mxu0 %v32197_v15 }
 0x893   : > { %25345 = vtanh.f32 %v19510_v35  ;;  %v19522_v50 = vadd.f32 %v19521_v40, %v19430_v58  ;;  %v31200_v13 = vpop.f32.mrf.mxu0  ;;  %21171 = vmatpush1.msra.mxu1 %v31073_v39  ;;  %21116 = vmatmul.mubr.f32.vlgmr.msra.gmra.mxu0 %v30850_v45 }
 0x894   : > { %25347 = vtanh.f32 %v19508_v43  ;;  %v19523_v24 = vpop.f32.mrf.mxu1  ;;  %21024 = vmatmul.mubr.f32.gmra.mxu1 %v30852_v5  ;;  %21173 = vmatprep.subr.mxu1 %v31081_v30 }
 0x895   : > { %25349 = vtanh.f32 %v19522_v50  ;;  %v19524_v9 = vadd.f32 %v19523_v24, %v19432_v14  ;;  %v31206_v41 = vpop.f32.mrf.mxu0  ;;  %21269 = vmatpush1.msra.mxu0 %v32257_v21  ;;  %21175 = vmatpush1.msra.mxu1 %v31087_v0 }
 0x896   : > { %21273 = vmatprep.subr.mxu0 %v32258_v36  ;;  %21367 = vmatprep.subr.mxu1 %v31098_v51 }
 0x897   : > { %25351 = vtanh.f32 %v19524_v9  ;;  %21277 = vmatpush1.msra.mxu0 %v32259_v55  ;;  %21029 = vmatprep.mubr.f32.mxu1 %v32197_v15 }
 0x898   : > { %v31217_v34 = vpop.f32.mrf.mxu0  ;;  %v31219_v12 = vpop.f32.mrf.mxu1  ;;  %21121 = vmatprep.mubr.f32.mxu0 %v32197_v15  ;;  %21281 = vmatprep.subr.mxu0 %v20973_v26 }
 0x899   : > { %21031 = vmatmul.mubr.f32.gmra.mxu1 %v30873_v27  ;;  %21124 = vmatmul.mubr.f32.gmra.mxu0 %v30869_v56 }
 0x89a   : > { %v31226_v61 = vpop.f32.mrf.mxu0  ;;  %v31228_v51 = vpop.f32.mrf.mxu1  ;;  %21285 = vmatpush1.msra.mxu0 %v20979_v47  ;;  %21129 = vmatprep.mubr.f32.mxu0 %v32197_v15 }
 0x89b   : > { %21208 = vmatprep.mubr.f32.mxu1 %v32197_v15 }
 0x89c   : > { %v31234_v62 = vpop.f32.mrf.mxu0 }
 0x89d   : > { %v31236_v25 = vpop.f32.mrf.mxu1  ;;  %21132 = vmatmul.mubr.f32.gmra.mxu0 %v30909_v23  ;;  %21212 = vmatmul.mubr.f32.vlgmr.msra.gmra.mxu1 %v30866_v59  ;;  %v25342_v10 = vpop.eup %25341 }
 0x89e   : > { %v31240_v26 = vpop.f32.mrf.mxu0  ;;  %21369 = vmatpush1.msra.mxu1 %v31085_v49  ;;  %21217 = vmatprep.mubr.f32.mxu1 %v32197_v15 }
 0x89f   : > { %v25344_v19 = vpop.eup %25343  ;;  %v31244_v47 = vpop.f32.mrf.mxu1  ;;  %21371 = vmatprep.subr.mxu1 %v31071_v11  ;;  %21318 = vmatprep.mubr.f32.mxu0 %v32197_v15  ;;  %v31259_v11 = vand.u32 4294901760, %v25342_v10 }
 0x8a0   : > { %v25346_v37 = vpop.eup %25345  ;;  %21373 = vmatpush1.msra.mxu1 %v31073_v39  ;;  %v31251_v18 = vand.u32 4294901760, %v25344_v19 }
 0x8a1   : > { %v25348_v38 = vpop.eup %25347  ;;  %21375 = vmatprep.subr.mxu1 %v31081_v30  ;;  %21221 = vmatmul.mubr.f32.gmra.mxu1 %v30898_v16  ;;  %v31264_v30 = vand.u32 4294901760, %v25346_v37  ;;  %v31291_v33 = vsub.f32 %v25342_v10, %v31259_v11 }
 0x8a2   : > { %v25350_v49 = vpop.eup %25349  ;;  %v31253_v4 = vpop.f32.mrf.mxu1  ;;  %21320 = vmatmul.mubr.f32.vlgmr.msra.gmra.mxu0 %v30835_v53  ;;  %21377 = vmatpush1.msra.mxu1 %v31087_v0  ;;  %v31274_v32 = vand.u32 4294901760, %v25348_v38  ;;  %v31277_v29 = vsub.f32 %v25344_v19, %v31251_v18 }
 0x8a3   : > { %v31255_v28 = vpop.f32.mrf.mxu0  ;;  %21226 = vmatprep.mubr.f32.mxu1 %v32197_v15  ;;  %21325 = vmatprep.mubr.f32.mxu0 %v32197_v15  ;;  %v20191_v39 = vsel %vm2530_vm3, %v25350_v49, 0  ;;  %v31295_v46 = vsub.f32 %v25346_v37, %v31264_v30  ;;  %v32161_v14 = vand.u32 4294901760, %v31291_v33 }
 0x8a4   : > { %v25352_v48 = vpop.eup %25351  ;;  %v31266_v1 = vpop.f32.mrf.mxu1  ;;  %v31270_v2 = vand.u32 4294901760, %v20191_v39  ;;  %v32159_v52 = vand.u32 4294901760, %v31277_v29  ;;  %v31310_v60 = vsub.f32 %v25348_v38, %v31274_v32 }
 0x8a5   : > { %v31268_v54 = vpop.f32.mrf.mxu0  ;;  %21230 = vmatmul.mubr.f32.gmra.mxu1 %v30936_v17  ;;  %v20194_v0 = vsel %vm2530_vm3, %v25352_v48, 0  ;;  %v32162_v9 = vand.u32 4294901760, %v31295_v46  ;;  %v21583_v49 = vsub.f32 %v31291_v33, %v32161_v14 }
 0x8a6   : > { %v31281_v7 = vpop.f32.mrf.mxu1  ;;  %21327 = vmatmul.mubr.f32.gmra.mxu0 %v30852_v5  ;;  %v31284_v63 = vand.u32 4294901760, %v20194_v0  ;;  %21410 = vmatprep.mubr.f32.mxu1 %v32197_v15  ;;  %v31288_v42 = vsub.f32 %v20191_v39, %v31270_v2  ;;  %v21577_v10 = vsub.f32 %v31277_v29, %v32159_v52  ;;  %v21594_v19 = vand.u32 4294901760, %v31310_v60 }
 0x8a7   : > { %v31279_v22 = vpop.f32.mrf.mxu0  ;;  %21332 = vmatprep.mubr.f32.mxu0 %v32197_v15  ;;  %v19735_v39 = vadd.f32 %v31236_v25, %v31200_v13  ;;  %v21589_v52 = vsub.f32 %v31295_v46, %v32162_v9  ;;  %v19737_v13 = vadd.f32 %v31244_v47, %v31206_v41  ;;  %v21584_v41 = vand.u32 4294901760, %v21583_v49 }
 0x8a8   : > { %v31299_v35 = vpop.f32.mrf.mxu1  ;;  %21459 = vmatprep.subr.mxu0 %v31284_v63  ;;  %v31303_v6 = vsub.f32 %v20194_v0, %v31284_v63  ;;  %v32160_v43 = vand.u32 4294901760, %v31288_v42  ;;  %v21595_v9 = vsub.f32 %v31310_v60, %v21594_v19  ;;  %v19742_v47 = vadd.f32 %v31253_v4, %v31217_v34 }
 0x8a9   : > { %v31297_v31 = vpop.f32.mrf.mxu0  ;;  %21461 = vmatpush1.msra.mxu0 %v31270_v2  ;;  %21412 = vmatmul.mubr.f32.vlgmr.msra.gmra.mxu1 %v30835_v53  ;;  %v19835_v25 = vadd.f32 %v31255_v28, %v19735_v39  ;;  %v19837_v28 = vadd.f32 %v31268_v54, %v19737_v13  ;;  %v21590_v39 = vand.u32 4294901760, %v21589_v52 }
 0x8aa   : > { %v19931_v58 = vpop.f32.mrf.mxu1  ;;  %21334 = vmatmul.mubr.f32.gmra.mxu0 %v30873_v27  ;;  %21463 = vmatprep.subr.mxu0 %v31251_v18  ;;  %v21564_v40 = vand.u32 4294901760, %v31303_v6  ;;  %v21571_v24 = vsub.f32 %v31288_v42, %v32160_v43  ;;  %v19843_v34 = vadd.f32 %v31279_v22, %v19742_v47  ;;  %v21596_v52 = vand.u32 4294901760, %v21595_v9 }
 0x8ab   : > { %v31316_v50 = vpop.f32.mrf.mxu0  ;;  %21465 = vmatpush1.msra.mxu0 %v31259_v11  ;;  %21417 = vmatprep.mubr.f32.mxu1 %v32197_v15 }
 0x8ac   : > { %v19933_v21 = vpop.f32.mrf.mxu1  ;;  %21467 = vmatprep.subr.mxu0 %v31264_v30  ;;  %21502 = vmatprep.mubr.f32.mxu0 %v32197_v15  ;;  %v21565_v36 = vsub.f32 %v31303_v6, %v21564_v40  ;;  %v21572_v0 = vand.u32 4294901760, %v21571_v24  ;;  %v21578_v24 = vand.u32 4294901760, %v21577_v10  ;;  %v19932_v10 = vadd.f32 %v19931_v58, %v19835_v25 }
 0x8ad   : > { %v20032_v55 = vpop.f32.mrf.mxu0  ;;  %21469 = vmatpush1.msra.mxu0 %v31274_v32  ;;  %21419 = vmatmul.mubr.f32.gmra.mxu1 %v30852_v5  ;;  %v19934_v4 = vadd.f32 %v19933_v21, %v19837_v28  ;;  %v32260_v25 = vand.u32 4294901760, %v31288_v42 }
 0x8ae   : > { %v19940_v37 = vpop.f32.mrf.mxu1  ;;  %21508 = vmatmul.mubr.f32.vlgmr.msra.gmra.mxu0 %v32255_v44  ;;  %21680 = vmatprep.subr.mxu0 %v31303_v6  ;;  %v21566_v38 = vand.u32 4294901760, %v21565_v36  ;;  %v19730_v36 = vadd.f32 %v31228_v51, %v31192_v8  ;;  %v19728_v8 = vadd.f32 %v31219_v12, %v31186_v3  ;;  %v19744_v12 = vadd.f32 %v31266_v1, %v31226_v61 }
 0x8af   : > { %v20037_v48 = vpop.f32.mrf.mxu0  ;;  %21683 = vmatpush1.msra.mxu0 %v31288_v42  ;;  %21424 = vmatprep.mubr.f32.mxu1 %v32197_v15 }
 0x8b0   : > { %v19942_v43 = vpop.f32.mrf.mxu1  ;;  %21567 = vmatprep.subr.mxu1 %v21566_v38  ;;  %21686 = vmatprep.subr.mxu0 %v31277_v29  ;;  %v19829_v51 = vadd.f32 %v31240_v26, %v19730_v36  ;;  %v19827_v3 = vadd.f32 %v31234_v62, %v19728_v8  ;;  %v20038_v54 = vadd.f32 %v20037_v48, %v19932_v10  ;;  %v32262_v8 = vand.u32 4294901760, %v31291_v33 }
 0x8b1   : > { %v20039_v14 = vpop.f32.mrf.mxu0  ;;  %21513 = vmatprep.mubr.f32.mxu0 %v32197_v15  ;;  %21573 = vmatpush1.msra.mxu1 %v21572_v0  ;;  %v19845_v58 = vadd.f32 %v31297_v31, %v19744_v12 }
 0x8b2   : > { %v20122_v38 = vpop.f32.mrf.mxu1  ;;  %21689 = vmatpush1.msra.mxu0 %v31291_v33  ;;  %21426 = vmatmul.mubr.f32.gmra.mxu1 %v30873_v27  ;;  %v19925_v26 = vadd.f32 %v31299_v35, %v19829_v51  ;;  %v19923_v62 = vadd.f32 %v31281_v7, %v19827_v3  ;;  %v19941_v35 = vadd.f32 %v19940_v37, %v19843_v34  ;;  %v32263_v51 = vand.u32 4294901760, %v31295_v46 }
 0x8b3   : > { %21519 = vmatmul.mubr.f32.gmra.mxu0 %v30956_v57  ;;  %21579 = vmatprep.subr.mxu1 %v21578_v24  ;;  %v20044_v0 = vpop.f32.mrf.mxu0  ;;  %v20040_v49 = vadd.f32 %v20039_v14, %v19934_v4  ;;  %v19943_v31 = vadd.f32 %v19942_v43, %v19845_v58  ;;  %v32261_v24 = vand.u32 4294901760, %v31277_v29 }
 0x8b4   : > { %v20124_v36 = vpop.f32.mrf.mxu1  ;;  %21692 = vmatprep.subr.mxu0 %v31295_v46  ;;  %21585 = vmatpush1.msra.mxu1 %v21584_v41  ;;  %v20033_v61 = vadd.f32 %v20032_v55, %v19925_v26  ;;  %v20031_v21 = vadd.f32 %v31316_v50, %v19923_v62  ;;  %v20045_v6 = vadd.f32 %v20044_v0, %v19941_v35 }
 0x8b5   : > { %21695 = vmatpush1.msra.mxu0 %v31310_v60  ;;  %21591 = vmatprep.subr.mxu1 %v21590_v39  ;;  %v20046_v9 = vpop.f32.mrf.mxu0 }
 0x8b6   : > { %v20129_v1 = vpop.f32.mrf.mxu1  ;;  %21880 = vmatprep.subr.mxu0 %v21564_v40  ;;  %21524 = vmatprep.mubr.f32.mxu0 %v32197_v15  ;;  %v20125_v48 = vadd.f32 %v20124_v36, %v20033_v61  ;;  %v20123_v14 = vadd.f32 %v20122_v38, %v20031_v21  ;;  %v20047_v50 = vadd.f32 %v20046_v9, %v19943_v31 }
 0x8b7   : > { %v20130_v22 = vadd.f32 %v20129_v1, %v20038_v54  ;;  %21597 = vmatpush1.msra.mxu1 %v21596_v52  ;;  %21630 = vmatprep.mubr.f32.mxu1 %v32197_v15 }
 0x8b8   : > { %v20131_v7 = vpop.f32.mrf.mxu1  ;;  %21530 = vmatmul.mubr.f32.gmra.mxu0 %v30984_v20  ;;  %21632 = vmatmul.mubr.f32.vlgmr.msra.gmra.mxu1 %v30835_v53 }
 0x8b9   : > { %v20132_v40 = vadd.f32 %v20131_v7, %v20040_v49  ;;  %21780 = vmatprep.subr.mxu1 %v31284_v63  ;;  %21637 = vmatprep.mubr.f32.mxu1 %v32197_v15  ;;  %25353 = vtanh.f32 %v20130_v22 }
 0x8ba   : > { %v20136_v55 = vpop.f32.mrf.mxu1  ;;  %21782 = vmatpush1.msra.mxu1 %v31270_v2  ;;  %21728 = vmatprep.mubr.f32.mxu0 %v32197_v15 }
 0x8bb   : > { %25355 = vtanh.f32 %v20132_v40  ;;  %v20137_v37 = vadd.f32 %v20136_v55, %v20045_v6  ;;  %21784 = vmatprep.subr.mxu1 %v31251_v18 }
 0x8bc   : > { %25357 = vtanh.f32 %v20125_v48  ;;  %v20138_v43 = vpop.f32.mrf.mxu1  ;;  %21786 = vmatpush1.msra.mxu1 %v31259_v11  ;;  %21731 = vmatmul.mubr.f32.vlgmr.msra.gmra.mxu0 %v30850_v45 }
 0x8bd   : > { %25359 = vtanh.f32 %v20137_v37  ;;  %v20139_v13 = vadd.f32 %v20138_v43, %v20047_v50  ;;  %21639 = vmatmul.mubr.f32.gmra.mxu1 %v30852_v5  ;;  %21788 = vmatprep.subr.mxu1 %v31264_v30 }
 0x8be   : > { %25361 = vtanh.f32 %v20123_v14  ;;  %21884 = vmatpush1.msra.mxu0 %v32260_v25  ;;  %21790 = vmatpush1.msra.mxu1 %v31274_v32 }
 0x8bf   : > { %25363 = vtanh.f32 %v20139_v13  ;;  %21888 = vmatprep.subr.mxu0 %v32261_v24  ;;  %21982 = vmatprep.subr.mxu1 %v31284_v63 }
 0x8c0   : > { %21892 = vmatpush1.msra.mxu0 %v32262_v8  ;;  %21644 = vmatprep.mubr.f32.mxu1 %v32197_v15 }
 0x8c1   : > { %21736 = vmatprep.mubr.f32.mxu0 %v32197_v15  ;;  %21896 = vmatprep.subr.mxu0 %v32263_v51 }
 0x8c2   : > { %21646 = vmatmul.mubr.f32.gmra.mxu1 %v30873_v27  ;;  %21739 = vmatmul.mubr.f32.gmra.mxu0 %v30869_v56 }
 0x8c3   : > { %21900 = vmatpush1.msra.mxu0 %v21594_v19  ;;  %21744 = vmatprep.mubr.f32.mxu0 %v32197_v15 }
 0x8c4   : > { %21823 = vmatprep.mubr.f32.mxu1 %v32197_v15 }
 0x8c6   : > { %21747 = vmatmul.mubr.f32.gmra.mxu0 %v30909_v23  ;;  %21827 = vmatmul.mubr.f32.vlgmr.msra.gmra.mxu1 %v30866_v59  ;;  %v25354_v29 = vpop.eup %25353 }
 0x8c7   : > { %21984 = vmatpush1.msra.mxu1 %v31270_v2  ;;  %21832 = vmatprep.mubr.f32.mxu1 %v32197_v15 }
 0x8c8   : > { %v25356_v63 = vpop.eup %25355  ;;  %21986 = vmatprep.subr.mxu1 %v31251_v18  ;;  %21933 = vmatprep.mubr.f32.mxu0 %v32197_v15  ;;  %v31423_v18 = vand.u32 4294901760, %v25354_v29 }
 0x8c9   : > { %v25358_v42 = vpop.eup %25357  ;;  %21988 = vmatpush1.msra.mxu1 %v31259_v11  ;;  %v31418_v46 = vand.u32 4294901760, %v25356_v63 }
 0x8ca   : > { %v25360_v33 = vpop.eup %25359  ;;  %21990 = vmatprep.subr.mxu1 %v31264_v30  ;;  %21836 = vmatmul.mubr.f32.gmra.mxu1 %v30898_v16  ;;  %v31429_v30 = vand.u32 4294901760, %v25358_v42  ;;  %v31446_v10 = vsub.f32 %v25354_v29, %v31423_v18 }
 0x8cb   : > { %v25362_v60 = vpop.eup %25361  ;;  %21935 = vmatmul.mubr.f32.vlgmr.msra.gmra.mxu0 %v30835_v53  ;;  %21992 = vmatpush1.msra.mxu1 %v31274_v32  ;;  %v20197_v2 = vsel %vm2530_vm3, %v25360_v33, 0  ;;  %v31441_v28 = vsub.f32 %v25356_v63, %v31418_v46 }
 0x8cc   : > { %v25364_v19 = vpop.eup %25363  ;;  %21841 = vmatprep.mubr.f32.mxu1 %v32197_v15  ;;  %21940 = vmatprep.mubr.f32.mxu0 %v32197_v15  ;;  %v31427_v11 = vand.u32 4294901760, %v20197_v2  ;;  %v31435_v32 = vand.u32 4294901760, %v25362_v60  ;;  %v31453_v12 = vsub.f32 %v25358_v42, %v31429_v30  ;;  %v22197_v34 = vand.u32 4294901760, %v31446_v10 }
 0x8cd   : > { %v20200_v38 = vsel %vm2530_vm3, %v25364_v19, 0  ;;  %v22191_v0 = vand.u32 4294901760, %v31441_v28 }
 0x8ce   : > { %21845 = vmatmul.mubr.f32.gmra.mxu1 %v30936_v17  ;;  %v31433_v41 = vand.u32 4294901760, %v20200_v38  ;;  %v31438_v47 = vsub.f32 %v20197_v2, %v31427_v11  ;;  %v31460_v36 = vsub.f32 %v25362_v60, %v31435_v32  ;;  %v22203_v52 = vand.u32 4294901760, %v31453_v12 }
 0x8cf   : > { %21942 = vmatmul.mubr.f32.gmra.mxu0 %v30852_v5  ;;  %22025 = vmatprep.mubr.f32.mxu1 %v32197_v15  ;;  %v22192_v58 = vsub.f32 %v31441_v28, %v22191_v0  ;;  %v22198_v1 = vsub.f32 %v31446_v10, %v22197_v34 }
 0x8d0   : > { %22074 = vmatprep.subr.mxu0 %v31433_v41  ;;  %21947 = vmatprep.mubr.f32.mxu0 %v32197_v15  ;;  %v22178_v39 = vsub.f32 %v20200_v38, %v31433_v41  ;;  %v22185_v3 = vand.u32 4294901760, %v31438_v47  ;;  %v22209_v61 = vand.u32 4294901760, %v31460_v36  ;;  %v22204_v49 = vsub.f32 %v31453_v12, %v22203_v52 }
 0x8d1   : > { %22076 = vmatpush1.msra.mxu0 %v31427_v11  ;;  %v22193_v22 = vand.u32 4294901760, %v22192_v58 }
 0x8d2   : > { %22027 = vmatmul.mubr.f32.vlgmr.msra.gmra.mxu1 %v30835_v53  ;;  %22078 = vmatprep.subr.mxu0 %v31418_v46  ;;  %v22179_v26 = vand.u32 4294901760, %v22178_v39  ;;  %v22186_v54 = vsub.f32 %v31438_v47, %v22185_v3  ;;  %v22210_v21 = vsub.f32 %v31460_v36, %v22209_v61  ;;  %v22205_v9 = vand.u32 4294901760, %v22204_v49 }
 0x8d3   : > { %21949 = vmatmul.mubr.f32.gmra.mxu0 %v30873_v27  ;;  %22032 = vmatprep.mubr.f32.mxu1 %v32197_v15 }
 0x8d4   : > { %22080 = vmatpush1.msra.mxu0 %v31423_v18  ;;  %22117 = vmatprep.mubr.f32.mxu0 %v32197_v15  ;;  %v22180_v4 = vsub.f32 %v22178_v39, %v22179_v26  ;;  %v22187_v35 = vand.u32 4294901760, %v22186_v54  ;;  %v22211_v48 = vand.u32 4294901760, %v22210_v21 }
 0x8d5   : > { %22082 = vmatprep.subr.mxu0 %v31429_v30 }
 0x8d6   : > { %22084 = vmatpush1.msra.mxu0 %v31435_v32  ;;  %22034 = vmatmul.mubr.f32.gmra.mxu1 %v30852_v5  ;;  %v22181_v62 = vand.u32 4294901760, %v22180_v4 }
 0x8d7   : > { %22123 = vmatmul.mubr.f32.vlgmr.msra.gmra.mxu0 %v32255_v44  ;;  %22295 = vmatprep.subr.mxu0 %v22178_v39  ;;  %v22199_v44 = vand.u32 4294901760, %v22198_v1 }
 0x8d8   : > { %22298 = vmatpush1.msra.mxu0 %v31438_v47  ;;  %22182 = vmatprep.subr.mxu1 %v22181_v62 }
 0x8d9   : > { %22301 = vmatprep.subr.mxu0 %v31441_v28  ;;  %22039 = vmatprep.mubr.f32.mxu1 %v32197_v15 }
 0x8da   : > { %22128 = vmatprep.mubr.f32.mxu0 %v32197_v15  ;;  %22188 = vmatpush1.msra.mxu1 %v22187_v35 }
 0x8db   : > { %22304 = vmatpush1.msra.mxu0 %v31446_v10  ;;  %22041 = vmatmul.mubr.f32.gmra.mxu1 %v30873_v27 }
 0x8dc   : > { %22134 = vmatmul.mubr.f32.gmra.mxu0 %v30956_v57  ;;  %22194 = vmatprep.subr.mxu1 %v22193_v22 }
 0x8dd   : > { %22307 = vmatprep.subr.mxu0 %v31453_v12  ;;  %22200 = vmatpush1.msra.mxu1 %v22199_v44 }
 0x8de   : > { %22310 = vmatpush1.msra.mxu0 %v31460_v36  ;;  %22206 = vmatprep.subr.mxu1 %v22205_v9 }
 0x8df   : > { %22495 = vmatprep.subr.mxu0 %v22179_v26  ;;  %22139 = vmatprep.mubr.f32.mxu0 %v32197_v15 }
 0x8e0   : > { %22212 = vmatpush1.msra.mxu1 %v22211_v48  ;;  %22245 = vmatprep.mubr.f32.mxu1 %v32197_v15 }
 0x8e1   : > { %22145 = vmatmul.mubr.f32.gmra.mxu0 %v30984_v20  ;;  %22247 = vmatmul.mubr.f32.vlgmr.msra.gmra.mxu1 %v30835_v53 }
 0x8e2   : > { %22395 = vmatprep.subr.mxu1 %v31433_v41  ;;  %22252 = vmatprep.mubr.f32.mxu1 %v32197_v15 }
 0x8e3   : > { %22397 = vmatpush1.msra.mxu1 %v31427_v11  ;;  %22343 = vmatprep.mubr.f32.mxu0 %v32197_v15 }
 0x8e4   : > { %22399 = vmatprep.subr.mxu1 %v31418_v46 }
 0x8e5   : > { %22401 = vmatpush1.msra.mxu1 %v31423_v18  ;;  %22346 = vmatmul.mubr.f32.vlgmr.msra.gmra.mxu0 %v30850_v45 }
 0x8e6   : > { %22254 = vmatmul.mubr.f32.gmra.mxu1 %v30852_v5  ;;  %22403 = vmatprep.subr.mxu1 %v31429_v30 }
 0x8e7   : > { %22499 = vmatpush1.msra.mxu0 %v22185_v3  ;;  %22405 = vmatpush1.msra.mxu1 %v31435_v32 }
 0x8e8   : > { %22503 = vmatprep.subr.mxu0 %v22191_v0  ;;  %22597 = vmatprep.subr.mxu1 %v31433_v41 }
 0x8e9   : > { %22507 = vmatpush1.msra.mxu0 %v22197_v34  ;;  %22259 = vmatprep.mubr.f32.mxu1 %v32197_v15 }
 0x8ea   : > { %22351 = vmatprep.mubr.f32.mxu0 %v32197_v15  ;;  %22511 = vmatprep.subr.mxu0 %v22203_v52 }
 0x8eb   : > { %22261 = vmatmul.mubr.f32.gmra.mxu1 %v30873_v27  ;;  %22354 = vmatmul.mubr.f32.gmra.mxu0 %v30869_v56 }
 0x8ec   : > { %22515 = vmatpush1.msra.mxu0 %v22209_v61  ;;  %22359 = vmatprep.mubr.f32.mxu0 %v32197_v15 }
 0x8ed   : > { %22438 = vmatprep.mubr.f32.mxu1 %v32197_v15 }
 0x8ef   : > { %22362 = vmatmul.mubr.f32.gmra.mxu0 %v30909_v23  ;;  %22442 = vmatmul.mubr.f32.vlgmr.msra.gmra.mxu1 %v30866_v59 }
 0x8f0   : > { %22599 = vmatpush1.msra.mxu1 %v31427_v11  ;;  %22447 = vmatprep.mubr.f32.mxu1 %v32197_v15 }
 0x8f1   : > { %22601 = vmatprep.subr.mxu1 %v31418_v46  ;;  %22548 = vmatprep.mubr.f32.mxu0 %v32197_v15 }
 0x8f2   : > { %22603 = vmatpush1.msra.mxu1 %v31423_v18 }
 0x8f3   : > { %22605 = vmatprep.subr.mxu1 %v31429_v30  ;;  %22451 = vmatmul.mubr.f32.gmra.mxu1 %v30898_v16 }
 0x8f4   : > { %22550 = vmatmul.mubr.f32.vlgmr.msra.gmra.mxu0 %v30835_v53  ;;  %22607 = vmatpush1.msra.mxu1 %v31435_v32 }
 0x8f5   : > { %22456 = vmatprep.mubr.f32.mxu1 %v32197_v15  ;;  %22555 = vmatprep.mubr.f32.mxu0 %v32197_v15 }
 0x8f7   : > { %22460 = vmatmul.mubr.f32.gmra.mxu1 %v30936_v17 }
 0x8f8   : > { %22557 = vmatmul.mubr.f32.gmra.mxu0 %v30852_v5  ;;  %22640 = vmatprep.mubr.f32.mxu1 %v32197_v15 }
 0x8f9   : > { %22562 = vmatprep.mubr.f32.mxu0 %v32197_v15 }
 0x8fb   : > { %22642 = vmatmul.mubr.f32.vlgmr.msra.gmra.mxu1 %v30835_v53 }
 0x8fc   : > { %22564 = vmatmul.mubr.f32.gmra.mxu0 %v30873_v27  ;;  %22647 = vmatprep.mubr.f32.mxu1 %v32197_v15 }
 0x8fd   : > { %22784 = vmatprep.mubr.f32.mxu0 %v32197_v15 }
 0x8ff   : > { %22649 = vmatmul.mubr.f32.gmra.mxu1 %v30852_v5 }
 0x900   : > { %22654 = vmatprep.mubr.f32.mxu1 %v32197_v15 }
 0x903   : > { %22656 = vmatmul.mubr.f32.gmra.mxu1 %v30873_v27 }
 0x904   : > { %22890 = vmatprep.mubr.f32.mxu1 %v32197_v15 }
 0x91d   : > { %v20279_v45 = vpop.f32.mrf.mxu0 }
 0x91f   : > { %v20281_v59 = vpop.f32.mrf.mxu0 }
 0x921   : > { %v20290_v56 = vpop.f32.mrf.mxu0 }
 0x923   : > { %v20292_v16 = vpop.f32.mrf.mxu0 }
 0x925   : > { %v20301_v23 = vpop.f32.mrf.mxu0 }
 0x926   : > { %v20403_v53 = vpop.f32.mrf.mxu1 }
 0x927   : > { %v20303_v17 = vpop.f32.mrf.mxu0  ;;  %v20404_v2 = vadd.f32 %v20403_v53, %v20279_v45 }
 0x928   : > { %v20405_v57 = vpop.f32.mrf.mxu1 }
 0x929   : > { %v20502_v20 = vpop.f32.mrf.mxu0  ;;  %v20406_v33 = vadd.f32 %v20405_v57, %v20281_v59 }
 0x92a   : > { %v20410_v7 = vpop.f32.mrf.mxu1  ;;  %v20503_v41 = vadd.f32 %v20502_v20, %v20404_v2 }
 0x92b   : > { %v20504_v31 = vpop.f32.mrf.mxu0  ;;  %v20411_v63 = vadd.f32 %v20410_v7, %v20290_v56 }
 0x92c   : > { %v20412_v6 = vpop.f32.mrf.mxu1  ;;  %v20505_v11 = vadd.f32 %v20504_v31, %v20406_v33 }
 0x92d   : > { %v20413_v46 = vadd.f32 %v20412_v6, %v20292_v16 }
 0x92f   : > { %v20417_v40 = vpop.f32.mrf.mxu1  ;;  %v20510_v5 = vpop.f32.mrf.mxu0 }
 0x930   : > { %v20511_v18 = vadd.f32 %v20510_v5, %v20411_v63  ;;  %v20418_v3 = vadd.f32 %v20417_v40, %v20301_v23 }
 0x931   : > { %v20419_v14 = vpop.f32.mrf.mxu1  ;;  %v20512_v55 = vpop.f32.mrf.mxu0 }
 0x932   : > { %v20513_v30 = vadd.f32 %v20512_v55, %v20413_v46  ;;  %v20420_v4 = vadd.f32 %v20419_v14, %v20303_v17  ;;  %v22686_v17 = vld [vmem:[%s32061_s3] sm:$0x3] }
 0x933   : > { %v20518_v50 = vpop.f32.mrf.mxu0  ;;  %v20598_v27 = vpop.f32.mrf.mxu1  ;;  %v22688_v7 = vsel %vm2520_vm2, %v22686_v17, 0 }
 0x934   : > { %v20599_v12 = vadd.f32 %v20598_v27, %v20503_v41  ;;  %v20519_v54 = vadd.f32 %v20518_v50, %v20418_v3  ;;  %v31551_v5 = vand.u32 4294901760, %v22688_v7 }
 0x935   : > { %v20520_v37 = vpop.f32.mrf.mxu0  ;;  %v20600_v43 = vpop.f32.mrf.mxu1 }
 0x936   : > { %v20601_v28 = vadd.f32 %v20600_v43, %v20505_v11  ;;  %v20521_v49 = vadd.f32 %v20520_v37, %v20420_v4 }
 0x937   : > { %v20607_v13 = vpop.f32.mrf.mxu1 }
 0x938   : > { %v20706_v25 = vpop.f32.mrf.mxu0  ;;  %v20608_v32 = vadd.f32 %v20607_v13, %v20511_v18  ;;  %v31558_v13 = vsub.f32 %v22688_v7, %v31551_v5 }
 0x939   : > { %v20609_v24 = vpop.f32.mrf.mxu1  ;;  %v20707_v52 = vadd.f32 %v20706_v25, %v20599_v12 }
 0x93a   : > { %v20708_v8 = vpop.f32.mrf.mxu0  ;;  %v20610_v10 = vadd.f32 %v20609_v24, %v20513_v30  ;;  %v31569_v46 = vand.u32 4294901760, %v31558_v13 }
 0x93b   : > { %v20616_v51 = vpop.f32.mrf.mxu1  ;;  %v20709_v36 = vadd.f32 %v20708_v8, %v20601_v28 }
 0x93c   : > { %v20713_v29 = vpop.f32.mrf.mxu0  ;;  %v20617_v22 = vadd.f32 %v20616_v51, %v20519_v54 }
 0x93d   : > { %v20618_v42 = vpop.f32.mrf.mxu1  ;;  %v20714_v26 = vadd.f32 %v20713_v29, %v20608_v32 }
 0x93e   : > { %v20715_v60 = vpop.f32.mrf.mxu0  ;;  %v20619_v9 = vadd.f32 %v20618_v42, %v20521_v49 }
 0x93f   : > { %v20798_v19 = vpop.f32.mrf.mxu1  ;;  %v20716_v34 = vadd.f32 %v20715_v60, %v20610_v10 }
 0x940   : > { %v20720_v38 = vpop.f32.mrf.mxu0  ;;  %v20799_v21 = vadd.f32 %v20798_v19, %v20707_v52 }
 0x941   : > { %v20800_v47 = vpop.f32.mrf.mxu1  ;;  %v20721_v48 = vadd.f32 %v20720_v38, %v20617_v22 }
 0x942   : > { %v20722_v39 = vpop.f32.mrf.mxu0  ;;  %v20801_v61 = vadd.f32 %v20800_v47, %v20709_v36 }
 0x943   : > { %v20805_v0 = vpop.f32.mrf.mxu1  ;;  %v20723_v56 = vadd.f32 %v20722_v39, %v20619_v9  ;;  %v22788_v39 = vsub.f32 %v31558_v13, %v31569_v46 }
 0x944   : > { %v20806_v62 = vadd.f32 %v20805_v0, %v20714_v26 }
 0x945   : > { %v20807_v58 = vpop.f32.mrf.mxu1 }
 0x946   : > { %v31533_v1 = vpop.f32.mrf.mxu0  ;;  %v20808_v35 = vadd.f32 %v20807_v58, %v20716_v34 }
 0x948   : > { %25365 = vtanh.f32 %v20808_v35  ;;  %v31535_v44 = vpop.f32.mrf.mxu0 }
 0x949   : > { %25367 = vtanh.f32 %v20806_v62 }
 0x94a   : > { %25369 = vtanh.f32 %v20801_v61  ;;  %v20812_v45 = vpop.f32.mrf.mxu1  ;;  %v31537_v59 = vpop.f32.mrf.mxu0  ;;  %v31617_v61 = vand.u32 4294901760, %v22788_v39 }
 0x94b   : > { %25371 = vtanh.f32 %v20799_v21  ;;  %v20813_v16 = vadd.f32 %v20812_v45, %v20721_v48 }
 0x94c   : > { %v20814_v23 = vpop.f32.mrf.mxu1  ;;  %v31539_v53 = vpop.f32.mrf.mxu0 }
 0x94d   : > { %25373 = vtanh.f32 %v20813_v16  ;;  %v20815_v57 = vadd.f32 %v20814_v23, %v20723_v56 }
 0x94f   : > { %25375 = vtanh.f32 %v20815_v57  ;;  %v31544_v20 = vpop.f32.mrf.mxu0 }
 0x950   : > { %v31547_v31 = vpop.f32.mrf.mxu1 }
 0x951   : > { %v31549_v6 = vpop.f32.mrf.mxu0 }
 0x952   : > { %v21020_v40 = vpop.f32.mrf.mxu1 }
 0x953   : > { %v31553_v14 = vpop.f32.mrf.mxu0  ;;  %v21021_v48 = vadd.f32 %v21020_v40, %v31535_v44 }
 0x954   : > { %v21025_v55 = vpop.f32.mrf.mxu1 }
 0x955   : > { %v25366_v50 = vpop.eup %25365  ;;  %v21119_v27 = vpop.f32.mrf.mxu0  ;;  %v21026_v57 = vadd.f32 %v21025_v55, %v31537_v59 }
 0x956   : > { %v25368_v37 = vpop.eup %25367  ;;  %v31555_v43 = vpop.f32.mrf.mxu1  ;;  %v31560_v8 = vand.u32 4294901760, %v25366_v50  ;;  %v21120_v7 = vadd.f32 %v21119_v27, %v21021_v48 }
 0x957   : > { %v25370_v25 = vpop.eup %25369  ;;  %v31564_v63 = vand.u32 4294901760, %v25368_v37  ;;  %v21028_v55 = vadd.f32 %v31555_v43, %v31539_v53 }
 0x958   : > { %v25372_v24 = vpop.eup %25371  ;;  %v31566_v33 = vand.u32 4294901760, %v25370_v25  ;;  %v31581_v38 = vsub.f32 %v25366_v50, %v31560_v8 }
 0x959   : > { %v31562_v51 = vpop.f32.mrf.mxu1  ;;  %v21125_v29 = vpop.f32.mrf.mxu0  ;;  %v31576_v19 = vand.u32 4294901760, %v25372_v24  ;;  %v31589_v28 = vsub.f32 %v25368_v37, %v31564_v63  ;;  %v21019_v37 = vadd.f32 %v31547_v31, %v31533_v1 }
 0x95a   : > { %v25374_v42 = vpop.eup %25373  ;;  %v31599_v12 = vsub.f32 %v25370_v25, %v31566_v33  ;;  %v22836_v54 = vand.u32 4294901760, %v31581_v38  ;;  %v21126_v27 = vadd.f32 %v21125_v29, %v21026_v57  ;;  %v21033_v43 = vadd.f32 %v31562_v51, %v31544_v20 }
 0x95b   : > { %v31571_v60 = vpop.f32.mrf.mxu1  ;;  %v31573_v2 = vpop.f32.mrf.mxu0  ;;  %v22691_v18 = vsel %vm2530_vm3, %v25374_v42, 0  ;;  %v31604_v36 = vsub.f32 %v25372_v24, %v31576_v19  ;;  %v22842_v62 = vand.u32 4294901760, %v31589_v28  ;;  %v21118_v31 = vadd.f32 %v31553_v14, %v21019_v37 }
 0x95c   : > { %v25376_v11 = vpop.eup %25375  ;;  %v31578_v30 = vand.u32 4294901760, %v22691_v18  ;;  %v22848_v49 = vand.u32 4294901760, %v31599_v12  ;;  %v22837_v16 = vsub.f32 %v31581_v38, %v22836_v54  ;;  %v21128_v39 = vadd.f32 %v31573_v2, %v21028_v55 }
 0x95d   : > { %v31583_v41 = vpop.f32.mrf.mxu0  ;;  %v31585_v32 = vpop.f32.mrf.mxu1  ;;  %v22694_v47 = vsel %vm2530_vm3, %v25376_v11, 0  ;;  %v22854_v9 = vand.u32 4294901760, %v31604_v36  ;;  %v22843_v17 = vsub.f32 %v31589_v28, %v22842_v62 }
 0x95e   : > { %v31591_v10 = vand.u32 4294901760, %v22694_v47  ;;  %v31596_v3 = vsub.f32 %v22691_v18, %v31578_v30  ;;  %v22849_v50 = vsub.f32 %v31599_v12, %v22848_v49  ;;  %v22838_v1 = vand.u32 4294901760, %v22837_v16 }
 0x95f   : > { %v31601_v26 = vpop.f32.mrf.mxu0  ;;  %v21215_v0 = vpop.f32.mrf.mxu1  ;;  %v22855_v59 = vsub.f32 %v31604_v36, %v22854_v9  ;;  %v21214_v29 = vadd.f32 %v31585_v32, %v21118_v31 }
 0x960   : > { %22741 = vmatprep.subr.mxu0 %v31591_v10  ;;  %v31608_v34 = vsub.f32 %v22694_v47, %v31591_v10  ;;  %v22830_v4 = vand.u32 4294901760, %v31596_v3  ;;  %v21216_v42 = vadd.f32 %v21215_v0, %v21120_v7  ;;  %v22844_v47 = vand.u32 4294901760, %v22843_v17 }
 0x961   : > { %v21222_v52 = vpop.f32.mrf.mxu1  ;;  %22743 = vmatpush1.msra.mxu0 %v31578_v30  ;;  %v22850_v53 = vand.u32 4294901760, %v22849_v50  ;;  %v22856_v0 = vand.u32 4294901760, %v22855_v59  ;;  %v21134_v17 = vadd.f32 %v31583_v41, %v21033_v43 }
 0x962   : > { %v31614_v58 = vpop.f32.mrf.mxu0  ;;  %22745 = vmatprep.subr.mxu0 %v31560_v8  ;;  %v22824_v35 = vand.u32 4294901760, %v31608_v34  ;;  %v22831_v21 = vsub.f32 %v31596_v3, %v22830_v4 }
 0x963   : > { %v21224_v22 = vpop.f32.mrf.mxu1  ;;  %22747 = vmatpush1.msra.mxu0 %v31564_v63  ;;  %v21322_v20 = vadd.f32 %v31614_v58, %v21214_v29 }
 0x964   : > { %v21323_v45 = vpop.f32.mrf.mxu0  ;;  %22749 = vmatprep.subr.mxu0 %v31566_v33  ;;  %v22825_v56 = vsub.f32 %v31608_v34, %v22824_v35  ;;  %v22832_v24 = vand.u32 4294901760, %v22831_v21 }
 0x965   : > { %v21231_v23 = vpop.f32.mrf.mxu1  ;;  %22751 = vmatpush1.msra.mxu0 %v31576_v19  ;;  %v21324_v21 = vadd.f32 %v21323_v45, %v21216_v42  ;;  %v21035_v45 = vadd.f32 %v31571_v60, %v31549_v6 }
 0x966   : > { %v21328_v44 = vpop.f32.mrf.mxu0  ;;  %22926 = vmatprep.subr.mxu0 %v31608_v34  ;;  %22790 = vmatmul.mubr.f32.vlgmr.msra.gmra.mxu0 %v31617_v61  ;;  %v22826_v40 = vand.u32 4294901760, %v22825_v56  ;;  %v21223_v34 = vadd.f32 %v21222_v52, %v21126_v27  ;;  %v21225_v56 = vadd.f32 %v21224_v22, %v21128_v39  ;;  %v21232_v6 = vadd.f32 %v21231_v23, %v21134_v17 }
 0x967   : > { %v21233_v25 = vpop.f32.mrf.mxu1  ;;  %22929 = vmatpush1.msra.mxu0 %v31596_v3  ;;  %22974 = vmatprep.mubr.f32.mxu0 %v32197_v15 }
 0x968   : > { %v21330_v18 = vpop.f32.mrf.mxu0  ;;  %22827 = vmatprep.subr.mxu1 %v22826_v40  ;;  %22932 = vmatprep.subr.mxu0 %v31581_v38  ;;  %v21329_v16 = vadd.f32 %v21328_v44, %v21223_v34 }
 0x969   : > { %v21413_v11 = vpop.f32.mrf.mxu1  ;;  %22833 = vmatpush1.msra.mxu1 %v22832_v24  ;;  %22935 = vmatpush1.msra.mxu0 %v31589_v28  ;;  %v21331_v32 = vadd.f32 %v21330_v18, %v21225_v56 }
 0x96a   : > { %v21335_v48 = vpop.f32.mrf.mxu0  ;;  %22839 = vmatprep.subr.mxu1 %v22838_v1  ;;  %22938 = vmatprep.subr.mxu0 %v31599_v12  ;;  %v21414_v60 = vadd.f32 %v21413_v11, %v21322_v20 }
 0x96b   : > { %v21415_v14 = vpop.f32.mrf.mxu1  ;;  %22845 = vmatpush1.msra.mxu1 %v22844_v47  ;;  %22941 = vmatpush1.msra.mxu0 %v31604_v36 }
 0x96c   : > { %v21337_v2 = vpop.f32.mrf.mxu0  ;;  %v21416_v52 = vadd.f32 %v21415_v14, %v21324_v21  ;;  %22851 = vmatprep.subr.mxu1 %v22850_v53  ;;  %23092 = vmatprep.subr.mxu0 %v22824_v35  ;;  %v21136_v35 = vadd.f32 %v31601_v26, %v21035_v45 }
 0x96d   : > { %v21420_v51 = vpop.f32.mrf.mxu1  ;;  %22857 = vmatpush1.msra.mxu1 %v22856_v0  ;;  %22977 = vmatmul.mubr.f32.vlgmr.msra.gmra.mxu0 %v31558_v13 }
 0x96e   : > { %v21421_v57 = vadd.f32 %v21420_v51, %v21329_v16  ;;  %v31665_v7 = vpop.f32.mrf.mxu0  ;;  %23096 = vmatpush1.msra.mxu0 %v22830_v4  ;;  %23010 = vmatprep.subr.mxu1 %v31591_v10  ;;  %25377 = vtanh.f32 %v21416_v52  ;;  %v21234_v3 = vadd.f32 %v21233_v25, %v21136_v35  ;;  %v21336_v4 = vadd.f32 %v21335_v48, %v21232_v6 }
 0x96f   : > { %v21422_v41 = vpop.f32.mrf.mxu1  ;;  %23100 = vmatprep.subr.mxu0 %v22836_v54  ;;  %22892 = vmatmul.mubr.f32.vlgmr.msra.gmra.mxu1 %v31551_v5 }
 0x970   : > { %v21423_v58 = vadd.f32 %v21422_v41, %v21331_v32  ;;  %v31674_v22 = vpop.f32.mrf.mxu0  ;;  %23012 = vmatpush1.msra.mxu1 %v31578_v30  ;;  %23104 = vmatpush1.msra.mxu0 %v22842_v62  ;;  %25379 = vtanh.f32 %v21421_v57  ;;  %v21338_v26 = vadd.f32 %v21337_v2, %v21234_v3 }
 0x971   : > { %23014 = vmatprep.subr.mxu1 %v31560_v8  ;;  %23108 = vmatprep.subr.mxu0 %v22848_v49 }
 0x972   : > { %25381 = vtanh.f32 %v21423_v58  ;;  %v21427_v38 = vpop.f32.mrf.mxu1  ;;  %23016 = vmatpush1.msra.mxu1 %v31564_v63  ;;  %23112 = vmatpush1.msra.mxu0 %v22854_v9 }
 0x973   : > { %25383 = vtanh.f32 %v21414_v60  ;;  %v21428_v54 = vadd.f32 %v21427_v38, %v21336_v4  ;;  %v31685_v28 = vpop.f32.mrf.mxu0  ;;  %23018 = vmatprep.subr.mxu1 %v31566_v33  ;;  %23053 = vmatprep.mubr.f32.mxu1 %v32197_v15 }
 0x974   : > { %v21429_v62 = vpop.f32.mrf.mxu1  ;;  %23020 = vmatpush1.msra.mxu1 %v31576_v19  ;;  %23145 = vmatprep.mubr.f32.mxu0 %v32197_v15 }
 0x975   : > { %25385 = vtanh.f32 %v21428_v54  ;;  %v21430_v12 = vadd.f32 %v21429_v62, %v21338_v26  ;;  %v31691_v49 = vpop.f32.mrf.mxu0  ;;  %23180 = vmatprep.subr.mxu1 %v31591_v10  ;;  %23057 = vmatmul.mubr.f32.vlgmr.msra.gmra.mxu1 %v31569_v46 }
 0x976   : > { %23182 = vmatpush1.msra.mxu1 %v31578_v30  ;;  %23147 = vmatmul.mubr.f32.vlgmr.msra.gmra.mxu0 %v31551_v5 }
 0x977   : > { %25387 = vtanh.f32 %v21430_v12  ;;  %23184 = vmatprep.subr.mxu1 %v31560_v8  ;;  %23301 = vmatprep.mubr.f32.mxu0 %v32197_v15 }
 0x978   : > { %v31699_v36 = vpop.f32.mrf.mxu0  ;;  %v31701_v9 = vpop.f32.mrf.mxu1  ;;  %23186 = vmatpush1.msra.mxu1 %v31564_v63  ;;  %23223 = vmatprep.mubr.f32.mxu1 %v32197_v15 }
 0x979   : > { %23188 = vmatprep.subr.mxu1 %v31566_v33 }
 0x97a   : > { %v31706_v10 = vpop.f32.mrf.mxu0  ;;  %v21635_v30 = vpop.f32.mrf.mxu1  ;;  %23190 = vmatpush1.msra.mxu1 %v31576_v19 }
 0x97b   : > { %23225 = vmatmul.mubr.f32.vlgmr.msra.gmra.mxu1 %v31551_v5  ;;  %v25378_v23 = vpop.eup %25377  ;;  %v21636_v3 = vadd.f32 %v21635_v30, %v31674_v22 }
 0x97c   : > { %v31710_v8 = vpop.f32.mrf.mxu0  ;;  %23407 = vmatprep.mubr.f32.mxu1 %v32197_v15  ;;  %v31721_v27 = vand.u32 4294901760, %v25378_v23 }
 0x97d   : > { %v21640_v44 = vpop.f32.mrf.mxu1  ;;  %v25380_v40 = vpop.eup %25379 }
 0x97e   : > { %v21734_v50 = vpop.f32.mrf.mxu0  ;;  %v31717_v24 = vand.u32 4294901760, %v25380_v40  ;;  %v31749_v14 = vsub.f32 %v25378_v23, %v31721_v27  ;;  %v21641_v12 = vadd.f32 %v21640_v44, %v31685_v28 }
 0x97f   : > { %v25382_v63 = vpop.eup %25381  ;;  %v31713_v37 = vpop.f32.mrf.mxu1  ;;  %v21735_v23 = vadd.f32 %v21734_v50, %v21636_v3 }
 0x980   : > { %v25384_v25 = vpop.eup %25383  ;;  %v31715_v33 = vand.u32 4294901760, %v25382_v63  ;;  %v31737_v21 = vsub.f32 %v25380_v40, %v31717_v24  ;;  %v23365_v32 = vand.u32 4294901760, %v31749_v14  ;;  %v21643_v28 = vadd.f32 %v31713_v37, %v31691_v49 }
 0x981   : > { %v31724_v18 = vand.u32 4294901760, %v25384_v25 }
 0x982   : > { %v25386_v59 = vpop.eup %25385  ;;  %v31719_v19 = vpop.f32.mrf.mxu1  ;;  %v31733_v39 = vsub.f32 %v25382_v63, %v31715_v33  ;;  %v23359_v17 = vand.u32 4294901760, %v31737_v21  ;;  %v23366_v62 = vsub.f32 %v31749_v14, %v23365_v32  ;;  %v21634_v63 = vadd.f32 %v31701_v9, %v31665_v7 }
 0x983   : > { %v21740_v55 = vpop.f32.mrf.mxu0  ;;  %v22697_v42 = vsel %vm2530_vm3, %v25386_v59, 0  ;;  %v31752_v0 = vsub.f32 %v25384_v25, %v31724_v18  ;;  %v21648_v37 = vadd.f32 %v31719_v19, %v31699_v36 }
 0x984   : > { %v25388_v1 = vpop.eup %25387  ;;  %v31726_v31 = vpop.f32.mrf.mxu1  ;;  %v31730_v47 = vand.u32 4294901760, %v22697_v42  ;;  %v23353_v45 = vand.u32 4294901760, %v31733_v39  ;;  %v23360_v38 = vsub.f32 %v31737_v21, %v23359_v17  ;;  %v21741_v44 = vadd.f32 %v21740_v55, %v21641_v12 }
 0x985   : > { %v31728_v11 = vpop.f32.mrf.mxu0  ;;  %v22700_v34 = vsel %vm2530_vm3, %v25388_v1, 0  ;;  %v23371_v6 = vand.u32 4294901760, %v31752_v0  ;;  %v23367_v7 = vand.u32 4294901760, %v23366_v62 }
 0x986   : > { %v31741_v53 = vpop.f32.mrf.mxu1  ;;  %v31743_v43 = vand.u32 4294901760, %v22700_v34  ;;  %v31746_v29 = vsub.f32 %v22697_v42, %v31730_v47  ;;  %v23354_v58 = vsub.f32 %v31733_v39, %v23353_v45  ;;  %v23361_v1 = vand.u32 4294901760, %v23360_v38 }
 0x987   : > { %v31739_v48 = vpop.f32.mrf.mxu0  ;;  %v23372_v40 = vsub.f32 %v31752_v0, %v23371_v6  ;;  %v21743_v9 = vadd.f32 %v31728_v11, %v21643_v28  ;;  %v21650_v11 = vadd.f32 %v31726_v31, %v31706_v10 }
 0x988   : > { %v21830_v16 = vpop.f32.mrf.mxu1  ;;  %23258 = vmatprep.subr.mxu0 %v31743_v43  ;;  %v23340_v2 = vsub.f32 %v22700_v34, %v31743_v43  ;;  %v23347_v52 = vand.u32 4294901760, %v31746_v29  ;;  %v23355_v59 = vand.u32 4294901760, %v23354_v58  ;;  %v21733_v34 = vadd.f32 %v31710_v8, %v21634_v63 }
 0x989   : > { %v31754_v56 = vpop.f32.mrf.mxu0  ;;  %23260 = vmatpush1.msra.mxu0 %v31730_v47  ;;  %v21831_v50 = vadd.f32 %v21830_v16, %v21735_v23  ;;  %v23373_v49 = vand.u32 4294901760, %v23372_v40 }
 0x98a   : > { %v21837_v20 = vpop.f32.mrf.mxu1  ;;  %23262 = vmatprep.subr.mxu0 %v31715_v33  ;;  %v23341_v51 = vand.u32 4294901760, %v23340_v2  ;;  %v23348_v35 = vsub.f32 %v31746_v29, %v23347_v52  ;;  %v21829_v55 = vadd.f32 %v31741_v53, %v21733_v34  ;;  %v21751_v10 = vadd.f32 %v31754_v56, %v21650_v11 }
 0x98b   : > { %v21936_v57 = vpop.f32.mrf.mxu0  ;;  %23264 = vmatpush1.msra.mxu0 %v31717_v24 }
 0x98c   : > { %v21839_v60 = vpop.f32.mrf.mxu1  ;;  %23266 = vmatprep.subr.mxu0 %v31721_v27  ;;  %v23342_v41 = vsub.f32 %v23340_v2, %v23341_v51  ;;  %v23349_v30 = vand.u32 4294901760, %v23348_v35  ;;  %v21838_v35 = vadd.f32 %v21837_v20, %v21741_v44  ;;  %v21749_v20 = vadd.f32 %v31739_v48, %v21648_v37 }
 0x98d   : > { %v21938_v4 = vpop.f32.mrf.mxu0  ;;  %23268 = vmatpush1.msra.mxu0 %v31724_v18  ;;  %v21840_v16 = vadd.f32 %v21839_v60, %v21743_v9 }
 0x98e   : > { %v21846_v26 = vpop.f32.mrf.mxu1  ;;  %23443 = vmatprep.subr.mxu0 %v23340_v2  ;;  %23307 = vmatmul.mubr.f32.vlgmr.msra.gmra.mxu0 %v31617_v61  ;;  %v23343_v54 = vand.u32 4294901760, %v23342_v41  ;;  %v21939_v41 = vadd.f32 %v21938_v4, %v21831_v50  ;;  %v21937_v4 = vadd.f32 %v21936_v57, %v21829_v55 }
 0x98f   : > { %v21943_v22 = vpop.f32.mrf.mxu0  ;;  %23446 = vmatpush1.msra.mxu0 %v31746_v29  ;;  %23491 = vmatprep.mubr.f32.mxu0 %v32197_v15  ;;  %v21847_v31 = vadd.f32 %v21846_v26, %v21749_v20 }
 0x990   : > { %v21848_v25 = vpop.f32.mrf.mxu1  ;;  %23344 = vmatprep.subr.mxu1 %v23343_v54  ;;  %23449 = vmatprep.subr.mxu0 %v31733_v39  ;;  %v21944_v3 = vadd.f32 %v21943_v22, %v21838_v35 }
 0x991   : > { %v21945_v42 = vpop.f32.mrf.mxu0  ;;  %23350 = vmatpush1.msra.mxu1 %v23349_v30  ;;  %23452 = vmatpush1.msra.mxu0 %v31737_v21  ;;  %v21849_v39 = vadd.f32 %v21848_v25, %v21751_v10 }
 0x992   : > { %v22028_v2 = vpop.f32.mrf.mxu1  ;;  %23356 = vmatprep.subr.mxu1 %v23355_v59  ;;  %23455 = vmatprep.subr.mxu0 %v31749_v14  ;;  %v21946_v36 = vadd.f32 %v21945_v42, %v21840_v16 }
 0x993   : > { %v21950_v58 = vpop.f32.mrf.mxu0  ;;  %23362 = vmatpush1.msra.mxu1 %v23361_v1  ;;  %23458 = vmatpush1.msra.mxu0 %v31752_v0  ;;  %v22029_v48 = vadd.f32 %v22028_v2, %v21937_v4 }
 0x994   : > { %v22030_v8 = vpop.f32.mrf.mxu1  ;;  %23368 = vmatprep.subr.mxu1 %v23367_v7  ;;  %23609 = vmatprep.subr.mxu0 %v23341_v51 }
 0x995   : > { %v21952_v38 = vpop.f32.mrf.mxu0  ;;  %v22031_v54 = vadd.f32 %v22030_v8, %v21939_v41  ;;  %23374 = vmatpush1.msra.mxu1 %v23373_v49  ;;  %23494 = vmatmul.mubr.f32.vlgmr.msra.gmra.mxu0 %v31558_v13 }
 0x996   : > { %v22035_v62 = vpop.f32.mrf.mxu1  ;;  %23613 = vmatpush1.msra.mxu0 %v23347_v52  ;;  %23527 = vmatprep.subr.mxu1 %v31743_v43  ;;  %v21953_v56 = vadd.f32 %v21952_v38, %v21849_v39 }
 0x997   : > { %v22036_v19 = vadd.f32 %v22035_v62, %v21944_v3  ;;  %v31808_v53 = vpop.f32.mrf.mxu0  ;;  %23617 = vmatprep.subr.mxu0 %v23353_v45  ;;  %23409 = vmatmul.mubr.f32.vlgmr.msra.gmra.mxu1 %v31551_v5  ;;  %25389 = vtanh.f32 %v22031_v54  ;;  %v21951_v45 = vadd.f32 %v21950_v58, %v21847_v31 }
 0x998   : > { %v22037_v51 = vpop.f32.mrf.mxu1  ;;  %23529 = vmatpush1.msra.mxu1 %v31730_v47  ;;  %23621 = vmatpush1.msra.mxu0 %v23359_v17 }
 0x999   : > { %v22038_v29 = vadd.f32 %v22037_v51, %v21946_v36  ;;  %v31817_v52 = vpop.f32.mrf.mxu0  ;;  %23531 = vmatprep.subr.mxu1 %v31715_v33  ;;  %23625 = vmatprep.subr.mxu0 %v23365_v32  ;;  %25391 = vtanh.f32 %v22036_v19 }
 0x99a   : > { %23533 = vmatpush1.msra.mxu1 %v31717_v24  ;;  %23629 = vmatpush1.msra.mxu0 %v23371_v6 }
 0x99b   : > { %25393 = vtanh.f32 %v22038_v29  ;;  %v22042_v21 = vpop.f32.mrf.mxu1  ;;  %23535 = vmatprep.subr.mxu1 %v31721_v27  ;;  %23570 = vmatprep.mubr.f32.mxu1 %v32197_v15 }
 0x99c   : > { %25395 = vtanh.f32 %v22029_v48  ;;  %v22043_v17 = vadd.f32 %v22042_v21, %v21951_v45  ;;  %v31827_v57 = vpop.f32.mrf.mxu0  ;;  %23537 = vmatpush1.msra.mxu1 %v31724_v18  ;;  %23662 = vmatprep.mubr.f32.mxu0 %v32197_v15 }
 0x99d   : > { %v22044_v14 = vpop.f32.mrf.mxu1  ;;  %23697 = vmatprep.subr.mxu1 %v31743_v43  ;;  %23574 = vmatmul.mubr.f32.vlgmr.msra.gmra.mxu1 %v31569_v46 }
 0x99e   : > { %25397 = vtanh.f32 %v22043_v17  ;;  %v22045_v0 = vadd.f32 %v22044_v14, %v21953_v56  ;;  %v31833_v32 = vpop.f32.mrf.mxu0  ;;  %23699 = vmatpush1.msra.mxu1 %v31730_v47  ;;  %23664 = vmatmul.mubr.f32.vlgmr.msra.gmra.mxu0 %v31551_v5 }
 0x99f   : > { %23701 = vmatprep.subr.mxu1 %v31715_v33  ;;  %23818 = vmatprep.mubr.f32.mxu0 %v32197_v15 }
 0x9a0   : > { %25399 = vtanh.f32 %v22045_v0  ;;  %23703 = vmatpush1.msra.mxu1 %v31717_v24  ;;  %23740 = vmatprep.mubr.f32.mxu1 %v32197_v15 }
 0x9a1   : > { %v31841_v43 = vpop.f32.mrf.mxu0  ;;  %v22248_v6 = vpop.f32.mrf.mxu1  ;;  %23705 = vmatprep.subr.mxu1 %v31721_v27 }
 0x9a2   : > { %23707 = vmatpush1.msra.mxu1 %v31724_v18  ;;  %v22249_v48 = vadd.f32 %v22248_v6, %v31808_v53 }
 0x9a3   : > { %v31845_v60 = vpop.f32.mrf.mxu0  ;;  %v22250_v47 = vpop.f32.mrf.mxu1  ;;  %23742 = vmatmul.mubr.f32.vlgmr.msra.gmra.mxu1 %v31551_v5 }
 0x9a4   : > { %23924 = vmatprep.mubr.f32.mxu1 %v32197_v15  ;;  %v25390_v26 = vpop.eup %25389  ;;  %v22251_v56 = vadd.f32 %v22250_v47, %v31817_v52 }
 0x9a5   : > { %v22347_v33 = vpop.f32.mrf.mxu0  ;;  %v31857_v28 = vand.u32 4294901760, %v25390_v26 }
 0x9a6   : > { %v22255_v12 = vpop.f32.mrf.mxu1  ;;  %v25392_v24 = vpop.eup %25391  ;;  %v22348_v17 = vadd.f32 %v22347_v33, %v22249_v48 }
 0x9a7   : > { %v22349_v23 = vpop.f32.mrf.mxu0  ;;  %v31853_v27 = vand.u32 4294901760, %v25392_v24  ;;  %v31883_v55 = vsub.f32 %v25390_v26, %v31857_v28  ;;  %v22256_v6 = vadd.f32 %v22255_v12, %v31827_v57 }
 0x9a8   : > { %v25394_v22 = vpop.eup %25393  ;;  %v31849_v30 = vpop.f32.mrf.mxu1  ;;  %v22350_v47 = vadd.f32 %v22349_v23, %v22251_v56 }
 0x9a9   : > { %v25396_v40 = vpop.eup %25395  ;;  %v31851_v63 = vand.u32 4294901760, %v25394_v22  ;;  %v31873_v35 = vsub.f32 %v25392_v24, %v31853_v27  ;;  %v23882_v36 = vand.u32 4294901760, %v31883_v55  ;;  %v22258_v57 = vadd.f32 %v31849_v30, %v31833_v32 }
 0x9aa   : > { %v31860_v50 = vand.u32 4294901760, %v25396_v40 }
 0x9ab   : > { %v25398_v18 = vpop.eup %25397  ;;  %v31855_v25 = vpop.f32.mrf.mxu1  ;;  %v31869_v7 = vsub.f32 %v25394_v22, %v31851_v63  ;;  %v23876_v20 = vand.u32 4294901760, %v31873_v35  ;;  %v23883_v0 = vsub.f32 %v31883_v55, %v23882_v36 }
 0x9ac   : > { %v22355_v59 = vpop.f32.mrf.mxu0  ;;  %v22703_v44 = vsel %vm2530_vm3, %v25398_v18, 0  ;;  %v31886_v8 = vsub.f32 %v25396_v40, %v31860_v50 }
 0x9ad   : > { %v25400_v42 = vpop.eup %25399  ;;  %v31862_v1 = vpop.f32.mrf.mxu1  ;;  %v31866_v2 = vand.u32 4294901760, %v22703_v44  ;;  %v23870_v11 = vand.u32 4294901760, %v31869_v7  ;;  %v23877_v21 = vsub.f32 %v31873_v35, %v23876_v20  ;;  %v22356_v12 = vadd.f32 %v22355_v59, %v22256_v6 }
 0x9ae   : > { %v31864_v34 = vpop.f32.mrf.mxu0  ;;  %v22706_v9 = vsel %vm2530_vm3, %v25400_v42, 0  ;;  %v23888_v31 = vand.u32 4294901760, %v31886_v8  ;;  %v23884_v23 = vand.u32 4294901760, %v23883_v0  ;;  %v22265_v30 = vadd.f32 %v31862_v1, %v31845_v60 }
 0x9af   : > { %v22443_v58 = vpop.f32.mrf.mxu1  ;;  %v31877_v49 = vand.u32 4294901760, %v22706_v9  ;;  %v31880_v37 = vsub.f32 %v22703_v44, %v31866_v2  ;;  %v23871_v39 = vsub.f32 %v31869_v7, %v23870_v11  ;;  %v23878_v44 = vand.u32 4294901760, %v23877_v21 }
 0x9b0   : > { %v31875_v41 = vpop.f32.mrf.mxu0  ;;  %v23889_v52 = vsub.f32 %v31886_v8, %v23888_v31  ;;  %v22444_v33 = vadd.f32 %v22443_v58, %v22348_v17  ;;  %v22263_v58 = vadd.f32 %v31855_v25, %v31841_v43 }
 0x9b1   : > { %v22445_v3 = vpop.f32.mrf.mxu1  ;;  %23775 = vmatprep.subr.mxu0 %v31877_v49  ;;  %v31892_v38 = vsub.f32 %v22706_v9, %v31877_v49  ;;  %v23864_v54 = vand.u32 4294901760, %v31880_v37  ;;  %v23872_v40 = vand.u32 4294901760, %v23871_v39 }
 0x9b2   : > { %v31888_v16 = vpop.f32.mrf.mxu0  ;;  %23777 = vmatpush1.msra.mxu0 %v31866_v2  ;;  %v22446_v42 = vadd.f32 %v22445_v3, %v22350_v47  ;;  %v23890_v32 = vand.u32 4294901760, %v23889_v52  ;;  %v22364_v39 = vadd.f32 %v31875_v41, %v22263_v58 }
 0x9b3   : > { %v22452_v4 = vpop.f32.mrf.mxu1  ;;  %23779 = vmatprep.subr.mxu0 %v31851_v63  ;;  %v23858_v62 = vand.u32 4294901760, %v31892_v38  ;;  %v23865_v10 = vsub.f32 %v31880_v37, %v23864_v54  ;;  %v22366_v25 = vadd.f32 %v31888_v16, %v22265_v30 }
 0x9b4   : > { %v22551_v19 = vpop.f32.mrf.mxu0  ;;  %23781 = vmatpush1.msra.mxu0 %v31853_v27  ;;  %v22453_v48 = vadd.f32 %v22452_v4, %v22356_v12 }
 0x9b5   : > { %v22454_v51 = vpop.f32.mrf.mxu1  ;;  %23783 = vmatprep.subr.mxu0 %v31857_v28  ;;  %v23859_v29 = vsub.f32 %v31892_v38, %v23858_v62  ;;  %v23866_v24 = vand.u32 4294901760, %v23865_v10  ;;  %v22552_v9 = vadd.f32 %v22551_v19, %v22444_v33  ;;  %v22358_v10 = vadd.f32 %v31864_v34, %v22258_v57 }
 0x9b6   : > { %v22553_v45 = vpop.f32.mrf.mxu0  ;;  %23785 = vmatpush1.msra.mxu0 %v31860_v50 }
 0x9b7   : > { %v22461_v53 = vpop.f32.mrf.mxu1  ;;  %23960 = vmatprep.subr.mxu0 %v31892_v38  ;;  %23824 = vmatmul.mubr.f32.vlgmr.msra.gmra.mxu0 %v31617_v61  ;;  %v23860_v14 = vand.u32 4294901760, %v23859_v29  ;;  %v22554_v59 = vadd.f32 %v22553_v45, %v22446_v42  ;;  %v22455_v21 = vadd.f32 %v22454_v51, %v22358_v10 }
 0x9b8   : > { %v22558_v26 = vpop.f32.mrf.mxu0  ;;  %23963 = vmatpush1.msra.mxu0 %v31880_v37  ;;  %24008 = vmatprep.mubr.f32.mxu0 %v32197_v15  ;;  %v22462_v60 = vadd.f32 %v22461_v53, %v22364_v39 }
 0x9b9   : > { %v22463_v22 = vpop.f32.mrf.mxu1  ;;  %23861 = vmatprep.subr.mxu1 %v23860_v14  ;;  %23966 = vmatprep.subr.mxu0 %v31869_v7  ;;  %v22559_v43 = vadd.f32 %v22558_v26, %v22453_v48 }
 0x9ba   : > { %v22560_v18 = vpop.f32.mrf.mxu0  ;;  %23867 = vmatpush1.msra.mxu1 %v23866_v24  ;;  %23969 = vmatpush1.msra.mxu0 %v31873_v35  ;;  %v22464_v37 = vadd.f32 %v22463_v22, %v22366_v25 }
 0x9bb   : > { %v22643_v38 = vpop.f32.mrf.mxu1  ;;  %23873 = vmatprep.subr.mxu1 %v23872_v40  ;;  %23972 = vmatprep.subr.mxu0 %v31883_v55  ;;  %v22561_v1 = vadd.f32 %v22560_v18, %v22455_v21 }
 0x9bc   : > { %23879 = vmatpush1.msra.mxu1 %v23878_v44  ;;  %23975 = vmatpush1.msra.mxu0 %v31886_v8  ;;  %v22565_v3 = vpop.f32.mrf.mxu0  ;;  %v22644_v19 = vadd.f32 %v22643_v38, %v22552_v9 }
 0x9bd   : > { %v22645_v29 = vpop.f32.mrf.mxu1  ;;  %23885 = vmatprep.subr.mxu1 %v23884_v23  ;;  %24126 = vmatprep.subr.mxu0 %v23858_v62  ;;  %v22566_v16 = vadd.f32 %v22565_v3, %v22462_v60 }
 0x9be   : > { %23891 = vmatpush1.msra.mxu1 %v23890_v32  ;;  %24011 = vmatmul.mubr.f32.vlgmr.msra.gmra.mxu0 %v31558_v13  ;;  %v22646_v34 = vadd.f32 %v22645_v29, %v22554_v59  ;;  %25401 = vtanh.f32 %v22644_v19  ;;  %v22567_v41 = vpop.f32.mrf.mxu0 }
 0x9bf   : > { %v22650_v4 = vpop.f32.mrf.mxu1  ;;  %24130 = vmatpush1.msra.mxu0 %v23864_v54  ;;  %24044 = vmatprep.subr.mxu1 %v31877_v49 }
 0x9c0   : > { %v22651_v45 = vadd.f32 %v22650_v4, %v22559_v43  ;;  %24134 = vmatprep.subr.mxu0 %v23870_v11  ;;  %23926 = vmatmul.mubr.f32.vlgmr.msra.gmra.mxu1 %v31551_v5  ;;  %v22568_v11 = vadd.f32 %v22567_v41, %v22464_v37 }
 0x9c1   : > { %v22652_v62 = vpop.f32.mrf.mxu1  ;;  %24046 = vmatpush1.msra.mxu1 %v31866_v2  ;;  %24138 = vmatpush1.msra.mxu0 %v23876_v20 }
 0x9c2   : > { %25403 = vtanh.f32 %v22651_v45  ;;  %v22653_v54 = vadd.f32 %v22652_v62, %v22561_v1  ;;  %24048 = vmatprep.subr.mxu1 %v31851_v63  ;;  %24142 = vmatprep.subr.mxu0 %v23882_v36 }
 0x9c3   : > { %25405 = vtanh.f32 %v22646_v34  ;;  %v22657_v7 = vpop.f32.mrf.mxu1  ;;  %24050 = vmatpush1.msra.mxu1 %v31853_v27  ;;  %24146 = vmatpush1.msra.mxu0 %v23888_v31 }
 0x9c4   : > { %25407 = vtanh.f32 %v22653_v54  ;;  %v22658_v35 = vadd.f32 %v22657_v7, %v22566_v16  ;;  %24052 = vmatprep.subr.mxu1 %v31857_v28  ;;  %24087 = vmatprep.mubr.f32.mxu1 %v32197_v15 }
 0x9c5   : > { %v22659_v20 = vpop.f32.mrf.mxu1  ;;  %24054 = vmatpush1.msra.mxu1 %v31860_v50  ;;  %24179 = vmatprep.mubr.f32.mxu0 %v32197_v15 }
 0x9c6   : > { %25409 = vtanh.f32 %v22658_v35  ;;  %v22660_v55 = vadd.f32 %v22659_v20, %v22568_v11  ;;  %24214 = vmatprep.subr.mxu1 %v31877_v49  ;;  %24091 = vmatmul.mubr.f32.vlgmr.msra.gmra.mxu1 %v31569_v46 }
 0x9c7   : > { %24216 = vmatpush1.msra.mxu1 %v31866_v2  ;;  %24181 = vmatmul.mubr.f32.vlgmr.msra.gmra.mxu0 %v31551_v5 }
 0x9c8   : > { %25411 = vtanh.f32 %v22660_v55  ;;  %24218 = vmatprep.subr.mxu1 %v31851_v63  ;;  %24335 = vmatprep.mubr.f32.mxu0 %v32197_v15 }
 0x9c9   : > { %24220 = vmatpush1.msra.mxu1 %v31853_v27  ;;  %24257 = vmatprep.mubr.f32.mxu1 %v32197_v15 }
 0x9ca   : > { %24222 = vmatprep.subr.mxu1 %v31857_v28 }
 0x9cb   : > { %24224 = vmatpush1.msra.mxu1 %v31860_v50  ;;  %v25402_v2 = vpop.eup %25401 }
 0x9cc   : > { %24259 = vmatmul.mubr.f32.vlgmr.msra.gmra.mxu1 %v31551_v5  ;;  %v31980_v28 = vand.u32 4294901760, %v25402_v2 }
 0x9cd   : > { %24441 = vmatprep.mubr.f32.mxu1 %v32197_v15 }
 0x9ce   : > { %v24404_v52 = vsub.f32 %v25402_v2, %v31980_v28 }
 0x9cf   : > { %v25404_v49 = vpop.eup %25403 }
 0x9d0   : > { %v25406_v8 = vpop.eup %25405  ;;  %v31975_v63 = vand.u32 4294901760, %v25404_v49  ;;  %v24405_v44 = vand.u32 4294901760, %v24404_v52 }
 0x9d1   : > { %v25408_v36 = vpop.eup %25407  ;;  %v31977_v27 = vand.u32 4294901760, %v25406_v8 }
 0x9d2   : > { %v31973_v31 = vand.u32 4294901760, %v25408_v36  ;;  %v24392_v0 = vsub.f32 %v25404_v49, %v31975_v63  ;;  %v24406_v48 = vsub.f32 %v24404_v52, %v24405_v44  ;;  %v25476_v49 = vmov 1983009808  }
 0x9d3   : > { %v25410_v51 = vpop.eup %25409  ;;  %v24398_v24 = vsub.f32 %v25406_v8, %v31977_v27  ;;  %v24793_v8 = vunpack.c.l.s4 %v25476_v49 }
 0x9d4   : > { %v22709_v56 = vsel %vm2530_vm3, %v25410_v51, 0  ;;  %v24386_v53 = vsub.f32 %v25408_v36, %v31973_v31  ;;  %v24393_v40 = vand.u32 4294901760, %v24392_v0  ;;  %v24407_v3 = vand.u32 4294901760, %v24406_v48 }
 0x9d5   : > { %v25412_v50 = vpop.eup %25411  ;;  %v31982_v17 = vand.u32 4294901760, %v22709_v56  ;;  %v24399_v12 = vand.u32 4294901760, %v24398_v24  ;;  %v24795_v36 = vlaneseq }
 0x9d6   : > { %v22712_v14 = vsel %vm2530_vm3, %v25412_v50, 0  ;;  %v24387_v22 = vand.u32 4294901760, %v24386_v53  ;;  %v24394_v38 = vsub.f32 %v24392_v0, %v24393_v40  ;;  %v24794_v50 = vunpack.c.0.s8 %v24793_v8 }
 0x9d7   : > { %v24291_v6 = vand.u32 4294901760, %v22712_v14  ;;  %v24380_v26 = vsub.f32 %v22709_v56, %v31982_v17  ;;  %v24400_v58 = vsub.f32 %v24398_v24, %v24399_v12 }
 0x9d8   : > { %v24388_v9 = vsub.f32 %v24386_v53, %v24387_v22  ;;  %v24395_v30 = vand.u32 4294901760, %v24394_v38 }
 0x9d9   : > { %24292 = vmatprep.subr.mxu0 %v24291_v6  ;;  %v24374_v47 = vsub.f32 %v22712_v14, %v24291_v6  ;;  %v24381_v33 = vand.u32 4294901760, %v24380_v26  ;;  %v24401_v59 = vand.u32 4294901760, %v24400_v58 }
 0x9da   : > { %24294 = vmatpush1.msra.mxu0 %v31982_v17  ;;  %v24389_v32 = vand.u32 4294901760, %v24388_v9 }
 0x9db   : > { %24296 = vmatprep.subr.mxu0 %v31973_v31  ;;  %v24375_v57 = vand.u32 4294901760, %v24374_v47  ;;  %v24382_v18 = vsub.f32 %v24380_v26, %v24381_v33 }
 0x9dc   : > { %24298 = vmatpush1.msra.mxu0 %v31975_v63 }
 0x9dd   : > { %24300 = vmatprep.subr.mxu0 %v31977_v27  ;;  %v24376_v42 = vsub.f32 %v24374_v47, %v24375_v57  ;;  %v24383_v10 = vand.u32 4294901760, %v24382_v18 }
 0x9de   : > { %24302 = vmatpush1.msra.mxu0 %v31980_v28 }
 0x9df   : > { %24477 = vmatprep.subr.mxu0 %v24374_v47  ;;  %24341 = vmatmul.mubr.f32.vlgmr.msra.gmra.mxu0 %v31617_v61  ;;  %v24377_v23 = vand.u32 4294901760, %v24376_v42 }
 0x9e0   : > { %24480 = vmatpush1.msra.mxu0 %v24380_v26  ;;  %24525 = vmatprep.mubr.f32.mxu0 %v32197_v15 }
 0x9e1   : > { %24378 = vmatprep.subr.mxu1 %v24377_v23  ;;  %24483 = vmatprep.subr.mxu0 %v24386_v53 }
 0x9e2   : > { %24384 = vmatpush1.msra.mxu1 %v24383_v10  ;;  %24486 = vmatpush1.msra.mxu0 %v24392_v0 }
 0x9e3   : > { %24390 = vmatprep.subr.mxu1 %v24389_v32  ;;  %24489 = vmatprep.subr.mxu0 %v24398_v24 }
 0x9e4   : > { %24396 = vmatpush1.msra.mxu1 %v24395_v30  ;;  %24492 = vmatpush1.msra.mxu0 %v24404_v52 }
 0x9e5   : > { %24402 = vmatprep.subr.mxu1 %v24401_v59  ;;  %24643 = vmatprep.subr.mxu0 %v24375_v57 }
 0x9e6   : > { %24408 = vmatpush1.msra.mxu1 %v24407_v3  ;;  %24528 = vmatmul.mubr.f32.vlgmr.msra.gmra.mxu0 %v31558_v13 }
 0x9e7   : > { %24647 = vmatpush1.msra.mxu0 %v24381_v33  ;;  %24561 = vmatprep.subr.mxu1 %v24291_v6 }
 0x9e8   : > { %24651 = vmatprep.subr.mxu0 %v24387_v22  ;;  %24443 = vmatmul.mubr.f32.vlgmr.msra.gmra.mxu1 %v31551_v5 }
 0x9e9   : > { %24563 = vmatpush1.msra.mxu1 %v31982_v17  ;;  %24655 = vmatpush1.msra.mxu0 %v24393_v40 }
 0x9ea   : > { %24565 = vmatprep.subr.mxu1 %v31973_v31  ;;  %24659 = vmatprep.subr.mxu0 %v24399_v12 }
 0x9eb   : > { %24567 = vmatpush1.msra.mxu1 %v31975_v63  ;;  %24663 = vmatpush1.msra.mxu0 %v24405_v44 }
 0x9ec   : > { %24569 = vmatprep.subr.mxu1 %v31977_v27  ;;  %24604 = vmatprep.mubr.f32.mxu1 %v32197_v15 }
 0x9ed   : > { %24571 = vmatpush1.msra.mxu1 %v31980_v28  ;;  %24696 = vmatprep.mubr.f32.mxu0 %v32197_v15 }
 0x9ee   : > { %24731 = vmatprep.subr.mxu1 %v24291_v6  ;;  %24608 = vmatmul.mubr.f32.vlgmr.msra.gmra.mxu1 %v31569_v46 }
 0x9ef   : > { %24733 = vmatpush1.msra.mxu1 %v31982_v17  ;;  %24698 = vmatmul.mubr.f32.vlgmr.msra.gmra.mxu0 %v31551_v5  ;;  %v24796_v17 = vshrl.u32 %v24795_v36, 7 }
 0x9f0   : > { %24735 = vmatprep.subr.mxu1 %v31973_v31  ;;  %24774 = vmatprep.mubr.f32.mxu1 %v32197_v15 }
 0x9f1   : > { %24737 = vmatpush1.msra.mxu1 %v31975_v63  ;;  %v24797_v22 = vsub.s32 %v24794_v50, %v24796_v17 }
 0x9f2   : > { %24739 = vmatprep.subr.mxu1 %v31977_v27 }
 0x9f3   : > { %24741 = vmatpush1.msra.mxu1 %v31980_v28 }
 0x9f4   : > { %24776 = vmatmul.mubr.f32.vlgmr.msra.gmra.mxu1 %v31551_v5 }
 0xa26   : > { %v22791_v13 = vpop.f32.mrf.mxu0 }
 0xa28   : > { %v22793_v61 = vpop.f32.mrf.mxu0 }
 0xa2d   : > { %v22978_v19 = vpop.f32.mrf.mxu0 }
 0xa2f   : > { %v22893_v46 = vpop.f32.mrf.mxu1  ;;  %v22980_v29 = vpop.f32.mrf.mxu0 }
 0xa30   : > { %v22894_v60 = vadd.f32 %v22893_v46, %v22791_v13 }
 0xa31   : > { %v22895_v39 = vpop.f32.mrf.mxu1 }
 0xa32   : > { %v22896_v1 = vadd.f32 %v22895_v39, %v22793_v61  ;;  %v22979_v62 = vadd.f32 %v22978_v19, %v22894_v60 }
 0xa34   : > { %v22981_v37 = vadd.f32 %v22980_v29, %v22896_v1 }
 0xa35   : > { %v23058_v43 = vpop.f32.mrf.mxu1 }
 0xa36   : > { %v23148_v21 = vpop.f32.mrf.mxu0  ;;  %v23059_v54 = vadd.f32 %v23058_v43, %v22979_v62 }
 0xa37   : > { %v23060_v34 = vpop.f32.mrf.mxu1 }
 0xa38   : > { %v23150_v25 = vpop.f32.mrf.mxu0  ;;  %v23061_v7 = vadd.f32 %v23060_v34, %v22981_v37  ;;  %v23149_v31 = vadd.f32 %v23148_v21, %v23059_v54 }
 0xa3a   : > { %v23151_v63 = vadd.f32 %v23150_v25, %v23061_v7 }
 0xa3b   : > { %v23226_v15 = vpop.f32.mrf.mxu1 }
 0xa3c   : > { %v23227_v14 = vadd.f32 %v23226_v15, %v23149_v31 }
 0xa3d   : > { %v23228_v41 = vpop.f32.mrf.mxu1 }
 0xa3e   : > { %v23229_v0 = vadd.f32 %v23228_v41, %v23151_v63 }
 0xa40   : > { %v24790_v33 = vcombine.low %v23227_v14, %v23229_v0 }
 0xa42   : > { %v24798_v18 = vrot.slane %v24790_v33, %v24797_v22 }
 0xa4e   : > { %v23308_v4 = vpop.f32.mrf.mxu0 }
 0xa50   : > { %v23310_v45 = vpop.f32.mrf.mxu0 }
 0xa55   : > { %v23495_v16 = vpop.f32.mrf.mxu0 }
 0xa57   : > { %v23410_v5 = vpop.f32.mrf.mxu1  ;;  %v23497_v20 = vpop.f32.mrf.mxu0 }
 0xa58   : > { %v23411_v11 = vadd.f32 %v23410_v5, %v23308_v4 }
 0xa59   : > { %v23412_v35 = vpop.f32.mrf.mxu1 }
 0xa5a   : > { %v23413_v55 = vadd.f32 %v23412_v35, %v23310_v45  ;;  %v23496_v2 = vadd.f32 %v23495_v16, %v23411_v11 }
 0xa5c   : > { %v23498_v51 = vadd.f32 %v23497_v20, %v23413_v55 }
 0xa5d   : > { %v23575_v27 = vpop.f32.mrf.mxu1 }
 0xa5e   : > { %v23576_v56 = vadd.f32 %v23575_v27, %v23496_v2  ;;  %v23665_v28 = vpop.f32.mrf.mxu0 }
 0xa5f   : > { %v23577_v53 = vpop.f32.mrf.mxu1 }
 0xa60   : > { %v23578_v6 = vadd.f32 %v23577_v53, %v23498_v51  ;;  %v23666_v26 = vadd.f32 %v23665_v28, %v23576_v56  ;;  %v23667_v24 = vpop.f32.mrf.mxu0 }
 0xa62   : > { %v23668_v52 = vadd.f32 %v23667_v24, %v23578_v6 }
 0xa63   : > { %v23743_v47 = vpop.f32.mrf.mxu1 }
 0xa64   : > { %v23744_v40 = vadd.f32 %v23743_v47, %v23666_v26 }
 0xa65   : > { %v23745_v57 = vpop.f32.mrf.mxu1 }
 0xa66   : > { %v23746_v12 = vadd.f32 %v23745_v57, %v23668_v52 }
 0xa68   : > { %v24791_v44 = vcombine.low %v23744_v40, %v23746_v12 }
 0xa6a   : > { %v24805_v42 = vrot.slane %v24791_v44, %v24797_v22 }
 0xa6c   : > { %v24806_v9 = vcombine.low %v24798_v18, %v24805_v42 }
 0xa6e   : > { %24826 = vst [vmem:[%s32018_s13] sm:$0xff] %v24806_v9 }
 0xa77   : > { %v23825_v38 = vpop.f32.mrf.mxu0 }
 0xa79   : > { %v23827_v23 = vpop.f32.mrf.mxu0 }
 0xa7e   : > { %v24012_v10 = vpop.f32.mrf.mxu0 }
 0xa80   : > { %v23927_v58 = vpop.f32.mrf.mxu1  ;;  %v24014_v32 = vpop.f32.mrf.mxu0 }
 0xa81   : > { %v23928_v46 = vadd.f32 %v23927_v58, %v23825_v38 }
 0xa82   : > { %v23929_v48 = vpop.f32.mrf.mxu1 }
 0xa83   : > { %v23930_v29 = vadd.f32 %v23929_v48, %v23827_v23  ;;  %v24013_v43 = vadd.f32 %v24012_v10, %v23928_v46 }
 0xa85   : > { %v24015_v25 = vadd.f32 %v24014_v32, %v23930_v29 }
 0xa86   : > { %v24092_v30 = vpop.f32.mrf.mxu1 }
 0xa87   : > { %v24182_v59 = vpop.f32.mrf.mxu0  ;;  %v24093_v60 = vadd.f32 %v24092_v30, %v24013_v43 }
 0xa88   : > { %v24094_v3 = vpop.f32.mrf.mxu1 }
 0xa89   : > { %v24184_v13 = vpop.f32.mrf.mxu0  ;;  %v24095_v1 = vadd.f32 %v24094_v3, %v24015_v25  ;;  %v24183_v16 = vadd.f32 %v24182_v59, %v24093_v60 }
 0xa8b   : > { %v24185_v5 = vadd.f32 %v24184_v13, %v24095_v1 }
 0xa8c   : > { %v24260_v19 = vpop.f32.mrf.mxu1 }
 0xa8d   : > { %v24261_v49 = vadd.f32 %v24260_v19, %v24183_v16 }
 0xa8e   : > { %v24262_v21 = vpop.f32.mrf.mxu1 }
 0xa8f   : > { %v24263_v8 = vadd.f32 %v24262_v21, %v24185_v5 }
 0xa91   : > { %v24807_v27 = vcombine.low %v24261_v49, %v24263_v8 }
 0xa93   : > { %v24815_v17 = vrot.slane %v24807_v27, %v24797_v22 }
 0xa9f   : > { %v24342_v61 = vpop.f32.mrf.mxu0 }
 0xaa1   : > { %v24344_v39 = vpop.f32.mrf.mxu0 }
 0xaa6   : > { %v24529_v4 = vpop.f32.mrf.mxu0 }
 0xaa8   : > { %v24444_v34 = vpop.f32.mrf.mxu1  ;;  %v24531_v62 = vpop.f32.mrf.mxu0 }
 0xaa9   : > { %v24445_v45 = vadd.f32 %v24444_v34, %v24342_v61 }
 0xaaa   : > { %v24446_v15 = vpop.f32.mrf.mxu1 }
 0xaab   : > { %v24447_v41 = vadd.f32 %v24446_v15, %v24344_v39  ;;  %v24530_v54 = vadd.f32 %v24529_v4, %v24445_v45 }
 0xaad   : > { %v24532_v7 = vadd.f32 %v24531_v62, %v24447_v41 }
 0xaae   : > { %v24609_v37 = vpop.f32.mrf.mxu1 }
 0xaaf   : > { %v24699_v11 = vpop.f32.mrf.mxu0  ;;  %v24610_v20 = vadd.f32 %v24609_v37, %v24530_v54 }
 0xab0   : > { %v24611_v35 = vpop.f32.mrf.mxu1 }
 0xab1   : > { %v24612_v55 = vadd.f32 %v24611_v35, %v24532_v7  ;;  %v24701_v2 = vpop.f32.mrf.mxu0  ;;  %v24700_v31 = vadd.f32 %v24699_v11, %v24610_v20 }
 0xab3   : > { %v24702_v63 = vadd.f32 %v24701_v2, %v24612_v55 }
 0xab4   : > { %v24777_v36 = vpop.f32.mrf.mxu1 }
 0xab5   : > { %v24778_v56 = vadd.f32 %v24777_v36, %v24700_v31 }
 0xab6   : > { %v24779_v51 = vpop.f32.mrf.mxu1 }
 0xab7   : > { %v24780_v28 = vadd.f32 %v24779_v51, %v24702_v63 }
 0xab9   : > { %v24808_v50 = vcombine.low %v24778_v56, %v24780_v28 }
 0xabb   : > { %v24822_v53 = vrot.slane %v24808_v50, %v24797_v22 }
 0xabd   : > { %v24823_v14 = vcombine.low %v24815_v17, %v24822_v53 }
 0xabf   : > { %24827 = vst [vmem:[%s32018_s13 + $0x8] sm:$0xff] %v24823_v14 }
 0xac0   : > { %25426 = shalt.err (!%p25423_p3)
}
 0xac1   : > { %s25427_s6 = scalar_lea.hbm %s24841_s27, 256  ;;  %s25431_s9 = scalar_lea.hbm %s32062_s4, 512 }
 0xac2   : > { %p25428_p4 = scmp.ne.s32.totalorder %s24841_s27, %s25427_s6  ;;  %p25432_p9 = scmp.lt.s32.totalorder %s24841_s27, %s32062_s4 }
 0xac3   : > { %p25433_p10 = scmp.lt.s32.totalorder %s25431_s9, %s25427_s6 }
 0xac4   : > { %p25429_p7 = pnand %p25428_p4, %p25541_p5 }
 0xac5   : > { %p25434_p11 = por %p25433_p10, %p25432_p9 }
 0xac6   : > { %p25430_p8 = pneg %p25429_p7 }
 0xac8   : > { %p25435_p12 = pnand %p25434_p11, %p25430_p8 }
 0xaca   : > { %25438 = shalt.err (!%p25435_p12)
}
 0xacb   : > { %24936 = dma.vmem_to_hbm [thread:$0]  (%p25541_p5), %s24844_s20, 256, %s24841_s27, %s24829_s28  }
 0xacc PF: > { %p24942_p13 = scmp.ge.s32.totalorder %s25473_s18, 2  ;;  %s24855_s12 = sand.u32 1, %s25461_s15  }
 0xacd   : > { %s24856_s13 = scalar_lea.sflag [#allocation3], %s24855_s12 }
 0xace   : > { %p24939_p0 = pnand %p24942_p13, %p25545_p6 }
 0xad0   : > { %p24940_p1 = pneg %p24939_p0 }
 0xad2   : > { %25456 = dma.done.wait (%p24940_p1), %s24856_s13, 256  }
 0xad3   : > { %25458 = vsyncadd (%p24940_p1), %s24856_s13, 4294967040  ;;  %p14_p2 = scmp.ge.s32.totalorder %s25528_s21, 4   ;;  %s32264_s15 = smov %s25465_s16 }
 0xad4   : > { %s32265_s16 = smov %s25469_s17  ;;  %s32266_s17 = smov %s25539_s24 }
 0xad5   : > { %s32267_s18 = smov %s25528_s21  ;;  %16 = sbr.rel (!%p14_p2) target bundleno = 3 (0x3), region = 78 }
 0xada   :  { %24861 = vsyncpa [#allocation3], 1 }
 0xadb   :  { %24863 = vsyncpa [#allocation3 + $0x1], 1 }

</bundles_post_ra>
